<compile_context>
chip_gen: v7x
topology: tpu7x:2x2x1
jax: 0.10.0
libtpu: 0.0.40
codegen_flags: <defaults>
</compile_context>

<pallas_src>
import functools
import math

import jax
import jax.numpy as jnp
from jax import lax
from jax.experimental import pallas as pl
from jax.experimental.pallas import tpu as pltpu

_EPS = 1e-5
_VMEM_LIMIT = 32 * 1024 * 1024


def _round_up(x, m):
    return (x + m - 1) // m * m


def _cdiv(a, b):
    return (a + b - 1) // b


def _pick_m_tile(m, cap):
    """Minimal-padding M tile (multiple of 16 for bf16 sublane packing)."""
    nt = max(1, _cdiv(m, cap))
    return _round_up(_cdiv(m, nt), 16)


# ----------------------------------------------------------------------------
# Kernel: fused Conv2d(4x4, stride 2, pad 1) - one image per grid step.
#   optional prologue : BatchNorm(scale/shift from raw stats) + LeakyReLU(0.2)
#   optional epilogue : LeakyReLU(0.2)
#   optional extra out: per-channel sum / sumsq of the raw conv output
# ----------------------------------------------------------------------------
def _conv4x4_s2_kernel(*refs, H, OW, C, Npad, fuse_in_bn, emit_stats, out_act,
                       m_prev):
    OH = H // 2
    it = iter(refs)
    x_ref = next(it)                       # (1, H, OW, 2C)  paired-column view
    w_ref = next(it)                       # (4, 4, C, Npad) bf16
    if fuse_in_bn:
        st_ref = next(it)                  # (N, 2, C) f32  producer sum/sumsq
        g_ref = next(it)                   # (1, C) f32
        b_ref = next(it)                   # (1, C) f32
    o_ref = next(it)                       # (1, OH*OW, Npad)
    if emit_stats:
        s_ref = next(it)                   # (1, 2, Npad) f32

    x = x_ref[0]                           # (H, OW, 2C) bf16
    xe = x[:, :, :C]                       # even input columns x[:, 2*ow, :]
    xo = x[:, :, C:]                       # odd  input columns x[:, 2*ow+1, :]

    if fuse_in_bn:
        # BatchNorm (training-mode batch stats) + LeakyReLU of the *previous*
        # block, applied on load.  Pad taps are inserted afterwards -> stay 0.
        tot = jnp.sum(st_ref[...], axis=0)            # (2, C)
        inv_m = 1.0 / float(m_prev)
        mean = tot[0:1, :] * inv_m
        var = jnp.maximum(tot[1:2, :] * inv_m - mean * mean, 0.0)
        scale = g_ref[...] * lax.rsqrt(var + _EPS)    # (1, C)
        shift = b_ref[...] - mean * scale

        def _bn_leaky(v):
            vf = v.astype(jnp.float32) * scale.reshape(1, 1, C) \
                 + shift.reshape(1, 1, C)
            return jnp.where(vf > 0, vf, 0.2 * vf).astype(jnp.bfloat16)

        xe = _bn_leaky(xe)
        xo = _bn_leaky(xo)

    # Column taps (kw = dj reads input column 2*ow + dj - 1):
    zc = jnp.zeros((H, 1, C), xe.dtype)
    col_m1 = jnp.concatenate([zc, xo[:, :OW - 1, :]], axis=1)   # dj=0: col 2ow-1
    col_p2 = jnp.concatenate([xe[:, 1:, :], zc], axis=1)        # dj=3: col 2ow+2
    cols = (col_m1, xe, xo, col_p2)                             # dj = 0..3

    zr = jnp.zeros((1, OW, C), xe.dtype)
    acc = jnp.zeros((OH * OW, Npad), jnp.float32)
    for dj in range(4):
        v = cols[dj].reshape(OH, 2, OW, C)          # split rows into (pair, parity)
        rows = (
            jnp.concatenate([zr, v[:OH - 1, 1]], axis=0),   # di=0: row 2oh-1
            v[:, 0],                                        # di=1: row 2oh
            v[:, 1],                                        # di=2: row 2oh+1
            jnp.concatenate([v[1:, 0], zr], axis=0),        # di=3: row 2oh+2
        )
        for di in range(4):
            a = rows[di].reshape(OH * OW, C)
            acc = acc + jnp.dot(a, w_ref[di, dj],
                                preferred_element_type=jnp.float32)

    if emit_stats:
        # Raw per-image sum / sumsq for the next layer's fused BatchNorm.
        s_ref[0, 0:1, :] = jnp.sum(acc, axis=0, keepdims=True)
        s_ref[0, 1:2, :] = jnp.sum(acc * acc, axis=0, keepdims=True)
    if out_act == "leaky":
        acc = jnp.where(acc > 0, acc, 0.2 * acc)
    o_ref[0] = acc.astype(o_ref.dtype)


def conv4x4_s2(x_paired, wpack, *, stats_in=None, gamma=None, beta=None,
               m_prev=None, emit_stats, out_act):
    """x_paired: (N, H, W/2, 2C) bf16 paired-column view of an NHWC activation."""
    n, h, ow, c2 = x_paired.shape
    c = c2 // 2
    npad = wpack.shape[-1]
    m_img = (h // 2) * ow
    fuse = stats_in is not None

    kernel = functools.partial(
        _conv4x4_s2_kernel, H=h, OW=ow, C=c, Npad=npad,
        fuse_in_bn=fuse, emit_stats=emit_stats, out_act=out_act, m_prev=m_prev)

    in_specs = [
        pl.BlockSpec((1, h, ow, c2), lambda i: (i, 0, 0, 0)),       # one image
        pl.BlockSpec(wpack.shape, lambda i: (0, 0, 0, 0)),          # resident W
    ]
    inputs = [x_paired, wpack]
    if fuse:
        in_specs += [
            pl.BlockSpec(stats_in.shape, lambda i: (0, 0, 0)),      # resident
            pl.BlockSpec((1, c), lambda i: (0, 0)),
            pl.BlockSpec((1, c), lambda i: (0, 0)),
        ]
        inputs += [stats_in, gamma, beta]

    out_shapes = [jax.ShapeDtypeStruct((n, m_img, npad), jnp.bfloat16)]
    out_specs = [pl.BlockSpec((1, m_img, npad), lambda i: (i, 0, 0))]
    if emit_stats:
        out_shapes.append(jax.ShapeDtypeStruct((n, 2, npad), jnp.float32))
        out_specs.append(pl.BlockSpec((1, 2, npad), lambda i: (i, 0, 0)))

    flops = 2 * n * m_img * 16 * c * npad
    bytes_accessed = (x_paired.size * 2 + wpack.size * 2
                      + n * m_img * npad * 2
                      + (n * 2 * npad * 4 if emit_stats else 0)
                      + ((stats_in.size * 4 + 2 * c * 8) if fuse else 0))

    res = pl.pallas_call(
        kernel,
        out_shape=tuple(out_shapes),
        grid=(n,),
        in_specs=in_specs,
        out_specs=tuple(out_specs),
        compiler_params=pltpu.CompilerParams(
            dimension_semantics=("parallel",),
            vmem_limit_bytes=_VMEM_LIMIT),
        cost_estimate=pl.CostEstimate(
            flops=int(flops), transcendentals=0,
            bytes_accessed=int(bytes_accessed)),
    )(*inputs)
    if emit_stats:
        return res[0], res[1]
    return res[0]


# ----------------------------------------------------------------------------
# Kernel: final Conv2d(4x4, stride 1, pad 0) on a 4x4 input == fused matmul.
# ----------------------------------------------------------------------------
def _final_mm_kernel(*refs, act, fuse_in_bn):
    it = iter(refs)
    a_ref = next(it)                       # (tm, K) bf16
    w_ref = next(it)                       # (K, Npad) bf16
    if fuse_in_bn:
        sc_ref = next(it)                  # (1, K) f32
        sh_ref = next(it)                  # (1, K) f32
    o_ref = next(it)                       # (tm, Npad) f32

    a = a_ref[...]
    if fuse_in_bn:
        af = a.astype(jnp.float32) * sc_ref[...] + sh_ref[...]
        a = jnp.where(af > 0, af, 0.2 * af).astype(jnp.bfloat16)
    acc = jnp.dot(a, w_ref[...], preferred_element_type=jnp.float32)
    if act == "sigmoid":
        z = jnp.exp(-jnp.abs(acc))                       # EUP
        acc = jnp.where(acc >= 0, 1.0 / (1.0 + z), z / (1.0 + z))
    elif act == "tanh":
        acc = jnp.tanh(acc)
    o_ref[...] = acc


def final_conv4x4(a, wk, scale_k=None, shift_k=None, *, act):
    m, k = a.shape
    npad = wk.shape[-1]
    tm = _pick_m_tile(m, 128)
    mpad = _round_up(m, tm)
    if mpad != m:
        a = jnp.pad(a, ((0, mpad - m), (0, 0)))
    nt = mpad // tm
    fuse = scale_k is not None

    in_specs = [pl.BlockSpec((tm, k), lambda i: (i, 0)),
                pl.BlockSpec((k, npad), lambda i: (0, 0))]          # resident W
    inputs = [a, wk]
    if fuse:
        in_specs += [pl.BlockSpec((1, k), lambda i: (0, 0)),
                     pl.BlockSpec((1, k), lambda i: (0, 0))]
        inputs += [scale_k, shift_k]

    flops = 2 * mpad * k * npad
    bytes_accessed = mpad * k * 2 + k * npad * 2 + mpad * npad * 4

    return pl.pallas_call(
        functools.partial(_final_mm_kernel, act=act, fuse_in_bn=fuse),
        out_shape=jax.ShapeDtypeStruct((mpad, npad), jnp.float32),
        grid=(nt,),
        in_specs=in_specs,
        out_specs=pl.BlockSpec((tm, npad), lambda i: (i, 0)),
        compiler_params=pltpu.CompilerParams(
            dimension_semantics=("parallel",),
            vmem_limit_bytes=_VMEM_LIMIT),
        cost_estimate=pl.CostEstimate(
            flops=int(flops),
            transcendentals=int(mpad * npad) if act in ("sigmoid", "tanh") else 0,
            bytes_accessed=int(bytes_accessed)),
    )(*inputs)


# ----------------------------------------------------------------------------
# Parameters (matches weights_init) and packing.
# ----------------------------------------------------------------------------
def _pack_conv4x4(w_oihw, cin_pad):
    """(out, in, 4, 4) -> (4, 4, cin_pad, round128(out)) bf16, tap-indexed."""
    cout, cin, _, _ = w_oihw.shape
    npad = _round_up(cout, 128)
    wp = jnp.pad(w_oihw, ((0, npad - cout), (0, cin_pad - cin), (0, 0), (0, 0)))
    return jnp.transpose(wp, (2, 3, 1, 0)).astype(jnp.bfloat16), npad


def _pack_conv_last(w_oihw, cin_pad):
    """(no, in, 4, 4) -> (16*cin_pad, round128(no)) bf16, K order = (h, w, c)."""
    cout, cin, kh, kw = w_oihw.shape
    npad = _round_up(cout, 128)
    wp = jnp.pad(w_oihw, ((0, npad - cout), (0, cin_pad - cin), (0, 0), (0, 0)))
    wk = jnp.transpose(wp, (2, 3, 1, 0)).reshape(kh * kw * cin_pad, npad)
    return wk.astype(jnp.bfloat16), npad


def init_discr_params(key, nc=1, ndf=64, no=1, w=64):
    nb_blocks = int(round(math.log2(w))) - 3
    c0 = _round_up(nc, 8)                  # small channel pad for the raw input
    params = {"c0": c0, "blocks": []}

    key, k0 = jax.random.split(key)
    w0 = 0.02 * jax.random.normal(k0, (ndf, nc, 4, 4), jnp.float32)
    wpack, npad = _pack_conv4x4(w0, c0)
    params["conv0"] = {"w": wpack, "npad": npad}

    nf = ndf
    cin_pad = npad
    for _ in range(nb_blocks):
        key, kw_, kg = jax.random.split(key, 3)
        wb = 0.02 * jax.random.normal(kw_, (nf * 2, nf, 4, 4), jnp.float32)
        wpack, npad = _pack_conv4x4(wb, cin_pad)
        gamma = 1.0 + 0.02 * jax.random.normal(kg, (nf * 2,), jnp.float32)
        gamma = jnp.pad(gamma, (0, npad - nf * 2)).reshape(1, npad)
        beta = jnp.zeros((1, npad), jnp.float32)
        params["blocks"].append(
            {"w": wpack, "gamma": gamma, "beta": beta, "npad": npad})
        nf *= 2
        cin_pad = npad

    key, kl = jax.random.split(key)
    wl = 0.02 * jax.random.normal(kl, (no, nf, 4, 4), jnp.float32)
    wk, npad_l = _pack_conv_last(wl, cin_pad)
    params["conv_last"] = {"w": wk, "npad": npad_l}
    return params


# ----------------------------------------------------------------------------
# Forward pass (matches Discr.forward).
# ----------------------------------------------------------------------------
def discr_forward(x_nchw, params, act="sigmoid", no=1):
    n, nc, h, _ = x_nchw.shape
    c0 = params["c0"]

    x = jnp.transpose(x_nchw, (0, 2, 3, 1))                       # NCHW -> NHWC
    x = jnp.pad(x, ((0, 0), (0, 0), (0, 0), (0, c0 - nc)))
    x = x.astype(jnp.bfloat16).reshape(n, h, h // 2, 2 * c0)      # paired cols

    # Conv(nc, ndf, 4, 2, 1) + LeakyReLU(0.2), fused, in-kernel patch extraction.
    cur = conv4x4_s2(x, params["conv0"]["w"], emit_stats=False, out_act="leaky")
    cpad = params["conv0"]["npad"]
    h //= 2

    # [Conv(nf, 2nf, 4, 2, 1) + BatchNorm2d + LeakyReLU] blocks.  The BN of the
    # previous block is folded into this conv's load path; this conv's own BN
    # stats are fused into its epilogue.
    prev_stats = prev_gamma = prev_beta = None
    for blk in params["blocks"]:
        x_in = cur.reshape(n, h, h // 2, 2 * cpad)                # free view
        cur, stats = conv4x4_s2(
            x_in, blk["w"],
            stats_in=prev_stats, gamma=prev_gamma, beta=prev_beta,
            m_prev=(n * h * h if prev_stats is not None else None),
            emit_stats=True, out_act=None)
        prev_stats, prev_gamma, prev_beta = stats, blk["gamma"], blk["beta"]
        cpad = blk["npad"]
        h //= 2

    # Conv(nf, no, 4, 1, 0) on the 4x4 feature map == a single fused matmul,
    # with the last block's BN+LeakyReLU folded into its prologue.
    a = cur.reshape(n, h * h * cpad)
    scale_k = shift_k = None
    if prev_stats is not None:
        m_cnt = n * h * h
        tot = jnp.sum(prev_stats, axis=0)                         # tiny glue
        mean = tot[0] / m_cnt
        var = jnp.maximum(tot[1] / m_cnt - mean * mean, 0.0)
        scale = prev_gamma[0] * lax.rsqrt(var + _EPS)
        shift = prev_beta[0] - mean * scale
        scale_k = jnp.tile(scale, h * h)[None, :]
        shift_k = jnp.tile(shift, h * h)[None, :]

    final_act = act if act in ("sigmoid", "tanh") else "none"
    out = final_conv4x4(a, params["conv_last"]["w"], scale_k, shift_k,
                        act=final_act)

    # PyTorch: out.view(-1, no); spatial collapses to 1x1 so this is (N, no).
    return out[:n, :no].reshape(-1, no)


# ----------------------------------------------------------------------------
if __name__ == "__main__":
    # Small config consistent with the module: nc=1, ndf=8, no=1, w=32
    # -> nb_blocks = 2 (exercises both the fused-BN conv path and the
    #    final-matmul BN fold); spatial 32 -> 16 -> 8 -> 4 -> 1.
    nc, ndf, no, w = 1, 8, 1, 32
    batch = 2

    key = jax.random.PRNGKey(0)
    key, kx = jax.random.split(key)
    x = jax.random.normal(kx, (batch, nc, w, w), jnp.float32)   # NCHW like PyTorch

    params = init_discr_params(key, nc=nc, ndf=ndf, no=no, w=w)

    fwd = jax.jit(lambda xin: discr_forward(xin, params, act="sigmoid", no=no))
    out = jax.block_until_ready(fwd(x))

    assert out.shape == (batch, no), out.shape
    assert bool(jnp.all(jnp.isfinite(out)))
    assert bool(jnp.all((out >= 0.0) & (out <= 1.0)))  # sigmoid range sanity check
    print("KERNEL_OK")
</pallas_src>

<mosaic_0001>
module attributes {stable_mosaic.version = 11 : i64} {
  func.func @_conv4x4_s2_kernel(%arg0: i32, %arg1: memref<1x32x16x16xbf16, #tpu.memory_space<vmem>>, %arg2: memref<4x4x8x128xbf16, #tpu.memory_space<vmem>>, %arg3: memref<1x256x128xbf16, #tpu.memory_space<vmem>>) attributes {dimension_semantics = [#tpu.dimension_semantics<parallel>], iteration_bounds = array<i64: 2>, scalar_prefetch = 0 : i64, scratch_operands = 0 : i64, tpu.core_type = #tpu.core_type<tc>, window_params = [{transform_indices = @transform_0, window_bounds = array<i64: 1, 32, 16, 16>}, {pipeline_mode = #tpu.pipeline_mode<synchronous>, transform_indices = @transform_1, window_bounds = array<i64: 4, 4, 8, 128>}, {transform_indices = @transform_2, window_bounds = array<i64: 1, 256, 128>}]} {
    %c0 = arith.constant 0 : index
    %c0_0 = arith.constant 0 : index
    %c0_1 = arith.constant 0 : index
    %c0_2 = arith.constant 0 : index
    %0 = vector.load %arg1[%c0, %c0_0, %c0_1, %c0_2] : memref<1x32x16x16xbf16, #tpu.memory_space<vmem>>, vector<1x32x16x16xbf16>
    %1 = vector.shape_cast %0 : vector<1x32x16x16xbf16> to vector<32x16x16xbf16>
    %2 = vector.extract_strided_slice %1 {offsets = [0, 0, 0], sizes = [32, 16, 8], strides = [1, 1, 1]} : vector<32x16x16xbf16> to vector<32x16x8xbf16>
    %3 = vector.extract_strided_slice %1 {offsets = [0, 0, 8], sizes = [32, 16, 8], strides = [1, 1, 1]} : vector<32x16x16xbf16> to vector<32x16x8xbf16>
    %cst = arith.constant 0.000000e+00 : bf16
    %4 = vector.broadcast %cst : bf16 to vector<32x1x8xbf16>
    %5 = vector.extract_strided_slice %3 {offsets = [0, 0, 0], sizes = [32, 15, 8], strides = [1, 1, 1]} : vector<32x16x8xbf16> to vector<32x15x8xbf16>
    %6 = tpu.concatenate %4, %5 in 1 : vector<32x1x8xbf16>, vector<32x15x8xbf16> -> vector<32x16x8xbf16>
    %7 = vector.extract_strided_slice %2 {offsets = [0, 1, 0], sizes = [32, 15, 8], strides = [1, 1, 1]} : vector<32x16x8xbf16> to vector<32x15x8xbf16>
    %8 = tpu.concatenate %7, %4 in 1 : vector<32x15x8xbf16>, vector<32x1x8xbf16> -> vector<32x16x8xbf16>
    %cst_3 = arith.constant 0.000000e+00 : bf16
    %9 = vector.broadcast %cst_3 : bf16 to vector<1x16x8xbf16>
    %cst_4 = arith.constant 0.000000e+00 : f32
    %10 = vector.broadcast %cst_4 : f32 to vector<256x128xf32>
    %11 = vector.shape_cast %6 : vector<32x16x8xbf16> to vector<16x2x16x8xbf16>
    %12 = vector.extract_strided_slice %11 {offsets = [0, 1, 0, 0], sizes = [15, 1, 16, 8], strides = [1, 1, 1, 1]} : vector<16x2x16x8xbf16> to vector<15x1x16x8xbf16>
    %13 = vector.shape_cast %12 : vector<15x1x16x8xbf16> to vector<15x16x8xbf16>
    %14 = tpu.concatenate %9, %13 in 0 : vector<1x16x8xbf16>, vector<15x16x8xbf16> -> vector<16x16x8xbf16>
    %15 = vector.extract_strided_slice %11 {offsets = [0, 0, 0, 0], sizes = [16, 1, 16, 8], strides = [1, 1, 1, 1]} : vector<16x2x16x8xbf16> to vector<16x1x16x8xbf16>
    %16 = vector.shape_cast %15 : vector<16x1x16x8xbf16> to vector<16x16x8xbf16>
    %17 = vector.extract_strided_slice %11 {offsets = [0, 1, 0, 0], sizes = [16, 1, 16, 8], strides = [1, 1, 1, 1]} : vector<16x2x16x8xbf16> to vector<16x1x16x8xbf16>
    %18 = vector.shape_cast %17 : vector<16x1x16x8xbf16> to vector<16x16x8xbf16>
    %19 = vector.extract_strided_slice %11 {offsets = [1, 0, 0, 0], sizes = [15, 1, 16, 8], strides = [1, 1, 1, 1]} : vector<16x2x16x8xbf16> to vector<15x1x16x8xbf16>
    %20 = vector.shape_cast %19 : vector<15x1x16x8xbf16> to vector<15x16x8xbf16>
    %21 = tpu.concatenate %20, %9 in 0 : vector<15x16x8xbf16>, vector<1x16x8xbf16> -> vector<16x16x8xbf16>
    %22 = vector.shape_cast %14 : vector<16x16x8xbf16> to vector<256x8xbf16>
    %c0_5 = arith.constant 0 : index
    %c0_6 = arith.constant 0 : index
    %c0_7 = arith.constant 0 : index
    %c0_8 = arith.constant 0 : index
    %23 = vector.load %arg2[%c0_5, %c0_6, %c0_7, %c0_8] : memref<4x4x8x128xbf16, #tpu.memory_space<vmem>>, vector<1x1x8x128xbf16>
    %24 = vector.shape_cast %23 : vector<1x1x8x128xbf16> to vector<8x128xbf16>
    %cst_9 = arith.constant dense<0.000000e+00> : vector<256x128xf32>
    %25 = tpu.matmul %22, %24, %cst_9 {dimension_numbers = #tpu.dot_dimension_numbers<[1], [0], [0], [1], [0, 0, 1, 1], [], []>} : vector<256x8xbf16>, vector<8x128xbf16>, vector<256x128xf32> -> vector<256x128xf32>
    %26 = arith.addf %10, %25 : vector<256x128xf32>
    %27 = vector.shape_cast %16 : vector<16x16x8xbf16> to vector<256x8xbf16>
    %c1 = arith.constant 1 : index
    %c0_10 = arith.constant 0 : index
    %c0_11 = arith.constant 0 : index
    %c0_12 = arith.constant 0 : index
    %28 = vector.load %arg2[%c1, %c0_10, %c0_11, %c0_12] : memref<4x4x8x128xbf16, #tpu.memory_space<vmem>>, vector<1x1x8x128xbf16>
    %29 = vector.shape_cast %28 : vector<1x1x8x128xbf16> to vector<8x128xbf16>
    %cst_13 = arith.constant dense<0.000000e+00> : vector<256x128xf32>
    %30 = tpu.matmul %27, %29, %cst_13 {dimension_numbers = #tpu.dot_dimension_numbers<[1], [0], [0], [1], [0, 0, 1, 1], [], []>} : vector<256x8xbf16>, vector<8x128xbf16>, vector<256x128xf32> -> vector<256x128xf32>
    %31 = arith.addf %26, %30 : vector<256x128xf32>
    %32 = vector.shape_cast %18 : vector<16x16x8xbf16> to vector<256x8xbf16>
    %c2 = arith.constant 2 : index
    %c0_14 = arith.constant 0 : index
    %c0_15 = arith.constant 0 : index
    %c0_16 = arith.constant 0 : index
    %33 = vector.load %arg2[%c2, %c0_14, %c0_15, %c0_16] : memref<4x4x8x128xbf16, #tpu.memory_space<vmem>>, vector<1x1x8x128xbf16>
    %34 = vector.shape_cast %33 : vector<1x1x8x128xbf16> to vector<8x128xbf16>
    %cst_17 = arith.constant dense<0.000000e+00> : vector<256x128xf32>
    %35 = tpu.matmul %32, %34, %cst_17 {dimension_numbers = #tpu.dot_dimension_numbers<[1], [0], [0], [1], [0, 0, 1, 1], [], []>} : vector<256x8xbf16>, vector<8x128xbf16>, vector<256x128xf32> -> vector<256x128xf32>
    %36 = arith.addf %31, %35 : vector<256x128xf32>
    %37 = vector.shape_cast %21 : vector<16x16x8xbf16> to vector<256x8xbf16>
    %c3 = arith.constant 3 : index
    %c0_18 = arith.constant 0 : index
    %c0_19 = arith.constant 0 : index
    %c0_20 = arith.constant 0 : index
    %38 = vector.load %arg2[%c3, %c0_18, %c0_19, %c0_20] : memref<4x4x8x128xbf16, #tpu.memory_space<vmem>>, vector<1x1x8x128xbf16>
    %39 = vector.shape_cast %38 : vector<1x1x8x128xbf16> to vector<8x128xbf16>
    %cst_21 = arith.constant dense<0.000000e+00> : vector<256x128xf32>
    %40 = tpu.matmul %37, %39, %cst_21 {dimension_numbers = #tpu.dot_dimension_numbers<[1], [0], [0], [1], [0, 0, 1, 1], [], []>} : vector<256x8xbf16>, vector<8x128xbf16>, vector<256x128xf32> -> vector<256x128xf32>
    %41 = arith.addf %36, %40 : vector<256x128xf32>
    %42 = vector.shape_cast %2 : vector<32x16x8xbf16> to vector<16x2x16x8xbf16>
    %43 = vector.extract_strided_slice %42 {offsets = [0, 1, 0, 0], sizes = [15, 1, 16, 8], strides = [1, 1, 1, 1]} : vector<16x2x16x8xbf16> to vector<15x1x16x8xbf16>
    %44 = vector.shape_cast %43 : vector<15x1x16x8xbf16> to vector<15x16x8xbf16>
    %45 = tpu.concatenate %9, %44 in 0 : vector<1x16x8xbf16>, vector<15x16x8xbf16> -> vector<16x16x8xbf16>
    %46 = vector.extract_strided_slice %42 {offsets = [0, 0, 0, 0], sizes = [16, 1, 16, 8], strides = [1, 1, 1, 1]} : vector<16x2x16x8xbf16> to vector<16x1x16x8xbf16>
    %47 = vector.shape_cast %46 : vector<16x1x16x8xbf16> to vector<16x16x8xbf16>
    %48 = vector.extract_strided_slice %42 {offsets = [0, 1, 0, 0], sizes = [16, 1, 16, 8], strides = [1, 1, 1, 1]} : vector<16x2x16x8xbf16> to vector<16x1x16x8xbf16>
    %49 = vector.shape_cast %48 : vector<16x1x16x8xbf16> to vector<16x16x8xbf16>
    %50 = vector.extract_strided_slice %42 {offsets = [1, 0, 0, 0], sizes = [15, 1, 16, 8], strides = [1, 1, 1, 1]} : vector<16x2x16x8xbf16> to vector<15x1x16x8xbf16>
    %51 = vector.shape_cast %50 : vector<15x1x16x8xbf16> to vector<15x16x8xbf16>
    %52 = tpu.concatenate %51, %9 in 0 : vector<15x16x8xbf16>, vector<1x16x8xbf16> -> vector<16x16x8xbf16>
    %53 = vector.shape_cast %45 : vector<16x16x8xbf16> to vector<256x8xbf16>
    %c0_22 = arith.constant 0 : index
    %c1_23 = arith.constant 1 : index
    %c0_24 = arith.constant 0 : index
    %c0_25 = arith.constant 0 : index
    %54 = vector.load %arg2[%c0_22, %c1_23, %c0_24, %c0_25] : memref<4x4x8x128xbf16, #tpu.memory_space<vmem>>, vector<1x1x8x128xbf16>
    %55 = vector.shape_cast %54 : vector<1x1x8x128xbf16> to vector<8x128xbf16>
    %cst_26 = arith.constant dense<0.000000e+00> : vector<256x128xf32>
    %56 = tpu.matmul %53, %55, %cst_26 {dimension_numbers = #tpu.dot_dimension_numbers<[1], [0], [0], [1], [0, 0, 1, 1], [], []>} : vector<256x8xbf16>, vector<8x128xbf16>, vector<256x128xf32> -> vector<256x128xf32>
    %57 = arith.addf %41, %56 : vector<256x128xf32>
    %58 = vector.shape_cast %47 : vector<16x16x8xbf16> to vector<256x8xbf16>
    %c1_27 = arith.constant 1 : index
    %c1_28 = arith.constant 1 : index
    %c0_29 = arith.constant 0 : index
    %c0_30 = arith.constant 0 : index
    %59 = vector.load %arg2[%c1_27, %c1_28, %c0_29, %c0_30] : memref<4x4x8x128xbf16, #tpu.memory_space<vmem>>, vector<1x1x8x128xbf16>
    %60 = vector.shape_cast %59 : vector<1x1x8x128xbf16> to vector<8x128xbf16>
    %cst_31 = arith.constant dense<0.000000e+00> : vector<256x128xf32>
    %61 = tpu.matmul %58, %60, %cst_31 {dimension_numbers = #tpu.dot_dimension_numbers<[1], [0], [0], [1], [0, 0, 1, 1], [], []>} : vector<256x8xbf16>, vector<8x128xbf16>, vector<256x128xf32> -> vector<256x128xf32>
    %62 = arith.addf %57, %61 : vector<256x128xf32>
    %63 = vector.shape_cast %49 : vector<16x16x8xbf16> to vector<256x8xbf16>
    %c2_32 = arith.constant 2 : index
    %c1_33 = arith.constant 1 : index
    %c0_34 = arith.constant 0 : index
    %c0_35 = arith.constant 0 : index
    %64 = vector.load %arg2[%c2_32, %c1_33, %c0_34, %c0_35] : memref<4x4x8x128xbf16, #tpu.memory_space<vmem>>, vector<1x1x8x128xbf16>
    %65 = vector.shape_cast %64 : vector<1x1x8x128xbf16> to vector<8x128xbf16>
    %cst_36 = arith.constant dense<0.000000e+00> : vector<256x128xf32>
    %66 = tpu.matmul %63, %65, %cst_36 {dimension_numbers = #tpu.dot_dimension_numbers<[1], [0], [0], [1], [0, 0, 1, 1], [], []>} : vector<256x8xbf16>, vector<8x128xbf16>, vector<256x128xf32> -> vector<256x128xf32>
    %67 = arith.addf %62, %66 : vector<256x128xf32>
    %68 = vector.shape_cast %52 : vector<16x16x8xbf16> to vector<256x8xbf16>
    %c3_37 = arith.constant 3 : index
    %c1_38 = arith.constant 1 : index
    %c0_39 = arith.constant 0 : index
    %c0_40 = arith.constant 0 : index
    %69 = vector.load %arg2[%c3_37, %c1_38, %c0_39, %c0_40] : memref<4x4x8x128xbf16, #tpu.memory_space<vmem>>, vector<1x1x8x128xbf16>
    %70 = vector.shape_cast %69 : vector<1x1x8x128xbf16> to vector<8x128xbf16>
    %cst_41 = arith.constant dense<0.000000e+00> : vector<256x128xf32>
    %71 = tpu.matmul %68, %70, %cst_41 {dimension_numbers = #tpu.dot_dimension_numbers<[1], [0], [0], [1], [0, 0, 1, 1], [], []>} : vector<256x8xbf16>, vector<8x128xbf16>, vector<256x128xf32> -> vector<256x128xf32>
    %72 = arith.addf %67, %71 : vector<256x128xf32>
    %73 = vector.shape_cast %3 : vector<32x16x8xbf16> to vector<16x2x16x8xbf16>
    %74 = vector.extract_strided_slice %73 {offsets = [0, 1, 0, 0], sizes = [15, 1, 16, 8], strides = [1, 1, 1, 1]} : vector<16x2x16x8xbf16> to vector<15x1x16x8xbf16>
    %75 = vector.shape_cast %74 : vector<15x1x16x8xbf16> to vector<15x16x8xbf16>
    %76 = tpu.concatenate %9, %75 in 0 : vector<1x16x8xbf16>, vector<15x16x8xbf16> -> vector<16x16x8xbf16>
    %77 = vector.extract_strided_slice %73 {offsets = [0, 0, 0, 0], sizes = [16, 1, 16, 8], strides = [1, 1, 1, 1]} : vector<16x2x16x8xbf16> to vector<16x1x16x8xbf16>
    %78 = vector.shape_cast %77 : vector<16x1x16x8xbf16> to vector<16x16x8xbf16>
    %79 = vector.extract_strided_slice %73 {offsets = [0, 1, 0, 0], sizes = [16, 1, 16, 8], strides = [1, 1, 1, 1]} : vector<16x2x16x8xbf16> to vector<16x1x16x8xbf16>
    %80 = vector.shape_cast %79 : vector<16x1x16x8xbf16> to vector<16x16x8xbf16>
    %81 = vector.extract_strided_slice %73 {offsets = [1, 0, 0, 0], sizes = [15, 1, 16, 8], strides = [1, 1, 1, 1]} : vector<16x2x16x8xbf16> to vector<15x1x16x8xbf16>
    %82 = vector.shape_cast %81 : vector<15x1x16x8xbf16> to vector<15x16x8xbf16>
    %83 = tpu.concatenate %82, %9 in 0 : vector<15x16x8xbf16>, vector<1x16x8xbf16> -> vector<16x16x8xbf16>
    %84 = vector.shape_cast %76 : vector<16x16x8xbf16> to vector<256x8xbf16>
    %c0_42 = arith.constant 0 : index
    %c2_43 = arith.constant 2 : index
    %c0_44 = arith.constant 0 : index
    %c0_45 = arith.constant 0 : index
    %85 = vector.load %arg2[%c0_42, %c2_43, %c0_44, %c0_45] : memref<4x4x8x128xbf16, #tpu.memory_space<vmem>>, vector<1x1x8x128xbf16>
    %86 = vector.shape_cast %85 : vector<1x1x8x128xbf16> to vector<8x128xbf16>
    %cst_46 = arith.constant dense<0.000000e+00> : vector<256x128xf32>
    %87 = tpu.matmul %84, %86, %cst_46 {dimension_numbers = #tpu.dot_dimension_numbers<[1], [0], [0], [1], [0, 0, 1, 1], [], []>} : vector<256x8xbf16>, vector<8x128xbf16>, vector<256x128xf32> -> vector<256x128xf32>
    %88 = arith.addf %72, %87 : vector<256x128xf32>
    %89 = vector.shape_cast %78 : vector<16x16x8xbf16> to vector<256x8xbf16>
    %c1_47 = arith.constant 1 : index
    %c2_48 = arith.constant 2 : index
    %c0_49 = arith.constant 0 : index
    %c0_50 = arith.constant 0 : index
    %90 = vector.load %arg2[%c1_47, %c2_48, %c0_49, %c0_50] : memref<4x4x8x128xbf16, #tpu.memory_space<vmem>>, vector<1x1x8x128xbf16>
    %91 = vector.shape_cast %90 : vector<1x1x8x128xbf16> to vector<8x128xbf16>
    %cst_51 = arith.constant dense<0.000000e+00> : vector<256x128xf32>
    %92 = tpu.matmul %89, %91, %cst_51 {dimension_numbers = #tpu.dot_dimension_numbers<[1], [0], [0], [1], [0, 0, 1, 1], [], []>} : vector<256x8xbf16>, vector<8x128xbf16>, vector<256x128xf32> -> vector<256x128xf32>
    %93 = arith.addf %88, %92 : vector<256x128xf32>
    %94 = vector.shape_cast %80 : vector<16x16x8xbf16> to vector<256x8xbf16>
    %c2_52 = arith.constant 2 : index
    %c2_53 = arith.constant 2 : index
    %c0_54 = arith.constant 0 : index
    %c0_55 = arith.constant 0 : index
    %95 = vector.load %arg2[%c2_52, %c2_53, %c0_54, %c0_55] : memref<4x4x8x128xbf16, #tpu.memory_space<vmem>>, vector<1x1x8x128xbf16>
    %96 = vector.shape_cast %95 : vector<1x1x8x128xbf16> to vector<8x128xbf16>
    %cst_56 = arith.constant dense<0.000000e+00> : vector<256x128xf32>
    %97 = tpu.matmul %94, %96, %cst_56 {dimension_numbers = #tpu.dot_dimension_numbers<[1], [0], [0], [1], [0, 0, 1, 1], [], []>} : vector<256x8xbf16>, vector<8x128xbf16>, vector<256x128xf32> -> vector<256x128xf32>
    %98 = arith.addf %93, %97 : vector<256x128xf32>
    %99 = vector.shape_cast %83 : vector<16x16x8xbf16> to vector<256x8xbf16>
    %c3_57 = arith.constant 3 : index
    %c2_58 = arith.constant 2 : index
    %c0_59 = arith.constant 0 : index
    %c0_60 = arith.constant 0 : index
    %100 = vector.load %arg2[%c3_57, %c2_58, %c0_59, %c0_60] : memref<4x4x8x128xbf16, #tpu.memory_space<vmem>>, vector<1x1x8x128xbf16>
    %101 = vector.shape_cast %100 : vector<1x1x8x128xbf16> to vector<8x128xbf16>
    %cst_61 = arith.constant dense<0.000000e+00> : vector<256x128xf32>
    %102 = tpu.matmul %99, %101, %cst_61 {dimension_numbers = #tpu.dot_dimension_numbers<[1], [0], [0], [1], [0, 0, 1, 1], [], []>} : vector<256x8xbf16>, vector<8x128xbf16>, vector<256x128xf32> -> vector<256x128xf32>
    %103 = arith.addf %98, %102 : vector<256x128xf32>
    %104 = vector.shape_cast %8 : vector<32x16x8xbf16> to vector<16x2x16x8xbf16>
    %105 = vector.extract_strided_slice %104 {offsets = [0, 1, 0, 0], sizes = [15, 1, 16, 8], strides = [1, 1, 1, 1]} : vector<16x2x16x8xbf16> to vector<15x1x16x8xbf16>
    %106 = vector.shape_cast %105 : vector<15x1x16x8xbf16> to vector<15x16x8xbf16>
    %107 = tpu.concatenate %9, %106 in 0 : vector<1x16x8xbf16>, vector<15x16x8xbf16> -> vector<16x16x8xbf16>
    %108 = vector.extract_strided_slice %104 {offsets = [0, 0, 0, 0], sizes = [16, 1, 16, 8], strides = [1, 1, 1, 1]} : vector<16x2x16x8xbf16> to vector<16x1x16x8xbf16>
    %109 = vector.shape_cast %108 : vector<16x1x16x8xbf16> to vector<16x16x8xbf16>
    %110 = vector.extract_strided_slice %104 {offsets = [0, 1, 0, 0], sizes = [16, 1, 16, 8], strides = [1, 1, 1, 1]} : vector<16x2x16x8xbf16> to vector<16x1x16x8xbf16>
    %111 = vector.shape_cast %110 : vector<16x1x16x8xbf16> to vector<16x16x8xbf16>
    %112 = vector.extract_strided_slice %104 {offsets = [1, 0, 0, 0], sizes = [15, 1, 16, 8], strides = [1, 1, 1, 1]} : vector<16x2x16x8xbf16> to vector<15x1x16x8xbf16>
    %113 = vector.shape_cast %112 : vector<15x1x16x8xbf16> to vector<15x16x8xbf16>
    %114 = tpu.concatenate %113, %9 in 0 : vector<15x16x8xbf16>, vector<1x16x8xbf16> -> vector<16x16x8xbf16>
    %115 = vector.shape_cast %107 : vector<16x16x8xbf16> to vector<256x8xbf16>
    %c0_62 = arith.constant 0 : index
    %c3_63 = arith.constant 3 : index
    %c0_64 = arith.constant 0 : index
    %c0_65 = arith.constant 0 : index
    %116 = vector.load %arg2[%c0_62, %c3_63, %c0_64, %c0_65] : memref<4x4x8x128xbf16, #tpu.memory_space<vmem>>, vector<1x1x8x128xbf16>
    %117 = vector.shape_cast %116 : vector<1x1x8x128xbf16> to vector<8x128xbf16>
    %cst_66 = arith.constant dense<0.000000e+00> : vector<256x128xf32>
    %118 = tpu.matmul %115, %117, %cst_66 {dimension_numbers = #tpu.dot_dimension_numbers<[1], [0], [0], [1], [0, 0, 1, 1], [], []>} : vector<256x8xbf16>, vector<8x128xbf16>, vector<256x128xf32> -> vector<256x128xf32>
    %119 = arith.addf %103, %118 : vector<256x128xf32>
    %120 = vector.shape_cast %109 : vector<16x16x8xbf16> to vector<256x8xbf16>
    %c1_67 = arith.constant 1 : index
    %c3_68 = arith.constant 3 : index
    %c0_69 = arith.constant 0 : index
    %c0_70 = arith.constant 0 : index
    %121 = vector.load %arg2[%c1_67, %c3_68, %c0_69, %c0_70] : memref<4x4x8x128xbf16, #tpu.memory_space<vmem>>, vector<1x1x8x128xbf16>
    %122 = vector.shape_cast %121 : vector<1x1x8x128xbf16> to vector<8x128xbf16>
    %cst_71 = arith.constant dense<0.000000e+00> : vector<256x128xf32>
    %123 = tpu.matmul %120, %122, %cst_71 {dimension_numbers = #tpu.dot_dimension_numbers<[1], [0], [0], [1], [0, 0, 1, 1], [], []>} : vector<256x8xbf16>, vector<8x128xbf16>, vector<256x128xf32> -> vector<256x128xf32>
    %124 = arith.addf %119, %123 : vector<256x128xf32>
    %125 = vector.shape_cast %111 : vector<16x16x8xbf16> to vector<256x8xbf16>
    %c2_72 = arith.constant 2 : index
    %c3_73 = arith.constant 3 : index
    %c0_74 = arith.constant 0 : index
    %c0_75 = arith.constant 0 : index
    %126 = vector.load %arg2[%c2_72, %c3_73, %c0_74, %c0_75] : memref<4x4x8x128xbf16, #tpu.memory_space<vmem>>, vector<1x1x8x128xbf16>
    %127 = vector.shape_cast %126 : vector<1x1x8x128xbf16> to vector<8x128xbf16>
    %cst_76 = arith.constant dense<0.000000e+00> : vector<256x128xf32>
    %128 = tpu.matmul %125, %127, %cst_76 {dimension_numbers = #tpu.dot_dimension_numbers<[1], [0], [0], [1], [0, 0, 1, 1], [], []>} : vector<256x8xbf16>, vector<8x128xbf16>, vector<256x128xf32> -> vector<256x128xf32>
    %129 = arith.addf %124, %128 : vector<256x128xf32>
    %130 = vector.shape_cast %114 : vector<16x16x8xbf16> to vector<256x8xbf16>
    %c3_77 = arith.constant 3 : index
    %c3_78 = arith.constant 3 : index
    %c0_79 = arith.constant 0 : index
    %c0_80 = arith.constant 0 : index
    %131 = vector.load %arg2[%c3_77, %c3_78, %c0_79, %c0_80] : memref<4x4x8x128xbf16, #tpu.memory_space<vmem>>, vector<1x1x8x128xbf16>
    %132 = vector.shape_cast %131 : vector<1x1x8x128xbf16> to vector<8x128xbf16>
    %cst_81 = arith.constant dense<0.000000e+00> : vector<256x128xf32>
    %133 = tpu.matmul %130, %132, %cst_81 {dimension_numbers = #tpu.dot_dimension_numbers<[1], [0], [0], [1], [0, 0, 1, 1], [], []>} : vector<256x8xbf16>, vector<8x128xbf16>, vector<256x128xf32> -> vector<256x128xf32>
    %134 = arith.addf %129, %133 : vector<256x128xf32>
    %cst_82 = arith.constant 0.000000e+00 : f32
    %135 = vector.broadcast %cst_82 : f32 to vector<256x128xf32>
    %136 = arith.cmpf ogt, %134, %135 : vector<256x128xf32>
    %cst_83 = arith.constant 2.000000e-01 : f32
    %137 = vector.broadcast %cst_83 : f32 to vector<256x128xf32>
    %138 = arith.mulf %137, %134 : vector<256x128xf32>
    %139 = arith.select %136, %134, %138 : vector<256x128xi1>, vector<256x128xf32>
    %140 = arith.truncf %139 : vector<256x128xf32> to vector<256x128xbf16>
    %c0_84 = arith.constant 0 : index
    %c0_85 = arith.constant 0 : index
    %c0_86 = arith.constant 0 : index
    %141 = vector.load %arg3[%c0_84, %c0_85, %c0_86] : memref<1x256x128xbf16, #tpu.memory_space<vmem>>, vector<1x256x128xbf16>
    %142 = vector.shape_cast %141 : vector<1x256x128xbf16> to vector<256x128xbf16>
    %143 = vector.shape_cast %140 : vector<256x128xbf16> to vector<1x256x128xbf16>
    tpu.vector_store %arg3[%c0_84, %c0_85, %c0_86], %143 {strides = array<i32>} : memref<1x256x128xbf16, #tpu.memory_space<vmem>>, vector<1x256x128xbf16>,
    return
  }
  func.func @transform_0(%arg0: i32) -> (i32, i32, i32, i32) {
    %c0_i32 = arith.constant 0 : i32
    %c0_i32_0 = arith.constant 0 : i32
    %c0_i32_1 = arith.constant 0 : i32
    %c0_i32_2 = arith.constant 0 : i32
    return %arg0, %c0_i32, %c0_i32_0, %c0_i32_1 : i32, i32, i32, i32
  }
  func.func @transform_1(%arg0: i32) -> (i32, i32, i32, i32) {
    %c0_i32 = arith.constant 0 : i32
    %c0_i32_0 = arith.constant 0 : i32
    %c0_i32_1 = arith.constant 0 : i32
    %c0_i32_2 = arith.constant 0 : i32
    %c0_i32_3 = arith.constant 0 : i32
    return %c0_i32, %c0_i32_0, %c0_i32_1, %c0_i32_2 : i32, i32, i32, i32
  }
  func.func @transform_2(%arg0: i32) -> (i32, i32, i32) {
    %c0_i32 = arith.constant 0 : i32
    %c0_i32_0 = arith.constant 0 : i32
    %c0_i32_1 = arith.constant 0 : i32
    return %arg0, %c0_i32, %c0_i32_0 : i32, i32, i32
  }
}

module attributes {stable_mosaic.version = 11 : i64} {
  func.func @_conv4x4_s2_kernel(%arg0: i32, %arg1: memref<1x16x8x256xbf16, #tpu.memory_space<vmem>>, %arg2: memref<4x4x128x128xbf16, #tpu.memory_space<vmem>>, %arg3: memref<1x64x128xbf16, #tpu.memory_space<vmem>>, %arg4: memref<1x2x128xf32, #tpu.memory_space<vmem>>) attributes {dimension_semantics = [#tpu.dimension_semantics<parallel>], iteration_bounds = array<i64: 2>, scalar_prefetch = 0 : i64, scratch_operands = 0 : i64, tpu.core_type = #tpu.core_type<tc>, window_params = [{transform_indices = @transform_0, window_bounds = array<i64: 1, 16, 8, 256>}, {pipeline_mode = #tpu.pipeline_mode<synchronous>, transform_indices = @transform_1, window_bounds = array<i64: 4, 4, 128, 128>}, {transform_indices = @transform_2, window_bounds = array<i64: 1, 64, 128>}, {transform_indices = @transform_3, window_bounds = array<i64: 1, 2, 128>}]} {
    %c0 = arith.constant 0 : index
    %c0_0 = arith.constant 0 : index
    %c0_1 = arith.constant 0 : index
    %c0_2 = arith.constant 0 : index
    %0 = vector.load %arg1[%c0, %c0_0, %c0_1, %c0_2] : memref<1x16x8x256xbf16, #tpu.memory_space<vmem>>, vector<1x16x8x256xbf16>
    %1 = vector.shape_cast %0 : vector<1x16x8x256xbf16> to vector<16x8x256xbf16>
    %2 = vector.extract_strided_slice %1 {offsets = [0, 0, 0], sizes = [16, 8, 128], strides = [1, 1, 1]} : vector<16x8x256xbf16> to vector<16x8x128xbf16>
    %3 = vector.extract_strided_slice %1 {offsets = [0, 0, 128], sizes = [16, 8, 128], strides = [1, 1, 1]} : vector<16x8x256xbf16> to vector<16x8x128xbf16>
    %cst = arith.constant 0.000000e+00 : bf16
    %4 = vector.broadcast %cst : bf16 to vector<16x1x128xbf16>
    %5 = vector.extract_strided_slice %3 {offsets = [0, 0, 0], sizes = [16, 7, 128], strides = [1, 1, 1]} : vector<16x8x128xbf16> to vector<16x7x128xbf16>
    %6 = tpu.concatenate %4, %5 in 1 : vector<16x1x128xbf16>, vector<16x7x128xbf16> -> vector<16x8x128xbf16>
    %7 = vector.extract_strided_slice %2 {offsets = [0, 1, 0], sizes = [16, 7, 128], strides = [1, 1, 1]} : vector<16x8x128xbf16> to vector<16x7x128xbf16>
    %8 = tpu.concatenate %7, %4 in 1 : vector<16x7x128xbf16>, vector<16x1x128xbf16> -> vector<16x8x128xbf16>
    %cst_3 = arith.constant 0.000000e+00 : bf16
    %9 = vector.broadcast %cst_3 : bf16 to vector<1x8x128xbf16>
    %cst_4 = arith.constant 0.000000e+00 : f32
    %10 = vector.broadcast %cst_4 : f32 to vector<64x128xf32>
    %11 = vector.shape_cast %6 : vector<16x8x128xbf16> to vector<8x2x8x128xbf16>
    %12 = vector.extract_strided_slice %11 {offsets = [0, 1, 0, 0], sizes = [7, 1, 8, 128], strides = [1, 1, 1, 1]} : vector<8x2x8x128xbf16> to vector<7x1x8x128xbf16>
    %13 = vector.shape_cast %12 : vector<7x1x8x128xbf16> to vector<7x8x128xbf16>
    %14 = tpu.concatenate %9, %13 in 0 : vector<1x8x128xbf16>, vector<7x8x128xbf16> -> vector<8x8x128xbf16>
    %15 = vector.extract_strided_slice %11 {offsets = [0, 0, 0, 0], sizes = [8, 1, 8, 128], strides = [1, 1, 1, 1]} : vector<8x2x8x128xbf16> to vector<8x1x8x128xbf16>
    %16 = vector.shape_cast %15 : vector<8x1x8x128xbf16> to vector<8x8x128xbf16>
    %17 = vector.extract_strided_slice %11 {offsets = [0, 1, 0, 0], sizes = [8, 1, 8, 128], strides = [1, 1, 1, 1]} : vector<8x2x8x128xbf16> to vector<8x1x8x128xbf16>
    %18 = vector.shape_cast %17 : vector<8x1x8x128xbf16> to vector<8x8x128xbf16>
    %19 = vector.extract_strided_slice %11 {offsets = [1, 0, 0, 0], sizes = [7, 1, 8, 128], strides = [1, 1, 1, 1]} : vector<8x2x8x128xbf16> to vector<7x1x8x128xbf16>
    %20 = vector.shape_cast %19 : vector<7x1x8x128xbf16> to vector<7x8x128xbf16>
    %21 = tpu.concatenate %20, %9 in 0 : vector<7x8x128xbf16>, vector<1x8x128xbf16> -> vector<8x8x128xbf16>
    %22 = vector.shape_cast %14 : vector<8x8x128xbf16> to vector<64x128xbf16>
    %c0_5 = arith.constant 0 : index
    %c0_6 = arith.constant 0 : index
    %c0_7 = arith.constant 0 : index
    %c0_8 = arith.constant 0 : index
    %23 = vector.load %arg2[%c0_5, %c0_6, %c0_7, %c0_8] : memref<4x4x128x128xbf16, #tpu.memory_space<vmem>>, vector<1x1x128x128xbf16>
    %24 = vector.shape_cast %23 : vector<1x1x128x128xbf16> to vector<128x128xbf16>
    %cst_9 = arith.constant dense<0.000000e+00> : vector<64x128xf32>
    %25 = tpu.matmul %22, %24, %cst_9 {dimension_numbers = #tpu.dot_dimension_numbers<[1], [0], [0], [1], [0, 0, 1, 1], [], []>} : vector<64x128xbf16>, vector<128x128xbf16>, vector<64x128xf32> -> vector<64x128xf32>
    %26 = arith.addf %10, %25 : vector<64x128xf32>
    %27 = vector.shape_cast %16 : vector<8x8x128xbf16> to vector<64x128xbf16>
    %c1 = arith.constant 1 : index
    %c0_10 = arith.constant 0 : index
    %c0_11 = arith.constant 0 : index
    %c0_12 = arith.constant 0 : index
    %28 = vector.load %arg2[%c1, %c0_10, %c0_11, %c0_12] : memref<4x4x128x128xbf16, #tpu.memory_space<vmem>>, vector<1x1x128x128xbf16>
    %29 = vector.shape_cast %28 : vector<1x1x128x128xbf16> to vector<128x128xbf16>
    %cst_13 = arith.constant dense<0.000000e+00> : vector<64x128xf32>
    %30 = tpu.matmul %27, %29, %cst_13 {dimension_numbers = #tpu.dot_dimension_numbers<[1], [0], [0], [1], [0, 0, 1, 1], [], []>} : vector<64x128xbf16>, vector<128x128xbf16>, vector<64x128xf32> -> vector<64x128xf32>
    %31 = arith.addf %26, %30 : vector<64x128xf32>
    %32 = vector.shape_cast %18 : vector<8x8x128xbf16> to vector<64x128xbf16>
    %c2 = arith.constant 2 : index
    %c0_14 = arith.constant 0 : index
    %c0_15 = arith.constant 0 : index
    %c0_16 = arith.constant 0 : index
    %33 = vector.load %arg2[%c2, %c0_14, %c0_15, %c0_16] : memref<4x4x128x128xbf16, #tpu.memory_space<vmem>>, vector<1x1x128x128xbf16>
    %34 = vector.shape_cast %33 : vector<1x1x128x128xbf16> to vector<128x128xbf16>
    %cst_17 = arith.constant dense<0.000000e+00> : vector<64x128xf32>
    %35 = tpu.matmul %32, %34, %cst_17 {dimension_numbers = #tpu.dot_dimension_numbers<[1], [0], [0], [1], [0, 0, 1, 1], [], []>} : vector<64x128xbf16>, vector<128x128xbf16>, vector<64x128xf32> -> vector<64x128xf32>
    %36 = arith.addf %31, %35 : vector<64x128xf32>
    %37 = vector.shape_cast %21 : vector<8x8x128xbf16> to vector<64x128xbf16>
    %c3 = arith.constant 3 : index
    %c0_18 = arith.constant 0 : index
    %c0_19 = arith.constant 0 : index
    %c0_20 = arith.constant 0 : index
    %38 = vector.load %arg2[%c3, %c0_18, %c0_19, %c0_20] : memref<4x4x128x128xbf16, #tpu.memory_space<vmem>>, vector<1x1x128x128xbf16>
    %39 = vector.shape_cast %38 : vector<1x1x128x128xbf16> to vector<128x128xbf16>
    %cst_21 = arith.constant dense<0.000000e+00> : vector<64x128xf32>
    %40 = tpu.matmul %37, %39, %cst_21 {dimension_numbers = #tpu.dot_dimension_numbers<[1], [0], [0], [1], [0, 0, 1, 1], [], []>} : vector<64x128xbf16>, vector<128x128xbf16>, vector<64x128xf32> -> vector<64x128xf32>
    %41 = arith.addf %36, %40 : vector<64x128xf32>
    %42 = vector.shape_cast %2 : vector<16x8x128xbf16> to vector<8x2x8x128xbf16>
    %43 = vector.extract_strided_slice %42 {offsets = [0, 1, 0, 0], sizes = [7, 1, 8, 128], strides = [1, 1, 1, 1]} : vector<8x2x8x128xbf16> to vector<7x1x8x128xbf16>
    %44 = vector.shape_cast %43 : vector<7x1x8x128xbf16> to vector<7x8x128xbf16>
    %45 = tpu.concatenate %9, %44 in 0 : vector<1x8x128xbf16>, vector<7x8x128xbf16> -> vector<8x8x128xbf16>
    %46 = vector.extract_strided_slice %42 {offsets = [0, 0, 0, 0], sizes = [8, 1, 8, 128], strides = [1, 1, 1, 1]} : vector<8x2x8x128xbf16> to vector<8x1x8x128xbf16>
    %47 = vector.shape_cast %46 : vector<8x1x8x128xbf16> to vector<8x8x128xbf16>
    %48 = vector.extract_strided_slice %42 {offsets = [0, 1, 0, 0], sizes = [8, 1, 8, 128], strides = [1, 1, 1, 1]} : vector<8x2x8x128xbf16> to vector<8x1x8x128xbf16>
    %49 = vector.shape_cast %48 : vector<8x1x8x128xbf16> to vector<8x8x128xbf16>
    %50 = vector.extract_strided_slice %42 {offsets = [1, 0, 0, 0], sizes = [7, 1, 8, 128], strides = [1, 1, 1, 1]} : vector<8x2x8x128xbf16> to vector<7x1x8x128xbf16>
    %51 = vector.shape_cast %50 : vector<7x1x8x128xbf16> to vector<7x8x128xbf16>
    %52 = tpu.concatenate %51, %9 in 0 : vector<7x8x128xbf16>, vector<1x8x128xbf16> -> vector<8x8x128xbf16>
    %53 = vector.shape_cast %45 : vector<8x8x128xbf16> to vector<64x128xbf16>
    %c0_22 = arith.constant 0 : index
    %c1_23 = arith.constant 1 : index
    %c0_24 = arith.constant 0 : index
    %c0_25 = arith.constant 0 : index
    %54 = vector.load %arg2[%c0_22, %c1_23, %c0_24, %c0_25] : memref<4x4x128x128xbf16, #tpu.memory_space<vmem>>, vector<1x1x128x128xbf16>
    %55 = vector.shape_cast %54 : vector<1x1x128x128xbf16> to vector<128x128xbf16>
    %cst_26 = arith.constant dense<0.000000e+00> : vector<64x128xf32>
    %56 = tpu.matmul %53, %55, %cst_26 {dimension_numbers = #tpu.dot_dimension_numbers<[1], [0], [0], [1], [0, 0, 1, 1], [], []>} : vector<64x128xbf16>, vector<128x128xbf16>, vector<64x128xf32> -> vector<64x128xf32>
    %57 = arith.addf %41, %56 : vector<64x128xf32>
    %58 = vector.shape_cast %47 : vector<8x8x128xbf16> to vector<64x128xbf16>
    %c1_27 = arith.constant 1 : index
    %c1_28 = arith.constant 1 : index
    %c0_29 = arith.constant 0 : index
    %c0_30 = arith.constant 0 : index
    %59 = vector.load %arg2[%c1_27, %c1_28, %c0_29, %c0_30] : memref<4x4x128x128xbf16, #tpu.memory_space<vmem>>, vector<1x1x128x128xbf16>
    %60 = vector.shape_cast %59 : vector<1x1x128x128xbf16> to vector<128x128xbf16>
    %cst_31 = arith.constant dense<0.000000e+00> : vector<64x128xf32>
    %61 = tpu.matmul %58, %60, %cst_31 {dimension_numbers = #tpu.dot_dimension_numbers<[1], [0], [0], [1], [0, 0, 1, 1], [], []>} : vector<64x128xbf16>, vector<128x128xbf16>, vector<64x128xf32> -> vector<64x128xf32>
    %62 = arith.addf %57, %61 : vector<64x128xf32>
    %63 = vector.shape_cast %49 : vector<8x8x128xbf16> to vector<64x128xbf16>
    %c2_32 = arith.constant 2 : index
    %c1_33 = arith.constant 1 : index
    %c0_34 = arith.constant 0 : index
    %c0_35 = arith.constant 0 : index
    %64 = vector.load %arg2[%c2_32, %c1_33, %c0_34, %c0_35] : memref<4x4x128x128xbf16, #tpu.memory_space<vmem>>, vector<1x1x128x128xbf16>
    %65 = vector.shape_cast %64 : vector<1x1x128x128xbf16> to vector<128x128xbf16>
    %cst_36 = arith.constant dense<0.000000e+00> : vector<64x128xf32>
    %66 = tpu.matmul %63, %65, %cst_36 {dimension_numbers = #tpu.dot_dimension_numbers<[1], [0], [0], [1], [0, 0, 1, 1], [], []>} : vector<64x128xbf16>, vector<128x128xbf16>, vector<64x128xf32> -> vector<64x128xf32>
    %67 = arith.addf %62, %66 : vector<64x128xf32>
    %68 = vector.shape_cast %52 : vector<8x8x128xbf16> to vector<64x128xbf16>
    %c3_37 = arith.constant 3 : index
    %c1_38 = arith.constant 1 : index
    %c0_39 = arith.constant 0 : index
    %c0_40 = arith.constant 0 : index
    %69 = vector.load %arg2[%c3_37, %c1_38, %c0_39, %c0_40] : memref<4x4x128x128xbf16, #tpu.memory_space<vmem>>, vector<1x1x128x128xbf16>
    %70 = vector.shape_cast %69 : vector<1x1x128x128xbf16> to vector<128x128xbf16>
    %cst_41 = arith.constant dense<0.000000e+00> : vector<64x128xf32>
    %71 = tpu.matmul %68, %70, %cst_41 {dimension_numbers = #tpu.dot_dimension_numbers<[1], [0], [0], [1], [0, 0, 1, 1], [], []>} : vector<64x128xbf16>, vector<128x128xbf16>, vector<64x128xf32> -> vector<64x128xf32>
    %72 = arith.addf %67, %71 : vector<64x128xf32>
    %73 = vector.shape_cast %3 : vector<16x8x128xbf16> to vector<8x2x8x128xbf16>
    %74 = vector.extract_strided_slice %73 {offsets = [0, 1, 0, 0], sizes = [7, 1, 8, 128], strides = [1, 1, 1, 1]} : vector<8x2x8x128xbf16> to vector<7x1x8x128xbf16>
    %75 = vector.shape_cast %74 : vector<7x1x8x128xbf16> to vector<7x8x128xbf16>
    %76 = tpu.concatenate %9, %75 in 0 : vector<1x8x128xbf16>, vector<7x8x128xbf16> -> vector<8x8x128xbf16>
    %77 = vector.extract_strided_slice %73 {offsets = [0, 0, 0, 0], sizes = [8, 1, 8, 128], strides = [1, 1, 1, 1]} : vector<8x2x8x128xbf16> to vector<8x1x8x128xbf16>
    %78 = vector.shape_cast %77 : vector<8x1x8x128xbf16> to vector<8x8x128xbf16>
    %79 = vector.extract_strided_slice %73 {offsets = [0, 1, 0, 0], sizes = [8, 1, 8, 128], strides = [1, 1, 1, 1]} : vector<8x2x8x128xbf16> to vector<8x1x8x128xbf16>
    %80 = vector.shape_cast %79 : vector<8x1x8x128xbf16> to vector<8x8x128xbf16>
    %81 = vector.extract_strided_slice %73 {offsets = [1, 0, 0, 0], sizes = [7, 1, 8, 128], strides = [1, 1, 1, 1]} : vector<8x2x8x128xbf16> to vector<7x1x8x128xbf16>
    %82 = vector.shape_cast %81 : vector<7x1x8x128xbf16> to vector<7x8x128xbf16>
    %83 = tpu.concatenate %82, %9 in 0 : vector<7x8x128xbf16>, vector<1x8x128xbf16> -> vector<8x8x128xbf16>
    %84 = vector.shape_cast %76 : vector<8x8x128xbf16> to vector<64x128xbf16>
    %c0_42 = arith.constant 0 : index
    %c2_43 = arith.constant 2 : index
    %c0_44 = arith.constant 0 : index
    %c0_45 = arith.constant 0 : index
    %85 = vector.load %arg2[%c0_42, %c2_43, %c0_44, %c0_45] : memref<4x4x128x128xbf16, #tpu.memory_space<vmem>>, vector<1x1x128x128xbf16>
    %86 = vector.shape_cast %85 : vector<1x1x128x128xbf16> to vector<128x128xbf16>
    %cst_46 = arith.constant dense<0.000000e+00> : vector<64x128xf32>
    %87 = tpu.matmul %84, %86, %cst_46 {dimension_numbers = #tpu.dot_dimension_numbers<[1], [0], [0], [1], [0, 0, 1, 1], [], []>} : vector<64x128xbf16>, vector<128x128xbf16>, vector<64x128xf32> -> vector<64x128xf32>
    %88 = arith.addf %72, %87 : vector<64x128xf32>
    %89 = vector.shape_cast %78 : vector<8x8x128xbf16> to vector<64x128xbf16>
    %c1_47 = arith.constant 1 : index
    %c2_48 = arith.constant 2 : index
    %c0_49 = arith.constant 0 : index
    %c0_50 = arith.constant 0 : index
    %90 = vector.load %arg2[%c1_47, %c2_48, %c0_49, %c0_50] : memref<4x4x128x128xbf16, #tpu.memory_space<vmem>>, vector<1x1x128x128xbf16>
    %91 = vector.shape_cast %90 : vector<1x1x128x128xbf16> to vector<128x128xbf16>
    %cst_51 = arith.constant dense<0.000000e+00> : vector<64x128xf32>
    %92 = tpu.matmul %89, %91, %cst_51 {dimension_numbers = #tpu.dot_dimension_numbers<[1], [0], [0], [1], [0, 0, 1, 1], [], []>} : vector<64x128xbf16>, vector<128x128xbf16>, vector<64x128xf32> -> vector<64x128xf32>
    %93 = arith.addf %88, %92 : vector<64x128xf32>
    %94 = vector.shape_cast %80 : vector<8x8x128xbf16> to vector<64x128xbf16>
    %c2_52 = arith.constant 2 : index
    %c2_53 = arith.constant 2 : index
    %c0_54 = arith.constant 0 : index
    %c0_55 = arith.constant 0 : index
    %95 = vector.load %arg2[%c2_52, %c2_53, %c0_54, %c0_55] : memref<4x4x128x128xbf16, #tpu.memory_space<vmem>>, vector<1x1x128x128xbf16>
    %96 = vector.shape_cast %95 : vector<1x1x128x128xbf16> to vector<128x128xbf16>
    %cst_56 = arith.constant dense<0.000000e+00> : vector<64x128xf32>
    %97 = tpu.matmul %94, %96, %cst_56 {dimension_numbers = #tpu.dot_dimension_numbers<[1], [0], [0], [1], [0, 0, 1, 1], [], []>} : vector<64x128xbf16>, vector<128x128xbf16>, vector<64x128xf32> -> vector<64x128xf32>
    %98 = arith.addf %93, %97 : vector<64x128xf32>
    %99 = vector.shape_cast %83 : vector<8x8x128xbf16> to vector<64x128xbf16>
    %c3_57 = arith.constant 3 : index
    %c2_58 = arith.constant 2 : index
    %c0_59 = arith.constant 0 : index
    %c0_60 = arith.constant 0 : index
    %100 = vector.load %arg2[%c3_57, %c2_58, %c0_59, %c0_60] : memref<4x4x128x128xbf16, #tpu.memory_space<vmem>>, vector<1x1x128x128xbf16>
    %101 = vector.shape_cast %100 : vector<1x1x128x128xbf16> to vector<128x128xbf16>
    %cst_61 = arith.constant dense<0.000000e+00> : vector<64x128xf32>
    %102 = tpu.matmul %99, %101, %cst_61 {dimension_numbers = #tpu.dot_dimension_numbers<[1], [0], [0], [1], [0, 0, 1, 1], [], []>} : vector<64x128xbf16>, vector<128x128xbf16>, vector<64x128xf32> -> vector<64x128xf32>
    %103 = arith.addf %98, %102 : vector<64x128xf32>
    %104 = vector.shape_cast %8 : vector<16x8x128xbf16> to vector<8x2x8x128xbf16>
    %105 = vector.extract_strided_slice %104 {offsets = [0, 1, 0, 0], sizes = [7, 1, 8, 128], strides = [1, 1, 1, 1]} : vector<8x2x8x128xbf16> to vector<7x1x8x128xbf16>
    %106 = vector.shape_cast %105 : vector<7x1x8x128xbf16> to vector<7x8x128xbf16>
    %107 = tpu.concatenate %9, %106 in 0 : vector<1x8x128xbf16>, vector<7x8x128xbf16> -> vector<8x8x128xbf16>
    %108 = vector.extract_strided_slice %104 {offsets = [0, 0, 0, 0], sizes = [8, 1, 8, 128], strides = [1, 1, 1, 1]} : vector<8x2x8x128xbf16> to vector<8x1x8x128xbf16>
    %109 = vector.shape_cast %108 : vector<8x1x8x128xbf16> to vector<8x8x128xbf16>
    %110 = vector.extract_strided_slice %104 {offsets = [0, 1, 0, 0], sizes = [8, 1, 8, 128], strides = [1, 1, 1, 1]} : vector<8x2x8x128xbf16> to vector<8x1x8x128xbf16>
    %111 = vector.shape_cast %110 : vector<8x1x8x128xbf16> to vector<8x8x128xbf16>
    %112 = vector.extract_strided_slice %104 {offsets = [1, 0, 0, 0], sizes = [7, 1, 8, 128], strides = [1, 1, 1, 1]} : vector<8x2x8x128xbf16> to vector<7x1x8x128xbf16>
    %113 = vector.shape_cast %112 : vector<7x1x8x128xbf16> to vector<7x8x128xbf16>
    %114 = tpu.concatenate %113, %9 in 0 : vector<7x8x128xbf16>, vector<1x8x128xbf16> -> vector<8x8x128xbf16>
    %115 = vector.shape_cast %107 : vector<8x8x128xbf16> to vector<64x128xbf16>
    %c0_62 = arith.constant 0 : index
    %c3_63 = arith.constant 3 : index
    %c0_64 = arith.constant 0 : index
    %c0_65 = arith.constant 0 : index
    %116 = vector.load %arg2[%c0_62, %c3_63, %c0_64, %c0_65] : memref<4x4x128x128xbf16, #tpu.memory_space<vmem>>, vector<1x1x128x128xbf16>
    %117 = vector.shape_cast %116 : vector<1x1x128x128xbf16> to vector<128x128xbf16>
    %cst_66 = arith.constant dense<0.000000e+00> : vector<64x128xf32>
    %118 = tpu.matmul %115, %117, %cst_66 {dimension_numbers = #tpu.dot_dimension_numbers<[1], [0], [0], [1], [0, 0, 1, 1], [], []>} : vector<64x128xbf16>, vector<128x128xbf16>, vector<64x128xf32> -> vector<64x128xf32>
    %119 = arith.addf %103, %118 : vector<64x128xf32>
    %120 = vector.shape_cast %109 : vector<8x8x128xbf16> to vector<64x128xbf16>
    %c1_67 = arith.constant 1 : index
    %c3_68 = arith.constant 3 : index
    %c0_69 = arith.constant 0 : index
    %c0_70 = arith.constant 0 : index
    %121 = vector.load %arg2[%c1_67, %c3_68, %c0_69, %c0_70] : memref<4x4x128x128xbf16, #tpu.memory_space<vmem>>, vector<1x1x128x128xbf16>
    %122 = vector.shape_cast %121 : vector<1x1x128x128xbf16> to vector<128x128xbf16>
    %cst_71 = arith.constant dense<0.000000e+00> : vector<64x128xf32>
    %123 = tpu.matmul %120, %122, %cst_71 {dimension_numbers = #tpu.dot_dimension_numbers<[1], [0], [0], [1], [0, 0, 1, 1], [], []>} : vector<64x128xbf16>, vector<128x128xbf16>, vector<64x128xf32> -> vector<64x128xf32>
    %124 = arith.addf %119, %123 : vector<64x128xf32>
    %125 = vector.shape_cast %111 : vector<8x8x128xbf16> to vector<64x128xbf16>
    %c2_72 = arith.constant 2 : index
    %c3_73 = arith.constant 3 : index
    %c0_74 = arith.constant 0 : index
    %c0_75 = arith.constant 0 : index
    %126 = vector.load %arg2[%c2_72, %c3_73, %c0_74, %c0_75] : memref<4x4x128x128xbf16, #tpu.memory_space<vmem>>, vector<1x1x128x128xbf16>
    %127 = vector.shape_cast %126 : vector<1x1x128x128xbf16> to vector<128x128xbf16>
    %cst_76 = arith.constant dense<0.000000e+00> : vector<64x128xf32>
    %128 = tpu.matmul %125, %127, %cst_76 {dimension_numbers = #tpu.dot_dimension_numbers<[1], [0], [0], [1], [0, 0, 1, 1], [], []>} : vector<64x128xbf16>, vector<128x128xbf16>, vector<64x128xf32> -> vector<64x128xf32>
    %129 = arith.addf %124, %128 : vector<64x128xf32>
    %130 = vector.shape_cast %114 : vector<8x8x128xbf16> to vector<64x128xbf16>
    %c3_77 = arith.constant 3 : index
    %c3_78 = arith.constant 3 : index
    %c0_79 = arith.constant 0 : index
    %c0_80 = arith.constant 0 : index
    %131 = vector.load %arg2[%c3_77, %c3_78, %c0_79, %c0_80] : memref<4x4x128x128xbf16, #tpu.memory_space<vmem>>, vector<1x1x128x128xbf16>
    %132 = vector.shape_cast %131 : vector<1x1x128x128xbf16> to vector<128x128xbf16>
    %cst_81 = arith.constant dense<0.000000e+00> : vector<64x128xf32>
    %133 = tpu.matmul %130, %132, %cst_81 {dimension_numbers = #tpu.dot_dimension_numbers<[1], [0], [0], [1], [0, 0, 1, 1], [], []>} : vector<64x128xbf16>, vector<128x128xbf16>, vector<64x128xf32> -> vector<64x128xf32>
    %134 = arith.addf %129, %133 : vector<64x128xf32>
    %cst_82 = arith.constant dense<0.000000e+00> : vector<128xf32>
    %135 = vector.multi_reduction <add>, %134, %cst_82 [0] : vector<64x128xf32> to vector<128xf32>
    %136 = vector.shape_cast %135 : vector<128xf32> to vector<1x128xf32>
    %c0_83 = arith.constant 0 : index
    %c0_84 = arith.constant 0 : index
    %c0_85 = arith.constant 0 : index
    %137 = vector.load %arg4[%c0_83, %c0_84, %c0_85] : memref<1x2x128xf32, #tpu.memory_space<vmem>>, vector<1x1x128xf32>
    %138 = vector.shape_cast %137 : vector<1x1x128xf32> to vector<1x128xf32>
    %139 = vector.shape_cast %136 : vector<1x128xf32> to vector<1x1x128xf32>
    tpu.vector_store %arg4[%c0_83, %c0_84, %c0_85], %139 {strides = array<i32>} : memref<1x2x128xf32, #tpu.memory_space<vmem>>, vector<1x1x128xf32>,
    %140 = arith.mulf %134, %134 : vector<64x128xf32>
    %cst_86 = arith.constant dense<0.000000e+00> : vector<128xf32>
    %141 = vector.multi_reduction <add>, %140, %cst_86 [0] : vector<64x128xf32> to vector<128xf32>
    %142 = vector.shape_cast %141 : vector<128xf32> to vector<1x128xf32>
    %c0_87 = arith.constant 0 : index
    %c1_88 = arith.constant 1 : index
    %c0_89 = arith.constant 0 : index
    %143 = vector.load %arg4[%c0_87, %c1_88, %c0_89] : memref<1x2x128xf32, #tpu.memory_space<vmem>>, vector<1x1x128xf32>
    %144 = vector.shape_cast %143 : vector<1x1x128xf32> to vector<1x128xf32>
    %145 = vector.shape_cast %142 : vector<1x128xf32> to vector<1x1x128xf32>
    tpu.vector_store %arg4[%c0_87, %c1_88, %c0_89], %145 {strides = array<i32>} : memref<1x2x128xf32, #tpu.memory_space<vmem>>, vector<1x1x128xf32>,
    %146 = arith.truncf %134 : vector<64x128xf32> to vector<64x128xbf16>
    %c0_90 = arith.constant 0 : index
    %c0_91 = arith.constant 0 : index
    %c0_92 = arith.constant 0 : index
    %147 = vector.load %arg3[%c0_90, %c0_91, %c0_92] : memref<1x64x128xbf16, #tpu.memory_space<vmem>>, vector<1x64x128xbf16>
    %148 = vector.shape_cast %147 : vector<1x64x128xbf16> to vector<64x128xbf16>
    %149 = vector.shape_cast %146 : vector<64x128xbf16> to vector<1x64x128xbf16>
    tpu.vector_store %arg3[%c0_90, %c0_91, %c0_92], %149 {strides = array<i32>} : memref<1x64x128xbf16, #tpu.memory_space<vmem>>, vector<1x64x128xbf16>,
    return
  }
  func.func @transform_0(%arg0: i32) -> (i32, i32, i32, i32) {
    %c0_i32 = arith.constant 0 : i32
    %c0_i32_0 = arith.constant 0 : i32
    %c0_i32_1 = arith.constant 0 : i32
    %c0_i32_2 = arith.constant 0 : i32
    return %arg0, %c0_i32, %c0_i32_0, %c0_i32_1 : i32, i32, i32, i32
  }
  func.func @transform_1(%arg0: i32) -> (i32, i32, i32, i32) {
    %c0_i32 = arith.constant 0 : i32
    %c0_i32_0 = arith.constant 0 : i32
    %c0_i32_1 = arith.constant 0 : i32
    %c0_i32_2 = arith.constant 0 : i32
    %c0_i32_3 = arith.constant 0 : i32
    return %c0_i32, %c0_i32_0, %c0_i32_1, %c0_i32_2 : i32, i32, i32, i32
  }
  func.func @transform_2(%arg0: i32) -> (i32, i32, i32) {
    %c0_i32 = arith.constant 0 : i32
    %c0_i32_0 = arith.constant 0 : i32
    %c0_i32_1 = arith.constant 0 : i32
    return %arg0, %c0_i32, %c0_i32_0 : i32, i32, i32
  }
  func.func @transform_3(%arg0: i32) -> (i32, i32, i32) {
    %c0_i32 = arith.constant 0 : i32
    %c0_i32_0 = arith.constant 0 : i32
    %c0_i32_1 = arith.constant 0 : i32
    return %arg0, %c0_i32, %c0_i32_0 : i32, i32, i32
  }
}

module attributes {stable_mosaic.version = 11 : i64} {
  func.func @_conv4x4_s2_kernel(%arg0: i32, %arg1: memref<1x8x4x256xbf16, #tpu.memory_space<vmem>>, %arg2: memref<4x4x128x128xbf16, #tpu.memory_space<vmem>>, %arg3: memref<2x2x128xf32, #tpu.memory_space<vmem>>, %arg4: memref<1x128xf32, #tpu.memory_space<vmem>>, %arg5: memref<1x128xf32, #tpu.memory_space<vmem>>, %arg6: memref<1x16x128xbf16, #tpu.memory_space<vmem>>, %arg7: memref<1x2x128xf32, #tpu.memory_space<vmem>>) attributes {dimension_semantics = [#tpu.dimension_semantics<parallel>], iteration_bounds = array<i64: 2>, scalar_prefetch = 0 : i64, scratch_operands = 0 : i64, tpu.core_type = #tpu.core_type<tc>, window_params = [{transform_indices = @transform_0, window_bounds = array<i64: 1, 8, 4, 256>}, {pipeline_mode = #tpu.pipeline_mode<synchronous>, transform_indices = @transform_1, window_bounds = array<i64: 4, 4, 128, 128>}, {pipeline_mode = #tpu.pipeline_mode<synchronous>, transform_indices = @transform_2, window_bounds = array<i64: 2, 2, 128>}, {pipeline_mode = #tpu.pipeline_mode<synchronous>, transform_indices = @transform_3, window_bounds = array<i64: 1, 128>}, {pipeline_mode = #tpu.pipeline_mode<synchronous>, transform_indices = @transform_4, window_bounds = array<i64: 1, 128>}, {transform_indices = @transform_5, window_bounds = array<i64: 1, 16, 128>}, {transform_indices = @transform_6, window_bounds = array<i64: 1, 2, 128>}]} {
    %c0 = arith.constant 0 : index
    %c0_0 = arith.constant 0 : index
    %c0_1 = arith.constant 0 : index
    %c0_2 = arith.constant 0 : index
    %0 = vector.load %arg1[%c0, %c0_0, %c0_1, %c0_2] : memref<1x8x4x256xbf16, #tpu.memory_space<vmem>>, vector<1x8x4x256xbf16>
    %1 = vector.shape_cast %0 : vector<1x8x4x256xbf16> to vector<8x4x256xbf16>
    %2 = vector.extract_strided_slice %1 {offsets = [0, 0, 0], sizes = [8, 4, 128], strides = [1, 1, 1]} : vector<8x4x256xbf16> to vector<8x4x128xbf16>
    %3 = vector.extract_strided_slice %1 {offsets = [0, 0, 128], sizes = [8, 4, 128], strides = [1, 1, 1]} : vector<8x4x256xbf16> to vector<8x4x128xbf16>
    %c0_3 = arith.constant 0 : index
    %c0_4 = arith.constant 0 : index
    %c0_5 = arith.constant 0 : index
    %4 = vector.load %arg3[%c0_3, %c0_4, %c0_5] : memref<2x2x128xf32, #tpu.memory_space<vmem>>, vector<2x2x128xf32>
    %cst = arith.constant dense<0.000000e+00> : vector<2x128xf32>
    %5 = vector.multi_reduction <add>, %4, %cst [0] : vector<2x2x128xf32> to vector<2x128xf32>
    %6 = vector.extract_strided_slice %5 {offsets = [0, 0], sizes = [1, 128], strides = [1, 1]} : vector<2x128xf32> to vector<1x128xf32>
    %cst_6 = arith.constant 7.812500e-03 : f32
    %7 = vector.broadcast %cst_6 : f32 to vector<1x128xf32>
    %8 = arith.mulf %6, %7 : vector<1x128xf32>
    %9 = vector.extract_strided_slice %5 {offsets = [1, 0], sizes = [1, 128], strides = [1, 1]} : vector<2x128xf32> to vector<1x128xf32>
    %cst_7 = arith.constant 7.812500e-03 : f32
    %10 = vector.broadcast %cst_7 : f32 to vector<1x128xf32>
    %11 = arith.mulf %9, %10 : vector<1x128xf32>
    %12 = arith.mulf %8, %8 : vector<1x128xf32>
    %13 = arith.subf %11, %12 : vector<1x128xf32>
    %cst_8 = arith.constant 0.000000e+00 : f32
    %14 = vector.broadcast %cst_8 : f32 to vector<1x128xf32>
    %15 = arith.maximumf %13, %14 : vector<1x128xf32>
    %c0_9 = arith.constant 0 : index
    %c0_10 = arith.constant 0 : index
    %16 = vector.load %arg4[%c0_9, %c0_10] : memref<1x128xf32, #tpu.memory_space<vmem>>, vector<1x128xf32>
    %cst_11 = arith.constant 9.99999974E-6 : f32
    %17 = vector.broadcast %cst_11 : f32 to vector<1x128xf32>
    %18 = arith.addf %15, %17 : vector<1x128xf32>
    %19 = math.rsqrt %18 : vector<1x128xf32>
    %20 = arith.mulf %16, %19 : vector<1x128xf32>
    %c0_12 = arith.constant 0 : index
    %c0_13 = arith.constant 0 : index
    %21 = vector.load %arg5[%c0_12, %c0_13] : memref<1x128xf32, #tpu.memory_space<vmem>>, vector<1x128xf32>
    %22 = arith.mulf %8, %20 : vector<1x128xf32>
    %23 = arith.subf %21, %22 : vector<1x128xf32>
    %24 = arith.extf %2 : vector<8x4x128xbf16> to vector<8x4x128xf32>
    %25 = vector.shape_cast %20 : vector<1x128xf32> to vector<1x1x128xf32>
    %26 = vector.broadcast %25 : vector<1x1x128xf32> to vector<8x4x128xf32>
    %27 = arith.mulf %24, %26 : vector<8x4x128xf32>
    %28 = vector.shape_cast %23 : vector<1x128xf32> to vector<1x1x128xf32>
    %29 = vector.broadcast %28 : vector<1x1x128xf32> to vector<8x4x128xf32>
    %30 = arith.addf %27, %29 : vector<8x4x128xf32>
    %cst_14 = arith.constant 0.000000e+00 : f32
    %31 = vector.broadcast %cst_14 : f32 to vector<8x4x128xf32>
    %32 = arith.cmpf ogt, %30, %31 : vector<8x4x128xf32>
    %cst_15 = arith.constant 2.000000e-01 : f32
    %33 = vector.broadcast %cst_15 : f32 to vector<8x4x128xf32>
    %34 = arith.mulf %33, %30 : vector<8x4x128xf32>
    %35 = arith.select %32, %30, %34 : vector<8x4x128xi1>, vector<8x4x128xf32>
    %36 = arith.truncf %35 : vector<8x4x128xf32> to vector<8x4x128xbf16>
    %37 = arith.extf %3 : vector<8x4x128xbf16> to vector<8x4x128xf32>
    %38 = vector.shape_cast %20 : vector<1x128xf32> to vector<1x1x128xf32>
    %39 = vector.broadcast %38 : vector<1x1x128xf32> to vector<8x4x128xf32>
    %40 = arith.mulf %37, %39 : vector<8x4x128xf32>
    %41 = vector.shape_cast %23 : vector<1x128xf32> to vector<1x1x128xf32>
    %42 = vector.broadcast %41 : vector<1x1x128xf32> to vector<8x4x128xf32>
    %43 = arith.addf %40, %42 : vector<8x4x128xf32>
    %cst_16 = arith.constant 0.000000e+00 : f32
    %44 = vector.broadcast %cst_16 : f32 to vector<8x4x128xf32>
    %45 = arith.cmpf ogt, %43, %44 : vector<8x4x128xf32>
    %cst_17 = arith.constant 2.000000e-01 : f32
    %46 = vector.broadcast %cst_17 : f32 to vector<8x4x128xf32>
    %47 = arith.mulf %46, %43 : vector<8x4x128xf32>
    %48 = arith.select %45, %43, %47 : vector<8x4x128xi1>, vector<8x4x128xf32>
    %49 = arith.truncf %48 : vector<8x4x128xf32> to vector<8x4x128xbf16>
    %cst_18 = arith.constant 0.000000e+00 : bf16
    %50 = vector.broadcast %cst_18 : bf16 to vector<8x1x128xbf16>
    %51 = vector.extract_strided_slice %49 {offsets = [0, 0, 0], sizes = [8, 3, 128], strides = [1, 1, 1]} : vector<8x4x128xbf16> to vector<8x3x128xbf16>
    %52 = tpu.concatenate %50, %51 in 1 : vector<8x1x128xbf16>, vector<8x3x128xbf16> -> vector<8x4x128xbf16>
    %53 = vector.extract_strided_slice %36 {offsets = [0, 1, 0], sizes = [8, 3, 128], strides = [1, 1, 1]} : vector<8x4x128xbf16> to vector<8x3x128xbf16>
    %54 = tpu.concatenate %53, %50 in 1 : vector<8x3x128xbf16>, vector<8x1x128xbf16> -> vector<8x4x128xbf16>
    %cst_19 = arith.constant 0.000000e+00 : bf16
    %55 = vector.broadcast %cst_19 : bf16 to vector<1x4x128xbf16>
    %cst_20 = arith.constant 0.000000e+00 : f32
    %56 = vector.broadcast %cst_20 : f32 to vector<16x128xf32>
    %57 = vector.shape_cast %52 : vector<8x4x128xbf16> to vector<4x2x4x128xbf16>
    %58 = vector.extract_strided_slice %57 {offsets = [0, 1, 0, 0], sizes = [3, 1, 4, 128], strides = [1, 1, 1, 1]} : vector<4x2x4x128xbf16> to vector<3x1x4x128xbf16>
    %59 = vector.shape_cast %58 : vector<3x1x4x128xbf16> to vector<3x4x128xbf16>
    %60 = tpu.concatenate %55, %59 in 0 : vector<1x4x128xbf16>, vector<3x4x128xbf16> -> vector<4x4x128xbf16>
    %61 = vector.extract_strided_slice %57 {offsets = [0, 0, 0, 0], sizes = [4, 1, 4, 128], strides = [1, 1, 1, 1]} : vector<4x2x4x128xbf16> to vector<4x1x4x128xbf16>
    %62 = vector.shape_cast %61 : vector<4x1x4x128xbf16> to vector<4x4x128xbf16>
    %63 = vector.extract_strided_slice %57 {offsets = [0, 1, 0, 0], sizes = [4, 1, 4, 128], strides = [1, 1, 1, 1]} : vector<4x2x4x128xbf16> to vector<4x1x4x128xbf16>
    %64 = vector.shape_cast %63 : vector<4x1x4x128xbf16> to vector<4x4x128xbf16>
    %65 = vector.extract_strided_slice %57 {offsets = [1, 0, 0, 0], sizes = [3, 1, 4, 128], strides = [1, 1, 1, 1]} : vector<4x2x4x128xbf16> to vector<3x1x4x128xbf16>
    %66 = vector.shape_cast %65 : vector<3x1x4x128xbf16> to vector<3x4x128xbf16>
    %67 = tpu.concatenate %66, %55 in 0 : vector<3x4x128xbf16>, vector<1x4x128xbf16> -> vector<4x4x128xbf16>
    %68 = vector.shape_cast %60 : vector<4x4x128xbf16> to vector<16x128xbf16>
    %c0_21 = arith.constant 0 : index
    %c0_22 = arith.constant 0 : index
    %c0_23 = arith.constant 0 : index
    %c0_24 = arith.constant 0 : index
    %69 = vector.load %arg2[%c0_21, %c0_22, %c0_23, %c0_24] : memref<4x4x128x128xbf16, #tpu.memory_space<vmem>>, vector<1x1x128x128xbf16>
    %70 = vector.shape_cast %69 : vector<1x1x128x128xbf16> to vector<128x128xbf16>
    %cst_25 = arith.constant dense<0.000000e+00> : vector<16x128xf32>
    %71 = tpu.matmul %68, %70, %cst_25 {dimension_numbers = #tpu.dot_dimension_numbers<[1], [0], [0], [1], [0, 0, 1, 1], [], []>} : vector<16x128xbf16>, vector<128x128xbf16>, vector<16x128xf32> -> vector<16x128xf32>
    %72 = arith.addf %56, %71 : vector<16x128xf32>
    %73 = vector.shape_cast %62 : vector<4x4x128xbf16> to vector<16x128xbf16>
    %c1 = arith.constant 1 : index
    %c0_26 = arith.constant 0 : index
    %c0_27 = arith.constant 0 : index
    %c0_28 = arith.constant 0 : index
    %74 = vector.load %arg2[%c1, %c0_26, %c0_27, %c0_28] : memref<4x4x128x128xbf16, #tpu.memory_space<vmem>>, vector<1x1x128x128xbf16>
    %75 = vector.shape_cast %74 : vector<1x1x128x128xbf16> to vector<128x128xbf16>
    %cst_29 = arith.constant dense<0.000000e+00> : vector<16x128xf32>
    %76 = tpu.matmul %73, %75, %cst_29 {dimension_numbers = #tpu.dot_dimension_numbers<[1], [0], [0], [1], [0, 0, 1, 1], [], []>} : vector<16x128xbf16>, vector<128x128xbf16>, vector<16x128xf32> -> vector<16x128xf32>
    %77 = arith.addf %72, %76 : vector<16x128xf32>
    %78 = vector.shape_cast %64 : vector<4x4x128xbf16> to vector<16x128xbf16>
    %c2 = arith.constant 2 : index
    %c0_30 = arith.constant 0 : index
    %c0_31 = arith.constant 0 : index
    %c0_32 = arith.constant 0 : index
    %79 = vector.load %arg2[%c2, %c0_30, %c0_31, %c0_32] : memref<4x4x128x128xbf16, #tpu.memory_space<vmem>>, vector<1x1x128x128xbf16>
    %80 = vector.shape_cast %79 : vector<1x1x128x128xbf16> to vector<128x128xbf16>
    %cst_33 = arith.constant dense<0.000000e+00> : vector<16x128xf32>
    %81 = tpu.matmul %78, %80, %cst_33 {dimension_numbers = #tpu.dot_dimension_numbers<[1], [0], [0], [1], [0, 0, 1, 1], [], []>} : vector<16x128xbf16>, vector<128x128xbf16>, vector<16x128xf32> -> vector<16x128xf32>
    %82 = arith.addf %77, %81 : vector<16x128xf32>
    %83 = vector.shape_cast %67 : vector<4x4x128xbf16> to vector<16x128xbf16>
    %c3 = arith.constant 3 : index
    %c0_34 = arith.constant 0 : index
    %c0_35 = arith.constant 0 : index
    %c0_36 = arith.constant 0 : index
    %84 = vector.load %arg2[%c3, %c0_34, %c0_35, %c0_36] : memref<4x4x128x128xbf16, #tpu.memory_space<vmem>>, vector<1x1x128x128xbf16>
    %85 = vector.shape_cast %84 : vector<1x1x128x128xbf16> to vector<128x128xbf16>
    %cst_37 = arith.constant dense<0.000000e+00> : vector<16x128xf32>
    %86 = tpu.matmul %83, %85, %cst_37 {dimension_numbers = #tpu.dot_dimension_numbers<[1], [0], [0], [1], [0, 0, 1, 1], [], []>} : vector<16x128xbf16>, vector<128x128xbf16>, vector<16x128xf32> -> vector<16x128xf32>
    %87 = arith.addf %82, %86 : vector<16x128xf32>
    %88 = vector.shape_cast %36 : vector<8x4x128xbf16> to vector<4x2x4x128xbf16>
    %89 = vector.extract_strided_slice %88 {offsets = [0, 1, 0, 0], sizes = [3, 1, 4, 128], strides = [1, 1, 1, 1]} : vector<4x2x4x128xbf16> to vector<3x1x4x128xbf16>
    %90 = vector.shape_cast %89 : vector<3x1x4x128xbf16> to vector<3x4x128xbf16>
    %91 = tpu.concatenate %55, %90 in 0 : vector<1x4x128xbf16>, vector<3x4x128xbf16> -> vector<4x4x128xbf16>
    %92 = vector.extract_strided_slice %88 {offsets = [0, 0, 0, 0], sizes = [4, 1, 4, 128], strides = [1, 1, 1, 1]} : vector<4x2x4x128xbf16> to vector<4x1x4x128xbf16>
    %93 = vector.shape_cast %92 : vector<4x1x4x128xbf16> to vector<4x4x128xbf16>
    %94 = vector.extract_strided_slice %88 {offsets = [0, 1, 0, 0], sizes = [4, 1, 4, 128], strides = [1, 1, 1, 1]} : vector<4x2x4x128xbf16> to vector<4x1x4x128xbf16>
    %95 = vector.shape_cast %94 : vector<4x1x4x128xbf16> to vector<4x4x128xbf16>
    %96 = vector.extract_strided_slice %88 {offsets = [1, 0, 0, 0], sizes = [3, 1, 4, 128], strides = [1, 1, 1, 1]} : vector<4x2x4x128xbf16> to vector<3x1x4x128xbf16>
    %97 = vector.shape_cast %96 : vector<3x1x4x128xbf16> to vector<3x4x128xbf16>
    %98 = tpu.concatenate %97, %55 in 0 : vector<3x4x128xbf16>, vector<1x4x128xbf16> -> vector<4x4x128xbf16>
    %99 = vector.shape_cast %91 : vector<4x4x128xbf16> to vector<16x128xbf16>
    %c0_38 = arith.constant 0 : index
    %c1_39 = arith.constant 1 : index
    %c0_40 = arith.constant 0 : index
    %c0_41 = arith.constant 0 : index
    %100 = vector.load %arg2[%c0_38, %c1_39, %c0_40, %c0_41] : memref<4x4x128x128xbf16, #tpu.memory_space<vmem>>, vector<1x1x128x128xbf16>
    %101 = vector.shape_cast %100 : vector<1x1x128x128xbf16> to vector<128x128xbf16>
    %cst_42 = arith.constant dense<0.000000e+00> : vector<16x128xf32>
    %102 = tpu.matmul %99, %101, %cst_42 {dimension_numbers = #tpu.dot_dimension_numbers<[1], [0], [0], [1], [0, 0, 1, 1], [], []>} : vector<16x128xbf16>, vector<128x128xbf16>, vector<16x128xf32> -> vector<16x128xf32>
    %103 = arith.addf %87, %102 : vector<16x128xf32>
    %104 = vector.shape_cast %93 : vector<4x4x128xbf16> to vector<16x128xbf16>
    %c1_43 = arith.constant 1 : index
    %c1_44 = arith.constant 1 : index
    %c0_45 = arith.constant 0 : index
    %c0_46 = arith.constant 0 : index
    %105 = vector.load %arg2[%c1_43, %c1_44, %c0_45, %c0_46] : memref<4x4x128x128xbf16, #tpu.memory_space<vmem>>, vector<1x1x128x128xbf16>
    %106 = vector.shape_cast %105 : vector<1x1x128x128xbf16> to vector<128x128xbf16>
    %cst_47 = arith.constant dense<0.000000e+00> : vector<16x128xf32>
    %107 = tpu.matmul %104, %106, %cst_47 {dimension_numbers = #tpu.dot_dimension_numbers<[1], [0], [0], [1], [0, 0, 1, 1], [], []>} : vector<16x128xbf16>, vector<128x128xbf16>, vector<16x128xf32> -> vector<16x128xf32>
    %108 = arith.addf %103, %107 : vector<16x128xf32>
    %109 = vector.shape_cast %95 : vector<4x4x128xbf16> to vector<16x128xbf16>
    %c2_48 = arith.constant 2 : index
    %c1_49 = arith.constant 1 : index
    %c0_50 = arith.constant 0 : index
    %c0_51 = arith.constant 0 : index
    %110 = vector.load %arg2[%c2_48, %c1_49, %c0_50, %c0_51] : memref<4x4x128x128xbf16, #tpu.memory_space<vmem>>, vector<1x1x128x128xbf16>
    %111 = vector.shape_cast %110 : vector<1x1x128x128xbf16> to vector<128x128xbf16>
    %cst_52 = arith.constant dense<0.000000e+00> : vector<16x128xf32>
    %112 = tpu.matmul %109, %111, %cst_52 {dimension_numbers = #tpu.dot_dimension_numbers<[1], [0], [0], [1], [0, 0, 1, 1], [], []>} : vector<16x128xbf16>, vector<128x128xbf16>, vector<16x128xf32> -> vector<16x128xf32>
    %113 = arith.addf %108, %112 : vector<16x128xf32>
    %114 = vector.shape_cast %98 : vector<4x4x128xbf16> to vector<16x128xbf16>
    %c3_53 = arith.constant 3 : index
    %c1_54 = arith.constant 1 : index
    %c0_55 = arith.constant 0 : index
    %c0_56 = arith.constant 0 : index
    %115 = vector.load %arg2[%c3_53, %c1_54, %c0_55, %c0_56] : memref<4x4x128x128xbf16, #tpu.memory_space<vmem>>, vector<1x1x128x128xbf16>
    %116 = vector.shape_cast %115 : vector<1x1x128x128xbf16> to vector<128x128xbf16>
    %cst_57 = arith.constant dense<0.000000e+00> : vector<16x128xf32>
    %117 = tpu.matmul %114, %116, %cst_57 {dimension_numbers = #tpu.dot_dimension_numbers<[1], [0], [0], [1], [0, 0, 1, 1], [], []>} : vector<16x128xbf16>, vector<128x128xbf16>, vector<16x128xf32> -> vector<16x128xf32>
    %118 = arith.addf %113, %117 : vector<16x128xf32>
    %119 = vector.shape_cast %49 : vector<8x4x128xbf16> to vector<4x2x4x128xbf16>
    %120 = vector.extract_strided_slice %119 {offsets = [0, 1, 0, 0], sizes = [3, 1, 4, 128], strides = [1, 1, 1, 1]} : vector<4x2x4x128xbf16> to vector<3x1x4x128xbf16>
    %121 = vector.shape_cast %120 : vector<3x1x4x128xbf16> to vector<3x4x128xbf16>
    %122 = tpu.concatenate %55, %121 in 0 : vector<1x4x128xbf16>, vector<3x4x128xbf16> -> vector<4x4x128xbf16>
    %123 = vector.extract_strided_slice %119 {offsets = [0, 0, 0, 0], sizes = [4, 1, 4, 128], strides = [1, 1, 1, 1]} : vector<4x2x4x128xbf16> to vector<4x1x4x128xbf16>
    %124 = vector.shape_cast %123 : vector<4x1x4x128xbf16> to vector<4x4x128xbf16>
    %125 = vector.extract_strided_slice %119 {offsets = [0, 1, 0, 0], sizes = [4, 1, 4, 128], strides = [1, 1, 1, 1]} : vector<4x2x4x128xbf16> to vector<4x1x4x128xbf16>
    %126 = vector.shape_cast %125 : vector<4x1x4x128xbf16> to vector<4x4x128xbf16>
    %127 = vector.extract_strided_slice %119 {offsets = [1, 0, 0, 0], sizes = [3, 1, 4, 128], strides = [1, 1, 1, 1]} : vector<4x2x4x128xbf16> to vector<3x1x4x128xbf16>
    %128 = vector.shape_cast %127 : vector<3x1x4x128xbf16> to vector<3x4x128xbf16>
    %129 = tpu.concatenate %128, %55 in 0 : vector<3x4x128xbf16>, vector<1x4x128xbf16> -> vector<4x4x128xbf16>
    %130 = vector.shape_cast %122 : vector<4x4x128xbf16> to vector<16x128xbf16>
    %c0_58 = arith.constant 0 : index
    %c2_59 = arith.constant 2 : index
    %c0_60 = arith.constant 0 : index
    %c0_61 = arith.constant 0 : index
    %131 = vector.load %arg2[%c0_58, %c2_59, %c0_60, %c0_61] : memref<4x4x128x128xbf16, #tpu.memory_space<vmem>>, vector<1x1x128x128xbf16>
    %132 = vector.shape_cast %131 : vector<1x1x128x128xbf16> to vector<128x128xbf16>
    %cst_62 = arith.constant dense<0.000000e+00> : vector<16x128xf32>
    %133 = tpu.matmul %130, %132, %cst_62 {dimension_numbers = #tpu.dot_dimension_numbers<[1], [0], [0], [1], [0, 0, 1, 1], [], []>} : vector<16x128xbf16>, vector<128x128xbf16>, vector<16x128xf32> -> vector<16x128xf32>
    %134 = arith.addf %118, %133 : vector<16x128xf32>
    %135 = vector.shape_cast %124 : vector<4x4x128xbf16> to vector<16x128xbf16>
    %c1_63 = arith.constant 1 : index
    %c2_64 = arith.constant 2 : index
    %c0_65 = arith.constant 0 : index
    %c0_66 = arith.constant 0 : index
    %136 = vector.load %arg2[%c1_63, %c2_64, %c0_65, %c0_66] : memref<4x4x128x128xbf16, #tpu.memory_space<vmem>>, vector<1x1x128x128xbf16>
    %137 = vector.shape_cast %136 : vector<1x1x128x128xbf16> to vector<128x128xbf16>
    %cst_67 = arith.constant dense<0.000000e+00> : vector<16x128xf32>
    %138 = tpu.matmul %135, %137, %cst_67 {dimension_numbers = #tpu.dot_dimension_numbers<[1], [0], [0], [1], [0, 0, 1, 1], [], []>} : vector<16x128xbf16>, vector<128x128xbf16>, vector<16x128xf32> -> vector<16x128xf32>
    %139 = arith.addf %134, %138 : vector<16x128xf32>
    %140 = vector.shape_cast %126 : vector<4x4x128xbf16> to vector<16x128xbf16>
    %c2_68 = arith.constant 2 : index
    %c2_69 = arith.constant 2 : index
    %c0_70 = arith.constant 0 : index
    %c0_71 = arith.constant 0 : index
    %141 = vector.load %arg2[%c2_68, %c2_69, %c0_70, %c0_71] : memref<4x4x128x128xbf16, #tpu.memory_space<vmem>>, vector<1x1x128x128xbf16>
    %142 = vector.shape_cast %141 : vector<1x1x128x128xbf16> to vector<128x128xbf16>
    %cst_72 = arith.constant dense<0.000000e+00> : vector<16x128xf32>
    %143 = tpu.matmul %140, %142, %cst_72 {dimension_numbers = #tpu.dot_dimension_numbers<[1], [0], [0], [1], [0, 0, 1, 1], [], []>} : vector<16x128xbf16>, vector<128x128xbf16>, vector<16x128xf32> -> vector<16x128xf32>
    %144 = arith.addf %139, %143 : vector<16x128xf32>
    %145 = vector.shape_cast %129 : vector<4x4x128xbf16> to vector<16x128xbf16>
    %c3_73 = arith.constant 3 : index
    %c2_74 = arith.constant 2 : index
    %c0_75 = arith.constant 0 : index
    %c0_76 = arith.constant 0 : index
    %146 = vector.load %arg2[%c3_73, %c2_74, %c0_75, %c0_76] : memref<4x4x128x128xbf16, #tpu.memory_space<vmem>>, vector<1x1x128x128xbf16>
    %147 = vector.shape_cast %146 : vector<1x1x128x128xbf16> to vector<128x128xbf16>
    %cst_77 = arith.constant dense<0.000000e+00> : vector<16x128xf32>
    %148 = tpu.matmul %145, %147, %cst_77 {dimension_numbers = #tpu.dot_dimension_numbers<[1], [0], [0], [1], [0, 0, 1, 1], [], []>} : vector<16x128xbf16>, vector<128x128xbf16>, vector<16x128xf32> -> vector<16x128xf32>
    %149 = arith.addf %144, %148 : vector<16x128xf32>
    %150 = vector.shape_cast %54 : vector<8x4x128xbf16> to vector<4x2x4x128xbf16>
    %151 = vector.extract_strided_slice %150 {offsets = [0, 1, 0, 0], sizes = [3, 1, 4, 128], strides = [1, 1, 1, 1]} : vector<4x2x4x128xbf16> to vector<3x1x4x128xbf16>
    %152 = vector.shape_cast %151 : vector<3x1x4x128xbf16> to vector<3x4x128xbf16>
    %153 = tpu.concatenate %55, %152 in 0 : vector<1x4x128xbf16>, vector<3x4x128xbf16> -> vector<4x4x128xbf16>
    %154 = vector.extract_strided_slice %150 {offsets = [0, 0, 0, 0], sizes = [4, 1, 4, 128], strides = [1, 1, 1, 1]} : vector<4x2x4x128xbf16> to vector<4x1x4x128xbf16>
    %155 = vector.shape_cast %154 : vector<4x1x4x128xbf16> to vector<4x4x128xbf16>
    %156 = vector.extract_strided_slice %150 {offsets = [0, 1, 0, 0], sizes = [4, 1, 4, 128], strides = [1, 1, 1, 1]} : vector<4x2x4x128xbf16> to vector<4x1x4x128xbf16>
    %157 = vector.shape_cast %156 : vector<4x1x4x128xbf16> to vector<4x4x128xbf16>
    %158 = vector.extract_strided_slice %150 {offsets = [1, 0, 0, 0], sizes = [3, 1, 4, 128], strides = [1, 1, 1, 1]} : vector<4x2x4x128xbf16> to vector<3x1x4x128xbf16>
    %159 = vector.shape_cast %158 : vector<3x1x4x128xbf16> to vector<3x4x128xbf16>
    %160 = tpu.concatenate %159, %55 in 0 : vector<3x4x128xbf16>, vector<1x4x128xbf16> -> vector<4x4x128xbf16>
    %161 = vector.shape_cast %153 : vector<4x4x128xbf16> to vector<16x128xbf16>
    %c0_78 = arith.constant 0 : index
    %c3_79 = arith.constant 3 : index
    %c0_80 = arith.constant 0 : index
    %c0_81 = arith.constant 0 : index
    %162 = vector.load %arg2[%c0_78, %c3_79, %c0_80, %c0_81] : memref<4x4x128x128xbf16, #tpu.memory_space<vmem>>, vector<1x1x128x128xbf16>
    %163 = vector.shape_cast %162 : vector<1x1x128x128xbf16> to vector<128x128xbf16>
    %cst_82 = arith.constant dense<0.000000e+00> : vector<16x128xf32>
    %164 = tpu.matmul %161, %163, %cst_82 {dimension_numbers = #tpu.dot_dimension_numbers<[1], [0], [0], [1], [0, 0, 1, 1], [], []>} : vector<16x128xbf16>, vector<128x128xbf16>, vector<16x128xf32> -> vector<16x128xf32>
    %165 = arith.addf %149, %164 : vector<16x128xf32>
    %166 = vector.shape_cast %155 : vector<4x4x128xbf16> to vector<16x128xbf16>
    %c1_83 = arith.constant 1 : index
    %c3_84 = arith.constant 3 : index
    %c0_85 = arith.constant 0 : index
    %c0_86 = arith.constant 0 : index
    %167 = vector.load %arg2[%c1_83, %c3_84, %c0_85, %c0_86] : memref<4x4x128x128xbf16, #tpu.memory_space<vmem>>, vector<1x1x128x128xbf16>
    %168 = vector.shape_cast %167 : vector<1x1x128x128xbf16> to vector<128x128xbf16>
    %cst_87 = arith.constant dense<0.000000e+00> : vector<16x128xf32>
    %169 = tpu.matmul %166, %168, %cst_87 {dimension_numbers = #tpu.dot_dimension_numbers<[1], [0], [0], [1], [0, 0, 1, 1], [], []>} : vector<16x128xbf16>, vector<128x128xbf16>, vector<16x128xf32> -> vector<16x128xf32>
    %170 = arith.addf %165, %169 : vector<16x128xf32>
    %171 = vector.shape_cast %157 : vector<4x4x128xbf16> to vector<16x128xbf16>
    %c2_88 = arith.constant 2 : index
    %c3_89 = arith.constant 3 : index
    %c0_90 = arith.constant 0 : index
    %c0_91 = arith.constant 0 : index
    %172 = vector.load %arg2[%c2_88, %c3_89, %c0_90, %c0_91] : memref<4x4x128x128xbf16, #tpu.memory_space<vmem>>, vector<1x1x128x128xbf16>
    %173 = vector.shape_cast %172 : vector<1x1x128x128xbf16> to vector<128x128xbf16>
    %cst_92 = arith.constant dense<0.000000e+00> : vector<16x128xf32>
    %174 = tpu.matmul %171, %173, %cst_92 {dimension_numbers = #tpu.dot_dimension_numbers<[1], [0], [0], [1], [0, 0, 1, 1], [], []>} : vector<16x128xbf16>, vector<128x128xbf16>, vector<16x128xf32> -> vector<16x128xf32>
    %175 = arith.addf %170, %174 : vector<16x128xf32>
    %176 = vector.shape_cast %160 : vector<4x4x128xbf16> to vector<16x128xbf16>
    %c3_93 = arith.constant 3 : index
    %c3_94 = arith.constant 3 : index
    %c0_95 = arith.constant 0 : index
    %c0_96 = arith.constant 0 : index
    %177 = vector.load %arg2[%c3_93, %c3_94, %c0_95, %c0_96] : memref<4x4x128x128xbf16, #tpu.memory_space<vmem>>, vector<1x1x128x128xbf16>
    %178 = vector.shape_cast %177 : vector<1x1x128x128xbf16> to vector<128x128xbf16>
    %cst_97 = arith.constant dense<0.000000e+00> : vector<16x128xf32>
    %179 = tpu.matmul %176, %178, %cst_97 {dimension_numbers = #tpu.dot_dimension_numbers<[1], [0], [0], [1], [0, 0, 1, 1], [], []>} : vector<16x128xbf16>, vector<128x128xbf16>, vector<16x128xf32> -> vector<16x128xf32>
    %180 = arith.addf %175, %179 : vector<16x128xf32>
    %cst_98 = arith.constant dense<0.000000e+00> : vector<128xf32>
    %181 = vector.multi_reduction <add>, %180, %cst_98 [0] : vector<16x128xf32> to vector<128xf32>
    %182 = vector.shape_cast %181 : vector<128xf32> to vector<1x128xf32>
    %c0_99 = arith.constant 0 : index
    %c0_100 = arith.constant 0 : index
    %c0_101 = arith.constant 0 : index
    %183 = vector.load %arg7[%c0_99, %c0_100, %c0_101] : memref<1x2x128xf32, #tpu.memory_space<vmem>>, vector<1x1x128xf32>
    %184 = vector.shape_cast %183 : vector<1x1x128xf32> to vector<1x128xf32>
    %185 = vector.shape_cast %182 : vector<1x128xf32> to vector<1x1x128xf32>
    tpu.vector_store %arg7[%c0_99, %c0_100, %c0_101], %185 {strides = array<i32>} : memref<1x2x128xf32, #tpu.memory_space<vmem>>, vector<1x1x128xf32>,
    %186 = arith.mulf %180, %180 : vector<16x128xf32>
    %cst_102 = arith.constant dense<0.000000e+00> : vector<128xf32>
    %187 = vector.multi_reduction <add>, %186, %cst_102 [0] : vector<16x128xf32> to vector<128xf32>
    %188 = vector.shape_cast %187 : vector<128xf32> to vector<1x128xf32>
    %c0_103 = arith.constant 0 : index
    %c1_104 = arith.constant 1 : index
    %c0_105 = arith.constant 0 : index
    %189 = vector.load %arg7[%c0_103, %c1_104, %c0_105] : memref<1x2x128xf32, #tpu.memory_space<vmem>>, vector<1x1x128xf32>
    %190 = vector.shape_cast %189 : vector<1x1x128xf32> to vector<1x128xf32>
    %191 = vector.shape_cast %188 : vector<1x128xf32> to vector<1x1x128xf32>
    tpu.vector_store %arg7[%c0_103, %c1_104, %c0_105], %191 {strides = array<i32>} : memref<1x2x128xf32, #tpu.memory_space<vmem>>, vector<1x1x128xf32>,
    %192 = arith.truncf %180 : vector<16x128xf32> to vector<16x128xbf16>
    %c0_106 = arith.constant 0 : index
    %c0_107 = arith.constant 0 : index
    %c0_108 = arith.constant 0 : index
    %193 = vector.load %arg6[%c0_106, %c0_107, %c0_108] : memref<1x16x128xbf16, #tpu.memory_space<vmem>>, vector<1x16x128xbf16>
    %194 = vector.shape_cast %193 : vector<1x16x128xbf16> to vector<16x128xbf16>
    %195 = vector.shape_cast %192 : vector<16x128xbf16> to vector<1x16x128xbf16>
    tpu.vector_store %arg6[%c0_106, %c0_107, %c0_108], %195 {strides = array<i32>} : memref<1x16x128xbf16, #tpu.memory_space<vmem>>, vector<1x16x128xbf16>,
    return
  }
  func.func @transform_0(%arg0: i32) -> (i32, i32, i32, i32) {
    %c0_i32 = arith.constant 0 : i32
    %c0_i32_0 = arith.constant 0 : i32
    %c0_i32_1 = arith.constant 0 : i32
    %c0_i32_2 = arith.constant 0 : i32
    return %arg0, %c0_i32, %c0_i32_0, %c0_i32_1 : i32, i32, i32, i32
  }
  func.func @transform_1(%arg0: i32) -> (i32, i32, i32, i32) {
    %c0_i32 = arith.constant 0 : i32
    %c0_i32_0 = arith.constant 0 : i32
    %c0_i32_1 = arith.constant 0 : i32
    %c0_i32_2 = arith.constant 0 : i32
    %c0_i32_3 = arith.constant 0 : i32
    return %c0_i32, %c0_i32_0, %c0_i32_1, %c0_i32_2 : i32, i32, i32, i32
  }
  func.func @transform_2(%arg0: i32) -> (i32, i32, i32) {
    %c0_i32 = arith.constant 0 : i32
    %c0_i32_0 = arith.constant 0 : i32
    %c0_i32_1 = arith.constant 0 : i32
    %c0_i32_2 = arith.constant 0 : i32
    return %c0_i32, %c0_i32_0, %c0_i32_1 : i32, i32, i32
  }
  func.func @transform_3(%arg0: i32) -> (i32, i32) {
    %c0_i32 = arith.constant 0 : i32
    %c0_i32_0 = arith.constant 0 : i32
    %c0_i32_1 = arith.constant 0 : i32
    return %c0_i32, %c0_i32_0 : i32, i32
  }
  func.func @transform_4(%arg0: i32) -> (i32, i32) {
    %c0_i32 = arith.constant 0 : i32
    %c0_i32_0 = arith.constant 0 : i32
    %c0_i32_1 = arith.constant 0 : i32
    return %c0_i32, %c0_i32_0 : i32, i32
  }
  func.func @transform_5(%arg0: i32) -> (i32, i32, i32) {
    %c0_i32 = arith.constant 0 : i32
    %c0_i32_0 = arith.constant 0 : i32
    %c0_i32_1 = arith.constant 0 : i32
    return %arg0, %c0_i32, %c0_i32_0 : i32, i32, i32
  }
  func.func @transform_6(%arg0: i32) -> (i32, i32, i32) {
    %c0_i32 = arith.constant 0 : i32
    %c0_i32_0 = arith.constant 0 : i32
    %c0_i32_1 = arith.constant 0 : i32
    return %arg0, %c0_i32, %c0_i32_0 : i32, i32, i32
  }
}

module attributes {stable_mosaic.version = 11 : i64} {
  func.func @_final_mm_kernel(%arg0: i32, %arg1: memref<16x2048xbf16, #tpu.memory_space<vmem>>, %arg2: memref<2048x128xbf16, #tpu.memory_space<vmem>>, %arg3: memref<1x2048xf32, #tpu.memory_space<vmem>>, %arg4: memref<1x2048xf32, #tpu.memory_space<vmem>>, %arg5: memref<16x128xf32, #tpu.memory_space<vmem>>) attributes {dimension_semantics = [#tpu.dimension_semantics<parallel>], iteration_bounds = array<i64: 1>, scalar_prefetch = 0 : i64, scratch_operands = 0 : i64, tpu.core_type = #tpu.core_type<tc>, window_params = [{transform_indices = @transform_0, window_bounds = array<i64: 16, 2048>}, {pipeline_mode = #tpu.pipeline_mode<synchronous>, transform_indices = @transform_1, window_bounds = array<i64: 2048, 128>}, {pipeline_mode = #tpu.pipeline_mode<synchronous>, transform_indices = @transform_2, window_bounds = array<i64: 1, 2048>}, {pipeline_mode = #tpu.pipeline_mode<synchronous>, transform_indices = @transform_3, window_bounds = array<i64: 1, 2048>}, {transform_indices = @transform_4, window_bounds = array<i64: 16, 128>}]} {
    %c0 = arith.constant 0 : index
    %c0_0 = arith.constant 0 : index
    %0 = vector.load %arg1[%c0, %c0_0] : memref<16x2048xbf16, #tpu.memory_space<vmem>>, vector<16x2048xbf16>
    %1 = arith.extf %0 : vector<16x2048xbf16> to vector<16x2048xf32>
    %c0_1 = arith.constant 0 : index
    %c0_2 = arith.constant 0 : index
    %2 = vector.load %arg3[%c0_1, %c0_2] : memref<1x2048xf32, #tpu.memory_space<vmem>>, vector<1x2048xf32>
    %3 = vector.broadcast %2 : vector<1x2048xf32> to vector<16x2048xf32>
    %4 = arith.mulf %1, %3 : vector<16x2048xf32>
    %c0_3 = arith.constant 0 : index
    %c0_4 = arith.constant 0 : index
    %5 = vector.load %arg4[%c0_3, %c0_4] : memref<1x2048xf32, #tpu.memory_space<vmem>>, vector<1x2048xf32>
    %6 = vector.broadcast %5 : vector<1x2048xf32> to vector<16x2048xf32>
    %7 = arith.addf %4, %6 : vector<16x2048xf32>
    %cst = arith.constant 0.000000e+00 : f32
    %8 = vector.broadcast %cst : f32 to vector<16x2048xf32>
    %9 = arith.cmpf ogt, %7, %8 : vector<16x2048xf32>
    %cst_5 = arith.constant 2.000000e-01 : f32
    %10 = vector.broadcast %cst_5 : f32 to vector<16x2048xf32>
    %11 = arith.mulf %10, %7 : vector<16x2048xf32>
    %12 = arith.select %9, %7, %11 : vector<16x2048xi1>, vector<16x2048xf32>
    %13 = arith.truncf %12 : vector<16x2048xf32> to vector<16x2048xbf16>
    %c0_6 = arith.constant 0 : index
    %c0_7 = arith.constant 0 : index
    %14 = vector.load %arg2[%c0_6, %c0_7] : memref<2048x128xbf16, #tpu.memory_space<vmem>>, vector<2048x128xbf16>
    %cst_8 = arith.constant dense<0.000000e+00> : vector<16x128xf32>
    %15 = tpu.matmul %13, %14, %cst_8 {dimension_numbers = #tpu.dot_dimension_numbers<[1], [0], [0], [1], [0, 0, 1, 1], [], []>} : vector<16x2048xbf16>, vector<2048x128xbf16>, vector<16x128xf32> -> vector<16x128xf32>
    %16 = math.absf %15 : vector<16x128xf32>
    %cst_9 = arith.constant 0.000000e+00 : f32
    %17 = vector.broadcast %cst_9 : f32 to vector<16x128xf32>
    %18 = arith.subf %17, %16 : vector<16x128xf32>
    %19 = math.exp %18 : vector<16x128xf32>
    %cst_10 = arith.constant 0.000000e+00 : f32
    %20 = vector.broadcast %cst_10 : f32 to vector<16x128xf32>
    %21 = arith.cmpf oge, %15, %20 : vector<16x128xf32>
    %cst_11 = arith.constant 1.000000e+00 : f32
    %22 = vector.broadcast %cst_11 : f32 to vector<16x128xf32>
    %23 = arith.addf %22, %19 : vector<16x128xf32>
    %cst_12 = arith.constant 1.000000e+00 : f32
    %24 = vector.broadcast %cst_12 : f32 to vector<16x128xf32>
    %25 = arith.divf %24, %23 : vector<16x128xf32>
    %cst_13 = arith.constant 1.000000e+00 : f32
    %26 = vector.broadcast %cst_13 : f32 to vector<16x128xf32>
    %27 = arith.addf %26, %19 : vector<16x128xf32>
    %28 = arith.divf %19, %27 : vector<16x128xf32>
    %29 = arith.select %21, %25, %28 : vector<16x128xi1>, vector<16x128xf32>
    %c0_14 = arith.constant 0 : index
    %c0_15 = arith.constant 0 : index
    %30 = vector.load %arg5[%c0_14, %c0_15] : memref<16x128xf32, #tpu.memory_space<vmem>>, vector<16x128xf32>
    tpu.vector_store %arg5[%c0_14, %c0_15], %29 {strides = array<i32>} : memref<16x128xf32, #tpu.memory_space<vmem>>, vector<16x128xf32>,
    return
  }
  func.func @transform_0(%arg0: i32) -> (i32, i32) {
    %c0_i32 = arith.constant 0 : i32
    %c0_i32_0 = arith.constant 0 : i32
    return %arg0, %c0_i32 : i32, i32
  }
  func.func @transform_1(%arg0: i32) -> (i32, i32) {
    %c0_i32 = arith.constant 0 : i32
    %c0_i32_0 = arith.constant 0 : i32
    %c0_i32_1 = arith.constant 0 : i32
    return %c0_i32, %c0_i32_0 : i32, i32
  }
  func.func @transform_2(%arg0: i32) -> (i32, i32) {
    %c0_i32 = arith.constant 0 : i32
    %c0_i32_0 = arith.constant 0 : i32
    %c0_i32_1 = arith.constant 0 : i32
    return %c0_i32, %c0_i32_0 : i32, i32
  }
  func.func @transform_3(%arg0: i32) -> (i32, i32) {
    %c0_i32 = arith.constant 0 : i32
    %c0_i32_0 = arith.constant 0 : i32
    %c0_i32_1 = arith.constant 0 : i32
    return %c0_i32, %c0_i32_0 : i32, i32
  }
  func.func @transform_4(%arg0: i32) -> (i32, i32) {
    %c0_i32 = arith.constant 0 : i32
    %c0_i32_0 = arith.constant 0 : i32
    return %arg0, %c0_i32 : i32, i32
  }
}

</mosaic_0001>

<bundles_post_ra>
// kernel: tile.13
= control target key start
LH: loop header
LB: loop body
LE: loop exit
PB: predicated region body
PF: predicated region fallthrough
CT: control target
= control target key end

     0   :  { %s28_s0 = inlined_call_operand.vmem [shape: f32[128], index: 0, kind: input, shape index: {}]   ;;  %s29_s1 = inlined_call_operand.vmem [shape: f32[16,128], index: 1, kind: output, shape index: {}]  }
   0x1   :  { %v4_v0 = vld [vmem:[%s28_s0] ss:$0 sm:$0xff] }
   0x2   :  { %5 = vst [vmem:[%s29_s1] sm:$0xff] %v4_v0  ;;  %8 = vst [vmem:[%s29_s1 + $0x8] sm:$0xff] %v4_v0 }

// kernel: _lambda_.5
= control target key start
LH: loop header
LB: loop body
LE: loop exit
PB: predicated region body
PF: predicated region fallthrough
CT: control target
= control target key end

     0   :  { %s4593_s12 = smov 0   ;;  %s5489_s0 = inlined_call_operand.vmem [shape: bf16[2,16,8,256], index: 0, kind: input, shape index: {}]   ;;  %s5490_s1 = inlined_call_operand.vmem [shape: bf16[4,4,128,128], index: 1, kind: input, shape index: {}]   ;;  %s5491_s2 = inlined_call_operand.vmem [shape: bf16[2,64,128], index: 2, kind: output, shape index: {0}]   ;;  %s5492_s3 = inlined_call_operand.vmem [shape: f32[2,2,128], index: 3, kind: output, shape index: {1}]  }
   0x1 LB: > { %s3152_s13 = sadd.s32 4294967295, %s4570_s12   ;;  %p3156_p0 = scmp.ge.s32.totalorder %s4570_s12, 1  ;;  %s4570_s12 = sphi %s4593_s12, %s14_s12  }
   0x2   : > { %p140_p1 = scmp.lt.s32.totalorder %s4570_s12, 3 }
   0x4   : > { %p141_p2 = pnand %p3156_p0, %p140_p1 }
   0x5   : > { %v4374_v0 = vld [vmem:[%s5490_s1 + $0x100] sm:$0xff] (!%p141_p2)   ;;  %v4376_v2 = vld [vmem:[%s5490_s1 + $0x108] sm:$0xff] (!%p141_p2)   ;;  %p168_p3 = scmp.lt.s32.totalorder (!%p141_p2), %s3152_s13, 1  ;;  %v4378_v4 = vld [vmem:[%s5490_s1 + $0x110] sm:$0xff] (!%p141_p2)   ;;  %vm375_vm0 = vcmask (!%p141_p2), 1040384   ;;  %v4572_v35 = vmov (!%p141_p2), 0  }
   0x6   : > { %144 = sbr.rel (%p141_p2) target bundleno = 509 (0x1fd), region = 28  ;;  %v4375_v1 = vld [vmem:[%s5490_s1 + $0x80] sm:$0xff] (!%p141_p2)   ;;  %3861 = vmatprep.subr.bf16.mxu1 (!%p141_p2), %v4374_v0  ;;  %v4377_v3 = vld [vmem:[%s5490_s1 + $0x88] sm:$0xff] (!%p141_p2)   ;;  %v4379_v5 = vld [vmem:[%s5490_s1 + $0x90] sm:$0xff] (!%p141_p2)   ;;  %vm376_vm1 = vsmask.f32 (!%p141_p2), 256 }
   0x7   : > { %4053 = vmatprep.subr.bf16.mxu0 (!%p141_p2), %v4375_v1  ;;  %3862 = vmatpush3.bf16.msra.mxu1 (!%p141_p2), %v4374_v0  ;;  %v4380_v6 = vld [vmem:[%s5490_s1 + $0x118] sm:$0xff] (!%p141_p2)   ;;  %v4382_v8 = vld [vmem:[%s5490_s1 + $0x120] sm:$0xff] (!%p141_p2)   ;;  %v4384_v10 = vld [vmem:[%s5490_s1 + $0x128] sm:$0xff] (!%p141_p2)   ;;  %vm554_vm3 = vcmask (!%p141_p2), 1043456   ;;  %vm555_vm4 = vsmask.f32 (!%p141_p2), 3328 }
   0x8   : > { %4054 = vmatpush3.bf16.msra.mxu0 (!%p141_p2), %v4375_v1  ;;  %3863 = vmatprep.subr.bf16.mxu1 (!%p141_p2), %v4376_v2  ;;  %v4381_v7 = vld [vmem:[%s5490_s1 + $0x98] sm:$0xff] (!%p141_p2)   ;;  %v4383_v9 = vld [vmem:[%s5490_s1 + $0xa0] sm:$0xff] (!%p141_p2)   ;;  %v4385_v14 = vld [vmem:[%s5490_s1 + $0xa8] sm:$0xff] (!%p141_p2)  }
   0x9   : > { %4055 = vmatprep.subr.bf16.mxu0 (!%p141_p2), %v4377_v3  ;;  %v4386_v23 = vld [vmem:[%s5490_s1 + $0x130] sm:$0xff] (!%p141_p2)   ;;  %vm4675_vm2 = vmand (!%p141_p2), %vm375_vm0, %vm376_vm1  ;;  %v4388_v42 = vld [vmem:[%s5490_s1 + $0x138] sm:$0xff] (!%p141_p2)  }
   0xa   : > { %v4387_v24 = vld [vmem:[%s5490_s1 + $0xb0] sm:$0xff] (!%p141_p2)   ;;  %v4389_v43 = vld [vmem:[%s5490_s1 + $0xb8] sm:$0xff] (!%p141_p2)   ;;  %v4393_v55 = vld [vmem:[%s5490_s1] sm:$0xff] (!%p141_p2)  }
   0xb   : > { %3864 = vmatpush3.bf16.msra.mxu1 (!%p141_p2), %v4376_v2  ;;  %v4394_v57 = vld [vmem:[%s5490_s1 + $0x180] sm:$0xff] (!%p141_p2)   ;;  %v4400_v61 = vld [vmem:[%s5490_s1 + $0x8] sm:$0xff] (!%p141_p2)   ;;  %v4437_v31 = vld [vmem:[%s5490_s1 + $0x238] sm:$0xff] (!%p141_p2)  }
   0xc   : > { %4056 = vmatpush3.bf16.msra.mxu0 (!%p141_p2), %v4377_v3  ;;  %3865 = vmatprep.subr.bf16.mxu1 (!%p141_p2), %v4378_v4  ;;  %v4401_v2 = vld [vmem:[%s5490_s1 + $0x188] sm:$0xff] (!%p141_p2)   ;;  %vm4987_vm5 = vmand (!%p141_p2), %vm554_vm3, %vm555_vm4 }
   0xd   : > { %s5498_s13 = smov (!%p168_p3, %s3152_s13), 1  ;;  %4057 = vmatprep.subr.bf16.mxu0 %v4379_v5 }
   0xe   : > { %s3636_s30 = sshll.u32 %s5498_s13, 7  ;;  %s3637_s5 = sshll.u32 %s5498_s13, 5 }
   0xf   : > { %3866 = vmatpush3.bf16.msra.mxu1 %v4378_v4  ;;  %s4637_s10 = scalar_lea.vmem %s5489_s0, %s3636_s30  ;;  %s5476_s8 = scalar_lea.vmem %s5491_s2, %s3637_s5 }
  0x10   : > { %4058 = vmatpush3.bf16.msra.mxu0 %v4379_v5  ;;  %3867 = vmatprep.subr.bf16.mxu1 %v4380_v6  ;;  %v4643_v11 = vld [vmem:[%s4637_s10] sm:$0xff]  ;;  %v4646_v12 = vld [vmem:[%s4637_s10 + $0x10] sm:$0xff]  ;;  %v4661_v18 = vld [vmem:[%s4637_s10 + $0x8] sm:$0xff]  ;;  %s3161_s9 = sshll.u32 %s5498_s13, 1 }
  0x11   : > { %4059 = vmatprep.subr.bf16.mxu0 %v4381_v7  ;;  %v4649_v13 = vld [vmem:[%s4637_s10 + $0x20] sm:$0xff]  ;;  %v3162_v15 = vcombine.high %v4643_v11, %v4643_v11  ;;  %v3164_v16 = vcombine.high %v4646_v12, %v4646_v12  ;;  %v1759_v27 = vrot.slane %v4661_v18, 4  ;;  %v4671_v28 = vld [vmem:[%s4637_s10 + $0x30] sm:$0xff]  ;;  %v4682_v33 = vld [vmem:[%s4637_s10 + $0x18] sm:$0xff]  ;;  %v3163_v45 = vcombine.high %v4661_v18, %v4661_v18  ;;  %s181_s15 = scalar_lea.vmem %s5492_s3, %s3161_s9 }
  0x12   : > { %v3166_v17 = vcombine.high %v4649_v13, %v4649_v13  ;;  %v3168_v32 = vcombine.high %v4671_v28, %v4671_v28  ;;  %v4688_v37 = vld [vmem:[%s4637_s10 + $0x28] sm:$0xff]  ;;  %v1761_v49 = vrot.slane %v4682_v33, 4  ;;  %v4733_v62 = vld [vmem:[%s4637_s10 + $0x40] sm:$0xff]  ;;  %v4736_v63 = vld [vmem:[%s4637_s10 + $0x50] sm:$0xff] }
  0x13   : > { %3868 = vmatpush3.bf16.msra.mxu1 %v4380_v6  ;;  %v248_v19 = vshrl.u32 %v3162_v15, 16  ;;  %v251_v20 = vshll.u32 %v3162_v15, 16  ;;  %v262_v21 = vshrl.u32 %v3164_v16, 16  ;;  %v265_v22 = vshll.u32 %v3164_v16, 16  ;;  %v4746_v5 = vld [vmem:[%s4637_s10 + $0x38] sm:$0xff]  ;;  %v4428_v18 = vld [vmem:[%s5490_s1 + $0x2a0] sm:$0xff]  }
  0x14   : > { %4060 = vmatpush3.bf16.msra.mxu0 %v4381_v7  ;;  %3869 = vmatprep.subr.bf16.mxu1 %v4382_v8  ;;  %v276_v25 = vshrl.u32 %v3166_v17, 16  ;;  %v279_v26 = vshll.u32 %v3166_v17, 16  ;;  %v3418_v36 = vcombine.low %v4572_v35, %v1759_v27  ;;  %v290_v40 = vshrl.u32 %v3168_v32, 16 }
  0x15   : > { %4061 = vmatprep.subr.bf16.mxu0 %v4383_v9  ;;  %v250_v29 = vrot.slane %v248_v19, 7  ;;  %v264_v30 = vrot.slane %v262_v21, 7  ;;  %v293_v41 = vshll.u32 %v3168_v32, 16  ;;  %v1763_v52 = vrot.slane %v4688_v37, 4  ;;  %v4762_v19 = vld [vmem:[%s4637_s10 + $0x60] sm:$0xff] }
  0x16   : > { %v278_v34 = vrot.slane %v276_v25, 7  ;;  %4069 = vmatprep.mubr.bf16.mxu0 %v3418_v36  ;;  %v292_v48 = vrot.slane %v290_v40, 7  ;;  %v255_v56 = vshrl.u32 %v3163_v45, 16  ;;  %v258_v1 = vshll.u32 %v3163_v45, 16  ;;  %v4778_v25 = vld [vmem:[%s4637_s10 + $0x68] sm:$0xff] }
  0x17   : > { %3870 = vmatpush3.bf16.msra.mxu1 %v4382_v8  ;;  %v253_v38 = vor.u32 %v251_v20, %v250_v29  ;;  %v267_v39 = vor.u32 %v265_v22, %v264_v30  ;;  %v3419_v60 = vcombine.low %v1761_v49, %v1763_v52  ;;  %v3170_v3 = vcombine.high %v4733_v62, %v4733_v62  ;;  %v4770_v22 = vld [vmem:[%s4637_s10 + $0x70] sm:$0xff] }
  0x18   : > { %4062 = vmatpush3.bf16.msra.mxu0 %v4383_v9  ;;  %3871 = vmatprep.subr.bf16.mxu1 %v4384_v10  ;;  %v281_v44 = vor.u32 %v279_v26, %v278_v34  ;;  %v295_v54 = vor.u32 %v293_v41, %v292_v48  ;;  %v257_v0 = vrot.slane %v255_v56, 7  ;;  %v3172_v4 = vcombine.high %v4736_v63, %v4736_v63  ;;  %v4755_v9 = vld [vmem:[%s4637_s10 + $0x48] sm:$0xff]  ;;  %v4403_v29 = vld [vmem:[%s5490_s1 + $0x190] sm:$0xff]  }
  0x19   : > { %4063 = vmatprep.subr.bf16.mxu0 %v4385_v14  ;;  %v378_v46 = vsel %vm4675_vm2, 0, %v253_v38  ;;  %v4702_v47 = vsel %vm4675_vm2, 0, %v267_v39  ;;  %v1758_v6 = vrot.slane %v4643_v11, 4  ;;  %v1760_v7 = vrot.slane %v4646_v12, 4  ;;  %v4402_v11 = vld [vmem:[%s5490_s1 + $0x10] sm:$0xff]   ;;  %v4449_v12 = vld [vmem:[%s5490_s1 + $0x328] sm:$0xff]  }
  0x1a   : > { %v4707_v50 = vsel %vm4675_vm2, 0, %v281_v44  ;;  %v3210_v51 = vcombine.low %v378_v46, %v4702_v47  ;;  %v4721_v58 = vsel %vm4675_vm2, 0, %v295_v54  ;;  %v4752_v8 = vcombine.high %v4682_v33, %v4682_v33  ;;  %v4404_v46 = vld [vmem:[%s5490_s1 + $0x18] sm:$0xff]  }
  0x1b   : > { %3872 = vmatpush3.bf16.msra.mxu1 %v4384_v10  ;;  %v3278_v53 = vcombine.low %v4702_v47, %v4707_v50  ;;  %v3211_v59 = vcombine.low %v4707_v50, %v4721_v58  ;;  %v1765_v10 = vrot.slane %v4746_v5, 4  ;;  %v307_v15 = vshll.u32 %v3170_v3, 16  ;;  %v4405_v54 = vld [vmem:[%s5490_s1 + $0x198] sm:$0xff]   ;;  %v4451_v47 = vld [vmem:[%s5490_s1 + $0x330] sm:$0xff]  }
  0x1c   : > { %4064 = vmatpush3.bf16.msra.mxu0 %v4385_v14  ;;  %3873 = vmatprep.subr.bf16.mxu1 %v4386_v23  ;;  %v304_v14 = vshrl.u32 %v3170_v3, 16  ;;  %v318_v16 = vshrl.u32 %v3172_v4, 16  ;;  %v321_v17 = vshll.u32 %v3172_v4, 16  ;;  %v4766_v20 = vcombine.high %v4688_v37, %v4688_v37 }
  0x1d   : > { %4065 = vmatprep.subr.bf16.mxu0 %v4387_v24  ;;  %3877 = vmatprep.mubr.bf16.mxu1 %v3210_v51  ;;  %v1767_v21 = vrot.slane %v4755_v9, 4  ;;  %v260_v26 = vor.u32 %v258_v1, %v257_v0  ;;  %v3176_v34 = vcombine.high %v4770_v22, %v4770_v22  ;;  %v1771_v41 = vrot.slane %v4778_v25, 4 }
  0x1e   : > { %v306_v30 = vrot.slane %v304_v14, 7  ;;  %v320_v32 = vrot.slane %v318_v16, 7  ;;  %v3446_v0 = vcombine.low %v1758_v6, %v1760_v7  ;;  %v269_v3 = vshrl.u32 %v4752_v8, 16  ;;  %v4406_v14 = vld [vmem:[%s5490_s1 + $0x20] sm:$0xff]  }
  0x1f   : > { %3874 = vmatpush3.bf16.msra.mxu1 %v4386_v23  ;;  %v3174_v23 = vcombine.high %v4762_v19, %v4762_v19  ;;  %v3420_v38 = vcombine.low %v1765_v10, %v1767_v21  ;;  %v346_v44 = vshrl.u32 %v3176_v34, 16  ;;  %v349_v45 = vshll.u32 %v3176_v34, 16 }
  0x20   : > { %4066 = vmatpush3.bf16.msra.mxu0 %v4387_v24  ;;  %3875 = vmatprep.subr.bf16.mxu1 %v4388_v42  ;;  %v4775_v24 = vld [vmem:[%s4637_s10 + $0x58] sm:$0xff]  ;;  %v283_v4 = vshrl.u32 %v4766_v20, 16  ;;  %v3169_v16 = vcombine.high %v4746_v5, %v4746_v5  ;;  %v271_v34 = vrot.slane %v269_v3, 7  ;;  %v3183_v33 = vcombine.low %v4688_v37, %v4688_v37 }
  0x21   : > { %4067 = vmatprep.subr.bf16.mxu0 %v4389_v43  ;;  %v1769_v36 = vrot.slane %v4775_v24, 4  ;;  %v332_v39 = vshrl.u32 %v3174_v23, 16  ;;  %v335_v40 = vshll.u32 %v3174_v23, 16  ;;  %v4408_v23 = vld [vmem:[%s5490_s1 + $0x28] sm:$0xff]   ;;  %v3191_v50 = vcombine.low %v4778_v25, %v4778_v25 }
  0x23   : > { %3876 = vmatpush3.bf16.msra.mxu1 %v4388_v42  ;;  %v309_v42 = vor.u32 %v307_v15, %v306_v30  ;;  %v334_v48 = vrot.slane %v332_v39, 7  ;;  %v3421_v51 = vcombine.low %v1769_v36, %v1771_v41  ;;  %v272_v30 = vshll.u32 %v4752_v8, 16 }
  0x24   : > { %4068 = vmatpush3.bf16.msra.mxu0 %v4389_v43  ;;  %3885 = vmatprep.subr.bf16.mxu1 %v4393_v55  ;;  %v323_v43 = vor.u32 %v321_v17, %v320_v32  ;;  %v4409_v32 = vld [vmem:[%s5490_s1 + $0x1a8] sm:$0xff]   ;;  %v3171_v39 = vcombine.high %v4755_v9, %v4755_v9  ;;  %v3173_v8 = vcombine.high %v4775_v24, %v4775_v24  ;;  %v4445_v9 = vld [vmem:[%s5490_s1 + $0x318] sm:$0xff]  }
  0x25   : > { %4077 = vmatprep.subr.bf16.mxu0 %v4394_v57  ;;  %v3476_v37 = vcombine.low %v1767_v21, %v1769_v36  ;;  %v4446_v21 = vld [vmem:[%s5490_s1 + $0x398] sm:$0xff]  }
  0x26   : > { %3878 = vmatmul.mubr.bf16.vlgmr.msra.gmra.mrb[0].mxu1 %v3211_v59  ;;  %v4807_v56 = vsel %vm4675_vm2, 0, %v323_v43  ;;  %v4412_v43 = vld [vmem:[%s5490_s1 + $0x30] sm:$0xff]  }
  0x27   : > { %3886 = vmatpush3.bf16.msra.mxu1 %v4393_v55  ;;  %4070 = vmatmul.mubr.bf16.vlgmr.msra.gmra.mrb[0].mxu0 %v3419_v60  ;;  %v4803_v55 = vsel %vm4675_vm2, 0, %v309_v42  ;;  %v297_v42 = vshrl.u32 %v3169_v16, 16 }
  0x28   : > { %4078 = vmatpush3.bf16.msra.mxu0 %v4394_v57  ;;  %3887 = vmatprep.subr.bf16.mxu1 %v4400_v61  ;;  %v348_v57 = vrot.slane %v346_v44, 7  ;;  %v3212_v59 = vcombine.low %v4803_v55, %v4807_v56  ;;  %v3279_v60 = vcombine.low %v4721_v58, %v4803_v55  ;;  %v4413_v44 = vld [vmem:[%s5490_s1 + $0x1b0] sm:$0xff]  }
  0x29   : > { %4079 = vmatprep.subr.bf16.mxu0 %v4401_v2  ;;  %4073 = vmatprep.mubr.bf16.mxu0 %v3420_v38  ;;  %v285_v38 = vrot.slane %v283_v4, 7  ;;  %v4417_v4 = vld [vmem:[%s5490_s1 + $0x1b8] sm:$0xff]  }
  0x2a   : > { %v351_v1 = vor.u32 %v349_v45, %v348_v57  ;;  %3881 = vmatprep.mubr.bf16.mxu1 %v3212_v59  ;;  %v311_v45 = vshrl.u32 %v3171_v39, 16  ;;  %v314_v59 = vshll.u32 %v3171_v39, 16  ;;  %v4420_v39 = vld [vmem:[%s5490_s1 + $0x280] sm:$0xff]  }
  0x2b   : > { %3888 = vmatpush3.bf16.msra.mxu1 %v4400_v61  ;;  %v337_v61 = vor.u32 %v335_v40, %v334_v48  ;;  %v286_v40 = vshll.u32 %v4766_v20, 16  ;;  %v3175_v20 = vcombine.high %v4778_v25, %v4778_v25  ;;  %v4455_v25 = vld [vmem:[%s5490_s1 + $0x3b8] sm:$0xff]  }
  0x2c   : > { %4080 = vmatpush3.bf16.msra.mxu0 %v4401_v2  ;;  %3889 = vmatprep.subr.bf16.mxu1 %v4402_v11  ;;  %v4817_v2 = vsel %vm4675_vm2, 0, %v260_v26  ;;  %v4833_v15 = vsel %vm4675_vm2, 0, %v351_v1  ;;  %v313_v57 = vrot.slane %v311_v45, 7  ;;  %v1762_v1 = vrot.slane %v4649_v13, 4  ;;  %v4450_v13 = vld [vmem:[%s5490_s1 + $0x3a8] sm:$0xff]  }
  0x2d   : > { %4081 = vmatprep.subr.bf16.mxu0 %v4403_v29  ;;  %v4826_v6 = vsel %vm4675_vm2, 0, %v337_v61  ;;  %v288_v48 = vor.u32 %v286_v40, %v285_v38  ;;  %v325_v61 = vshrl.u32 %v3173_v8, 16  ;;  %v339_v3 = vshrl.u32 %v3175_v20, 16 }
  0x2e   : > { %v3280_v17 = vcombine.low %v4807_v56, %v4826_v6  ;;  %v3213_v26 = vcombine.low %v4826_v6, %v4833_v15  ;;  %v342_v38 = vshll.u32 %v3175_v20, 16  ;;  %v1766_v40 = vrot.slane %v4733_v62, 4  ;;  %v4462_v56 = vld [vmem:[%s5490_s1 + $0x58] sm:$0xff]  }
  0x2f   : > { %3890 = vmatpush3.bf16.msra.mxu1 %v4402_v11  ;;  %4074 = vmatmul.mubr.bf16.gmra.mrb[4].mxu0 %v3421_v51  ;;  %v4407_v11 = vld [vmem:[%s5490_s1 + $0x1a0] sm:$0xff]   ;;  %v299_v51 = vrot.slane %v297_v42, 7  ;;  %v1768_v42 = vrot.slane %v4736_v63, 4  ;;  %v3502_v36 = vcombine.low %v1760_v7, %v1762_v1  ;;  %v5067_v7 = vld [vmem:[%s4637_s10 + $0x8] sm:$0xff]  ;;  %v4461_v63 = vld [vmem:[%s5490_s1 + $0xd0] sm:$0xff]   ;;  %v3281_v55 = vcombine.low %v4833_v15, %v4572_v35 }
  0x30   : > { %4082 = vmatpush3.bf16.msra.mxu0 %v4403_v29  ;;  %3891 = vmatprep.subr.bf16.mxu1 %v4404_v46  ;;  %v3222_v29 = vcombine.low %v4572_v35, %v4817_v2  ;;  %v4463_v6 = vld [vmem:[%s5490_s1 + $0xd8] sm:$0xff]  }
  0x31   : > { %4083 = vmatprep.subr.bf16.mxu0 %v4405_v54  ;;  %4093 = vmatprep.mubr.bf16.mxu0 %v3446_v0  ;;  %v4416_v0 = vld [vmem:[%s5490_s1 + $0x38] sm:$0xff]  }
  0x32   : > { %3882 = vmatmul.mubr.bf16.gmra.mrb[4].mxu1 %v3213_v26 }
  0x33   : > { %3892 = vmatpush3.bf16.msra.mxu1 %v4404_v46  ;;  %3901 = vmatprep.mubr.bf16.mxu1 %v3222_v29  ;;  %v274_v46 = vor.u32 %v272_v30, %v271_v34  ;;  %v316_v29 = vor.u32 %v314_v59, %v313_v57  ;;  %v327_v30 = vrot.slane %v325_v61, 7  ;;  %v341_v34 = vrot.slane %v339_v3, 7 }
  0x34   : > { %4084 = vmatpush3.bf16.msra.mxu0 %v4405_v54  ;;  %3893 = vmatprep.subr.bf16.mxu1 %v4406_v14  ;;  %v300_v54 = vshll.u32 %v3169_v16, 16  ;;  %v1764_v16 = vrot.slane %v4671_v28, 4  ;;  %v3448_v57 = vcombine.low %v1766_v40, %v1768_v42  ;;  %v1770_v59 = vrot.slane %v4762_v19, 4 }
  0x35   : > { %4085 = vmatprep.subr.bf16.mxu0 %v4407_v11  ;;  %v1772_v61 = vrot.slane %v4770_v22, 4  ;;  %v3306_v22 = vcombine.low %v4572_v35, %v5067_v7 }
  0x36   : > { %v302_v26 = vor.u32 %v300_v54, %v299_v51  ;;  %v4422_v51 = vld [vmem:[%s5490_s1 + $0x288] sm:$0xff]   ;;  %v3504_v28 = vcombine.low %v1768_v42, %v1770_v59 }
  0x37   : > { %3894 = vmatpush3.bf16.msra.mxu1 %v4406_v14  ;;  %v4872_v14 = vsel %vm4675_vm2, 0, %v274_v46  ;;  %v344_v46 = vor.u32 %v342_v38, %v341_v34  ;;  %v4426_v34 = vld [vmem:[%s5490_s1 + $0x298] sm:$0xff]  }
  0x38   : > { %4086 = vmatpush3.bf16.msra.mxu0 %v4407_v11  ;;  %3895 = vmatprep.subr.bf16.mxu1 %v4408_v23  ;;  %v4876_v11 = vsel %vm4675_vm2, 0, %v288_v48  ;;  %v4421_v48 = vld [vmem:[%s5490_s1 + $0x208] sm:$0xff]   ;;  %v3250_v38 = vcombine.low %v4817_v2, %v4872_v14 }
  0x39   : > { %4087 = vmatprep.subr.bf16.mxu0 %v4409_v32  ;;  %v3223_v45 = vcombine.low %v4872_v14, %v4876_v11  ;;  %v4921_v3 = vsel %vm4675_vm2, 0, %v344_v46 }
  0x3b   : > { %3896 = vmatpush3.bf16.msra.mxu1 %v4408_v23  ;;  %v4419_v23 = vld [vmem:[%s5490_s1 + $0x200] sm:$0xff]  }
  0x3c   : > { %4088 = vmatpush3.bf16.msra.mxu0 %v4409_v32  ;;  %3897 = vmatprep.subr.bf16.mxu1 %v4412_v43  ;;  %v328_v32 = vshll.u32 %v3173_v8, 16  ;;  %v4891_v8 = vsel %vm4675_vm2, 0, %v302_v26 }
  0x3d   : > { %4089 = vmatprep.subr.bf16.mxu0 %v4413_v44 }
  0x3e   : > { %v330_v20 = vor.u32 %v328_v32, %v327_v30  ;;  %v4425_v30 = vld [vmem:[%s5490_s1 + $0x218] sm:$0xff]  }
  0x3f   : > { %3898 = vmatpush3.bf16.msra.mxu1 %v4412_v43  ;;  %v4895_v43 = vsel %vm4675_vm2, 0, %v316_v29  ;;  %v3449_v29 = vcombine.low %v1770_v59, %v1772_v61  ;;  %v4939_v32 = vld [vmem:[%s4637_s10 + $0x78] sm:$0xff] }
  0x40   : > { %4090 = vmatpush3.bf16.msra.mxu0 %v4413_v44  ;;  %3899 = vmatprep.subr.bf16.mxu1 %v4416_v0  ;;  %v3447_v44 = vcombine.low %v1762_v1, %v1764_v16  ;;  %v3224_v54 = vcombine.low %v4891_v8, %v4895_v43  ;;  %v3179_v1 = vcombine.low %v5067_v7, %v5067_v7 }
  0x41   : > { %4091 = vmatprep.subr.bf16.mxu0 %v4417_v4 }
  0x43   : > { %3900 = vmatpush3.bf16.msra.mxu1 %v4416_v0  ;;  %v4917_v0 = vsel %vm4675_vm2, 0, %v330_v20  ;;  %v4427_v20 = vld [vmem:[%s5490_s1 + $0x220] sm:$0xff]  }
  0x44   : > { %4092 = vmatpush3.bf16.msra.mxu0 %v4417_v4  ;;  %3909 = vmatprep.subr.bf16.mxu1 %v4419_v23  ;;  %v4423_v4 = vld [vmem:[%s5490_s1 + $0x210] sm:$0xff]   ;;  %v3225_v26 = vcombine.low %v4917_v0, %v4921_v3 }
  0x45   : > { %4101 = vmatprep.subr.bf16.mxu0 %v4420_v39 }
  0x46   : > { %3902 = vmatmul.mubr.bf16.vlgmr.msra.gmra.mrb[0].mxu1 %v3223_v45  ;;  %v1773_v45 = vrot.slane %v4939_v32, 4 }
  0x47   : > { %3910 = vmatpush3.bf16.msra.mxu1 %v4419_v23  ;;  %4094 = vmatmul.mubr.bf16.vlgmr.msra.gmra.mrb[0].mxu0 %v3447_v44  ;;  %v4424_v23 = vld [vmem:[%s5490_s1 + $0x290] sm:$0xff]   ;;  %v3474_v44 = vcombine.low %v1759_v27, %v1761_v49  ;;  %v3185_v49 = vcombine.low %v4746_v5, %v4746_v5  ;;  %v3252_v5 = vcombine.low %v4895_v43, %v4917_v0  ;;  %v4447_v43 = vld [vmem:[%s5490_s1 + $0x320] sm:$0xff]  }
  0x48   : > { %4102 = vmatpush3.bf16.msra.mxu0 %v4420_v39  ;;  %3911 = vmatprep.subr.bf16.mxu1 %v4421_v48  ;;  %v3177_v39 = vcombine.high %v4939_v32, %v4939_v32  ;;  %v4958_v2 = vcombine.low %v1771_v41, %v1773_v45  ;;  %v4429_v41 = vld [vmem:[%s5490_s1 + $0x228] sm:$0xff]   ;;  %v4448_v0 = vld [vmem:[%s5490_s1 + $0x3a0] sm:$0xff]  }
  0x49   : > { %4103 = vmatprep.subr.bf16.mxu0 %v4422_v51  ;;  %3905 = vmatprep.mubr.bf16.mxu1 %v3224_v54 }
  0x4a   : > { %4097 = vmatprep.mubr.bf16.mxu0 %v3448_v57  ;;  %v353_v46 = vshrl.u32 %v3177_v39, 16  ;;  %v464_v57 = vshll.u32 %v3183_v33, 16 }
  0x4b   : > { %3912 = vmatpush3.bf16.msra.mxu1 %v4421_v48  ;;  %v356_v48 = vshll.u32 %v3177_v39, 16  ;;  %v4438_v39 = vld [vmem:[%s5490_s1 + $0x2b8] sm:$0xff]  }
  0x4c   : > { %4104 = vmatpush3.bf16.msra.mxu0 %v4422_v51  ;;  %3913 = vmatprep.subr.bf16.mxu1 %v4423_v4  ;;  %v355_v27 = vrot.slane %v353_v46, 7  ;;  %v4430_v51 = vld [vmem:[%s5490_s1 + $0x2a8] sm:$0xff]   ;;  %v4439_v46 = vld [vmem:[%s5490_s1 + $0x300] sm:$0xff]  }
  0x4d   : > { %4105 = vmatprep.subr.bf16.mxu0 %v4424_v23 }
  0x4e   : > { %3906 = vmatmul.mubr.bf16.gmra.mrb[4].mxu1 %v3225_v26  ;;  %v358_v14 = vor.u32 %v356_v48, %v355_v27  ;;  %v4434_v26 = vld [vmem:[%s5490_s1 + $0x2b0] sm:$0xff]   ;;  %v4440_v48 = vld [vmem:[%s5490_s1 + $0x380] sm:$0xff]  }
  0x4f   : > { %3914 = vmatpush3.bf16.msra.mxu1 %v4423_v4  ;;  %4098 = vmatmul.mubr.bf16.gmra.mrb[4].mxu0 %v3449_v29  ;;  %v478_v4 = vshll.u32 %v3185_v49, 16  ;;  %v462_v29 = vshrl.u32 %v3183_v33, 16 }
  0x50   : > { %4106 = vmatpush3.bf16.msra.mxu0 %v4424_v23  ;;  %3915 = vmatprep.subr.bf16.mxu1 %v4425_v30  ;;  %v393_v54 = vsel %vm4675_vm2, 0, %v358_v14  ;;  %v4433_v23 = vld [vmem:[%s5490_s1 + $0x230] sm:$0xff]  }
  0x51   : > { %4107 = vmatprep.subr.bf16.mxu0 %v4426_v34  ;;  %3925 = vmatprep.mubr.bf16.mxu1 %v3250_v38  ;;  %v480_v38 = vrot.slane %v478_v4, 1  ;;  %v3253_v24 = vcombine.low %v4921_v3, %v393_v54  ;;  %v4454_v3 = vld [vmem:[%s5490_s1 + $0x338] sm:$0xff]   ;;  %v436_v54 = vshll.u32 %v3179_v1, 16 }
  0x52   : > { %4117 = vmatprep.mubr.bf16.mxu0 %v3474_v44 }
  0x53   : > { %3916 = vmatpush3.bf16.msra.mxu1 %v4425_v30  ;;  %v476_v30 = vshrl.u32 %v3185_v49, 16  ;;  %v3475_v49 = vcombine.low %v1763_v52, %v1765_v10  ;;  %v4443_v52 = vld [vmem:[%s5490_s1 + $0x310] sm:$0xff]  }
  0x54   : > { %4108 = vmatpush3.bf16.msra.mxu0 %v4426_v34  ;;  %3917 = vmatprep.subr.bf16.mxu1 %v4427_v20  ;;  %v466_v34 = vrot.slane %v464_v57, 1  ;;  %v4444_v10 = vld [vmem:[%s5490_s1 + $0x390] sm:$0xff]   ;;  %v518_v57 = vshrl.u32 %v3191_v50, 16 }
  0x55   : > { %4109 = vmatprep.subr.bf16.mxu0 %v4428_v18  ;;  %v481_v44 = vor.u32 %v480_v38, %v476_v30  ;;  %v434_v30 = vshrl.u32 %v3179_v1, 16  ;;  %v4458_v38 = vld [vmem:[%s5490_s1 + $0x48] sm:$0xff]  }
  0x56   : > { %v467_v45 = vor.u32 %v466_v34, %v462_v29  ;;  %v438_v34 = vrot.slane %v436_v54, 1 }
  0x57   : > { %3918 = vmatpush3.bf16.msra.mxu1 %v4427_v20  ;;  %v5005_v33 = vsel %vm4987_vm5, %v481_v44, 0  ;;  %v4508_v20 = vld [vmem:[%s5490_s1 + $0x258] sm:$0xff]  }
  0x58   : > { %4110 = vmatpush3.bf16.msra.mxu0 %v4428_v18  ;;  %3919 = vmatprep.subr.bf16.mxu1 %v4429_v41  ;;  %v3251_v18 = vcombine.low %v4876_v11, %v4891_v8  ;;  %v5001_v27 = vsel %vm4987_vm5, %v467_v45, 0  ;;  %v4441_v11 = vld [vmem:[%s5490_s1 + $0x308] sm:$0xff]  }
  0x59   : > { %4111 = vmatprep.subr.bf16.mxu0 %v4430_v51  ;;  %v3587_v14 = vcombine.low %v5001_v27, %v5005_v33  ;;  %v4442_v8 = vld [vmem:[%s5490_s1 + $0x388] sm:$0xff]  }
  0x5a   : > { %v4459_v45 = vld [vmem:[%s5490_s1 + $0xc8] sm:$0xff]  }
  0x5b   : > { %3920 = vmatpush3.bf16.msra.mxu1 %v4429_v41  ;;  %v3193_v41 = vcombine.low %v4939_v32, %v4939_v32  ;;  %v3503_v32 = vcombine.low %v1764_v16, %v1766_v40  ;;  %v4460_v16 = vld [vmem:[%s5490_s1 + $0x50] sm:$0xff]   ;;  %v439_v40 = vor.u32 %v438_v34, %v434_v30 }
  0x5c   : > { %4112 = vmatpush3.bf16.msra.mxu0 %v4430_v51  ;;  %3921 = vmatprep.subr.bf16.mxu1 %v4433_v23  ;;  %v4456_v51 = vld [vmem:[%s5490_s1 + $0x40] sm:$0xff]  }
  0x5d   : > { %4113 = vmatprep.subr.bf16.mxu0 %v4434_v26  ;;  %v534_v29 = vshll.u32 %v3193_v41, 16  ;;  %v5127_v42 = vsel %vm4987_vm5, %v439_v40, 0 }
  0x5e   : > { %v3530_v15 = vcombine.low %v4572_v35, %v5127_v42 }
  0x5f   : > { %3922 = vmatpush3.bf16.msra.mxu1 %v4433_v23  ;;  %v4457_v23 = vld [vmem:[%s5490_s1 + $0xc0] sm:$0xff]  }
  0x60   : > { %4114 = vmatpush3.bf16.msra.mxu0 %v4434_v26  ;;  %3923 = vmatprep.subr.bf16.mxu1 %v4437_v31  ;;  %v532_v26 = vshrl.u32 %v3193_v41, 16 }
  0x61   : > { %4115 = vmatprep.subr.bf16.mxu0 %v4438_v39 }
  0x63   : > { %3924 = vmatpush3.bf16.msra.mxu1 %v4437_v31 }
  0x64   : > { %4116 = vmatpush3.bf16.msra.mxu0 %v4438_v39  ;;  %3933 = vmatprep.subr.bf16.mxu1 %v4439_v46  ;;  %v536_v39 = vrot.slane %v534_v29, 1 }
  0x65   : > { %4125 = vmatprep.subr.bf16.mxu0 %v4440_v48 }
  0x66   : > { %3926 = vmatmul.mubr.bf16.vlgmr.msra.gmra.mrb[0].mxu1 %v3251_v18  ;;  %v537_v62 = vor.u32 %v536_v39, %v532_v26  ;;  %v5199_v26 = vld [vmem:[%s4637_s10 + $0x28] sm:$0xff] }
  0x67   : > { %3934 = vmatpush3.bf16.msra.mxu1 %v4439_v46  ;;  %4118 = vmatmul.mubr.bf16.vlgmr.msra.gmra.mrb[0].mxu0 %v3475_v49  ;;  %v4465_v46 = vld [vmem:[%s5490_s1 + $0xe0] sm:$0xff]   ;;  %v4466_v49 = vld [vmem:[%s5490_s1 + $0x68] sm:$0xff]  }
  0x68   : > { %4126 = vmatpush3.bf16.msra.mxu0 %v4440_v48  ;;  %3935 = vmatprep.subr.bf16.mxu1 %v4441_v11  ;;  %v572_v58 = vsel %vm4987_vm5, %v537_v62, 0  ;;  %v5151_v48 = vld [vmem:[%s4637_s10 + $0x48] sm:$0xff] }
  0x69   : > { %4127 = vmatprep.subr.bf16.mxu0 %v4442_v8  ;;  %3929 = vmatprep.mubr.bf16.mxu1 %v3252_v5  ;;  %v3187_v18 = vcombine.low %v5151_v48, %v5151_v48  ;;  %v4477_v62 = vld [vmem:[%s5490_s1 + $0x1c8] sm:$0xff]  }
  0x6a   : > { %4121 = vmatprep.mubr.bf16.mxu0 %v3476_v37  ;;  %v4468_v37 = vld [vmem:[%s5490_s1 + $0x70] sm:$0xff]  }
  0x6b   : > { %3936 = vmatpush3.bf16.msra.mxu1 %v4441_v11  ;;  %v492_v5 = vshll.u32 %v3187_v18, 16 }
  0x6c   : > { %4128 = vmatpush3.bf16.msra.mxu0 %v4442_v8  ;;  %3937 = vmatprep.subr.bf16.mxu1 %v4443_v52  ;;  %v4467_v8 = vld [vmem:[%s5490_s1 + $0xe8] sm:$0xff]  }
  0x6d   : > { %4129 = vmatprep.subr.bf16.mxu0 %v4444_v10 }
  0x6e   : > { %3930 = vmatmul.mubr.bf16.gmra.mrb[4].mxu1 %v3253_v24  ;;  %v5165_v24 = vld [vmem:[%s4637_s10 + $0x58] sm:$0xff] }
  0x6f   : > { %3938 = vmatpush3.bf16.msra.mxu1 %v4443_v52  ;;  %4122 = vmatmul.mubr.bf16.gmra.mrb[4].mxu0 %v4958_v2  ;;  %v520_v2 = vshll.u32 %v3191_v50, 16  ;;  %v4470_v50 = vld [vmem:[%s5490_s1 + $0x78] sm:$0xff]  }
  0x70   : > { %4130 = vmatpush3.bf16.msra.mxu0 %v4444_v10  ;;  %3939 = vmatprep.subr.bf16.mxu1 %v4445_v9 }
  0x71   : > { %4131 = vmatprep.subr.bf16.mxu0 %v4446_v21  ;;  %3949 = vmatprep.mubr.bf16.mxu1 %v3278_v53  ;;  %v4452_v53 = vld [vmem:[%s5490_s1 + $0x3b0] sm:$0xff]   ;;  %v522_v4 = vrot.slane %v520_v2, 1 }
  0x72   : > { %4141 = vmatprep.mubr.bf16.mxu0 %v3502_v36  ;;  %v490_v36 = vshrl.u32 %v3187_v18, 16  ;;  %v4480_v18 = vld [vmem:[%s5490_s1 + $0x158] sm:$0xff]  }
  0x73   : > { %3940 = vmatpush3.bf16.msra.mxu1 %v4445_v9  ;;  %v523_v31 = vor.u32 %v522_v4, %v518_v57  ;;  %v3189_v9 = vcombine.low %v5165_v24, %v5165_v24 }
  0x74   : > { %4132 = vmatpush3.bf16.msra.mxu0 %v4446_v21  ;;  %3941 = vmatprep.subr.bf16.mxu1 %v4447_v43  ;;  %v4469_v21 = vld [vmem:[%s5490_s1 + $0xf0] sm:$0xff]  }
  0x75   : > { %4133 = vmatprep.subr.bf16.mxu0 %v4448_v0  ;;  %v5107_v44 = vsel %vm4987_vm5, %v523_v31, 0  ;;  %v506_v1 = vshll.u32 %v3189_v9, 16  ;;  %v504_v57 = vshrl.u32 %v3189_v9, 16  ;;  %v4483_v9 = vld [vmem:[%s5490_s1 + $0x1e0] sm:$0xff]  }
  0x76   : > { %v5118_v19 = vcombine.low %v5107_v44, %v572_v58 }
  0x77   : > { %3942 = vmatpush3.bf16.msra.mxu1 %v4447_v43  ;;  %v494_v43 = vrot.slane %v492_v5, 1  ;;  %v508_v4 = vrot.slane %v506_v1, 1 }
  0x78   : > { %4134 = vmatpush3.bf16.msra.mxu0 %v4448_v0  ;;  %3943 = vmatprep.subr.bf16.mxu1 %v4449_v12  ;;  %v5173_v0 = vld [vmem:[%s4637_s10] sm:$0xff] }
  0x79   : > { %4135 = vmatprep.subr.bf16.mxu0 %v4450_v13  ;;  %v495_v2 = vor.u32 %v494_v43, %v490_v36  ;;  %v5271_v43 = vld [vmem:[%s4637_s10 + $0x40] sm:$0xff] }
  0x7b   : > { %3944 = vmatpush3.bf16.msra.mxu1 %v4449_v12  ;;  %v3178_v12 = vcombine.low %v5173_v0, %v5173_v0 }
  0x7c   : > { %4136 = vmatpush3.bf16.msra.mxu0 %v4450_v13  ;;  %3945 = vmatprep.subr.bf16.mxu1 %v4451_v47  ;;  %v5178_v13 = vld [vmem:[%s4637_s10 + $0x10] sm:$0xff] }
  0x7d   : > { %4137 = vmatprep.subr.bf16.mxu0 %v4452_v53 }
  0x7f   : > { %3946 = vmatpush3.bf16.msra.mxu1 %v4451_v47  ;;  %v3180_v47 = vcombine.low %v5178_v13, %v5178_v13 }
  0x80   : > { %4138 = vmatpush3.bf16.msra.mxu0 %v4452_v53  ;;  %3947 = vmatprep.subr.bf16.mxu1 %v4454_v3 }
  0x81   : > { %4139 = vmatprep.subr.bf16.mxu0 %v4455_v25  ;;  %v443_v41 = vshll.u32 %v3180_v47, 16  ;;  %v441_v30 = vshrl.u32 %v3180_v47, 16 }
  0x83   : > { %3948 = vmatpush3.bf16.msra.mxu1 %v4454_v3  ;;  %v4471_v3 = vld [vmem:[%s5490_s1 + $0xf8] sm:$0xff]   ;;  %v445_v39 = vrot.slane %v443_v41, 1 }
  0x84   : > { %4140 = vmatpush3.bf16.msra.mxu0 %v4455_v25  ;;  %3957 = vmatprep.subr.bf16.mxu1 %v4456_v51  ;;  %v429_v25 = vshll.u32 %v3178_v12, 16 }
  0x85   : > { %4149 = vmatprep.subr.bf16.mxu0 %v4457_v23 }
  0x86   : > { %3950 = vmatmul.mubr.bf16.vlgmr.msra.gmra.mrb[0].mxu1 %v3279_v60  ;;  %v3505_v60 = vcombine.low %v1772_v61, %v4572_v35  ;;  %v4464_v61 = vld [vmem:[%s5490_s1 + $0x60] sm:$0xff]   ;;  %v431_v31 = vrot.slane %v429_v25, 1 }
  0x87   : > { %3958 = vmatpush3.bf16.msra.mxu1 %v4456_v51  ;;  %4142 = vmatmul.mubr.bf16.vlgmr.msra.gmra.mrb[0].mxu0 %v3503_v32  ;;  %v4472_v51 = vld [vmem:[%s5490_s1 + $0x140] sm:$0xff]   ;;  %v427_v32 = vshrl.u32 %v3178_v12, 16  ;;  %v5276_v12 = vld [vmem:[%s4637_s10 + $0x50] sm:$0xff] }
  0x88   : > { %4150 = vmatpush3.bf16.msra.mxu0 %v4457_v23  ;;  %3959 = vmatprep.subr.bf16.mxu1 %v4458_v38  ;;  %v4474_v23 = vld [vmem:[%s5490_s1 + $0x1c0] sm:$0xff]   ;;  %v3188_v47 = vcombine.low %v5276_v12, %v5276_v12 }
  0x89   : > { %4151 = vmatprep.subr.bf16.mxu0 %v4459_v45  ;;  %3953 = vmatprep.mubr.bf16.mxu1 %v3280_v17  ;;  %v5140_v17 = vld [vmem:[%s4637_s10 + $0x18] sm:$0xff] }
  0x8a   : > { %4145 = vmatprep.mubr.bf16.mxu0 %v3504_v28  ;;  %v3181_v59 = vcombine.low %v5140_v17, %v5140_v17  ;;  %v3307_v29 = vcombine.low %v5140_v17, %v5199_v26  ;;  %v509_v28 = vor.u32 %v508_v4, %v504_v57  ;;  %v4487_v57 = vld [vmem:[%s5490_s1 + $0x170] sm:$0xff]   ;;  %v5290_v4 = vld [vmem:[%s4637_s10 + $0x60] sm:$0xff] }
  0x8b   : > { %3960 = vmatpush3.bf16.msra.mxu1 %v4458_v38  ;;  %v5207_v38 = vsel %vm4987_vm5, %v495_v2, 0 }
  0x8c   : > { %4152 = vmatpush3.bf16.msra.mxu0 %v4459_v45  ;;  %3961 = vmatprep.subr.bf16.mxu1 %v4460_v16  ;;  %v450_v11 = vshll.u32 %v3181_v59, 16  ;;  %v448_v52 = vshrl.u32 %v3181_v59, 16  ;;  %v4476_v45 = vld [vmem:[%s5490_s1 + $0x148] sm:$0xff]   ;;  %v3532_v58 = vcombine.low %v5005_v33, %v5207_v38  ;;  %v4533_v33 = vld [vmem:[%s5490_s1 + $0x3d8] sm:$0xff]  }
  0x8d   : > { %4153 = vmatprep.subr.bf16.mxu0 %v4461_v63 }
  0x8e   : > { %3954 = vmatmul.mubr.bf16.gmra.mrb[4].mxu1 %v3281_v55  ;;  %v452_v10 = vrot.slane %v450_v11, 1  ;;  %v446_v55 = vor.u32 %v445_v39, %v441_v30  ;;  %v4490_v30 = vld [vmem:[%s5490_s1 + $0x1f0] sm:$0xff]  }
  0x8f   : > { %3962 = vmatpush3.bf16.msra.mxu1 %v4460_v16  ;;  %4146 = vmatmul.mubr.bf16.gmra.mrb[4].mxu0 %v3505_v60  ;;  %v5216_v16 = vld [vmem:[%s4637_s10 + $0x38] sm:$0xff]  ;;  %v4478_v60 = vld [vmem:[%s5490_s1 + $0x150] sm:$0xff]  }
  0x90   : > { %4154 = vmatpush3.bf16.msra.mxu0 %v4461_v63  ;;  %3963 = vmatprep.subr.bf16.mxu1 %v4462_v56  ;;  %v453_v53 = vor.u32 %v452_v10, %v448_v52  ;;  %v3308_v40 = vcombine.low %v5216_v16, %v5151_v48  ;;  %v432_v63 = vor.u32 %v431_v31, %v427_v32  ;;  %v4482_v10 = vld [vmem:[%s5490_s1 + $0x160] sm:$0xff]  }
  0x91   : > { %4155 = vmatprep.subr.bf16.mxu0 %v4463_v6  ;;  %3973 = vmatprep.mubr.bf16.mxu1 %v3306_v22  ;;  %v5233_v22 = vld [vmem:[%s4637_s10 + $0x68] sm:$0xff] }
  0x92   : > { %4165 = vmatprep.mubr.bf16.mxu0 %v3530_v15  ;;  %v5193_v54 = vsel %vm4987_vm5, %v453_v53, 0  ;;  %v3309_v15 = vcombine.low %v5165_v24, %v5233_v22  ;;  %v4485_v53 = vld [vmem:[%s5490_s1 + $0x1e8] sm:$0xff]  }
  0x93   : > { %3964 = vmatpush3.bf16.msra.mxu1 %v4462_v56  ;;  %v3531_v34 = vcombine.low %v5193_v54, %v5001_v27  ;;  %v5227_v56 = vsel %vm4987_vm5, %v509_v28, 0  ;;  %v497_v28 = vshrl.u32 %v3188_v47, 16  ;;  %v4532_v27 = vld [vmem:[%s5490_s1 + $0x358] sm:$0xff]  }
  0x94   : > { %4156 = vmatpush3.bf16.msra.mxu0 %v4463_v6  ;;  %3965 = vmatprep.subr.bf16.mxu1 %v4464_v61  ;;  %v4479_v6 = vld [vmem:[%s5490_s1 + $0x1d0] sm:$0xff]   ;;  %v3533_v59 = vcombine.low %v5227_v56, %v5107_v44  ;;  %v3334_v44 = vcombine.low %v5173_v0, %v5178_v13  ;;  %v3186_v0 = vcombine.low %v5271_v43, %v5271_v43 }
  0x95   : > { %4157 = vmatprep.subr.bf16.mxu0 %v4465_v46 }
  0x96   : > { %v485_v41 = vshll.u32 %v3186_v0, 16  ;;  %v483_v31 = vshrl.u32 %v3186_v0, 16 }
  0x97   : > { %3966 = vmatpush3.bf16.msra.mxu1 %v4464_v61  ;;  %v557_v61 = vsel %vm4987_vm5, %v432_v63, 0 }
  0x98   : > { %4158 = vmatpush3.bf16.msra.mxu0 %v4465_v46  ;;  %3967 = vmatprep.subr.bf16.mxu1 %v4466_v49  ;;  %v5243_v46 = vsel %vm4987_vm5, %v446_v55, 0  ;;  %v4495_v55 = vld [vmem:[%s5490_s1 + $0x1f8] sm:$0xff]  }
  0x99   : > { %4159 = vmatprep.subr.bf16.mxu0 %v4467_v8  ;;  %v3558_v11 = vcombine.low %v557_v61, %v5243_v46  ;;  %v4497_v61 = vld [vmem:[%s5490_s1 + $0x240] sm:$0xff]  }
  0x9b   : > { %3968 = vmatpush3.bf16.msra.mxu1 %v4466_v49  ;;  %v4481_v49 = vld [vmem:[%s5490_s1 + $0x1d8] sm:$0xff]  }
  0x9c   : > { %4160 = vmatpush3.bf16.msra.mxu0 %v4467_v8  ;;  %3969 = vmatprep.subr.bf16.mxu1 %v4468_v37  ;;  %v5255_v8 = vld [vmem:[%s4637_s10 + $0x20] sm:$0xff] }
  0x9d   : > { %4161 = vmatprep.subr.bf16.mxu0 %v4469_v21  ;;  %v3182_v5 = vcombine.low %v5255_v8, %v5255_v8 }
  0x9f   : > { %3970 = vmatpush3.bf16.msra.mxu1 %v4468_v37  ;;  %v5260_v37 = vld [vmem:[%s4637_s10 + $0x30] sm:$0xff]  ;;  %v455_v1 = vshrl.u32 %v3182_v5, 16 }
  0xa0   : > { %4162 = vmatpush3.bf16.msra.mxu0 %v4469_v21  ;;  %3971 = vmatprep.subr.bf16.mxu1 %v4470_v50  ;;  %v3184_v52 = vcombine.low %v5260_v37, %v5260_v37  ;;  %v457_v21 = vshll.u32 %v3182_v5, 16  ;;  %v4500_v5 = vld [vmem:[%s5490_s1 + $0x2c0] sm:$0xff]  }
  0xa1   : > { %4163 = vmatprep.subr.bf16.mxu0 %v4471_v3 }
  0xa2   : > { %v471_v36 = vshll.u32 %v3184_v52, 16  ;;  %v469_v2 = vshrl.u32 %v3184_v52, 16  ;;  %v3335_v52 = vcombine.low %v5255_v8, %v5260_v37 }
  0xa3   : > { %3972 = vmatpush3.bf16.msra.mxu1 %v4470_v50  ;;  %v4484_v50 = vld [vmem:[%s5490_s1 + $0x168] sm:$0xff]  }
  0xa4   : > { %4164 = vmatpush3.bf16.msra.mxu0 %v4471_v3  ;;  %3981 = vmatprep.subr.bf16.mxu1 %v4472_v51  ;;  %v459_v3 = vrot.slane %v457_v21, 1  ;;  %v473_v25 = vrot.slane %v471_v36, 1  ;;  %v4504_v36 = vld [vmem:[%s5490_s1 + $0x248] sm:$0xff]  }
  0xa5   : > { %4173 = vmatprep.subr.bf16.mxu0 %v4474_v23 }
  0xa6   : > { %3974 = vmatmul.mubr.bf16.vlgmr.msra.gmra.mrb[0].mxu1 %v3307_v29  ;;  %v5295_v29 = vld [vmem:[%s4637_s10 + $0x70] sm:$0xff]  ;;  %v474_v39 = vor.u32 %v473_v25, %v469_v2 }
  0xa7   : > { %3982 = vmatpush3.bf16.msra.mxu1 %v4472_v51  ;;  %4166 = vmatmul.mubr.bf16.vlgmr.msra.gmra.mrb[0].mxu0 %v3531_v34  ;;  %v499_v51 = vshll.u32 %v3188_v47, 16  ;;  %v3192_v32 = vcombine.low %v5295_v29, %v5295_v29  ;;  %v460_v34 = vor.u32 %v459_v3, %v455_v1  ;;  %v4506_v3 = vld [vmem:[%s5490_s1 + $0x250] sm:$0xff]  }
  0xa8   : > { %4174 = vmatpush3.bf16.msra.mxu0 %v4474_v23  ;;  %3983 = vmatprep.subr.bf16.mxu1 %v4476_v45  ;;  %v3190_v23 = vcombine.low %v5290_v4, %v5290_v4 }
  0xa9   : > { %4175 = vmatprep.subr.bf16.mxu0 %v4477_v62  ;;  %3977 = vmatprep.mubr.bf16.mxu1 %v3308_v40  ;;  %v4494_v40 = vld [vmem:[%s5490_s1 + $0x178] sm:$0xff]   ;;  %v527_v63 = vshll.u32 %v3192_v32, 16 }
  0xaa   : > { %4169 = vmatprep.mubr.bf16.mxu0 %v3532_v58  ;;  %v513_v58 = vshll.u32 %v3190_v23, 16 }
  0xab   : > { %3984 = vmatpush3.bf16.msra.mxu1 %v4476_v45  ;;  %v487_v45 = vrot.slane %v485_v41, 1  ;;  %v4507_v41 = vld [vmem:[%s5490_s1 + $0x2d0] sm:$0xff]  }
  0xac   : > { %4176 = vmatpush3.bf16.msra.mxu0 %v4477_v62  ;;  %3985 = vmatprep.subr.bf16.mxu1 %v4478_v60  ;;  %v501_v62 = vrot.slane %v499_v51, 1  ;;  %v3337_v51 = vcombine.low %v5290_v4, %v5295_v29 }
  0xad   : > { %4177 = vmatprep.subr.bf16.mxu0 %v4479_v6 }
  0xae   : > { %3978 = vmatmul.mubr.bf16.gmra.mrb[4].mxu1 %v3309_v15  ;;  %v488_v15 = vor.u32 %v487_v45, %v483_v31  ;;  %v4511_v31 = vld [vmem:[%s5490_s1 + $0x2e0] sm:$0xff]   ;;  %v4523_v45 = vld [vmem:[%s5490_s1 + $0x2f8] sm:$0xff]  }
  0xaf   : > { %3986 = vmatpush3.bf16.msra.mxu1 %v4478_v60  ;;  %4170 = vmatmul.mubr.bf16.gmra.mrb[4].mxu0 %v3533_v59  ;;  %v5310_v60 = vsel %vm4987_vm5, %v460_v34, 0  ;;  %v502_v59 = vor.u32 %v501_v62, %v497_v28  ;;  %v4510_v34 = vld [vmem:[%s5490_s1 + $0x260] sm:$0xff]  }
  0xb0   : > { %4178 = vmatpush3.bf16.msra.mxu0 %v4479_v6  ;;  %3987 = vmatprep.subr.bf16.mxu1 %v4480_v18  ;;  %v5314_v6 = vsel %vm4987_vm5, %v474_v39, 0  ;;  %v4522_v39 = vld [vmem:[%s5490_s1 + $0x278] sm:$0xff]   ;;  %v4525_v28 = vld [vmem:[%s5490_s1 + $0x340] sm:$0xff]  }
  0xb1   : > { %4179 = vmatprep.subr.bf16.mxu0 %v4481_v49  ;;  %3997 = vmatprep.mubr.bf16.mxu1 %v3334_v44  ;;  %v525_v44 = vshrl.u32 %v3192_v32, 16  ;;  %v5332_v21 = vsel %vm4987_vm5, %v502_v59, 0  ;;  %v3362_v32 = vcombine.low %v5067_v7, %v5140_v17  ;;  %v4512_v7 = vld [vmem:[%s5490_s1 + $0x268] sm:$0xff]   ;;  %v4515_v17 = vld [vmem:[%s5490_s1 + $0x270] sm:$0xff]   ;;  %v4526_v62 = vld [vmem:[%s5490_s1 + $0x3c0] sm:$0xff]  }
  0xb2   : > { %4189 = vmatprep.mubr.bf16.mxu0 %v3558_v11  ;;  %v529_v11 = vrot.slane %v527_v63, 1  ;;  %v4529_v63 = vld [vmem:[%s5490_s1 + $0x3c8] sm:$0xff]   ;;  %v4544_v59 = vld [vmem:[%s5490_s1 + $0x3f8] sm:$0xff]  }
  0xb3   : > { %3988 = vmatpush3.bf16.msra.mxu1 %v4480_v18  ;;  %v511_v18 = vshrl.u32 %v3190_v23, 16  ;;  %v4509_v23 = vld [vmem:[%s5490_s1 + $0x2d8] sm:$0xff]  }
  0xb4   : > { %4180 = vmatpush3.bf16.msra.mxu0 %v4481_v49  ;;  %3989 = vmatprep.subr.bf16.mxu1 %v4482_v10  ;;  %v515_v49 = vrot.slane %v513_v58, 1  ;;  %v530_v47 = vor.u32 %v529_v11, %v525_v44  ;;  %v4528_v58 = vld [vmem:[%s5490_s1 + $0x348] sm:$0xff]   ;;  %v3393_v11 = vcombine.low %v5295_v29, %v4572_v35 }
  0xb5   : > { %4181 = vmatprep.subr.bf16.mxu0 %v4483_v9 }
  0xb6   : > { %v516_v0 = vor.u32 %v515_v49, %v511_v18  ;;  %v5353_v25 = vsel %vm4987_vm5, %v530_v47, 0  ;;  %v3392_v49 = vcombine.low %v5276_v12, %v5290_v4 }
  0xb7   : > { %3990 = vmatpush3.bf16.msra.mxu1 %v4482_v10  ;;  %v3559_v10 = vcombine.low %v5310_v60, %v5314_v6 }
  0xb8   : > { %4182 = vmatpush3.bf16.msra.mxu0 %v4483_v9  ;;  %3991 = vmatprep.subr.bf16.mxu1 %v4484_v50  ;;  %v5328_v9 = vsel %vm4987_vm5, %v488_v15, 0  ;;  %v5349_v2 = vsel %vm4987_vm5, %v516_v0, 0  ;;  %v4535_v15 = vld [vmem:[%s5490_s1 + $0x3e0] sm:$0xff]  }
  0xb9   : > { %4183 = vmatprep.subr.bf16.mxu0 %v4485_v53  ;;  %v3560_v1 = vcombine.low %v5328_v9, %v5332_v21  ;;  %v3615_v18 = vcombine.low %v5314_v6, %v5328_v9  ;;  %v3616_v44 = vcombine.low %v5332_v21, %v5349_v2 }
  0xbb   : > { %3992 = vmatpush3.bf16.msra.mxu1 %v4484_v50  ;;  %v4505_v50 = vld [vmem:[%s5490_s1 + $0x2c8] sm:$0xff]  }
  0xbc   : > { %4184 = vmatpush3.bf16.msra.mxu0 %v4485_v53  ;;  %3993 = vmatprep.subr.bf16.mxu1 %v4487_v57  ;;  %v3336_v53 = vcombine.low %v5271_v43, %v5276_v12 }
  0xbd   : > { %4185 = vmatprep.subr.bf16.mxu0 %v4490_v30 }
  0xbf   : > { %3994 = vmatpush3.bf16.msra.mxu1 %v4487_v57  ;;  %v3561_v57 = vcombine.low %v5349_v2, %v5353_v25 }
  0xc0   : > { %4186 = vmatpush3.bf16.msra.mxu0 %v4490_v30  ;;  %3995 = vmatprep.subr.bf16.mxu1 %v4494_v40  ;;  %v3586_v30 = vcombine.low %v5127_v42, %v5193_v54  ;;  %v4513_v42 = vld [vmem:[%s5490_s1 + $0x2e8] sm:$0xff]   ;;  %v4518_v54 = vld [vmem:[%s5490_s1 + $0x2f0] sm:$0xff]  }
  0xc1   : > { %4187 = vmatprep.subr.bf16.mxu0 %v4495_v55 }
  0xc3   : > { %3996 = vmatpush3.bf16.msra.mxu1 %v4494_v40  ;;  %v3363_v40 = vcombine.low %v5199_v26, %v5216_v16  ;;  %v3588_v26 = vcombine.low %v5207_v38, %v5227_v56  ;;  %v4530_v16 = vld [vmem:[%s5490_s1 + $0x350] sm:$0xff]   ;;  %v3614_v56 = vcombine.low %v5243_v46, %v5310_v60  ;;  %v4543_v60 = vld [vmem:[%s5490_s1 + $0x378] sm:$0xff]  }
  0xc4   : > { %4188 = vmatpush3.bf16.msra.mxu0 %v4495_v55  ;;  %4005 = vmatprep.subr.bf16.mxu1 %v4497_v61  ;;  %v3364_v55 = vcombine.low %v5151_v48, %v5165_v24  ;;  %v4531_v48 = vld [vmem:[%s5490_s1 + $0x3d0] sm:$0xff]   ;;  %v4563_v24 = vld [vmem:[%s4637_s10 + $0x78] sm:$0xff] }
  0xc5   : > { %4197 = vmatprep.subr.bf16.mxu0 %v4500_v5  ;;  %v3365_v38 = vcombine.low %v5233_v22, %v4563_v24  ;;  %v4534_v22 = vld [vmem:[%s5490_s1 + $0x360] sm:$0xff]   ;;  %v4540_v46 = vld [vmem:[%s5490_s1 + $0x370] sm:$0xff]  }
  0xc6   : > { %3998 = vmatmul.mubr.bf16.vlgmr.msra.gmra.mrb[0].mxu1 %v3335_v52 }
  0xc7   : > { %4006 = vmatpush3.bf16.msra.mxu1 %v4497_v61  ;;  %4190 = vmatmul.mubr.bf16.vlgmr.msra.gmra.mrb[0].mxu0 %v3559_v10  ;;  %v3391_v61 = vcombine.low %v5260_v37, %v5271_v43  ;;  %v3617_v37 = vcombine.low %v5353_v25, %v4572_v35 }
  0xc8   : > { %4198 = vmatpush3.bf16.msra.mxu0 %v4500_v5  ;;  %4007 = vmatprep.subr.bf16.mxu1 %v4504_v36 }
  0xc9   : > { %4199 = vmatprep.subr.bf16.mxu0 %v4505_v50  ;;  %4001 = vmatprep.mubr.bf16.mxu1 %v3336_v53 }
  0xca   : > { %4193 = vmatprep.mubr.bf16.mxu0 %v3560_v1 }
  0xcb   : > { %4008 = vmatpush3.bf16.msra.mxu1 %v4504_v36 }
  0xcc   : > { %4200 = vmatpush3.bf16.msra.mxu0 %v4505_v50  ;;  %4009 = vmatprep.subr.bf16.mxu1 %v4506_v3 }
  0xcd   : > { %4201 = vmatprep.subr.bf16.mxu0 %v4507_v41 }
  0xce   : > { %4002 = vmatmul.mubr.bf16.gmra.mrb[4].mxu1 %v3337_v51 }
  0xcf   : > { %4010 = vmatpush3.bf16.msra.mxu1 %v4506_v3  ;;  %4194 = vmatmul.mubr.bf16.gmra.mrb[4].mxu0 %v3561_v57 }
  0xd0   : > { %4202 = vmatpush3.bf16.msra.mxu0 %v4507_v41  ;;  %4011 = vmatprep.subr.bf16.mxu1 %v4508_v20 }
  0xd1   : > { %4203 = vmatprep.subr.bf16.mxu0 %v4509_v23  ;;  %4021 = vmatprep.mubr.bf16.mxu1 %v3362_v32 }
  0xd2   : > { %4213 = vmatprep.mubr.bf16.mxu0 %v3586_v30 }
  0xd3   : > { %4012 = vmatpush3.bf16.msra.mxu1 %v4508_v20 }
  0xd4   : > { %4204 = vmatpush3.bf16.msra.mxu0 %v4509_v23  ;;  %4013 = vmatprep.subr.bf16.mxu1 %v4510_v34 }
  0xd5   : > { %4205 = vmatprep.subr.bf16.mxu0 %v4511_v31 }
  0xd7   : > { %4014 = vmatpush3.bf16.msra.mxu1 %v4510_v34 }
  0xd8   : > { %4206 = vmatpush3.bf16.msra.mxu0 %v4511_v31  ;;  %4015 = vmatprep.subr.bf16.mxu1 %v4512_v7 }
  0xd9   : > { %4207 = vmatprep.subr.bf16.mxu0 %v4513_v42 }
  0xdb   : > { %4016 = vmatpush3.bf16.msra.mxu1 %v4512_v7 }
  0xdc   : > { %4208 = vmatpush3.bf16.msra.mxu0 %v4513_v42  ;;  %4017 = vmatprep.subr.bf16.mxu1 %v4515_v17 }
  0xdd   : > { %4209 = vmatprep.subr.bf16.mxu0 %v4518_v54 }
  0xdf   : > { %4018 = vmatpush3.bf16.msra.mxu1 %v4515_v17 }
  0xe0   : > { %4210 = vmatpush3.bf16.msra.mxu0 %v4518_v54  ;;  %4019 = vmatprep.subr.bf16.mxu1 %v4522_v39 }
  0xe1   : > { %4211 = vmatprep.subr.bf16.mxu0 %v4523_v45 }
  0xe3   : > { %4020 = vmatpush3.bf16.msra.mxu1 %v4522_v39 }
  0xe4   : > { %4212 = vmatpush3.bf16.msra.mxu0 %v4523_v45  ;;  %4029 = vmatprep.subr.bf16.mxu1 %v4525_v28 }
  0xe5   : > { %4221 = vmatprep.subr.bf16.mxu0 %v4526_v62 }
  0xe6   : > { %4022 = vmatmul.mubr.bf16.vlgmr.msra.gmra.mrb[0].mxu1 %v3363_v40 }
  0xe7   : > { %4030 = vmatpush3.bf16.msra.mxu1 %v4525_v28  ;;  %4214 = vmatmul.mubr.bf16.vlgmr.msra.gmra.mrb[0].mxu0 %v3587_v14  ;;  %v3390_v14 = vcombine.low %v5178_v13, %v5255_v8  ;;  %v4537_v13 = vld [vmem:[%s5490_s1 + $0x3e8] sm:$0xff]   ;;  %v4542_v8 = vld [vmem:[%s5490_s1 + $0x3f0] sm:$0xff]  }
  0xe8   : > { %4222 = vmatpush3.bf16.msra.mxu0 %v4526_v62  ;;  %4031 = vmatprep.subr.bf16.mxu1 %v4528_v58 }
  0xe9   : > { %4223 = vmatprep.subr.bf16.mxu0 %v4529_v63  ;;  %4025 = vmatprep.mubr.bf16.mxu1 %v3364_v55 }
  0xea   : > { %4217 = vmatprep.mubr.bf16.mxu0 %v3588_v26 }
  0xeb   : > { %4032 = vmatpush3.bf16.msra.mxu1 %v4528_v58 }
  0xec   : > { %4224 = vmatpush3.bf16.msra.mxu0 %v4529_v63  ;;  %4033 = vmatprep.subr.bf16.mxu1 %v4530_v16 }
  0xed   : > { %4225 = vmatprep.subr.bf16.mxu0 %v4531_v48 }
  0xee   : > { %4026 = vmatmul.mubr.bf16.gmra.mrb[4].mxu1 %v3365_v38 }
  0xef   : > { %4034 = vmatpush3.bf16.msra.mxu1 %v4530_v16  ;;  %4218 = vmatmul.mubr.bf16.gmra.mrb[4].mxu0 %v5118_v19  ;;  %v4536_v19 = vld [vmem:[%s5490_s1 + $0x368] sm:$0xff]  }
  0xf0   : > { %4226 = vmatpush3.bf16.msra.mxu0 %v4531_v48  ;;  %4035 = vmatprep.subr.bf16.mxu1 %v4532_v27 }
  0xf1   : > { %4227 = vmatprep.subr.bf16.mxu0 %v4533_v33  ;;  %4045 = vmatprep.mubr.bf16.mxu1 %v3390_v14 }
  0xf2   : > { %4237 = vmatprep.mubr.bf16.mxu0 %v3614_v56 }
  0xf3   : > { %4036 = vmatpush3.bf16.msra.mxu1 %v4532_v27 }
  0xf4   : > { %4228 = vmatpush3.bf16.msra.mxu0 %v4533_v33  ;;  %4037 = vmatprep.subr.bf16.mxu1 %v4534_v22 }
  0xf5   : > { %4229 = vmatprep.subr.bf16.mxu0 %v4535_v15 }
  0xf7   : > { %4038 = vmatpush3.bf16.msra.mxu1 %v4534_v22 }
  0xf8   : > { %4230 = vmatpush3.bf16.msra.mxu0 %v4535_v15  ;;  %4039 = vmatprep.subr.bf16.mxu1 %v4536_v19 }
  0xf9   : > { %4231 = vmatprep.subr.bf16.mxu0 %v4537_v13 }
  0xfb   : > { %4040 = vmatpush3.bf16.msra.mxu1 %v4536_v19 }
  0xfc   : > { %4232 = vmatpush3.bf16.msra.mxu0 %v4537_v13  ;;  %4041 = vmatprep.subr.bf16.mxu1 %v4540_v46 }
  0xfd   : > { %4233 = vmatprep.subr.bf16.mxu0 %v4542_v8 }
  0xff   : > { %4042 = vmatpush3.bf16.msra.mxu1 %v4540_v46 }
 0x100   : > { %4234 = vmatpush3.bf16.msra.mxu0 %v4542_v8  ;;  %4043 = vmatprep.subr.bf16.mxu1 %v4543_v60 }
 0x101   : > { %4235 = vmatprep.subr.bf16.mxu0 %v4544_v59 }
 0x103   : > { %4044 = vmatpush3.bf16.msra.mxu1 %v4543_v60 }
 0x104   : > { %4236 = vmatpush3.bf16.msra.mxu0 %v4544_v59 }
 0x106   : > { %4046 = vmatmul.mubr.bf16.vlgmr.msra.gmra.mrb[0].mxu1 %v3391_v61 }
 0x107   : > { %4238 = vmatmul.mubr.bf16.vlgmr.msra.gmra.mrb[0].mxu0 %v3615_v18  ;;  %4049 = vmatprep.mubr.bf16.mxu1 %v3392_v49 }
 0x108   : > { %4241 = vmatprep.mubr.bf16.mxu0 %v3616_v44 }
 0x10e   : > { %4050 = vmatmul.mubr.bf16.gmra.mrb[4].mxu1 %v3393_v11 }
 0x10f   : > { %4242 = vmatmul.mubr.bf16.gmra.mrb[4].mxu0 %v3617_v37 }
 0x1d9   : > { %v4047_v43 = vpop.f32.mrb[0].mxu1 }
 0x1da   : > { %v4239_v6 = vpop.f32.mrb[0].mxu0  ;;  %v1719_v12 = vpop.f32.mrb[1].mxu1 }
 0x1db   : > { %v4245_v4 = vadd.f32 %v4239_v6, %v4047_v43  ;;  %v2951_v5 = vpop.f32.mrb[1].mxu0  ;;  %v4048_v52 = vpop.f32.mrb[2].mxu1 }
 0x1dc   : > { %v4246_v10 = vadd.f32 %v2951_v5, %v1719_v12  ;;  %v4240_v9 = vpop.f32.mrb[2].mxu0  ;;  %v1722_v21 = vpop.f32.mrb[3].mxu1 }
 0x1dd   : > { %v4247_v36 = vadd.f32 %v4240_v9, %v4048_v52  ;;  %v2954_v0 = vpop.f32.mrb[3].mxu0  ;;  %v3006_v2 = vmul.f32 %v4245_v4, %v4245_v4 }
 0x1de   : > { %v4248_v35 = vadd.f32 %v2954_v0, %v1722_v21  ;;  %v3004_v47 = vmul.f32 %v4246_v10, %v4246_v10 }
 0x1df   : > { %v3654_v29 = vpack.c.bf16 %v4247_v36, %v4245_v4  ;;  %v3007_v30 = vmul.f32 %v4247_v36, %v4247_v36 }
 0x1e0   : > { %v2990_v50 = vadd.f32 %v4248_v35, %v4246_v10  ;;  %v3005_v53 = vmul.f32 %v4248_v35, %v4248_v35  ;;  %v3649_v1 = vpack.c.bf16 %v4248_v35, %v4246_v10 }
 0x1e1   : > { %3666 = vst [vmem:[%s5476_s8 + $0x8] sm:$0xff] %v3654_v29   ;;  %v4051_v3 = vpop.f32.mrb[4].mxu1 }
 0x1e2   : > { %v2991_v25 = vadd.f32 %v4245_v4, %v2990_v50  ;;  %v3012_v41 = vadd.f32 %v3005_v53, %v3004_v47  ;;  %3650 = vst [vmem:[%s5476_s8] sm:$0xff] %v3649_v1   ;;  %v4243_v51 = vpop.f32.mrb[4].mxu0  ;;  %v1735_v57 = vpop.f32.mrb[5].mxu1 }
 0x1e3   : > { %v4249_v20 = vadd.f32 %v4243_v51, %v4051_v3  ;;  %v2967_v23 = vpop.f32.mrb[5].mxu0  ;;  %v4052_v32 = vpop.f32.mrb[6].mxu1 }
 0x1e4   : > { %v3013_v34 = vadd.f32 %v3012_v41, %v3006_v2  ;;  %v4250_v31 = vadd.f32 %v2967_v23, %v1735_v57  ;;  %v2992_v7 = vadd.f32 %v4247_v36, %v2991_v25  ;;  %v4244_v42 = vpop.f32.mrb[6].mxu0  ;;  %v1738_v17 = vpop.f32.mrb[7].mxu1 }
 0x1e5   : > { %v4251_v54 = vadd.f32 %v4244_v42, %v4052_v32  ;;  %v2970_v39 = vpop.f32.mrb[7].mxu0  ;;  %v3010_v48 = vmul.f32 %v4249_v20, %v4249_v20 }
 0x1e6   : > { %v2993_v45 = vadd.f32 %v4250_v31, %v2992_v7  ;;  %v3008_v28 = vmul.f32 %v4250_v31, %v4250_v31  ;;  %v3014_v62 = vadd.f32 %v3013_v34, %v3007_v30  ;;  %v4252_v40 = vadd.f32 %v2970_v39, %v1738_v17 }
 0x1e7   : > { %v3664_v58 = vpack.c.bf16 %v4251_v54, %v4249_v20  ;;  %v3011_v27 = vmul.f32 %v4251_v54, %v4251_v54 }
 0x1e8   : > { %v3015_v63 = vadd.f32 %v3014_v62, %v3008_v28  ;;  %v2994_v55 = vadd.f32 %v4252_v40, %v2993_v45  ;;  %v3009_v26 = vmul.f32 %v4252_v40, %v4252_v40  ;;  %v3659_v16 = vpack.c.bf16 %v4252_v40, %v4250_v31 }
 0x1e9   : > { %3668 = vst [vmem:[%s5476_s8 + $0x18] sm:$0xff] %v3664_v58  }
 0x1ea   : > { %v2995_v24 = vadd.f32 %v4249_v20, %v2994_v55  ;;  %v3016_v38 = vadd.f32 %v3015_v63, %v3009_v26  ;;  %3667 = vst [vmem:[%s5476_s8 + $0x10] sm:$0xff] %v3659_v16  }
 0x1ec   : > { %v2996_v33 = vadd.f32 %v4251_v54, %v2995_v24  ;;  %v3017_v14 = vadd.f32 %v3016_v38, %v3010_v48 }
 0x1ee   : > { %v2997_v56 = vrot.slane %v2996_v33, 4  ;;  %v3018_v22 = vadd.f32 %v3017_v14, %v3011_v27 }
 0x1f0   : > { %v2998_v15 = vadd.f32 %v2997_v56, %v2996_v33  ;;  %v3019_v19 = vrot.slane %v3018_v22, 4 }
 0x1f2   : > { %v2999_v13 = vrot.slane %v2998_v15, 2  ;;  %v3020_v46 = vadd.f32 %v3019_v19, %v3018_v22 }
 0x1f4   : > { %v3000_v8 = vadd.f32 %v2999_v13, %v2998_v15  ;;  %v3021_v60 = vrot.slane %v3020_v46, 2 }
 0x1f6   : > { %v3001_v59 = vrot.slane %v3000_v8, 1  ;;  %v3022_v61 = vadd.f32 %v3021_v60, %v3020_v46 }
 0x1f8   : > { %v3002_v18 = vadd.f32 %v3001_v59, %v3000_v8  ;;  %v3023_v49 = vrot.slane %v3022_v61, 1 }
 0x1fa   : > { %3003 = vst [vmem:[%s181_s15] sm:$0x1] %v3002_v18  ;;  %v3024_v44 = vadd.f32 %v3023_v49, %v3022_v61 }
 0x1fc   : > { %3025 = vst [vmem:[%s181_s15 + $0x1] sm:$0x1] %v3024_v44 }
 0x1fd PF: > { %s14_s12 = sadd.s32 1, %s4570_s12  }
 0x1fe   : > { %p11_p4 = scmp.ge.s32.totalorder %s14_s12, 4  }
 0x200   :  { %13 = sbr.rel (!%p11_p4) target bundleno = 1 (0x1), region = 85 }

// kernel: _lambda_.7
= control target key start
LH: loop header
LB: loop body
LE: loop exit
PB: predicated region body
PF: predicated region fallthrough
CT: control target
= control target key end

     0   :  { %v70_v22 = vlaneseq  ;;  %s2847_s1 = inlined_call_operand.vmem [shape: bf16[2048,128], index: 1, kind: input, shape index: {}]   ;;  %s2848_s0 = inlined_call_operand.vmem [shape: bf16[16,2048], index: 0, kind: input, shape index: {}]   ;;  %s2849_s2 = inlined_call_operand.vmem [shape: f32[1,2048], index: 2, kind: input, shape index: {}]   ;;  %s2850_s3 = inlined_call_operand.vmem [shape: f32[1,2048], index: 3, kind: input, shape index: {}]   ;;  %s2851_s4 = inlined_call_operand.vmem [shape: f32[16,128], index: 4, kind: output, shape index: {}]  }
   0x1   :  { %v2092_v0 = vld [vmem:[%s2847_s1 + $0x40] sm:$0xff]   ;;  %v2096_v4 = vld [vmem:[%s2847_s1 + $0x48] sm:$0xff]   ;;  %v2100_v8 = vld [vmem:[%s2847_s1 + $0x50] sm:$0xff]  }
   0x2   :  { %v2093_v1 = vld [vmem:[%s2847_s1 + $0xc0] sm:$0xff]   ;;  %1916 = vmatprep.subr.bf16.mxu0 %v2092_v0  ;;  %v2097_v5 = vld [vmem:[%s2847_s1 + $0xc8] sm:$0xff]   ;;  %v2101_v9 = vld [vmem:[%s2847_s1 + $0xd0] sm:$0xff]   ;;  %v2331_v27 = vshrl.u32 %v70_v22, 7 }
   0x3   :  { %v2094_v2 = vld [vmem:[%s2847_s1] sm:$0xff]   ;;  %1938 = vmatprep.subr.bf16.mxu1 %v2093_v1  ;;  %v2098_v6 = vld [vmem:[%s2847_s1 + $0x8] sm:$0xff]   ;;  %v2102_v10 = vld [vmem:[%s2847_s1 + $0x10] sm:$0xff]  }
   0x4   :  { %v2095_v3 = vld [vmem:[%s2847_s1 + $0x80] sm:$0xff]   ;;  %1917 = vmatpush3.bf16.msra.mxu0 %v2094_v2  ;;  %v2099_v7 = vld [vmem:[%s2847_s1 + $0x88] sm:$0xff]   ;;  %v2103_v11 = vld [vmem:[%s2847_s1 + $0x90] sm:$0xff]   ;;  %v2346_v32 = vsub.s32 1, %v2331_v27  ;;  %v2352_v34 = vsub.s32 3, %v2331_v27  ;;  %v2358_v36 = vsub.s32 0, %v2331_v27 }
   0x5   :  { %1939 = vmatpush3.bf16.msra.mxu1 %v2095_v3  ;;  %1918 = vmatprep.subr.bf16.mxu0 %v2096_v4  ;;  %v2104_v12 = vld [vmem:[%s2847_s1 + $0x58] sm:$0xff]   ;;  %v2108_v16 = vld [vmem:[%s2847_s1 + $0x60] sm:$0xff]   ;;  %v2112_v20 = vld [vmem:[%s2847_s1 + $0x68] sm:$0xff]   ;;  %v2372_v40 = vsub.s32 2, %v2331_v27  ;;  %v2375_v41 = vsub.s32 5, %v2331_v27  ;;  %v2378_v42 = vsub.s32 7, %v2331_v27 }
   0x6   :  { %1940 = vmatprep.subr.bf16.mxu1 %v2097_v5  ;;  %v2105_v13 = vld [vmem:[%s2847_s1 + $0xd8] sm:$0xff]   ;;  %v2109_v17 = vld [vmem:[%s2847_s1 + $0xe0] sm:$0xff]   ;;  %v2113_v21 = vld [vmem:[%s2847_s1 + $0xe8] sm:$0xff]  }
   0x7   :  { %v2106_v14 = vld [vmem:[%s2847_s1 + $0x18] sm:$0xff]   ;;  %v2110_v18 = vld [vmem:[%s2847_s1 + $0x20] sm:$0xff]   ;;  %v2114_v23 = vld [vmem:[%s2847_s1 + $0x28] sm:$0xff]  }
   0x8   :  { %1919 = vmatpush3.bf16.msra.mxu0 %v2098_v6  ;;  %v2107_v15 = vld [vmem:[%s2847_s1 + $0x98] sm:$0xff]   ;;  %v2111_v19 = vld [vmem:[%s2847_s1 + $0xa0] sm:$0xff]   ;;  %v2115_v24 = vld [vmem:[%s2847_s1 + $0xa8] sm:$0xff]  }
   0x9   :  { %1941 = vmatpush3.bf16.msra.mxu1 %v2099_v7  ;;  %1920 = vmatprep.subr.bf16.mxu0 %v2100_v8  ;;  %v2116_v25 = vld [vmem:[%s2847_s1 + $0x70] sm:$0xff]   ;;  %v2120_v30 = vld [vmem:[%s2847_s1 + $0x78] sm:$0xff]   ;;  %v18_v37 = vld [vmem:[%s2848_s0] sm:$0xff] }
   0xa   :  { %1942 = vmatprep.subr.bf16.mxu1 %v2101_v9  ;;  %v2117_v26 = vld [vmem:[%s2847_s1 + $0xf0] sm:$0xff]   ;;  %v2121_v31 = vld [vmem:[%s2847_s1 + $0xf8] sm:$0xff]   ;;  %v26_v38 = vld [vmem:[%s2848_s0 + $0x40] sm:$0xff]  ;;  %v34_v43 = vunpack.c.l.bf16 %v18_v37  ;;  %v35_v44 = vunpack.c.h.bf16 %v18_v37  ;;  %v2423_v37 = vsub.s32 4, %v2331_v27 }
   0xb   :  { %v2118_v28 = vld [vmem:[%s2847_s1 + $0x30] sm:$0xff]   ;;  %v2122_v33 = vld [vmem:[%s2847_s1 + $0x38] sm:$0xff]   ;;  %v2369_v39 = vld [vmem:[%s2849_s2] sm:$0xff]  ;;  %v50_v45 = vunpack.c.l.bf16 %v26_v38  ;;  %v51_v46 = vunpack.c.h.bf16 %v26_v38 }
   0xc   :  { %1921 = vmatpush3.bf16.msra.mxu0 %v2102_v10  ;;  %v2119_v29 = vld [vmem:[%s2847_s1 + $0xb0] sm:$0xff]   ;;  %v2123_v35 = vld [vmem:[%s2847_s1 + $0xb8] sm:$0xff]   ;;  %v2383_v47 = vld [vmem:[%s2850_s3] sm:$0xff]  ;;  %v77_v48 = vrot.slane %v2369_v39, %v2346_v32  ;;  %v85_v52 = vrot.slane %v2369_v39, %v2352_v34  ;;  %v73_v61 = vrot.slane %v2369_v39, %v2358_v36  ;;  %v81_v2 = vrot.slane %v2369_v39, %v2372_v40 }
   0xd   :  { %1943 = vmatpush3.bf16.msra.mxu1 %v2103_v11  ;;  %1922 = vmatprep.subr.bf16.mxu0 %v2104_v12  ;;  %v193_v49 = vrot.slane %v2383_v47, %v2346_v32  ;;  %v19_v50 = vld [vmem:[%s2848_s0 + $0x8] sm:$0xff]  ;;  %v201_v53 = vrot.slane %v2383_v47, %v2352_v34  ;;  %v2124_v58 = vld [vmem:[%s2847_s1 + $0x140] sm:$0xff]   ;;  %v189_v62 = vrot.slane %v2383_v47, %v2358_v36 }
   0xe   :  { %1944 = vmatprep.subr.bf16.mxu1 %v2105_v13  ;;  %v27_v51 = vld [vmem:[%s2848_s0 + $0x48] sm:$0xff]  ;;  %v36_v54 = vunpack.c.l.bf16 %v19_v50  ;;  %v37_v55 = vunpack.c.h.bf16 %v19_v50  ;;  %v151_v59 = vmul.f32 %v77_v48, %v35_v44  ;;  %v167_v60 = vmul.f32 %v77_v48, %v51_v46  ;;  %v2125_v63 = vld [vmem:[%s2847_s1 + $0x1c0] sm:$0xff]  }
   0xf   :  { %v52_v56 = vunpack.c.l.bf16 %v27_v51  ;;  %v53_v57 = vunpack.c.h.bf16 %v27_v51  ;;  %v197_v3 = vrot.slane %v2383_v47, %v2372_v40  ;;  %v150_v6 = vmul.f32 %v73_v61, %v34_v43  ;;  %v2128_v46 = vld [vmem:[%s2847_s1 + $0x148] sm:$0xff]  }
  0x10   :  { %1923 = vmatpush3.bf16.msra.mxu0 %v2106_v14  ;;  %v153_v0 = vmul.f32 %v85_v52, %v37_v55  ;;  %v267_v4 = vadd.f32 %v193_v49, %v151_v59  ;;  %v283_v5 = vadd.f32 %v193_v49, %v167_v60  ;;  %v166_v7 = vmul.f32 %v73_v61, %v50_v45  ;;  %v2127_v45 = vld [vmem:[%s2847_s1 + $0x180] sm:$0xff]   ;;  %v2129_v50 = vld [vmem:[%s2847_s1 + $0x1c8] sm:$0xff]  }
  0x11   :  { %1945 = vmatpush3.bf16.msra.mxu1 %v2107_v15  ;;  %1924 = vmatprep.subr.bf16.mxu0 %v2108_v16  ;;  %v169_v1 = vmul.f32 %v85_v52, %v53_v57  ;;  %v152_v10 = vmul.f32 %v81_v2, %v36_v54  ;;  %v168_v11 = vmul.f32 %v81_v2, %v52_v56  ;;  %v2435_v51 = vsub.s32 6, %v2331_v27  ;;  %v2130_v54 = vld [vmem:[%s2847_s1 + $0x108] sm:$0xff]  }
  0x12   :  { %1946 = vmatprep.subr.bf16.mxu1 %v2109_v17  ;;  %v269_v8 = vadd.f32 %v201_v53, %v153_v0  ;;  %vm299_vm0 = vcmp.gt.f32.partialorder %v267_v4, 0.0  ;;  %vm315_vm1 = vcmp.gt.f32.partialorder %v283_v5, 0.0  ;;  %v331_v12 = vmul.f32 0.2, %v267_v4  ;;  %v2131_v27 = vld [vmem:[%s2847_s1 + $0x188] sm:$0xff]  }
  0x13   :  { %v285_v9 = vadd.f32 %v201_v53, %v169_v1  ;;  %v347_v13 = vmul.f32 0.2, %v283_v5 }
  0x14   :  { %1925 = vmatpush3.bf16.msra.mxu0 %v2110_v18  ;;  %vm301_vm2 = vcmp.gt.f32.partialorder %v269_v8, 0.0  ;;  %v333_v14 = vmul.f32 0.2, %v269_v8  ;;  %v363_v16 = vsel %vm299_vm0, %v267_v4, %v331_v12  ;;  %v266_v18 = vadd.f32 %v189_v62, %v150_v6  ;;  %v2136_v6 = vld [vmem:[%s2847_s1 + $0x158] sm:$0xff]   ;;  %v2142_v12 = vld [vmem:[%s2847_s1 + $0x120] sm:$0xff]  }
  0x15   :  { %1947 = vmatpush3.bf16.msra.mxu1 %v2111_v19  ;;  %1926 = vmatprep.subr.bf16.mxu0 %v2112_v20  ;;  %vm317_vm3 = vcmp.gt.f32.partialorder %v285_v9, 0.0  ;;  %v349_v15 = vmul.f32 0.2, %v285_v9  ;;  %v379_v17 = vsel %vm315_vm1, %v283_v5, %v347_v13  ;;  %v282_v19 = vadd.f32 %v189_v62, %v166_v7  ;;  %v2135_v5 = vld [vmem:[%s2847_s1 + $0x190] sm:$0xff]   ;;  %v2137_v7 = vld [vmem:[%s2847_s1 + $0x1d8] sm:$0xff]   ;;  %v2143_v13 = vld [vmem:[%s2847_s1 + $0x1a0] sm:$0xff]  }
  0x16   :  { %1948 = vmatprep.subr.bf16.mxu1 %v2113_v21  ;;  %v395_v20 = vpack.c.bf16 %v379_v17, %v363_v16  ;;  %v365_v21 = vsel %vm301_vm2, %v269_v8, %v333_v14  ;;  %vm298_vm4 = vcmp.gt.f32.partialorder %v266_v18, 0.0  ;;  %v2138_v8 = vld [vmem:[%s2847_s1 + $0x118] sm:$0xff]   ;;  %v2144_v14 = vld [vmem:[%s2847_s1 + $0x168] sm:$0xff]  }
  0x17   :  { %v381_v22 = vsel %vm317_vm3, %v285_v9, %v349_v15  ;;  %vm314_vm5 = vcmp.gt.f32.partialorder %v282_v19, 0.0  ;;  %v2139_v9 = vld [vmem:[%s2847_s1 + $0x198] sm:$0xff]   ;;  %v2145_v15 = vld [vmem:[%s2847_s1 + $0x1e8] sm:$0xff]  }
  0x18   :  { %1927 = vmatpush3.bf16.msra.mxu0 %v2114_v23  ;;  %v268_v23 = vadd.f32 %v197_v3, %v152_v10  ;;  %1466 = vmatprep.mubr.bf16.mxu0 %v395_v20  ;;  %v2140_v10 = vld [vmem:[%s2847_s1 + $0x160] sm:$0xff]   ;;  %v2146_v16 = vld [vmem:[%s2847_s1 + $0x128] sm:$0xff]   ;;  %v93_v20 = vrot.slane %v2369_v39, %v2375_v41 }
  0x19   :  { %1949 = vmatpush3.bf16.msra.mxu1 %v2115_v24  ;;  %1928 = vmatprep.subr.bf16.mxu0 %v2116_v25  ;;  %v67_v24 = vld [vmem:[%s2849_s2 + $0x8] sm:$0xff]  ;;  %v397_v25 = vpack.c.bf16 %v381_v22, %v365_v21  ;;  %v209_v21 = vrot.slane %v2383_v47, %v2375_v41  ;;  %v101_v22 = vrot.slane %v2369_v39, %v2378_v42 }
  0x1a   :  { %1950 = vmatprep.subr.bf16.mxu1 %v2117_v26  ;;  %v330_v26 = vmul.f32 0.2, %v266_v18  ;;  %vm300_vm6 = vcmp.gt.f32.partialorder %v268_v23, 0.0  ;;  %v2438_v52 = vrot.slane %v67_v24, %v2346_v32  ;;  %v2447_v56 = vrot.slane %v67_v24, %v2352_v34  ;;  %v2147_v17 = vld [vmem:[%s2847_s1 + $0x1a8] sm:$0xff]  }
  0x1b   :  { %1507 = vmatprep.mubr.bf16.mxu1 %v397_v25  ;;  %v2471_v61 = vrot.slane %v67_v24, %v2375_v41  ;;  %v2486_v0 = vrot.slane %v67_v24, %v2423_v37  ;;  %v2492_v2 = vrot.slane %v67_v24, %v2435_v51  ;;  %v20_v25 = vld [vmem:[%s2848_s0 + $0x10] sm:$0xff] }
  0x1c   :  { %1929 = vmatpush3.bf16.msra.mxu0 %v2118_v28  ;;  %v183_v28 = vld [vmem:[%s2850_s3 + $0x8] sm:$0xff] }
  0x1d   :  { %1951 = vmatpush3.bf16.msra.mxu1 %v2119_v29  ;;  %1930 = vmatprep.subr.bf16.mxu0 %v2120_v30  ;;  %v346_v29 = vmul.f32 0.2, %v282_v19  ;;  %v284_v30 = vadd.f32 %v197_v3, %v168_v11  ;;  %v2444_v55 = vrot.slane %v183_v28, %v2346_v32  ;;  %v2450_v57 = vrot.slane %v183_v28, %v2352_v34  ;;  %v2132_v34 = vld [vmem:[%s2847_s1 + $0x150] sm:$0xff]   ;;  %v2141_v11 = vld [vmem:[%s2847_s1 + $0x1e0] sm:$0xff]  }
  0x1e   :  { %1952 = vmatprep.subr.bf16.mxu1 %v2121_v31  ;;  %v332_v31 = vmul.f32 0.2, %v268_v23  ;;  %v2459_v59 = vrot.slane %v183_v28, %v2358_v36  ;;  %v2462_v32 = vrot.slane %v67_v24, %v2372_v40  ;;  %v2465_v60 = vrot.slane %v183_v28, %v2372_v40  ;;  %v2133_v40 = vld [vmem:[%s2847_s1 + $0x1d0] sm:$0xff]  }
  0x1f   :  { %v378_v38 = vsel %vm314_vm5, %v282_v19, %v346_v29  ;;  %vm316_vm7 = vcmp.gt.f32.partialorder %v284_v30, 0.0  ;;  %v348_v43 = vmul.f32 0.2, %v284_v30  ;;  %v2474_v62 = vrot.slane %v183_v28, %v2375_v41  ;;  %v2134_v3 = vld [vmem:[%s2847_s1 + $0x110] sm:$0xff]  }
  0x20   :  { %1931 = vmatpush3.bf16.msra.mxu0 %v2122_v33  ;;  %v362_v33 = vsel %vm298_vm4, %v266_v18, %v330_v26  ;;  %v364_v44 = vsel %vm300_vm6, %v268_v23, %v332_v31  ;;  %v2489_v1 = vrot.slane %v183_v28, %v2423_v37  ;;  %v2498_v4 = vrot.slane %v183_v28, %v2435_v51  ;;  %v2148_v18 = vld [vmem:[%s2847_s1 + $0x170] sm:$0xff]  }
  0x21   :  { %1953 = vmatpush3.bf16.msra.mxu1 %v2123_v35  ;;  %1960 = vmatprep.subr.bf16.mxu0 %v2124_v58  ;;  %v2126_v35 = vld [vmem:[%s2847_s1 + $0x100] sm:$0xff]   ;;  %v394_v48 = vpack.c.bf16 %v378_v38, %v362_v33  ;;  %v380_v49 = vsel %vm316_vm7, %v284_v30, %v348_v43  ;;  %v2456_v58 = vrot.slane %v67_v24, %v2358_v36  ;;  %v2149_v19 = vld [vmem:[%s2847_s1 + $0x1f0] sm:$0xff]   ;;  %v38_v33 = vunpack.c.l.bf16 %v20_v25 }
  0x22   :  { %1982 = vmatprep.subr.bf16.mxu1 %v2125_v63  ;;  %v396_v53 = vpack.c.bf16 %v380_v49, %v364_v44  ;;  %v2477_v36 = vrot.slane %v67_v24, %v2378_v42  ;;  %v2483_v63 = vrot.slane %v183_v28, %v2378_v42  ;;  %v89_v23 = vrot.slane %v2369_v39, %v2423_v37  ;;  %v2150_v24 = vld [vmem:[%s2847_s1 + $0x130] sm:$0xff]  }
  0x23   :  { %1467 = vmatmul.mubr.bf16.vlgmr.msra.gmra.mrb[0].mxu0 %v394_v48  ;;  %v28_v26 = vld [vmem:[%s2848_s0 + $0x50] sm:$0xff]  ;;  %v217_v41 = vrot.slane %v2383_v47, %v2378_v42  ;;  %v205_v28 = vrot.slane %v2383_v47, %v2423_v37  ;;  %v97_v29 = vrot.slane %v2369_v39, %v2435_v51  ;;  %v213_v30 = vrot.slane %v2383_v47, %v2435_v51  ;;  %v21_v42 = vld [vmem:[%s2848_s0 + $0x18] sm:$0xff] }
  0x24   :  { %1961 = vmatpush3.bf16.msra.mxu0 %v2126_v35  ;;  %1508 = vmatmul.mubr.bf16.vlgmr.msra.gmra.mrb[0].mxu1 %v396_v53  ;;  %v2151_v31 = vld [vmem:[%s2847_s1 + $0x1b0] sm:$0xff]   ;;  %v39_v35 = vunpack.c.h.bf16 %v20_v25  ;;  %v54_v38 = vunpack.c.l.bf16 %v28_v26  ;;  %v55_v43 = vunpack.c.h.bf16 %v28_v26  ;;  %v29_v39 = vld [vmem:[%s2848_s0 + $0x58] sm:$0xff]  ;;  %v40_v37 = vunpack.c.l.bf16 %v21_v42 }
  0x25   :  { %1962 = vmatprep.subr.bf16.mxu0 %v2128_v46  ;;  %1983 = vmatpush3.bf16.msra.mxu1 %v2127_v45  ;;  %v2152_v47 = vld [vmem:[%s2847_s1 + $0x178] sm:$0xff]   ;;  %v41_v44 = vunpack.c.h.bf16 %v21_v42  ;;  %v56_v45 = vunpack.c.l.bf16 %v29_v39  ;;  %v57_v46 = vunpack.c.h.bf16 %v29_v39  ;;  %v154_v51 = vmul.f32 %v89_v23, %v38_v33  ;;  %v2159_v33 = vld [vmem:[%s2847_s1 + $0x280] sm:$0xff]  }
  0x26   :  { %1984 = vmatprep.subr.bf16.mxu1 %v2129_v50  ;;  %v2153_v48 = vld [vmem:[%s2847_s1 + $0x1f8] sm:$0xff]   ;;  %v155_v49 = vmul.f32 %v93_v20, %v39_v35  ;;  %v171_v50 = vmul.f32 %v93_v20, %v55_v43  ;;  %v170_v53 = vmul.f32 %v89_v23, %v54_v38  ;;  %v2160_v38 = vld [vmem:[%s2847_s1 + $0x248] sm:$0xff]  }
  0x28   :  { %1963 = vmatpush3.bf16.msra.mxu0 %v2130_v54  ;;  %v2154_v54 = vld [vmem:[%s2847_s1 + $0x138] sm:$0xff]  }
  0x29   :  { %1964 = vmatprep.subr.bf16.mxu0 %v2132_v34  ;;  %1985 = vmatpush3.bf16.msra.mxu1 %v2131_v27  ;;  %v157_v27 = vmul.f32 %v101_v22, %v41_v44  ;;  %v173_v34 = vmul.f32 %v101_v22, %v57_v46  ;;  %v2162_v44 = vld [vmem:[%s2847_s1 + $0x208] sm:$0xff]   ;;  %v2164_v46 = vld [vmem:[%s2847_s1 + $0x250] sm:$0xff]  }
  0x2a   :  { %1986 = vmatprep.subr.bf16.mxu1 %v2133_v40  ;;  %v156_v40 = vmul.f32 %v97_v29, %v40_v37 }
  0x2c   :  { %1965 = vmatpush3.bf16.msra.mxu0 %v2134_v3  ;;  %v172_v3 = vmul.f32 %v97_v29, %v56_v45  ;;  %v2163_v45 = vld [vmem:[%s2847_s1 + $0x288] sm:$0xff]  }
  0x2d   :  { %1966 = vmatprep.subr.bf16.mxu0 %v2136_v6  ;;  %1987 = vmatpush3.bf16.msra.mxu1 %v2135_v5  ;;  %v2155_v5 = vld [vmem:[%s2847_s1 + $0x1b8] sm:$0xff]   ;;  %v271_v6 = vadd.f32 %v209_v21, %v155_v49  ;;  %v2166_v49 = vld [vmem:[%s2847_s1 + $0x210] sm:$0xff]  }
  0x2e   :  { %1988 = vmatprep.subr.bf16.mxu1 %v2137_v7  ;;  %v287_v7 = vadd.f32 %v209_v21, %v171_v50  ;;  %v2167_v50 = vld [vmem:[%s2847_s1 + $0x290] sm:$0xff]  }
  0x2f   :  { %vm303_vm8 = vcmp.gt.f32.partialorder %v271_v6, 0.0 }
  0x30   :  { %1967 = vmatpush3.bf16.msra.mxu0 %v2138_v8  ;;  %v270_v8 = vadd.f32 %v205_v28, %v154_v51  ;;  %vm319_vm9 = vcmp.gt.f32.partialorder %v287_v7, 0.0  ;;  %v2168_v51 = vld [vmem:[%s2847_s1 + $0x258] sm:$0xff]  }
  0x31   :  { %1968 = vmatprep.subr.bf16.mxu0 %v2140_v10  ;;  %1989 = vmatpush3.bf16.msra.mxu1 %v2139_v9  ;;  %v286_v9 = vadd.f32 %v205_v28, %v170_v53  ;;  %v2156_v10 = vld [vmem:[%s2847_s1 + $0x240] sm:$0xff]   ;;  %v2169_v53 = vld [vmem:[%s2847_s1 + $0x2d8] sm:$0xff]  }
  0x32   :  { %1990 = vmatprep.subr.bf16.mxu1 %v2141_v11  ;;  %v273_v11 = vadd.f32 %v217_v41, %v157_v27  ;;  %vm302_vm12 = vcmp.gt.f32.partialorder %v270_v8, 0.0  ;;  %v334_v25 = vmul.f32 0.2, %v270_v8  ;;  %v2158_v28 = vld [vmem:[%s2847_s1 + $0x200] sm:$0xff]   ;;  %v2171_v27 = vld [vmem:[%s2847_s1 + $0x298] sm:$0xff]  }
  0x33   :  { %vm318_vm13 = vcmp.gt.f32.partialorder %v286_v9, 0.0 }
  0x34   :  { %1969 = vmatpush3.bf16.msra.mxu0 %v2142_v12  ;;  %v289_v12 = vadd.f32 %v217_v41, %v173_v34  ;;  %vm305_vm10 = vcmp.gt.f32.partialorder %v273_v11, 0.0  ;;  %v350_v41 = vmul.f32 0.2, %v286_v9  ;;  %v366_v29 = vsel %vm302_vm12, %v270_v8, %v334_v25  ;;  %v2172_v34 = vld [vmem:[%s2847_s1 + $0x260] sm:$0xff]   ;;  %v2178_v8 = vld [vmem:[%s2847_s1 + $0x228] sm:$0xff]  }
  0x35   :  { %1970 = vmatprep.subr.bf16.mxu0 %v2144_v14  ;;  %1991 = vmatpush3.bf16.msra.mxu1 %v2143_v13  ;;  %v272_v13 = vadd.f32 %v213_v30, %v156_v40  ;;  %v288_v14 = vadd.f32 %v213_v30, %v172_v3  ;;  %v2173_v40 = vld [vmem:[%s2847_s1 + $0x2e0] sm:$0xff]  }
  0x36   :  { %1992 = vmatprep.subr.bf16.mxu1 %v2145_v15  ;;  %v2157_v15 = vld [vmem:[%s2847_s1 + $0x2c0] sm:$0xff]   ;;  %vm321_vm11 = vcmp.gt.f32.partialorder %v289_v12, 0.0  ;;  %v382_v35 = vsel %vm318_vm13, %v286_v9, %v350_v41  ;;  %v2179_v9 = vld [vmem:[%s2847_s1 + $0x2a8] sm:$0xff]  }
  0x37   :  { %vm304_vm14 = vcmp.gt.f32.partialorder %v272_v13, 0.0  ;;  %vm320_vm15 = vcmp.gt.f32.partialorder %v288_v14, 0.0  ;;  %v336_v30 = vmul.f32 0.2, %v272_v13  ;;  %v398_v43 = vpack.c.bf16 %v382_v35, %v366_v29  ;;  %v2174_v3 = vld [vmem:[%s2847_s1 + $0x220] sm:$0xff]   ;;  %v2187_v35 = vld [vmem:[%s2847_s1 + $0x2b8] sm:$0xff]  }
  0x38   :  { %1971 = vmatpush3.bf16.msra.mxu0 %v2146_v16  ;;  %v335_v16 = vmul.f32 0.2, %v271_v6 }
  0x39   :  { %1972 = vmatprep.subr.bf16.mxu0 %v2148_v18  ;;  %1993 = vmatpush3.bf16.msra.mxu1 %v2147_v17  ;;  %v351_v17 = vmul.f32 0.2, %v287_v7  ;;  %v337_v18 = vmul.f32 0.2, %v273_v11  ;;  %v368_v42 = vsel %vm304_vm14, %v272_v13, %v336_v30  ;;  %v2183_v13 = vld [vmem:[%s2847_s1 + $0x2b0] sm:$0xff]  }
  0x3a   :  { %1994 = vmatprep.subr.bf16.mxu1 %v2149_v19  ;;  %v353_v19 = vmul.f32 0.2, %v289_v12  ;;  %v367_v20 = vsel %vm303_vm8, %v271_v6, %v335_v16  ;;  %v2176_v6 = vld [vmem:[%s2847_s1 + $0x268] sm:$0xff]   ;;  %v30_v16 = vld [vmem:[%s2848_s0 + $0x60] sm:$0xff] }
  0x3b   :  { %v383_v21 = vsel %vm319_vm9, %v287_v7, %v351_v17  ;;  %v369_v23 = vsel %vm305_vm10, %v273_v11, %v337_v18  ;;  %v2177_v7 = vld [vmem:[%s2847_s1 + $0x2e8] sm:$0xff]   ;;  %v2181_v11 = vld [vmem:[%s2847_s1 + $0x2f0] sm:$0xff]  }
  0x3c   :  { %1973 = vmatpush3.bf16.msra.mxu0 %v2150_v24  ;;  %v399_v22 = vpack.c.bf16 %v383_v21, %v367_v20  ;;  %v385_v24 = vsel %vm321_vm11, %v289_v12, %v353_v19  ;;  %v2182_v12 = vld [vmem:[%s2847_s1 + $0x230] sm:$0xff]   ;;  %v58_v19 = vunpack.c.l.bf16 %v30_v16  ;;  %v59_v20 = vunpack.c.h.bf16 %v30_v16  ;;  %v23_v21 = vld [vmem:[%s2848_s0 + $0x28] sm:$0xff] }
  0x3d   :  { %1974 = vmatprep.subr.bf16.mxu0 %v2152_v47  ;;  %1995 = vmatpush3.bf16.msra.mxu1 %v2151_v31  ;;  %v401_v26 = vpack.c.bf16 %v385_v24, %v369_v23  ;;  %v352_v31 = vmul.f32 0.2, %v288_v14  ;;  %v2161_v47 = vld [vmem:[%s2847_s1 + $0x2c8] sm:$0xff]   ;;  %v2185_v23 = vld [vmem:[%s2847_s1 + $0x2f8] sm:$0xff]   ;;  %v44_v24 = vunpack.c.l.bf16 %v23_v21  ;;  %v45_v25 = vunpack.c.h.bf16 %v23_v21  ;;  %v2199_v21 = vld [vmem:[%s2847_s1 + $0x390] sm:$0xff]  }
  0x3e   :  { %1996 = vmatprep.subr.bf16.mxu1 %v2153_v48  ;;  %1548 = vmatprep.mubr.bf16.mxu0 %v399_v22  ;;  %v2165_v48 = vld [vmem:[%s2847_s1 + $0x2d0] sm:$0xff]   ;;  %v31_v22 = vld [vmem:[%s2848_s0 + $0x68] sm:$0xff]  ;;  %v175_v30 = vmul.f32 %v2438_v52, %v59_v20 }
  0x3f   :  { %1589 = vmatprep.mubr.bf16.mxu1 %v401_v26  ;;  %v384_v39 = vsel %vm320_vm15, %v288_v14, %v352_v31  ;;  %v2184_v14 = vld [vmem:[%s2847_s1 + $0x278] sm:$0xff]   ;;  %v60_v26 = vunpack.c.l.bf16 %v31_v22  ;;  %v61_v41 = vunpack.c.h.bf16 %v31_v22  ;;  %v2194_v16 = vld [vmem:[%s2847_s1 + $0x308] sm:$0xff]   ;;  %v2198_v20 = vld [vmem:[%s2847_s1 + $0x310] sm:$0xff]  }
  0x40   :  { %1975 = vmatpush3.bf16.msra.mxu0 %v2154_v54  ;;  %v400_v37 = vpack.c.bf16 %v384_v39, %v368_v42  ;;  %v2170_v54 = vld [vmem:[%s2847_s1 + $0x218] sm:$0xff]   ;;  %v160_v42 = vmul.f32 %v2462_v32, %v44_v24 }
  0x41   :  { %2004 = vmatprep.subr.bf16.mxu0 %v2156_v10  ;;  %1997 = vmatpush3.bf16.msra.mxu1 %v2155_v5  ;;  %v2175_v5 = vld [vmem:[%s2847_s1 + $0x2a0] sm:$0xff]   ;;  %v2180_v10 = vld [vmem:[%s2847_s1 + $0x270] sm:$0xff]   ;;  %v176_v39 = vmul.f32 %v2462_v32, %v60_v26  ;;  %v2200_v22 = vld [vmem:[%s2847_s1 + $0x358] sm:$0xff]  }
  0x42   :  { %2026 = vmatprep.subr.bf16.mxu1 %v2157_v15  ;;  %v22_v15 = vld [vmem:[%s2848_s0 + $0x20] sm:$0xff]  ;;  %v276_v32 = vadd.f32 %v2465_v60, %v160_v42  ;;  %v2202_v24 = vld [vmem:[%s2847_s1 + $0x318] sm:$0xff]   ;;  %v2214_v42 = vld [vmem:[%s2847_s1 + $0x330] sm:$0xff]  }
  0x43   :  { %1549 = vmatmul.mubr.bf16.vlgmr.msra.gmra.mrb[4].mxu0 %v398_v43  ;;  %v42_v17 = vunpack.c.l.bf16 %v22_v15  ;;  %v43_v18 = vunpack.c.h.bf16 %v22_v15  ;;  %v177_v43 = vmul.f32 %v2447_v56, %v61_v41  ;;  %v2204_v26 = vld [vmem:[%s2847_s1 + $0x360] sm:$0xff]  }
  0x44   :  { %1590 = vmatmul.mubr.bf16.vlgmr.msra.gmra.mrb[4].mxu1 %v400_v37  ;;  %2005 = vmatpush3.bf16.msra.mxu0 %v2158_v28  ;;  %v2186_v28 = vld [vmem:[%s2847_s1 + $0x238] sm:$0xff]   ;;  %v2188_v37 = vld [vmem:[%s2847_s1 + $0x340] sm:$0xff]   ;;  %vm308_vm6 = vcmp.gt.f32.partialorder %v276_v32, 0.0 }
  0x45   :  { %2027 = vmatpush3.bf16.msra.mxu1 %v2159_v33  ;;  %2006 = vmatprep.subr.bf16.mxu0 %v2160_v38  ;;  %v159_v29 = vmul.f32 %v2438_v52, %v43_v18  ;;  %v158_v31 = vmul.f32 %v2456_v58, %v42_v17  ;;  %v174_v33 = vmul.f32 %v2456_v58, %v58_v19  ;;  %v2195_v17 = vld [vmem:[%s2847_s1 + $0x388] sm:$0xff]   ;;  %v2196_v18 = vld [vmem:[%s2847_s1 + $0x350] sm:$0xff]   ;;  %v2205_v41 = vld [vmem:[%s2847_s1 + $0x3e0] sm:$0xff]  }
  0x46   :  { %2028 = vmatprep.subr.bf16.mxu1 %v2161_v47  ;;  %v161_v38 = vmul.f32 %v2447_v56, %v45_v25  ;;  %v291_v47 = vadd.f32 %v2444_v55, %v175_v30  ;;  %v293_v56 = vadd.f32 %v2450_v57, %v177_v43  ;;  %v2197_v19 = vld [vmem:[%s2847_s1 + $0x3d0] sm:$0xff]   ;;  %v2203_v25 = vld [vmem:[%s2847_s1 + $0x398] sm:$0xff]   ;;  %v2208_v30 = vld [vmem:[%s2847_s1 + $0x368] sm:$0xff]  }
  0x47   :  { %v275_v52 = vadd.f32 %v2444_v55, %v159_v29  ;;  %v274_v58 = vadd.f32 %v2459_v59, %v158_v31  ;;  %v2207_v29 = vld [vmem:[%s2847_s1 + $0x3a0] sm:$0xff]   ;;  %v2209_v31 = vld [vmem:[%s2847_s1 + $0x3e8] sm:$0xff]   ;;  %v2213_v43 = vld [vmem:[%s2847_s1 + $0x3f0] sm:$0xff]  }
  0x48   :  { %2007 = vmatpush3.bf16.msra.mxu0 %v2162_v44  ;;  %v277_v44 = vadd.f32 %v2450_v57, %v161_v38  ;;  %vm323_vm1 = vcmp.gt.f32.partialorder %v291_v47, 0.0  ;;  %vm325_vm3 = vcmp.gt.f32.partialorder %v293_v56, 0.0  ;;  %v2212_v38 = vld [vmem:[%s2847_s1 + $0x370] sm:$0xff]  }
  0x49   :  { %2029 = vmatpush3.bf16.msra.mxu1 %v2163_v45  ;;  %2008 = vmatprep.subr.bf16.mxu0 %v2164_v46  ;;  %v290_v45 = vadd.f32 %v2459_v59, %v174_v33  ;;  %v2189_v46 = vld [vmem:[%s2847_s1 + $0x3c0] sm:$0xff]   ;;  %vm307_vm0 = vcmp.gt.f32.partialorder %v275_v52, 0.0  ;;  %v339_v55 = vmul.f32 0.2, %v275_v52  ;;  %vm306_vm4 = vcmp.gt.f32.partialorder %v274_v58, 0.0  ;;  %v2210_v33 = vld [vmem:[%s2847_s1 + $0x328] sm:$0xff]  }
  0x4a   :  { %2030 = vmatprep.subr.bf16.mxu1 %v2165_v48  ;;  %v355_v48 = vmul.f32 0.2, %v291_v47  ;;  %vm309_vm2 = vcmp.gt.f32.partialorder %v277_v44, 0.0 }
  0x4b   :  { %vm322_vm5 = vcmp.gt.f32.partialorder %v290_v45, 0.0 }
  0x4c   :  { %2009 = vmatpush3.bf16.msra.mxu0 %v2166_v49  ;;  %v341_v49 = vmul.f32 0.2, %v277_v44  ;;  %v387_v57 = vsel %vm323_vm1, %v291_v47, %v355_v48  ;;  %v25_v47 = vld [vmem:[%s2848_s0 + $0x38] sm:$0xff] }
  0x4d   :  { %2031 = vmatpush3.bf16.msra.mxu1 %v2167_v50  ;;  %2010 = vmatprep.subr.bf16.mxu0 %v2168_v51  ;;  %v357_v50 = vmul.f32 0.2, %v293_v56  ;;  %v371_v51 = vsel %vm307_vm0, %v275_v52, %v339_v55  ;;  %v32_v52 = vld [vmem:[%s2848_s0 + $0x70] sm:$0xff]  ;;  %v48_v55 = vunpack.c.l.bf16 %v25_v47  ;;  %v49_v48 = vunpack.c.h.bf16 %v25_v47 }
  0x4e   :  { %2032 = vmatprep.subr.bf16.mxu1 %v2169_v53  ;;  %v403_v59 = vpack.c.bf16 %v387_v57, %v371_v51  ;;  %v373_v53 = vsel %vm309_vm2, %v277_v44, %v341_v49  ;;  %v2217_v51 = vld [vmem:[%s2847_s1 + $0x3f8] sm:$0xff]  }
  0x50   :  { %2011 = vmatpush3.bf16.msra.mxu0 %v2170_v54  ;;  %v389_v54 = vsel %vm325_vm3, %v293_v56, %v357_v50  ;;  %1630 = vmatprep.mubr.bf16.mxu0 %v403_v59  ;;  %v62_v56 = vunpack.c.l.bf16 %v32_v52 }
  0x51   :  { %2033 = vmatpush3.bf16.msra.mxu1 %v2171_v27  ;;  %2012 = vmatprep.subr.bf16.mxu0 %v2172_v34  ;;  %v338_v27 = vmul.f32 0.2, %v274_v58  ;;  %v405_v34 = vpack.c.bf16 %v389_v54, %v373_v53 }
  0x52   :  { %2034 = vmatprep.subr.bf16.mxu1 %v2173_v40  ;;  %v354_v40 = vmul.f32 0.2, %v290_v45  ;;  %v178_v54 = vmul.f32 %v2486_v0, %v62_v56 }
  0x53   :  { %1671 = vmatprep.mubr.bf16.mxu1 %v405_v34  ;;  %v165_v34 = vmul.f32 %v2477_v36, %v49_v48 }
  0x54   :  { %2013 = vmatpush3.bf16.msra.mxu0 %v2174_v3  ;;  %v292_v3 = vadd.f32 %v2465_v60, %v176_v39  ;;  %v2192_v60 = vld [vmem:[%s2847_s1 + $0x348] sm:$0xff]   ;;  %v24_v39 = vld [vmem:[%s2848_s0 + $0x30] sm:$0xff] }
  0x55   :  { %2035 = vmatpush3.bf16.msra.mxu1 %v2175_v5  ;;  %2014 = vmatprep.subr.bf16.mxu0 %v2176_v6  ;;  %v2190_v5 = vld [vmem:[%s2847_s1 + $0x300] sm:$0xff]   ;;  %v370_v6 = vsel %vm306_vm4, %v274_v58, %v338_v27  ;;  %v2216_v58 = vld [vmem:[%s2847_s1 + $0x378] sm:$0xff]   ;;  %v47_v44 = vunpack.c.h.bf16 %v24_v39 }
  0x56   :  { %2036 = vmatprep.subr.bf16.mxu1 %v2177_v7  ;;  %v340_v7 = vmul.f32 0.2, %v276_v32  ;;  %vm324_vm7 = vcmp.gt.f32.partialorder %v292_v3, 0.0  ;;  %v2218_v27 = vld [vmem:[%s2847_s1 + $0x338] sm:$0xff]  }
  0x57   :  { %v163_v57 = vmul.f32 %v2471_v61, %v47_v44 }
  0x58   :  { %2015 = vmatpush3.bf16.msra.mxu0 %v2178_v8  ;;  %v386_v8 = vsel %vm322_vm5, %v290_v45, %v354_v40  ;;  %v63_v45 = vunpack.c.h.bf16 %v32_v52 }
  0x59   :  { %2037 = vmatpush3.bf16.msra.mxu1 %v2179_v9  ;;  %2016 = vmatprep.subr.bf16.mxu0 %v2180_v10  ;;  %v356_v9 = vmul.f32 0.2, %v292_v3  ;;  %v2191_v10 = vld [vmem:[%s2847_s1 + $0x380] sm:$0xff]  }
  0x5a   :  { %2038 = vmatprep.subr.bf16.mxu1 %v2181_v11  ;;  %v402_v11 = vpack.c.bf16 %v386_v8, %v370_v6  ;;  %v179_v59 = vmul.f32 %v2471_v61, %v63_v45  ;;  %v279_v61 = vadd.f32 %v2474_v62, %v163_v57  ;;  %v2219_v8 = vld [vmem:[%s2847_s1 + $0x3b8] sm:$0xff]  }
  0x5c   :  { %2017 = vmatpush3.bf16.msra.mxu0 %v2182_v12  ;;  %v372_v12 = vsel %vm308_vm6, %v276_v32, %v340_v7  ;;  %v33_v32 = vld [vmem:[%s2848_s0 + $0x78] sm:$0xff]  ;;  %v295_v6 = vadd.f32 %v2474_v62, %v179_v59  ;;  %v294_v7 = vadd.f32 %v2489_v1, %v178_v54  ;;  %vm311_vm8 = vcmp.gt.f32.partialorder %v279_v61, 0.0 }
  0x5d   :  { %2039 = vmatpush3.bf16.msra.mxu1 %v2183_v13  ;;  %2018 = vmatprep.subr.bf16.mxu0 %v2184_v14  ;;  %v388_v13 = vsel %vm324_vm7, %v292_v3, %v356_v9  ;;  %v2193_v14 = vld [vmem:[%s2847_s1 + $0x3c8] sm:$0xff]   ;;  %v64_v49 = vunpack.c.l.bf16 %v33_v32  ;;  %v65_v50 = vunpack.c.h.bf16 %v33_v32  ;;  %v164_v3 = vmul.f32 %v2492_v2, %v48_v55 }
  0x5e   :  { %2040 = vmatprep.subr.bf16.mxu1 %v2185_v23  ;;  %v404_v15 = vpack.c.bf16 %v388_v13, %v372_v12  ;;  %v2201_v23 = vld [vmem:[%s2847_s1 + $0x3d8] sm:$0xff]   ;;  %vm327_vm9 = vcmp.gt.f32.partialorder %v295_v6, 0.0  ;;  %v343_v62 = vmul.f32 0.2, %v279_v61  ;;  %vm326_vm13 = vcmp.gt.f32.partialorder %v294_v7, 0.0 }
  0x5f   :  { %v181_v40 = vmul.f32 %v2477_v36, %v65_v50  ;;  %v281_v36 = vadd.f32 %v2483_v63, %v165_v34 }
  0x60   :  { %2019 = vmatpush3.bf16.msra.mxu0 %v2186_v28  ;;  %v2206_v28 = vld [vmem:[%s2847_s1 + $0x320] sm:$0xff]  }
  0x61   :  { %2041 = vmatpush3.bf16.msra.mxu1 %v2187_v35  ;;  %2048 = vmatprep.subr.bf16.mxu0 %v2188_v37  ;;  %v2211_v35 = vld [vmem:[%s2847_s1 + $0x3a8] sm:$0xff]   ;;  %v46_v37 = vunpack.c.l.bf16 %v24_v39  ;;  %v297_v9 = vadd.f32 %v2483_v63, %v181_v40  ;;  %vm313_vm10 = vcmp.gt.f32.partialorder %v281_v36, 0.0 }
  0x62   :  { %2070 = vmatprep.subr.bf16.mxu1 %v2189_v46  ;;  %v2215_v46 = vld [vmem:[%s2847_s1 + $0x3b0] sm:$0xff]  }
  0x63   :  { %1631 = vmatmul.mubr.bf16.vlgmr.msra.gmra.mrb[8].mxu0 %v402_v11  ;;  %v162_v53 = vmul.f32 %v2486_v0, %v46_v37  ;;  %v359_v11 = vmul.f32 0.2, %v295_v6  ;;  %vm329_vm11 = vcmp.gt.f32.partialorder %v297_v9, 0.0  ;;  %v361_v12 = vmul.f32 0.2, %v297_v9 }
  0x64   :  { %2049 = vmatpush3.bf16.msra.mxu0 %v2190_v5  ;;  %1672 = vmatmul.mubr.bf16.vlgmr.msra.gmra.mrb[8].mxu1 %v404_v15  ;;  %v180_v5 = vmul.f32 %v2492_v2, %v64_v49  ;;  %v280_v2 = vadd.f32 %v2498_v4, %v164_v3 }
  0x65   :  { %2050 = vmatprep.subr.bf16.mxu0 %v2192_v60  ;;  %2071 = vmatpush3.bf16.msra.mxu1 %v2191_v10  ;;  %v278_v0 = vadd.f32 %v2489_v1, %v162_v53  ;;  %v345_v1 = vmul.f32 0.2, %v281_v36  ;;  %v375_v60 = vsel %vm311_vm8, %v279_v61, %v343_v62  ;;  %v391_v13 = vsel %vm327_vm9, %v295_v6, %v359_v11 }
  0x66   :  { %2072 = vmatprep.subr.bf16.mxu1 %v2193_v14  ;;  %v296_v10 = vadd.f32 %v2498_v4, %v180_v5  ;;  %v407_v63 = vpack.c.bf16 %v391_v13, %v375_v60  ;;  %v393_v15 = vsel %vm329_vm11, %v297_v9, %v361_v12  ;;  %vm312_vm14 = vcmp.gt.f32.partialorder %v280_v2, 0.0 }
  0x67   :  { %vm310_vm12 = vcmp.gt.f32.partialorder %v278_v0, 0.0  ;;  %v377_v14 = vsel %vm313_vm10, %v281_v36, %v345_v1 }
  0x68   :  { %2051 = vmatpush3.bf16.msra.mxu0 %v2194_v16  ;;  %v342_v16 = vmul.f32 0.2, %v278_v0  ;;  %v409_v4 = vpack.c.bf16 %v393_v15, %v377_v14  ;;  %vm328_vm15 = vcmp.gt.f32.partialorder %v296_v10, 0.0  ;;  %1712 = vmatprep.mubr.bf16.mxu0 %v407_v63 }
  0x69   :  { %2052 = vmatprep.subr.bf16.mxu0 %v2196_v18  ;;  %2073 = vmatpush3.bf16.msra.mxu1 %v2195_v17  ;;  %v358_v17 = vmul.f32 0.2, %v294_v7 }
  0x6a   :  { %2074 = vmatprep.subr.bf16.mxu1 %v2197_v19  ;;  %v374_v18 = vsel %vm310_vm12, %v278_v0, %v342_v16  ;;  %v344_v19 = vmul.f32 0.2, %v280_v2  ;;  %1753 = vmatprep.mubr.bf16.mxu1 %v409_v4 }
  0x6c   :  { %2053 = vmatpush3.bf16.msra.mxu0 %v2198_v20  ;;  %v360_v20 = vmul.f32 0.2, %v296_v10 }
  0x6d   :  { %2054 = vmatprep.subr.bf16.mxu0 %v2200_v22  ;;  %2075 = vmatpush3.bf16.msra.mxu1 %v2199_v21  ;;  %v390_v21 = vsel %vm326_vm13, %v294_v7, %v358_v17 }
  0x6e   :  { %2076 = vmatprep.subr.bf16.mxu1 %v2201_v23  ;;  %v406_v22 = vpack.c.bf16 %v390_v21, %v374_v18  ;;  %v376_v23 = vsel %vm312_vm14, %v280_v2, %v344_v19 }
  0x70   :  { %2055 = vmatpush3.bf16.msra.mxu0 %v2202_v24  ;;  %v392_v24 = vsel %vm328_vm15, %v296_v10, %v360_v20 }
  0x71   :  { %2056 = vmatprep.subr.bf16.mxu0 %v2204_v26  ;;  %2077 = vmatpush3.bf16.msra.mxu1 %v2203_v25  ;;  %v408_v25 = vpack.c.bf16 %v392_v24, %v376_v23 }
  0x72   :  { %2078 = vmatprep.subr.bf16.mxu1 %v2205_v41 }
  0x74   :  { %2057 = vmatpush3.bf16.msra.mxu0 %v2206_v28 }
  0x75   :  { %2058 = vmatprep.subr.bf16.mxu0 %v2208_v30  ;;  %2079 = vmatpush3.bf16.msra.mxu1 %v2207_v29 }
  0x76   :  { %2080 = vmatprep.subr.bf16.mxu1 %v2209_v31 }
  0x78   :  { %2059 = vmatpush3.bf16.msra.mxu0 %v2210_v33 }
  0x79   :  { %2060 = vmatprep.subr.bf16.mxu0 %v2212_v38  ;;  %2081 = vmatpush3.bf16.msra.mxu1 %v2211_v35 }
  0x7a   :  { %2082 = vmatprep.subr.bf16.mxu1 %v2213_v43 }
  0x7c   :  { %2061 = vmatpush3.bf16.msra.mxu0 %v2214_v42 }
  0x7d   :  { %2062 = vmatprep.subr.bf16.mxu0 %v2216_v58  ;;  %2083 = vmatpush3.bf16.msra.mxu1 %v2215_v46 }
  0x7e   :  { %2084 = vmatprep.subr.bf16.mxu1 %v2217_v51 }
  0x80   :  { %2063 = vmatpush3.bf16.msra.mxu0 %v2218_v27 }
  0x81   :  { %2085 = vmatpush3.bf16.msra.mxu1 %v2219_v8 }
  0x83   :  { %1713 = vmatmul.mubr.bf16.vlgmr.msra.gmra.mrb[12].mxu0 %v406_v22 }
  0x84   :  { %1754 = vmatmul.mubr.bf16.vlgmr.msra.gmra.mrb[12].mxu1 %v408_v25 }
  0xf6   :  { %v1932_v26 = vpop.f32.mrb[0].mxu0 }
  0xf7   :  { %v1933_v41 = vpop.f32.mrb[1].mxu0  ;;  %v1954_v28 = vpop.f32.mrb[0].mxu1 }
  0xf8   :  { %v1934_v29 = vadd.f32 %v1933_v41, %v1932_v26  ;;  %v1935_v30 = vpop.f32.mrb[2].mxu0  ;;  %v1955_v31 = vpop.f32.mrb[1].mxu1 }
  0xf9   :  { %v1936_v33 = vpop.f32.mrb[3].mxu0  ;;  %v1956_v35 = vadd.f32 %v1955_v31, %v1954_v28  ;;  %v1957_v38 = vpop.f32.mrb[2].mxu1 }
  0xfa   :  { %v1937_v43 = vadd.f32 %v1936_v33, %v1935_v30  ;;  %v1958_v42 = vpop.f32.mrb[3].mxu1 }
  0xfb   :  { %v1510_v39 = vadd.f32 %v1956_v35, %v1934_v29  ;;  %v1959_v52 = vadd.f32 %v1958_v42, %v1957_v38 }
  0xfd   :  { %v1513_v47 = vadd.f32 %v1959_v52, %v1937_v43 }
 0x116   :  { %v1976_v58 = vpop.f32.mrb[4].mxu0 }
 0x117   :  { %v1998_v37 = vpop.f32.mrb[4].mxu1  ;;  %v1977_v44 = vpop.f32.mrb[5].mxu0 }
 0x118   :  { %v1978_v56 = vadd.f32 %v1977_v44, %v1976_v58  ;;  %v1999_v45 = vpop.f32.mrb[5].mxu1  ;;  %v1979_v32 = vpop.f32.mrb[6].mxu0 }
 0x119   :  { %v2000_v46 = vadd.f32 %v1999_v45, %v1998_v37  ;;  %v2001_v55 = vpop.f32.mrb[6].mxu1  ;;  %v1980_v48 = vpop.f32.mrb[7].mxu0 }
 0x11a   :  { %v1551_v49 = vadd.f32 %v1978_v56, %v1510_v39  ;;  %v1981_v50 = vadd.f32 %v1980_v48, %v1979_v32  ;;  %v2002_v51 = vpop.f32.mrb[7].mxu1 }
 0x11b   :  { %v2003_v57 = vadd.f32 %v2002_v51, %v2001_v55 }
 0x11c   :  { %v1592_v59 = vadd.f32 %v2000_v46, %v1551_v49  ;;  %v1554_v53 = vadd.f32 %v1981_v50, %v1513_v47 }
 0x11e   :  { %v1595_v54 = vadd.f32 %v2003_v57, %v1554_v53 }
 0x136   :  { %v2020_v27 = vpop.f32.mrb[8].mxu0 }
 0x137   :  { %v2021_v34 = vpop.f32.mrb[9].mxu0  ;;  %v2042_v40 = vpop.f32.mrb[8].mxu1 }
 0x138   :  { %v2022_v3 = vadd.f32 %v2021_v34, %v2020_v27  ;;  %v2023_v5 = vpop.f32.mrb[10].mxu0  ;;  %v2043_v61 = vpop.f32.mrb[9].mxu1 }
 0x139   :  { %v2024_v6 = vpop.f32.mrb[11].mxu0  ;;  %v2044_v7 = vadd.f32 %v2043_v61, %v2042_v40  ;;  %v2045_v8 = vpop.f32.mrb[10].mxu1 }
 0x13a   :  { %v1633_v0 = vadd.f32 %v2022_v3, %v1592_v59  ;;  %v2025_v36 = vadd.f32 %v2024_v6, %v2023_v5  ;;  %v2046_v9 = vpop.f32.mrb[11].mxu1 }
 0x13b   :  { %v2047_v62 = vadd.f32 %v2046_v9, %v2045_v8 }
 0x13c   :  { %v1674_v2 = vadd.f32 %v2044_v7, %v1633_v0  ;;  %v1636_v10 = vadd.f32 %v2025_v36, %v1595_v54 }
 0x13e   :  { %v1677_v11 = vadd.f32 %v2047_v62, %v1636_v10 }
 0x156   :  { %v2064_v1 = vpop.f32.mrb[12].mxu0 }
 0x157   :  { %v2086_v12 = vpop.f32.mrb[12].mxu1  ;;  %v2065_v60 = vpop.f32.mrb[13].mxu0 }
 0x158   :  { %v2066_v13 = vadd.f32 %v2065_v60, %v2064_v1  ;;  %v2087_v63 = vpop.f32.mrb[13].mxu1  ;;  %v2067_v14 = vpop.f32.mrb[14].mxu0 }
 0x159   :  { %v2088_v15 = vadd.f32 %v2087_v63, %v2086_v12  ;;  %v2089_v16 = vpop.f32.mrb[14].mxu1  ;;  %v2068_v4 = vpop.f32.mrb[15].mxu0 }
 0x15a   :  { %v1715_v17 = vadd.f32 %v2066_v13, %v1674_v2  ;;  %v2069_v18 = vadd.f32 %v2068_v4, %v2067_v14  ;;  %v2090_v19 = vpop.f32.mrb[15].mxu1 }
 0x15b   :  { %v2091_v20 = vadd.f32 %v2090_v19, %v2089_v16 }
 0x15c   :  { %v1756_v21 = vadd.f32 %v2088_v15, %v1715_v17  ;;  %v1718_v22 = vadd.f32 %v2069_v18, %v1677_v11 }
 0x15e   :  { %v1762_v23 = vand.u32 2147483647, %v1756_v21  ;;  %v1759_v24 = vadd.f32 %v2091_v20, %v1718_v22  ;;  %vm1770_vm0 = vcmp.ge.f32.partialorder %v1756_v21, 0.0 }
 0x160   :  { %v1764_v25 = vsub.f32 0.0, %v1762_v23  ;;  %v1763_v26 = vand.u32 2147483647, %v1759_v24  ;;  %vm1771_vm1 = vcmp.ge.f32.partialorder %v1759_v24, 0.0 }
 0x162   :  { %v1766_v41 = vmul.f32 1.442695, %v1764_v25  ;;  %v1765_v28 = vsub.f32 0.0, %v1763_v26 }
 0x164   :  { %2220 = vpow2.f32 %v1766_v41  ;;  %v1768_v29 = vmul.f32 1.442695, %v1765_v28 }
 0x166   :  { %2222 = vpow2.f32 %v1768_v29 }
 0x16e   :  { %v2221_v30 = vpop.eup %2220 }
 0x16f   :  { %v1772_v31 = vadd.f32 1.0, %v2221_v30 }
 0x170   :  { %v2223_v33 = vpop.eup %2222 }
 0x171   :  { %2224 = vrcp.f32 %v1772_v31  ;;  %v1773_v35 = vadd.f32 1.0, %v2223_v33 }
 0x173   :  { %2226 = vrcp.f32 %v1773_v35 }
 0x17b   :  { %v2225_v38 = vpop.eup %2224 }
 0x17c   :  { %v1778_v43 = vmul.f32 %v2225_v38, %v2221_v30 }
 0x17d   :  { %v2227_v42 = vpop.eup %2226 }
 0x17e   :  { %v1780_v39 = vsel %vm1770_vm0, %v2225_v38, %v1778_v43  ;;  %v1779_v52 = vmul.f32 %v2227_v42, %v2223_v33 }
 0x17f   :  { %1782 = vst [vmem:[%s2851_s4] sm:$0xff] %v1780_v39 }
 0x180   :  { %v1781_v47 = vsel %vm1771_vm1, %v2227_v42, %v1779_v52 }
 0x181   :  { %1783 = vst [vmem:[%s2851_s4 + $0x8] sm:$0xff] %v1781_v47 }

// kernel: _lambda_.6
= control target key start
LH: loop header
LB: loop body
LE: loop exit
PB: predicated region body
PF: predicated region fallthrough
CT: control target
= control target key end

     0   :  { %s3881_s21 = smov 0   ;;  %s4850_s0 = inlined_call_operand.vmem [shape: bf16[2,8,4,256], index: 0, kind: input, shape index: {}]   ;;  %s4851_s1 = inlined_call_operand.vmem [shape: bf16[4,4,128,128], index: 1, kind: input, shape index: {}]   ;;  %s4852_s2 = inlined_call_operand.vmem [shape: f32[2,2,128], index: 2, kind: input, shape index: {}]   ;;  %s4853_s3 = inlined_call_operand.vmem [shape: f32[1,128], index: 3, kind: input, shape index: {}]   ;;  %s4854_s4 = inlined_call_operand.vmem [shape: f32[1,128], index: 4, kind: input, shape index: {}]   ;;  %s4855_s5 = inlined_call_operand.vmem [shape: bf16[2,16,128], index: 5, kind: output, shape index: {0}]   ;;  %s4856_s6 = inlined_call_operand.vmem [shape: f32[2,2,128], index: 6, kind: output, shape index: {1}]  }
   0x1 LB: > { %s2765_s22 = sadd.s32 4294967295, %s3839_s21   ;;  %p2769_p0 = scmp.ge.s32.totalorder %s3839_s21, 1  ;;  %s3839_s21 = sphi %s3881_s21, %s17_s21  }
   0x2   : > { %p215_p1 = scmp.lt.s32.totalorder %s3839_s21, 3 }
   0x4   : > { %p216_p2 = pnand %p2769_p0, %p215_p1 }
   0x5   : > { %v3703_v0 = vld [vmem:[%s4851_s1 + $0x80] sm:$0xff] (!%p216_p2)   ;;  %v3841_v1 = vmov (!%p216_p2), 0.0   ;;  %v3704_v2 = vld [vmem:[%s4851_s1 + $0x88] sm:$0xff] (!%p216_p2)   ;;  %vm3842_vm0 = vmmov (!%p216_p2), 0   ;;  %v3706_v5 = vld [vmem:[%s4851_s1 + $0x90] sm:$0xff] (!%p216_p2)   ;;  %vm274_vm1 = vcmask (!%p216_p2), 1041408   ;;  %v292_v30 = vlaneseq (!%p216_p2) }
   0x6   : > { %219 = sbr.rel (%p216_p2) target bundleno = 531 (0x213), region = 40  ;;  %3472 = vmatprep.subr.bf16.mxu0 (!%p216_p2), %v3841_v1  ;;  %3312 = vmatprep.subr.bf16.mxu1 (!%p216_p2), %v3841_v1  ;;  %v3705_v3 = vld [vmem:[%s4851_s1 + $0x100] sm:$0xff] (!%p216_p2)   ;;  %v3707_v4 = vld [vmem:[%s4851_s1 + $0x108] sm:$0xff] (!%p216_p2)   ;;  %v3709_v6 = vld [vmem:[%s4851_s1 + $0x110] sm:$0xff] (!%p216_p2)   ;;  %p249_p3 = scmp.lt.s32.totalorder (!%p216_p2), %s2765_s22, 1  ;;  %vm521_vm9 = vcmask (!%p216_p2), 1040384  }
   0x7   : > { %3473 = vmatpush3.bf16.msra.mxu0 (!%p216_p2), %v3703_v0  ;;  %3488 = vmatprep.mubr.msk.bf16.mxu0 (!%p216_p2), %vm3842_vm0, %v3841_v1  ;;  %v3708_v7 = vld [vmem:[%s4851_s1 + $0x98] sm:$0xff] (!%p216_p2)   ;;  %v3710_v9 = vld [vmem:[%s4851_s1 + $0xa0] sm:$0xff] (!%p216_p2)   ;;  %v3712_v15 = vld [vmem:[%s4851_s1 + $0xa8] sm:$0xff] (!%p216_p2)   ;;  %v3843_v28 = vmov (!%p216_p2), 1966171168   ;;  %v3984_v32 = vshrl.u32 (!%p216_p2), %v292_v30, 7 }
   0x8   : > { %3474 = vmatprep.subr.bf16.mxu0 (!%p216_p2), %v3841_v1  ;;  %3328 = vmatprep.mubr.msk.bf16.mxu1 (!%p216_p2), %vm3842_vm0, %v3841_v1  ;;  %v3711_v8 = vld [vmem:[%s4851_s1 + $0x118] sm:$0xff] (!%p216_p2)   ;;  %v3713_v10 = vld [vmem:[%s4851_s1 + $0x120] sm:$0xff] (!%p216_p2)   ;;  %v3715_v17 = vld [vmem:[%s4851_s1 + $0x128] sm:$0xff] (!%p216_p2)   ;;  %v290_v29 = vunpack.c.l.s4 (!%p216_p2), %v3843_v28  ;;  %vm522_vm10 = vsmask.f32 (!%p216_p2), 256 }
   0x9   : > { %3313 = vmatpush3.bf16.msra.mxu1 (!%p216_p2), %v3705_v3  ;;  %v272_v11 = vld [vmem:[%s4852_s2] sm:$0x3] (!%p216_p2)  ;;  %v273_v12 = vld [vmem:[%s4852_s2 + $0x2] sm:$0x3] (!%p216_p2)  ;;  %v3714_v19 = vld [vmem:[%s4851_s1 + $0xb0] sm:$0xff] (!%p216_p2)   ;;  %v320_v37 = vsub.s32 (!%p216_p2), 0, %v3984_v32 }
   0xa   : > { %3314 = vmatprep.subr.bf16.mxu1 (!%p216_p2), %v3841_v1  ;;  %v275_v13 = vsel (!%p216_p2), %vm274_vm1, %v272_v11, 0.0  ;;  %v276_v14 = vsel (!%p216_p2), %vm274_vm1, %v273_v12, 0.0  ;;  %v3717_v21 = vld [vmem:[%s4851_s1 + $0x130] sm:$0xff] (!%p216_p2)   ;;  %v3716_v23 = vld [vmem:[%s4851_s1 + $0xb8] sm:$0xff] (!%p216_p2)   ;;  %v291_v31 = vunpack.c.0.s8 (!%p216_p2), %v290_v29  ;;  %v285_v44 = vld [vmem:[%s4853_s3] sm:$0x1] (!%p216_p2) }
   0xb   : > { %3475 = vmatpush3.bf16.msra.mxu0 (!%p216_p2), %v3704_v2  ;;  %v277_v16 = vadd.f32 (!%p216_p2), %v276_v14, %v275_v13  ;;  %v3719_v26 = vld [vmem:[%s4851_s1 + $0x138] sm:$0xff] (!%p216_p2)   ;;  %v306_v59 = vld [vmem:[%s4854_s4] sm:$0x1] (!%p216_p2)  ;;  %vm4094_vm11 = vmand (!%p216_p2), %vm521_vm9, %vm522_vm10 }
   0xc   : > { %3476 = vmatprep.subr.bf16.mxu0 (!%p216_p2), %v3841_v1  ;;  %v294_v34 = vsub.s32 (!%p216_p2), %v291_v31, %v3984_v32 }
   0xd   : > { %3315 = vmatpush3.bf16.msra.mxu1 %v3707_v4  ;;  %v3948_v18 = vmul.f32 0.0078125, %v277_v16  ;;  %s4862_s22 = smov (!%p249_p3, %s2765_s22), 1 }
   0xe   : > { %3316 = vmatprep.subr.bf16.mxu1 %v3841_v1  ;;  %s3159_s13 = sshll.u32 %s4862_s22, 5  ;;  %s3160_s27 = sshll.u32 %s4862_s22, 3 }
   0xf   : > { %3477 = vmatpush3.bf16.msra.mxu0 %v3706_v5  ;;  %v279_v20 = vmul.f32 %v3948_v18, %v3948_v18  ;;  %s3982_s16 = scalar_lea.vmem %s4850_s0, %s3159_s13  ;;  %v3844_v5 = vmov 1983009808   ;;  %s258_s30 = scalar_lea.vmem %s4855_s5, %s3160_s27 }
  0x10   : > { %3478 = vmatprep.subr.bf16.mxu0 %v3841_v1  ;;  %v265_v33 = vld [vmem:[%s3982_s16 + $0x4] sm:$0xf]  ;;  %v267_v35 = vld [vmem:[%s3982_s16 + $0xc] sm:$0xf]  ;;  %v269_v36 = vld [vmem:[%s3982_s16 + $0x14] sm:$0xf] }
  0x11   : > { %3317 = vmatpush3.bf16.msra.mxu1 %v3709_v6  ;;  %v281_v22 = vrot.slane %v279_v20, 7  ;;  %v386_v38 = vrot.slane %v265_v33, 2  ;;  %v3992_v39 = vld [vmem:[%s3982_s16] sm:$0xf]  ;;  %v3995_v41 = vld [vmem:[%s3982_s16 + $0x8] sm:$0xf]  ;;  %v310_v54 = vunpack.c.l.bf16 %v265_v33  ;;  %v312_v55 = vunpack.c.l.bf16 %v267_v35 }
  0x12   : > { %3318 = vmatprep.subr.bf16.mxu1 %v3841_v1  ;;  %v3998_v43 = vld [vmem:[%s3982_s16 + $0x10] sm:$0xf]  ;;  %v4004_v45 = vld [vmem:[%s3982_s16 + $0x18] sm:$0xf]  ;;  %v388_v47 = vrot.slane %v267_v35, 2  ;;  %v390_v48 = vrot.slane %v269_v36, 2  ;;  %v314_v57 = vunpack.c.l.bf16 %v269_v36  ;;  %v647_v6 = vunpack.c.l.s4 %v3844_v5 }
  0x13   : > { %3479 = vmatpush3.bf16.msra.mxu0 %v3708_v7  ;;  %v283_v24 = vsub.f32 %v3948_v18, %v281_v22  ;;  %v385_v49 = vrot.slane %v3992_v39, 2  ;;  %v387_v50 = vrot.slane %v3995_v41, 2  ;;  %v389_v52 = vrot.slane %v3998_v43, 2  ;;  %s2774_s7 = sshll.u32 %s4862_s22, 1 }
  0x14   : > { %3480 = vmatprep.subr.bf16.mxu0 %v3841_v1  ;;  %v391_v53 = vrot.slane %v4004_v45, 2  ;;  %v402_v58 = vunpack.c.l.bf16 %v386_v38  ;;  %v404_v60 = vunpack.c.l.bf16 %v388_v47  ;;  %v406_v61 = vunpack.c.l.bf16 %v390_v48  ;;  %s262_s10 = scalar_lea.vmem %s4856_s6, %s2774_s7 }
  0x15   : > { %3319 = vmatpush3.bf16.msra.mxu1 %v3711_v8  ;;  %v284_v25 = vmax.f32 %v283_v24, 0.0  ;;  %v401_v62 = vunpack.c.l.bf16 %v385_v49  ;;  %v403_v63 = vunpack.c.l.bf16 %v387_v50  ;;  %v405_v3 = vunpack.c.l.bf16 %v389_v52 }
  0x16   : > { %3320 = vmatprep.subr.bf16.mxu1 %v3841_v1  ;;  %v407_v4 = vunpack.c.l.bf16 %v391_v53  ;;  %v648_v20 = vunpack.c.0.s8 %v647_v6 }
  0x17   : > { %3481 = vmatpush3.bf16.msra.mxu0 %v3710_v9  ;;  %v286_v27 = vadd.f32 1e-05, %v284_v25 }
  0x18   : > { %3482 = vmatprep.subr.bf16.mxu0 %v3841_v1 }
  0x19   : > { %3321 = vmatpush3.bf16.msra.mxu1 %v3713_v10  ;;  %3831 = vrsqrt.f32 %v286_v27 }
  0x1a   : > { %3322 = vmatprep.subr.bf16.mxu1 %v3841_v1 }
  0x1b   : > { %3483 = vmatpush3.bf16.msra.mxu0 %v3712_v15 }
  0x1c   : > { %3484 = vmatprep.subr.bf16.mxu0 %v3841_v1 }
  0x1d   : > { %3323 = vmatpush3.bf16.msra.mxu1 %v3715_v17 }
  0x1e   : > { %3324 = vmatprep.subr.bf16.mxu1 %v3841_v1 }
  0x1f   : > { %3485 = vmatpush3.bf16.msra.mxu0 %v3714_v19  ;;  %v4035_v19 = vld [vmem:[%s3982_s16 + $0x1c] sm:$0xf] }
  0x20   : > { %3486 = vmatprep.subr.bf16.mxu0 %v3841_v1 }
  0x21   : > { %3325 = vmatpush3.bf16.msra.mxu1 %v3717_v21  ;;  %v316_v21 = vunpack.c.l.bf16 %v4035_v19 }
  0x22   : > { %3326 = vmatprep.subr.bf16.mxu1 %v3841_v1 }
  0x23   : > { %3487 = vmatpush3.bf16.msra.mxu0 %v3716_v23  ;;  %v3832_v40 = vpop.eup %3831 }
  0x24   : > { %3492 = vmatprep.subr.bf16.mxu0 %v3841_v1  ;;  %v295_v42 = vrot.slane %v3832_v40, %v294_v34 }
  0x25   : > { %3327 = vmatpush3.bf16.msra.mxu1 %v3719_v26 }
  0x26   : > { %3332 = vmatprep.subr.bf16.mxu1 %v3841_v1  ;;  %v296_v46 = vcombine.high %v295_v42, %v295_v42 }
  0x28   : > { %v303_v51 = vrot.slane %v296_v46, %v294_v34  ;;  %v4049_v34 = vsub.s32 %v648_v20, %v3984_v32  ;;  %v3845_v46 = vmov 0  }
  0x2a   : > { %v305_v56 = vmul.f32 %v303_v51, %v285_v44 }
  0x2c   : > { %v307_v0 = vmul.f32 %v305_v56, %v3948_v18  ;;  %v4014_v2 = vrot.slane %v305_v56, %v320_v37 }
  0x2e   : > { %v308_v7 = vsub.f32 %v306_v59, %v307_v0  ;;  %v4017_v8 = vmul.f32 %v4014_v2, %v310_v54  ;;  %v4020_v9 = vmul.f32 %v4014_v2, %v312_v55  ;;  %v4023_v10 = vmul.f32 %v4014_v2, %v314_v57  ;;  %v3718_v55 = vld [vmem:[%s4851_s1 + $0x180] sm:$0xff]  }
  0x2f   : > { %v410_v11 = vmul.f32 %v402_v58, %v4014_v2  ;;  %v412_v12 = vmul.f32 %v404_v60, %v4014_v2  ;;  %v414_v13 = vmul.f32 %v406_v61, %v4014_v2  ;;  %v409_v14 = vmul.f32 %v401_v62, %v4014_v2  ;;  %v3720_v61 = vld [vmem:[%s4851_s1 + $0x188] sm:$0xff]  }
  0x30   : > { %v4029_v15 = vrot.slane %v308_v7, %v320_v37  ;;  %v411_v16 = vmul.f32 %v403_v63, %v4014_v2  ;;  %v413_v17 = vmul.f32 %v405_v3, %v4014_v2  ;;  %v415_v18 = vmul.f32 %v407_v4, %v4014_v2 }
  0x31   : > { %v4046_v29 = vmul.f32 %v4014_v2, %v316_v21 }
  0x32   : > { %v418_v22 = vadd.f32 %v410_v11, %v4029_v15  ;;  %v420_v23 = vadd.f32 %v412_v12, %v4029_v15  ;;  %v422_v24 = vadd.f32 %v414_v13, %v4029_v15  ;;  %v417_v25 = vadd.f32 %v409_v14, %v4029_v15 }
  0x33   : > { %v419_v26 = vadd.f32 %v411_v16, %v4029_v15  ;;  %v421_v27 = vadd.f32 %v413_v17, %v4029_v15  ;;  %v423_v28 = vadd.f32 %v415_v18, %v4029_v15  ;;  %v3751_v16 = vld [vmem:[%s4851_s1 + $0x238] sm:$0xff]  }
  0x34   : > { %vm426_vm2 = vcmp.gt.f32.partialorder %v418_v22, 0.0  ;;  %vm428_vm3 = vcmp.gt.f32.partialorder %v420_v23, 0.0  ;;  %vm430_vm4 = vcmp.gt.f32.partialorder %v422_v24, 0.0  ;;  %v434_v30 = vmul.f32 0.2, %v418_v22 }
  0x35   : > { %v436_v31 = vmul.f32 0.2, %v420_v23  ;;  %v438_v33 = vmul.f32 0.2, %v422_v24  ;;  %vm425_vm5 = vcmp.gt.f32.partialorder %v417_v25, 0.0  ;;  %vm427_vm6 = vcmp.gt.f32.partialorder %v419_v26, 0.0 }
  0x36   : > { %v4051_v35 = vsel %vm426_vm2, %v418_v22, %v434_v30  ;;  %v433_v36 = vmul.f32 0.2, %v417_v25  ;;  %v435_v42 = vmul.f32 0.2, %v419_v26  ;;  %vm429_vm7 = vcmp.gt.f32.partialorder %v421_v27, 0.0 }
  0x37   : > { %v4053_v37 = vsel %vm428_vm3, %v420_v23, %v436_v31  ;;  %v4055_v38 = vsel %vm430_vm4, %v422_v24, %v438_v33  ;;  %v4059_v40 = vpack.c.bf16 %v4051_v35, %v4051_v35  ;;  %vm431_vm8 = vcmp.gt.f32.partialorder %v423_v28, 0.0 }
  0x38   : > { %v2973_v44 = vpack.c.bf16 %v4055_v38, %v4053_v37  ;;  %v437_v32 = vmul.f32 0.2, %v421_v27  ;;  %v439_v48 = vmul.f32 0.2, %v423_v28  ;;  %v4065_v49 = vsel %vm425_vm5, %v417_v25, %v433_v36 }
  0x39   : > { %v1647_v47 = vcombine.low %v3845_v46, %v4059_v40  ;;  %v4067_v50 = vsel %vm427_vm6, %v419_v26, %v435_v42  ;;  %v449_v56 = vpack.c.bf16 %v4065_v49, %v4065_v49  ;;  %v4100_v17 = vpack.c.bf16 %v4053_v37, %v4053_v37  ;;  %v3722_v26 = vld [vmem:[%s4851_s1 + $0x190] sm:$0xff]  }
  0x3a   : > { %v1662_v52 = vrot.slane %v2973_v44, %v4049_v34  ;;  %v4071_v53 = vsel %vm429_vm7, %v421_v27, %v437_v32  ;;  %v4073_v54 = vsel %vm431_vm8, %v423_v28, %v439_v48  ;;  %v451_v57 = vpack.c.bf16 %v4067_v50, %v4067_v50  ;;  %v3724_v48 = vld [vmem:[%s4851_s1 + $0x198] sm:$0xff]  }
  0x3b   : > { %v1655_v51 = vrot.slane %v1647_v47, %v4049_v34  ;;  %v453_v59 = vpack.c.bf16 %v4071_v53, %v4071_v53  ;;  %v455_v60 = vpack.c.bf16 %v4073_v54, %v4073_v54  ;;  %v458_v62 = vshrl.u32 %v449_v56, 16 }
  0x3c   : > { %v461_v63 = vshll.u32 %v449_v56, 16  ;;  %v472_v0 = vshrl.u32 %v451_v57, 16  ;;  %v475_v3 = vshll.u32 %v451_v57, 16  ;;  %v392_v23 = vrot.slane %v4035_v19, 2 }
  0x3d   : > { %v1663_v58 = vcombine.low %v1655_v51, %v1662_v52  ;;  %v486_v4 = vshrl.u32 %v453_v59, 16  ;;  %v489_v5 = vshll.u32 %v453_v59, 16  ;;  %v500_v6 = vshrl.u32 %v455_v60, 16 }
  0x3e   : > { %v503_v7 = vshll.u32 %v455_v60, 16  ;;  %v460_v11 = vrot.slane %v458_v62, 7  ;;  %v474_v12 = vrot.slane %v472_v0, 7  ;;  %v4112_v27 = vpack.c.bf16 %v4055_v38, %v4055_v38 }
  0x3f   : > { %3489 = vmatmul.mubr.bf16.vlgmr.msra.gmra.mrb[0].mxu0 %v1663_v58  ;;  %v488_v13 = vrot.slane %v486_v4, 7  ;;  %v502_v14 = vrot.slane %v500_v6, 7  ;;  %v479_v31 = vshrl.u32 %v4100_v17, 16  ;;  %v309_v33 = vunpack.c.l.bf16 %v3992_v39 }
  0x40   : > { %3493 = vmatpush3.bf16.msra.mxu0 %v3718_v55  ;;  %3508 = vmatprep.mubr.msk.bf16.mxu0 %vm3842_vm0, %v3841_v1  ;;  %v463_v18 = vor.u32 %v461_v63, %v460_v11  ;;  %v477_v20 = vor.u32 %v475_v3, %v474_v12  ;;  %v482_v44 = vshll.u32 %v4100_v17, 16  ;;  %v311_v32 = vunpack.c.l.bf16 %v3995_v41  ;;  %v3721_v41 = vld [vmem:[%s4851_s1] sm:$0xff]  }
  0x41   : > { %3494 = vmatprep.subr.bf16.mxu0 %v3841_v1  ;;  %v491_v21 = vor.u32 %v489_v5, %v488_v13  ;;  %v505_v22 = vor.u32 %v503_v7, %v502_v14  ;;  %v408_v51 = vunpack.c.l.bf16 %v392_v23  ;;  %v313_v52 = vunpack.c.l.bf16 %v3998_v43 }
  0x42   : > { %v524_v24 = vsel %vm4094_vm11, 0, %v463_v18  ;;  %v526_v25 = vsel %vm4094_vm11, 0, %v477_v20  ;;  %v3024_v39 = vpack.c.bf16 %v4053_v37, %v4051_v35  ;;  %v493_v57 = vshrl.u32 %v4112_v27, 16  ;;  %v3728_v20 = vld [vmem:[%s4851_s1 + $0x1a8] sm:$0xff]  }
  0x43   : > { %v528_v28 = vsel %vm4094_vm11, 0, %v491_v21  ;;  %v530_v19 = vsel %vm4094_vm11, 0, %v505_v22  ;;  %v644_v30 = vcombine.low %v524_v24, %v526_v25  ;;  %v416_v58 = vmul.f32 %v408_v51, %v4014_v2  ;;  %v3725_v24 = vld [vmem:[%s4851_s1 + $0x10] sm:$0xff]  }
  0x44   : > { %3495 = vmatpush3.bf16.msra.mxu0 %v3720_v61  ;;  %v645_v36 = vcombine.low %v528_v28, %v530_v19  ;;  %v1006_v42 = vcombine.low %v526_v25, %v528_v28  ;;  %v1007_v56 = vcombine.low %v530_v19, %v3845_v46  ;;  %v3050_v43 = vpack.c.bf16 %v4071_v53, %v4067_v50 }
  0x45   : > { %3496 = vmatprep.subr.bf16.mxu0 %v3841_v1  ;;  %v652_v47 = vrot.slane %v644_v30, %v4049_v34  ;;  %v2031_v59 = vcombine.low %v455_v60, %v3845_v46  ;;  %v481_v61 = vrot.slane %v479_v31, 7  ;;  %v2998_v35 = vpack.c.bf16 %v4067_v50, %v4065_v49  ;;  %v3726_v49 = vld [vmem:[%s4851_s1 + $0x1a0] sm:$0xff]  }
  0x46   : > { %v659_v55 = vrot.slane %v645_v36, %v4049_v34  ;;  %v2999_v37 = vpack.c.bf16 %v4073_v54, %v4071_v53  ;;  %v424_v63 = vadd.f32 %v416_v58, %v4029_v15  ;;  %v2038_v0 = vrot.slane %v3050_v43, %v4049_v34  ;;  %v3723_v54 = vld [vmem:[%s4851_s1 + $0x8] sm:$0xff]  }
  0x47   : > { %v2045_v3 = vrot.slane %v2031_v59, %v4049_v34  ;;  %v1014_v4 = vrot.slane %v1006_v42, %v4049_v34  ;;  %v496_v5 = vshll.u32 %v4112_v27, 16  ;;  %v315_v60 = vunpack.c.l.bf16 %v4004_v45  ;;  %v3732_v59 = vld [vmem:[%s4851_s1 + $0x1b8] sm:$0xff]  }
  0x48   : > { %3497 = vmatpush3.bf16.msra.mxu0 %v3722_v26  ;;  %v660_v62 = vcombine.low %v652_v47, %v659_v55  ;;  %v1021_v50 = vrot.slane %v1007_v56, %v4049_v34  ;;  %v338_v53 = vadd.f32 %v4029_v15, %v4017_v8  ;;  %vm432_vm12 = vcmp.gt.f32.partialorder %v424_v63, 0.0 }
  0x49   : > { %3498 = vmatprep.subr.bf16.mxu0 %v3841_v1  ;;  %v440_v45 = vmul.f32 0.2, %v424_v63  ;;  %v4161_v6 = vcombine.low %v2038_v0, %v2045_v3  ;;  %v340_v7 = vadd.f32 %v4029_v15, %v4020_v9  ;;  %v495_v11 = vrot.slane %v493_v57, 7 }
  0x4a   : > { %3329 = vmatmul.mubr.bf16.vlgmr.msra.gmra.mrb[0].mxu1 %v660_v62  ;;  %v4167_v12 = vrot.slane %v2998_v35, %v4049_v34  ;;  %v4171_v8 = vcombine.low %v1014_v4, %v1021_v50  ;;  %v342_v13 = vadd.f32 %v4029_v15, %v4023_v10  ;;  %v4176_v14 = vrot.slane %v2999_v37, %v4049_v34  ;;  %v3731_v50 = vld [vmem:[%s4851_s1 + $0x28] sm:$0xff]  }
  0x4b   : > { %3333 = vmatpush3.bf16.msra.mxu1 %v3721_v41  ;;  %3348 = vmatprep.mubr.msk.bf16.mxu1 %vm3842_vm0, %v3841_v1  ;;  %v465_v17 = vshrl.u32 %v4059_v40, 16  ;;  %v484_v9 = vor.u32 %v482_v44, %v481_v61  ;;  %v448_v18 = vsel %vm432_vm12, %v424_v63, %v440_v45  ;;  %v4184_v23 = vrot.slane %v3024_v39, %v4049_v34  ;;  %v3729_v39 = vld [vmem:[%s4851_s1 + $0x20] sm:$0xff]  }
  0x4c   : > { %3499 = vmatpush3.bf16.msra.mxu0 %v3724_v48  ;;  %3334 = vmatprep.subr.bf16.mxu1 %v3841_v1  ;;  %v456_v21 = vpack.c.bf16 %v448_v18, %v448_v18  ;;  %v3025_v22 = vpack.c.bf16 %v448_v18, %v4055_v38  ;;  %v323_v10 = vmul.f32 %v4014_v2, %v309_v33  ;;  %v468_v25 = vshll.u32 %v4059_v40, 16  ;;  %v3727_v40 = vld [vmem:[%s4851_s1 + $0x18] sm:$0xff]   ;;  %v3730_v33 = vld [vmem:[%s4851_s1 + $0x1b0] sm:$0xff]  }
  0x4d   : > { %3500 = vmatprep.subr.bf16.mxu0 %v3841_v1  ;;  %v325_v26 = vmul.f32 %v4014_v2, %v311_v32  ;;  %v327_v27 = vmul.f32 %v4014_v2, %v313_v52  ;;  %v329_v38 = vmul.f32 %v4014_v2, %v315_v60  ;;  %vm346_vm13 = vcmp.gt.f32.partialorder %v338_v53, 0.0 }
  0x4e   : > { %v507_v28 = vshrl.u32 %v456_v21, 16  ;;  %v510_v19 = vshll.u32 %v456_v21, 16  ;;  %v4197_v30 = vrot.slane %v3025_v22, %v4049_v34  ;;  %v4200_v31 = vadd.f32 %v4029_v15, %v323_v10 }
  0x4f   : > { %3335 = vmatpush3.bf16.msra.mxu1 %v3723_v54  ;;  %v4209_v2 = vadd.f32 %v4029_v15, %v325_v26  ;;  %v4212_v36 = vadd.f32 %v4029_v15, %v327_v27  ;;  %v4215_v42 = vadd.f32 %v4029_v15, %v329_v38  ;;  %vm348_vm14 = vcmp.gt.f32.partialorder %v340_v7, 0.0 }
  0x50   : > { %3501 = vmatpush3.bf16.msra.mxu0 %v3726_v49  ;;  %3336 = vmatprep.subr.bf16.mxu1 %v3841_v1  ;;  %v509_v44 = vrot.slane %v507_v28, 7  ;;  %v1920_v32 = vcombine.low %v4184_v23, %v4197_v30  ;;  %v467_v47 = vrot.slane %v465_v17, 7  ;;  %vm350_vm15 = vcmp.gt.f32.partialorder %v342_v13, 0.0 }
  0x51   : > { %3502 = vmatprep.subr.bf16.mxu0 %v3841_v1  ;;  %v354_v48 = vmul.f32 0.2, %v338_v53  ;;  %v356_v51 = vmul.f32 0.2, %v340_v7  ;;  %v498_v52 = vor.u32 %v496_v5, %v495_v11  ;;  %v358_v56 = vmul.f32 0.2, %v342_v13 }
  0x52   : > { %v4221_v55 = vor.u32 %v510_v19, %v509_v44  ;;  %v1793_v57 = vcombine.low %v4167_v12, %v4176_v14  ;;  %v4230_v41 = vsel %vm4094_vm11, 0, %v484_v9  ;;  %v470_v63 = vor.u32 %v468_v25, %v467_v47  ;;  %v3736_v25 = vld [vmem:[%s4851_s1 + $0x288] sm:$0xff]   ;;  %v3733_v19 = vld [vmem:[%s4851_s1 + $0x30] sm:$0xff]  }
  0x53   : > { %3337 = vmatpush3.bf16.msra.mxu1 %v3725_v24  ;;  %v4233_v58 = vsel %vm346_vm13, %v338_v53, %v354_v48  ;;  %v4235_v43 = vsel %vm348_vm14, %v340_v7, %v356_v51  ;;  %v4243_v62 = vsel %vm350_vm15, %v342_v13, %v358_v56  ;;  %vm597_vm2 = vsmask.f32 1280  ;;  %v3734_v53 = vld [vmem:[%s4851_s1 + $0x280] sm:$0xff]  }
  0x54   : > { %3503 = vmatpush3.bf16.msra.mxu0 %v3728_v20  ;;  %3338 = vmatprep.subr.bf16.mxu1 %v3841_v1  ;;  %v531_v61 = vsel %vm4094_vm11, 0, %v4221_v55  ;;  %v370_v35 = vpack.c.bf16 %v4233_v58, %v4233_v58  ;;  %v372_v37 = vpack.c.bf16 %v4235_v43, %v4235_v43  ;;  %v374_v0 = vpack.c.bf16 %v4243_v62, %v4243_v62  ;;  %vm4274_vm3 = vmand %vm274_vm1, %vm597_vm2 }
  0x55   : > { %3504 = vmatprep.subr.bf16.mxu0 %v3841_v1  ;;  %v2871_v3 = vpack.c.bf16 %v4243_v62, %v4235_v43  ;;  %v4263_v54 = vsel %vm4094_vm11, 0, %v498_v52  ;;  %v4270_v17 = vsel %vm4094_vm11, 0, %v470_v63  ;;  %v3738_v52 = vld [vmem:[%s4851_s1 + $0x290] sm:$0xff]   ;;  %vm345_vm1 = vcmp.gt.f32.partialorder %v4200_v31, 0.0 }
  0x56   : > { %v540_v4 = vshrl.u32 %v370_v35, 16  ;;  %v542_v5 = vshll.u32 %v370_v35, 16  ;;  %v554_v60 = vshrl.u32 %v372_v37, 16  ;;  %v556_v49 = vshll.u32 %v372_v37, 16 }
  0x57   : > { %3339 = vmatpush3.bf16.msra.mxu1 %v3727_v40  ;;  %v568_v45 = vshrl.u32 %v374_v0, 16  ;;  %v570_v7 = vshll.u32 %v374_v0, 16  ;;  %v1135_v11 = vcombine.low %v3845_v46, %v370_v35  ;;  %v1150_v14 = vrot.slane %v2871_v3, %v4049_v34  ;;  %v3737_v35 = vld [vmem:[%s4851_s1 + $0x200] sm:$0xff]  }
  0x58   : > { %3505 = vmatpush3.bf16.msra.mxu0 %v3730_v33  ;;  %3340 = vmatprep.subr.bf16.mxu1 %v3841_v1  ;;  %v544_v12 = vrot.slane %v542_v5, 1  ;;  %v558_v13 = vrot.slane %v556_v49, 1  ;;  %v755_v26 = vcombine.low %v3845_v46, %v4270_v17  ;;  %v756_v27 = vcombine.low %v4230_v41, %v4263_v54 }
  0x59   : > { %3506 = vmatprep.subr.bf16.mxu0 %v3841_v1  ;;  %v572_v9 = vrot.slane %v570_v7, 1  ;;  %v1143_v20 = vrot.slane %v1135_v11, %v4049_v34  ;;  %vm347_vm4 = vcmp.gt.f32.partialorder %v4209_v2, 0.0  ;;  %vm349_vm5 = vcmp.gt.f32.partialorder %v4212_v36, 0.0 }
  0x5a   : > { %v545_v21 = vor.u32 %v544_v12, %v540_v4  ;;  %v559_v22 = vor.u32 %v558_v13, %v554_v60  ;;  %v763_v48 = vrot.slane %v755_v26, %v4049_v34  ;;  %v770_v51 = vrot.slane %v756_v27, %v4049_v34  ;;  %v3741_v27 = vld [vmem:[%s4851_s1 + $0x210] sm:$0xff]  }
  0x5b   : > { %3341 = vmatpush3.bf16.msra.mxu1 %v3729_v39  ;;  %v573_v10 = vor.u32 %v572_v9, %v568_v45  ;;  %v4280_v24 = vcombine.low %v1143_v20, %v1150_v14  ;;  %v3735_v39 = vld [vmem:[%s4851_s1 + $0x38] sm:$0xff]   ;;  %vm351_vm6 = vcmp.gt.f32.partialorder %v4215_v42, 0.0  ;;  %v353_v37 = vmul.f32 0.2, %v4200_v31 }
  0x5c   : > { %3507 = vmatpush3.bf16.msra.mxu0 %v3732_v59  ;;  %3342 = vmatprep.subr.bf16.mxu1 %v3841_v1  ;;  %v4293_v38 = vsel %vm4274_vm3, %v545_v21, 0  ;;  %v4297_v28 = vsel %vm4274_vm3, %v559_v22, 0  ;;  %v771_v63 = vcombine.low %v763_v48, %v770_v51  ;;  %v355_v0 = vmul.f32 0.2, %v4209_v2 }
  0x5d   : > { %3512 = vmatprep.subr.bf16.mxu0 %v3841_v1  ;;  %v4305_v40 = vsel %vm4274_vm3, %v573_v10, 0  ;;  %v2159_v33 = vcombine.low %v3845_v46, %v4293_v38  ;;  %v357_v3 = vmul.f32 0.2, %v4212_v36  ;;  %v359_v4 = vmul.f32 0.2, %v4215_v42 }
  0x5e   : > { %v2160_v44 = vcombine.low %v4297_v28, %v4305_v40  ;;  %v361_v5 = vsel %vm345_vm1, %v4200_v31, %v353_v37  ;;  %v4344_v60 = vsel %vm347_vm4, %v4209_v2, %v355_v0  ;;  %v3739_v2 = vld [vmem:[%s4851_s1 + $0x208] sm:$0xff]   ;;  %v344_v37 = vadd.f32 %v4029_v15, %v4046_v29 }
  0x5f   : > { %3509 = vmatmul.mubr.bf16.vlgmr.msra.gmra.mrb[0].mxu0 %v1793_v57  ;;  %3343 = vmatpush3.bf16.msra.mxu1 %v3731_v50  ;;  %v2167_v47 = vrot.slane %v2159_v33, %v4049_v34  ;;  %v3740_v57 = vld [vmem:[%s4851_s1 + $0x298] sm:$0xff]   ;;  %v4347_v49 = vsel %vm349_vm5, %v4212_v36, %v357_v3  ;;  %v367_v50 = vsel %vm351_vm6, %v4215_v42, %v359_v4  ;;  %v3742_v36 = vld [vmem:[%s4851_s1 + $0x2a0] sm:$0xff]   ;;  %v3746_v4 = vld [vmem:[%s4851_s1 + $0x2b0] sm:$0xff]  }
  0x60   : > { %3513 = vmatpush3.bf16.msra.mxu0 %v3734_v53  ;;  %3528 = vmatprep.mubr.msk.bf16.mxu0 %vm3842_vm0, %v3841_v1  ;;  %v2174_v56 = vrot.slane %v2160_v44, %v4049_v34  ;;  %v369_v53 = vpack.c.bf16 %v361_v5, %v361_v5  ;;  %v371_v45 = vpack.c.bf16 %v4344_v60, %v4344_v60  ;;  %vm352_vm7 = vcmp.gt.f32.partialorder %v344_v37, 0.0 }
  0x61   : > { %3514 = vmatprep.subr.bf16.mxu0 %v3841_v1  ;;  %3344 = vmatprep.subr.bf16.mxu1 %v3841_v1  ;;  %v373_v7 = vpack.c.bf16 %v4347_v49, %v4347_v49  ;;  %v4354_v11 = vpack.c.bf16 %v367_v50, %v367_v50  ;;  %v2896_v31 = vpack.c.bf16 %v4344_v60, %v361_v5 }
  0x62   : > { %v4327_v59 = vcombine.low %v2167_v47, %v2174_v56  ;;  %v533_v42 = vshrl.u32 %v369_v53, 16  ;;  %v535_v12 = vshll.u32 %v369_v53, 16  ;;  %v2897_v13 = vpack.c.bf16 %v367_v50, %v4347_v49  ;;  %v3744_v47 = vld [vmem:[%s4851_s1 + $0x2a8] sm:$0xff]  }
  0x63   : > { %3345 = vmatpush3.bf16.msra.mxu1 %v3733_v19  ;;  %v547_v14 = vshrl.u32 %v371_v45, 16  ;;  %v549_v9 = vshll.u32 %v371_v45, 16  ;;  %v561_v20 = vshrl.u32 %v373_v7, 16  ;;  %v563_v21 = vshll.u32 %v373_v7, 16  ;;  %v3745_v45 = vld [vmem:[%s4851_s1 + $0x220] sm:$0xff]   ;;  %v3748_v7 = vld [vmem:[%s4851_s1 + $0x2b8] sm:$0xff]  }
  0x64   : > { %3515 = vmatpush3.bf16.msra.mxu0 %v3736_v25  ;;  %3346 = vmatprep.subr.bf16.mxu1 %v3841_v1  ;;  %v537_v22 = vrot.slane %v535_v12, 1  ;;  %v575_v10 = vshrl.u32 %v4354_v11, 16  ;;  %v577_v25 = vshll.u32 %v4354_v11, 16  ;;  %v4371_v26 = vrot.slane %v2896_v31, %v4049_v34 }
  0x65   : > { %3516 = vmatprep.subr.bf16.mxu0 %v3841_v1  ;;  %v551_v19 = vrot.slane %v549_v9, 1  ;;  %v565_v33 = vrot.slane %v563_v21, 1  ;;  %v4377_v44 = vrot.slane %v2897_v13, %v4049_v34  ;;  %v360_v31 = vmul.f32 0.2, %v344_v37  ;;  %v3750_v13 = vld [vmem:[%s4851_s1 + $0x380] sm:$0xff]  }
  0x66   : > { %v538_v48 = vor.u32 %v537_v22, %v533_v42  ;;  %v579_v51 = vrot.slane %v577_v25, 1  ;;  %v3747_v42 = vld [vmem:[%s4851_s1 + $0x228] sm:$0xff]   ;;  %v881_v25 = vcombine.low %v4263_v54, %v531_v61  ;;  %v2416_v23 = vcombine.low %v4293_v38, %v4297_v28  ;;  %v3754_v61 = vld [vmem:[%s4851_s1 + $0x390] sm:$0xff]  }
  0x67   : > { %3347 = vmatpush3.bf16.msra.mxu1 %v3735_v39  ;;  %v566_v56 = vor.u32 %v565_v33, %v561_v20  ;;  %v1281_v39 = vcombine.low %v4371_v26, %v4377_v44  ;;  %v3749_v20 = vld [vmem:[%s4851_s1 + $0x230] sm:$0xff]   ;;  %v3752_v22 = vld [vmem:[%s4851_s1 + $0x388] sm:$0xff]   ;;  %v2922_v38 = vpack.c.bf16 %v4235_v43, %v4233_v58  ;;  %v3753_v33 = vld [vmem:[%s4851_s1 + $0x300] sm:$0xff]  }
  0x68   : > { %3517 = vmatpush3.bf16.msra.mxu0 %v3738_v52  ;;  %3352 = vmatprep.subr.bf16.mxu1 %v3841_v1  ;;  %v552_v52 = vor.u32 %v551_v19, %v547_v14  ;;  %v3808_v26 = vld [vmem:[%s4851_s1 + $0x2e8] sm:$0xff]   ;;  %v3805_v44 = vld [vmem:[%s4851_s1 + $0x250] sm:$0xff]  }
  0x69   : > { %3518 = vmatprep.subr.bf16.mxu0 %v3841_v1  ;;  %v4399_v3 = vsel %vm4274_vm3, %v566_v56, 0  ;;  %v3762_v56 = vld [vmem:[%s4851_s1 + $0x3b0] sm:$0xff]  }
  0x6a   : > { %3349 = vmatmul.mubr.bf16.vlgmr.msra.gmra.mrb[0].mxu1 %v771_v63  ;;  %v3743_v63 = vld [vmem:[%s4851_s1 + $0x218] sm:$0xff]   ;;  %v4395_v0 = vsel %vm4274_vm3, %v552_v52, 0  ;;  %v3757_v52 = vld [vmem:[%s4851_s1 + $0x310] sm:$0xff]  }
  0x6b   : > { %3353 = vmatpush3.bf16.msra.mxu1 %v3737_v35  ;;  %3368 = vmatprep.mubr.msk.bf16.mxu1 %vm3842_vm0, %v3841_v1  ;;  %v599_v35 = vsel %vm4274_vm3, %v538_v48, 0  ;;  %v3755_v48 = vld [vmem:[%s4851_s1 + $0x308] sm:$0xff]  }
  0x6c   : > { %3519 = vmatpush3.bf16.msra.mxu0 %v3740_v57  ;;  %3354 = vmatprep.subr.bf16.mxu1 %v3841_v1  ;;  %v580_v57 = vor.u32 %v579_v51, %v575_v10  ;;  %v2289_v29 = vcombine.low %v599_v35, %v4395_v0  ;;  %v880_v10 = vcombine.low %v4270_v17, %v4230_v41  ;;  %v3760_v51 = vld [vmem:[%s4851_s1 + $0x3a8] sm:$0xff]   ;;  %v3764_v35 = vld [vmem:[%s4851_s1 + $0x3b8] sm:$0xff]  }
  0x6d   : > { %3520 = vmatprep.subr.bf16.mxu0 %v3841_v1  ;;  %v895_v41 = vrot.slane %v881_v25, %v4049_v34  ;;  %v2424_v17 = vrot.slane %v2416_v23, %v4049_v34  ;;  %v3781_v25 = vld [vmem:[%s4851_s1 + $0x70] sm:$0xff]   ;;  %v3783_v23 = vld [vmem:[%s4851_s1 + $0x78] sm:$0xff]  }
  0x6e   : > { %v4406_v15 = vsel %vm4274_vm3, %v580_v57, 0  ;;  %v2297_v50 = vrot.slane %v2289_v29, %v4049_v34  ;;  %v888_v55 = vrot.slane %v880_v10, %v4049_v34  ;;  %v3759_v57 = vld [vmem:[%s4851_s1 + $0x318] sm:$0xff]   ;;  %v2542_v29 = vcombine.low %v4395_v0, %v4399_v3  ;;  %v3784_v10 = vld [vmem:[%s4851_s1 + $0x1c8] sm:$0xff]  }
  0x6f   : > { %3355 = vmatpush3.bf16.msra.mxu1 %v3739_v2  ;;  %v2290_v5 = vcombine.low %v4399_v3, %v4406_v15 }
  0x70   : > { %3521 = vmatpush3.bf16.msra.mxu0 %v3742_v36  ;;  %3356 = vmatprep.subr.bf16.mxu1 %v3841_v1  ;;  %v368_v36 = vsel %vm352_vm7, %v344_v37, %v360_v31  ;;  %v3761_v37 = vld [vmem:[%s4851_s1 + $0x320] sm:$0xff]   ;;  %v1519_v31 = vcombine.low %v4354_v11, %v3845_v46  ;;  %v3778_v11 = vld [vmem:[%s4851_s1 + $0xf0] sm:$0xff]  }
  0x71   : > { %3522 = vmatprep.subr.bf16.mxu0 %v3841_v1  ;;  %v2304_v53 = vrot.slane %v2290_v5, %v4049_v34  ;;  %v376_v12 = vpack.c.bf16 %v368_v36, %v368_v36  ;;  %v2923_v28 = vpack.c.bf16 %v368_v36, %v4243_v62  ;;  %v3758_v62 = vld [vmem:[%s4851_s1 + $0x3a0] sm:$0xff]   ;;  %v2543_v5 = vcombine.low %v4406_v15, %v3845_v46  ;;  %v3770_v15 = vld [vmem:[%s4851_s1 + $0xd0] sm:$0xff]   ;;  %v3772_v36 = vld [vmem:[%s4851_s1 + $0xd8] sm:$0xff]  }
  0x72   : > { %v3774_v46 = vld [vmem:[%s4851_s1 + $0xe0] sm:$0xff]  }
  0x73   : > { %3357 = vmatpush3.bf16.msra.mxu1 %v3741_v27  ;;  %v4422_v2 = vcombine.low %v2297_v50, %v2304_v53  ;;  %v582_v14 = vshrl.u32 %v376_v12, 16  ;;  %v584_v9 = vshll.u32 %v376_v12, 16  ;;  %v896_v27 = vcombine.low %v888_v55, %v895_v41  ;;  %v3768_v50 = vld [vmem:[%s4851_s1 + $0xc8] sm:$0xff]   ;;  %v3765_v53 = vld [vmem:[%s4851_s1 + $0x330] sm:$0xff]  }
  0x74   : > { %3523 = vmatpush3.bf16.msra.mxu0 %v3744_v47  ;;  %3358 = vmatprep.subr.bf16.mxu1 %v3841_v1  ;;  %v4483_v47 = vrot.slane %v2922_v38, %v4049_v34  ;;  %v4486_v58 = vrot.slane %v2923_v28, %v4049_v34  ;;  %v2557_v0 = vrot.slane %v2543_v5, %v4049_v34  ;;  %v3787_v55 = vld [vmem:[%s4851_s1 + $0x148] sm:$0xff]   ;;  %v3789_v41 = vld [vmem:[%s4851_s1 + $0x150] sm:$0xff]   ;;  %v3798_v38 = vld [vmem:[%s4851_s1 + $0x2c0] sm:$0xff]  }
  0x75   : > { %3524 = vmatprep.subr.bf16.mxu0 %v3841_v1  ;;  %v586_v21 = vrot.slane %v584_v9, 1  ;;  %v1533_v12 = vrot.slane %v1519_v31, %v4049_v34  ;;  %v3780_v9 = vld [vmem:[%s4851_s1 + $0xf8] sm:$0xff]   ;;  %v3795_v28 = vld [vmem:[%s4851_s1 + $0x168] sm:$0xff]  }
  0x76   : > { %v1408_v43 = vcombine.low %v4483_v47, %v4486_v58  ;;  %v3815_v5 = vld [vmem:[%s4851_s1 + $0x278] sm:$0xff]   ;;  %v3824_v47 = vld [vmem:[%s4851_s1 + $0x3e8] sm:$0xff]   ;;  %v3821_v58 = vld [vmem:[%s4851_s1 + $0x350] sm:$0xff]  }
  0x77   : > { %3359 = vmatpush3.bf16.msra.mxu1 %v3743_v63  ;;  %v587_v30 = vor.u32 %v586_v21, %v582_v14  ;;  %v3766_v63 = vld [vmem:[%s4851_s1 + $0xc0] sm:$0xff]   ;;  %v3775_v14 = vld [vmem:[%s4851_s1 + $0x58] sm:$0xff]   ;;  %v3827_v31 = vld [vmem:[%s4851_s1 + $0x368] sm:$0xff]  }
  0x78   : > { %3525 = vmatpush3.bf16.msra.mxu0 %v3746_v4  ;;  %3360 = vmatprep.subr.bf16.mxu1 %v3841_v1  ;;  %v3763_v4 = vld [vmem:[%s4851_s1 + $0x328] sm:$0xff]   ;;  %v3782_v21 = vld [vmem:[%s4851_s1 + $0x1c0] sm:$0xff]  }
  0x79   : > { %3526 = vmatprep.subr.bf16.mxu0 %v3841_v1 }
  0x7b   : > { %3361 = vmatpush3.bf16.msra.mxu1 %v3745_v45  ;;  %v3767_v45 = vld [vmem:[%s4851_s1 + $0x338] sm:$0xff]  }
  0x7c   : > { %3527 = vmatpush3.bf16.msra.mxu0 %v3748_v7  ;;  %3362 = vmatprep.subr.bf16.mxu1 %v3841_v1  ;;  %v2948_v7 = vpack.c.bf16 %v4347_v49, %v4344_v60  ;;  %v3773_v49 = vld [vmem:[%s4851_s1 + $0x50] sm:$0xff]  }
  0x7d   : > { %3532 = vmatprep.subr.bf16.mxu0 %v3841_v1 }
  0x7f   : > { %3529 = vmatmul.mubr.bf16.vlgmr.msra.gmra.mrb[0].mxu0 %v1920_v32  ;;  %3363 = vmatpush3.bf16.msra.mxu1 %v3747_v42  ;;  %v606_v32 = vsel %vm4274_vm3, %v587_v30, 0  ;;  %v1526_v42 = vrot.slane %v2948_v7, %v4049_v34  ;;  %v3788_v30 = vld [vmem:[%s4851_s1 + $0x1d8] sm:$0xff]   ;;  %v3825_v7 = vld [vmem:[%s4851_s1 + $0x360] sm:$0xff]  }
  0x80   : > { %3533 = vmatpush3.bf16.msra.mxu0 %v3750_v13  ;;  %3548 = vmatprep.mubr.msk.bf16.mxu0 %vm3842_vm0, %v3841_v1  ;;  %v2417_v54 = vcombine.low %v4305_v40, %v606_v32  ;;  %v3756_v40 = vld [vmem:[%s4851_s1 + $0x398] sm:$0xff]   ;;  %v3769_v13 = vld [vmem:[%s4851_s1 + $0x40] sm:$0xff]  }
  0x81   : > { %3534 = vmatprep.subr.bf16.mxu0 %v3841_v1  ;;  %3364 = vmatprep.subr.bf16.mxu1 %v3841_v1  ;;  %v4574_v60 = vcombine.low %v1526_v42, %v1533_v12  ;;  %v3790_v32 = vld [vmem:[%s4851_s1 + $0x1e0] sm:$0xff]   ;;  %v3830_v42 = vld [vmem:[%s4851_s1 + $0x378] sm:$0xff]  }
  0x82   : > { %v2431_v18 = vrot.slane %v2417_v54, %v4049_v34  ;;  %v3791_v54 = vld [vmem:[%s4851_s1 + $0x158] sm:$0xff]  }
  0x83   : > { %3365 = vmatpush3.bf16.msra.mxu1 %v3749_v20  ;;  %v3777_v20 = vld [vmem:[%s4851_s1 + $0x60] sm:$0xff]  }
  0x84   : > { %3535 = vmatpush3.bf16.msra.mxu0 %v3752_v22  ;;  %3366 = vmatprep.subr.bf16.mxu1 %v3841_v1  ;;  %v4476_v19 = vcombine.low %v2424_v17, %v2431_v18  ;;  %v3779_v22 = vld [vmem:[%s4851_s1 + $0x68] sm:$0xff]   ;;  %v3796_v17 = vld [vmem:[%s4851_s1 + $0x1f8] sm:$0xff]   ;;  %v3793_v18 = vld [vmem:[%s4851_s1 + $0x160] sm:$0xff]  }
  0x85   : > { %3536 = vmatprep.subr.bf16.mxu0 %v3841_v1 }
  0x87   : > { %3367 = vmatpush3.bf16.msra.mxu1 %v3751_v16  ;;  %v3785_v16 = vld [vmem:[%s4851_s1 + $0x140] sm:$0xff]  }
  0x88   : > { %3537 = vmatpush3.bf16.msra.mxu0 %v3754_v61  ;;  %3372 = vmatprep.subr.bf16.mxu1 %v3841_v1  ;;  %v3794_v61 = vld [vmem:[%s4851_s1 + $0x1f0] sm:$0xff]  }
  0x89   : > { %3538 = vmatprep.subr.bf16.mxu0 %v3841_v1 }
  0x8a   : > { %3369 = vmatmul.mubr.bf16.vlgmr.msra.gmra.mrb[0].mxu1 %v896_v27  ;;  %v3800_v27 = vld [vmem:[%s4851_s1 + $0x2c8] sm:$0xff]  }
  0x8b   : > { %3373 = vmatpush3.bf16.msra.mxu1 %v3753_v33  ;;  %3388 = vmatprep.mubr.msk.bf16.mxu1 %vm3842_vm0, %v3841_v1  ;;  %v3799_v33 = vld [vmem:[%s4851_s1 + $0x178] sm:$0xff]  }
  0x8c   : > { %3539 = vmatpush3.bf16.msra.mxu0 %v3756_v40  ;;  %3374 = vmatprep.subr.bf16.mxu1 %v3841_v1  ;;  %v3797_v40 = vld [vmem:[%s4851_s1 + $0x170] sm:$0xff]  }
  0x8d   : > { %3540 = vmatprep.subr.bf16.mxu0 %v3841_v1 }
  0x8f   : > { %3375 = vmatpush3.bf16.msra.mxu1 %v3755_v48  ;;  %v3801_v48 = vld [vmem:[%s4851_s1 + $0x240] sm:$0xff]  }
  0x90   : > { %3541 = vmatpush3.bf16.msra.mxu0 %v3758_v62  ;;  %3376 = vmatprep.subr.bf16.mxu1 %v3841_v1  ;;  %v3804_v62 = vld [vmem:[%s4851_s1 + $0x2d8] sm:$0xff]  }
  0x91   : > { %3542 = vmatprep.subr.bf16.mxu0 %v3841_v1 }
  0x93   : > { %3377 = vmatpush3.bf16.msra.mxu1 %v3757_v52  ;;  %v3803_v52 = vld [vmem:[%s4851_s1 + $0x248] sm:$0xff]  }
  0x94   : > { %3543 = vmatpush3.bf16.msra.mxu0 %v3760_v51  ;;  %3378 = vmatprep.subr.bf16.mxu1 %v3841_v1  ;;  %v3806_v51 = vld [vmem:[%s4851_s1 + $0x2e0] sm:$0xff]  }
  0x95   : > { %3544 = vmatprep.subr.bf16.mxu0 %v3841_v1 }
  0x97   : > { %3379 = vmatpush3.bf16.msra.mxu1 %v3759_v57  ;;  %v3812_v57 = vld [vmem:[%s4851_s1 + $0x2f8] sm:$0xff]  }
  0x98   : > { %3545 = vmatpush3.bf16.msra.mxu0 %v3762_v56  ;;  %3380 = vmatprep.subr.bf16.mxu1 %v3841_v1  ;;  %v3807_v56 = vld [vmem:[%s4851_s1 + $0x258] sm:$0xff]  }
  0x99   : > { %3546 = vmatprep.subr.bf16.mxu0 %v3841_v1 }
  0x9b   : > { %3381 = vmatpush3.bf16.msra.mxu1 %v3761_v37  ;;  %v3814_v37 = vld [vmem:[%s4851_s1 + $0x3c0] sm:$0xff]  }
  0x9c   : > { %3547 = vmatpush3.bf16.msra.mxu0 %v3764_v35  ;;  %3382 = vmatprep.subr.bf16.mxu1 %v3841_v1  ;;  %v3809_v35 = vld [vmem:[%s4851_s1 + $0x260] sm:$0xff]  }
  0x9d   : > { %3552 = vmatprep.subr.bf16.mxu0 %v3841_v1 }
  0x9f   : > { %3549 = vmatmul.mubr.bf16.vlgmr.msra.gmra.mrb[0].mxu0 %v4161_v6  ;;  %3383 = vmatpush3.bf16.msra.mxu1 %v3763_v4  ;;  %v2550_v6 = vrot.slane %v2542_v29, %v4049_v34  ;;  %v3771_v34 = vld [vmem:[%s4851_s1 + $0x48] sm:$0xff]   ;;  %v3813_v29 = vld [vmem:[%s4851_s1 + $0x270] sm:$0xff]  }
  0xa0   : > { %3553 = vmatpush3.bf16.msra.mxu0 %v3766_v63  ;;  %3568 = vmatprep.mubr.msk.bf16.mxu0 %vm3842_vm0, %v3841_v1  ;;  %v3811_v63 = vld [vmem:[%s4851_s1 + $0x268] sm:$0xff]  }
  0xa1   : > { %3554 = vmatprep.subr.bf16.mxu0 %v3841_v1  ;;  %3384 = vmatprep.subr.bf16.mxu1 %v3841_v1  ;;  %v4550_v3 = vcombine.low %v2550_v6, %v2557_v0  ;;  %v3816_v4 = vld [vmem:[%s4851_s1 + $0x3c8] sm:$0xff]   ;;  %v3822_v6 = vld [vmem:[%s4851_s1 + $0x3e0] sm:$0xff]  }
  0xa2   : > { %v3819_v0 = vld [vmem:[%s4851_s1 + $0x348] sm:$0xff]  }
  0xa3   : > { %3385 = vmatpush3.bf16.msra.mxu1 %v3765_v53  ;;  %v3817_v53 = vld [vmem:[%s4851_s1 + $0x340] sm:$0xff]  }
  0xa4   : > { %3555 = vmatpush3.bf16.msra.mxu0 %v3768_v50  ;;  %3386 = vmatprep.subr.bf16.mxu1 %v3841_v1  ;;  %v3820_v50 = vld [vmem:[%s4851_s1 + $0x3d8] sm:$0xff]  }
  0xa5   : > { %3556 = vmatprep.subr.bf16.mxu0 %v3841_v1 }
  0xa7   : > { %3387 = vmatpush3.bf16.msra.mxu1 %v3767_v45  ;;  %v3828_v45 = vld [vmem:[%s4851_s1 + $0x3f8] sm:$0xff]  }
  0xa8   : > { %3557 = vmatpush3.bf16.msra.mxu0 %v3770_v15  ;;  %3392 = vmatprep.subr.bf16.mxu1 %v3841_v1  ;;  %v3823_v15 = vld [vmem:[%s4851_s1 + $0x358] sm:$0xff]  }
  0xa9   : > { %3558 = vmatprep.subr.bf16.mxu0 %v3841_v1 }
  0xaa   : > { %3389 = vmatmul.mubr.bf16.vlgmr.msra.gmra.mrb[0].mxu1 %v4171_v8  ;;  %v3776_v8 = vld [vmem:[%s4851_s1 + $0xe8] sm:$0xff]  }
  0xab   : > { %3393 = vmatpush3.bf16.msra.mxu1 %v3769_v13  ;;  %3408 = vmatprep.mubr.msk.bf16.mxu1 %vm3842_vm0, %v3841_v1 }
  0xac   : > { %3559 = vmatpush3.bf16.msra.mxu0 %v3772_v36  ;;  %3394 = vmatprep.subr.bf16.mxu1 %v3841_v1  ;;  %v3829_v36 = vld [vmem:[%s4851_s1 + $0x370] sm:$0xff]  }
  0xad   : > { %3560 = vmatprep.subr.bf16.mxu0 %v3841_v1 }
  0xaf   : > { %3395 = vmatpush3.bf16.msra.mxu1 %v3771_v34 }
  0xb0   : > { %3561 = vmatpush3.bf16.msra.mxu0 %v3774_v46  ;;  %3396 = vmatprep.subr.bf16.mxu1 %v3841_v1 }
  0xb1   : > { %3562 = vmatprep.subr.bf16.mxu0 %v3841_v1 }
  0xb3   : > { %3397 = vmatpush3.bf16.msra.mxu1 %v3773_v49 }
  0xb4   : > { %3563 = vmatpush3.bf16.msra.mxu0 %v3776_v8  ;;  %3398 = vmatprep.subr.bf16.mxu1 %v3841_v1 }
  0xb5   : > { %3564 = vmatprep.subr.bf16.mxu0 %v3841_v1 }
  0xb7   : > { %3399 = vmatpush3.bf16.msra.mxu1 %v3775_v14 }
  0xb8   : > { %3565 = vmatpush3.bf16.msra.mxu0 %v3778_v11  ;;  %3400 = vmatprep.subr.bf16.mxu1 %v3841_v1 }
  0xb9   : > { %3566 = vmatprep.subr.bf16.mxu0 %v3841_v1 }
  0xbb   : > { %3401 = vmatpush3.bf16.msra.mxu1 %v3777_v20 }
  0xbc   : > { %3567 = vmatpush3.bf16.msra.mxu0 %v3780_v9  ;;  %3402 = vmatprep.subr.bf16.mxu1 %v3841_v1 }
  0xbd   : > { %3572 = vmatprep.subr.bf16.mxu0 %v3841_v1 }
  0xbf   : > { %3569 = vmatmul.mubr.bf16.vlgmr.msra.gmra.mrb[0].mxu0 %v4327_v59  ;;  %3403 = vmatpush3.bf16.msra.mxu1 %v3779_v22  ;;  %v3786_v59 = vld [vmem:[%s4851_s1 + $0x1d0] sm:$0xff]  }
  0xc0   : > { %3573 = vmatpush3.bf16.msra.mxu0 %v3782_v21  ;;  %3588 = vmatprep.mubr.msk.bf16.mxu0 %vm3842_vm0, %v3841_v1 }
  0xc1   : > { %3574 = vmatprep.subr.bf16.mxu0 %v3841_v1  ;;  %3404 = vmatprep.subr.bf16.mxu1 %v3841_v1 }
  0xc3   : > { %3405 = vmatpush3.bf16.msra.mxu1 %v3781_v25 }
  0xc4   : > { %3575 = vmatpush3.bf16.msra.mxu0 %v3784_v10  ;;  %3406 = vmatprep.subr.bf16.mxu1 %v3841_v1 }
  0xc5   : > { %3576 = vmatprep.subr.bf16.mxu0 %v3841_v1 }
  0xc7   : > { %3407 = vmatpush3.bf16.msra.mxu1 %v3783_v23 }
  0xc8   : > { %3577 = vmatpush3.bf16.msra.mxu0 %v3786_v59  ;;  %3412 = vmatprep.subr.bf16.mxu1 %v3841_v1 }
  0xc9   : > { %3578 = vmatprep.subr.bf16.mxu0 %v3841_v1 }
  0xca   : > { %3409 = vmatmul.mubr.bf16.vlgmr.msra.gmra.mrb[0].mxu1 %v4280_v24  ;;  %v3792_v24 = vld [vmem:[%s4851_s1 + $0x1e8] sm:$0xff]  }
  0xcb   : > { %3413 = vmatpush3.bf16.msra.mxu1 %v3785_v16  ;;  %3428 = vmatprep.mubr.msk.bf16.mxu1 %vm3842_vm0, %v3841_v1 }
  0xcc   : > { %3579 = vmatpush3.bf16.msra.mxu0 %v3788_v30  ;;  %3414 = vmatprep.subr.bf16.mxu1 %v3841_v1 }
  0xcd   : > { %3580 = vmatprep.subr.bf16.mxu0 %v3841_v1 }
  0xcf   : > { %3415 = vmatpush3.bf16.msra.mxu1 %v3787_v55 }
  0xd0   : > { %3581 = vmatpush3.bf16.msra.mxu0 %v3790_v32  ;;  %3416 = vmatprep.subr.bf16.mxu1 %v3841_v1 }
  0xd1   : > { %3582 = vmatprep.subr.bf16.mxu0 %v3841_v1 }
  0xd3   : > { %3417 = vmatpush3.bf16.msra.mxu1 %v3789_v41 }
  0xd4   : > { %3583 = vmatpush3.bf16.msra.mxu0 %v3792_v24  ;;  %3418 = vmatprep.subr.bf16.mxu1 %v3841_v1 }
  0xd5   : > { %3584 = vmatprep.subr.bf16.mxu0 %v3841_v1 }
  0xd7   : > { %3419 = vmatpush3.bf16.msra.mxu1 %v3791_v54 }
  0xd8   : > { %3585 = vmatpush3.bf16.msra.mxu0 %v3794_v61  ;;  %3420 = vmatprep.subr.bf16.mxu1 %v3841_v1 }
  0xd9   : > { %3586 = vmatprep.subr.bf16.mxu0 %v3841_v1 }
  0xdb   : > { %3421 = vmatpush3.bf16.msra.mxu1 %v3793_v18 }
  0xdc   : > { %3587 = vmatpush3.bf16.msra.mxu0 %v3796_v17  ;;  %3422 = vmatprep.subr.bf16.mxu1 %v3841_v1 }
  0xdd   : > { %3592 = vmatprep.subr.bf16.mxu0 %v3841_v1 }
  0xdf   : > { %3589 = vmatmul.mubr.bf16.vlgmr.msra.gmra.mrb[0].mxu0 %v4422_v2  ;;  %3423 = vmatpush3.bf16.msra.mxu1 %v3795_v28  ;;  %v3802_v2 = vld [vmem:[%s4851_s1 + $0x2d0] sm:$0xff]  }
  0xe0   : > { %3593 = vmatpush3.bf16.msra.mxu0 %v3798_v38  ;;  %3608 = vmatprep.mubr.msk.bf16.mxu0 %vm3842_vm0, %v3841_v1 }
  0xe1   : > { %3594 = vmatprep.subr.bf16.mxu0 %v3841_v1  ;;  %3424 = vmatprep.subr.bf16.mxu1 %v3841_v1 }
  0xe3   : > { %3425 = vmatpush3.bf16.msra.mxu1 %v3797_v40 }
  0xe4   : > { %3595 = vmatpush3.bf16.msra.mxu0 %v3800_v27  ;;  %3426 = vmatprep.subr.bf16.mxu1 %v3841_v1 }
  0xe5   : > { %3596 = vmatprep.subr.bf16.mxu0 %v3841_v1 }
  0xe7   : > { %3427 = vmatpush3.bf16.msra.mxu1 %v3799_v33 }
  0xe8   : > { %3597 = vmatpush3.bf16.msra.mxu0 %v3802_v2  ;;  %3432 = vmatprep.subr.bf16.mxu1 %v3841_v1 }
  0xe9   : > { %3598 = vmatprep.subr.bf16.mxu0 %v3841_v1 }
  0xea   : > { %3429 = vmatmul.mubr.bf16.vlgmr.msra.gmra.mrb[0].mxu1 %v1281_v39  ;;  %v3810_v39 = vld [vmem:[%s4851_s1 + $0x2f0] sm:$0xff]  }
  0xeb   : > { %3433 = vmatpush3.bf16.msra.mxu1 %v3801_v48  ;;  %3448 = vmatprep.mubr.msk.bf16.mxu1 %vm3842_vm0, %v3841_v1 }
  0xec   : > { %3599 = vmatpush3.bf16.msra.mxu0 %v3804_v62  ;;  %3434 = vmatprep.subr.bf16.mxu1 %v3841_v1 }
  0xed   : > { %3600 = vmatprep.subr.bf16.mxu0 %v3841_v1 }
  0xef   : > { %3435 = vmatpush3.bf16.msra.mxu1 %v3803_v52 }
  0xf0   : > { %3601 = vmatpush3.bf16.msra.mxu0 %v3806_v51  ;;  %3436 = vmatprep.subr.bf16.mxu1 %v3841_v1 }
  0xf1   : > { %3602 = vmatprep.subr.bf16.mxu0 %v3841_v1 }
  0xf3   : > { %3437 = vmatpush3.bf16.msra.mxu1 %v3805_v44 }
  0xf4   : > { %3603 = vmatpush3.bf16.msra.mxu0 %v3808_v26  ;;  %3438 = vmatprep.subr.bf16.mxu1 %v3841_v1 }
  0xf5   : > { %3604 = vmatprep.subr.bf16.mxu0 %v3841_v1 }
  0xf7   : > { %3439 = vmatpush3.bf16.msra.mxu1 %v3807_v56 }
  0xf8   : > { %3605 = vmatpush3.bf16.msra.mxu0 %v3810_v39  ;;  %3440 = vmatprep.subr.bf16.mxu1 %v3841_v1 }
  0xf9   : > { %3606 = vmatprep.subr.bf16.mxu0 %v3841_v1 }
  0xfb   : > { %3441 = vmatpush3.bf16.msra.mxu1 %v3809_v35 }
  0xfc   : > { %3607 = vmatpush3.bf16.msra.mxu0 %v3812_v57  ;;  %3442 = vmatprep.subr.bf16.mxu1 %v3841_v1 }
  0xfd   : > { %3612 = vmatprep.subr.bf16.mxu0 %v3841_v1 }
  0xff   : > { %3609 = vmatmul.mubr.bf16.vlgmr.msra.gmra.mrb[0].mxu0 %v4476_v19  ;;  %3443 = vmatpush3.bf16.msra.mxu1 %v3811_v63  ;;  %v3818_v19 = vld [vmem:[%s4851_s1 + $0x3d0] sm:$0xff]  }
 0x100   : > { %3613 = vmatpush3.bf16.msra.mxu0 %v3814_v37  ;;  %3628 = vmatprep.mubr.msk.bf16.mxu0 %vm3842_vm0, %v3841_v1 }
 0x101   : > { %3614 = vmatprep.subr.bf16.mxu0 %v3841_v1  ;;  %3444 = vmatprep.subr.bf16.mxu1 %v3841_v1 }
 0x103   : > { %3445 = vmatpush3.bf16.msra.mxu1 %v3813_v29 }
 0x104   : > { %3615 = vmatpush3.bf16.msra.mxu0 %v3816_v4  ;;  %3446 = vmatprep.subr.bf16.mxu1 %v3841_v1 }
 0x105   : > { %3616 = vmatprep.subr.bf16.mxu0 %v3841_v1 }
 0x107   : > { %3447 = vmatpush3.bf16.msra.mxu1 %v3815_v5 }
 0x108   : > { %3617 = vmatpush3.bf16.msra.mxu0 %v3818_v19  ;;  %3452 = vmatprep.subr.bf16.mxu1 %v3841_v1 }
 0x109   : > { %3618 = vmatprep.subr.bf16.mxu0 %v3841_v1 }
 0x10a   : > { %3449 = vmatmul.mubr.bf16.vlgmr.msra.gmra.mrb[0].mxu1 %v1408_v43  ;;  %v3826_v43 = vld [vmem:[%s4851_s1 + $0x3f0] sm:$0xff]  }
 0x10b   : > { %3453 = vmatpush3.bf16.msra.mxu1 %v3817_v53  ;;  %3468 = vmatprep.mubr.msk.bf16.mxu1 %vm3842_vm0, %v3841_v1 }
 0x10c   : > { %3619 = vmatpush3.bf16.msra.mxu0 %v3820_v50  ;;  %3454 = vmatprep.subr.bf16.mxu1 %v3841_v1 }
 0x10d   : > { %3620 = vmatprep.subr.bf16.mxu0 %v3841_v1 }
 0x10f   : > { %3455 = vmatpush3.bf16.msra.mxu1 %v3819_v0 }
 0x110   : > { %3621 = vmatpush3.bf16.msra.mxu0 %v3822_v6  ;;  %3456 = vmatprep.subr.bf16.mxu1 %v3841_v1 }
 0x111   : > { %3622 = vmatprep.subr.bf16.mxu0 %v3841_v1 }
 0x113   : > { %3457 = vmatpush3.bf16.msra.mxu1 %v3821_v58 }
 0x114   : > { %3623 = vmatpush3.bf16.msra.mxu0 %v3824_v47  ;;  %3458 = vmatprep.subr.bf16.mxu1 %v3841_v1 }
 0x115   : > { %3624 = vmatprep.subr.bf16.mxu0 %v3841_v1 }
 0x117   : > { %3459 = vmatpush3.bf16.msra.mxu1 %v3823_v15 }
 0x118   : > { %3625 = vmatpush3.bf16.msra.mxu0 %v3826_v43  ;;  %3460 = vmatprep.subr.bf16.mxu1 %v3841_v1 }
 0x119   : > { %3626 = vmatprep.subr.bf16.mxu0 %v3841_v1 }
 0x11b   : > { %3461 = vmatpush3.bf16.msra.mxu1 %v3825_v7 }
 0x11c   : > { %3627 = vmatpush3.bf16.msra.mxu0 %v3828_v45  ;;  %3462 = vmatprep.subr.bf16.mxu1 %v3841_v1 }
 0x11f   : > { %3629 = vmatmul.mubr.bf16.vlgmr.msra.gmra.mrb[0].mxu0 %v4550_v3  ;;  %3463 = vmatpush3.bf16.msra.mxu1 %v3827_v31 }
 0x120   : > { %3464 = vmatprep.subr.bf16.mxu1 %v3841_v1 }
 0x123   : > { %3465 = vmatpush3.bf16.msra.mxu1 %v3829_v36 }
 0x124   : > { %3466 = vmatprep.subr.bf16.mxu1 %v3841_v1 }
 0x127   : > { %3467 = vmatpush3.bf16.msra.mxu1 %v3830_v42 }
 0x12a   : > { %3469 = vmatmul.mubr.bf16.vlgmr.msra.gmra.mrb[0].mxu1 %v4574_v60 }
 0x1f2   : > { %v2642_v12 = vpop.f32.mrb[0].mxu0 }
 0x1f3   : > { %v3630_v3 = vpop.f32.mrb[1].mxu0 }
 0x1f4   : > { %v2645_v13 = vpop.f32.mrb[2].mxu0 }
 0x1f5   : > { %v3631_v46 = vpop.f32.mrb[3].mxu0 }
 0x1fd   : > { %v1618_v34 = vpop.f32.mrb[0].mxu1 }
 0x1fe   : > { %v3632_v8 = vadd.f32 %v2642_v12, %v1618_v34  ;;  %v3470_v49 = vpop.f32.mrb[1].mxu1 }
 0x1ff   : > { %v1621_v11 = vpop.f32.mrb[2].mxu1 }
 0x200   : > { %v3633_v14 = vadd.f32 %v2645_v13, %v1621_v11  ;;  %v3471_v9 = vpop.f32.mrb[3].mxu1  ;;  %v2659_v1 = vmul.f32 %v3632_v8, %v3632_v8 }
 0x202   : > { %v2651_v20 = vadd.f32 %v3633_v14, %v3632_v8  ;;  %v2660_v21 = vmul.f32 %v3633_v14, %v3633_v14  ;;  %v3166_v60 = vpack.c.bf16 %v3633_v14, %v3632_v8 }
 0x204   : > { %v2652_v22 = vrot.slane %v2651_v20, 4  ;;  %v2661_v10 = vadd.f32 %v2660_v21, %v2659_v1  ;;  %3167 = vst [vmem:[%s258_s30] sm:$0xff] %v3166_v60  }
 0x206   : > { %v2653_v25 = vadd.f32 %v2652_v22, %v2651_v20  ;;  %v2662_v59 = vrot.slane %v2661_v10, 4 }
 0x208   : > { %v2654_v23 = vrot.slane %v2653_v25, 2  ;;  %v2663_v30 = vadd.f32 %v2662_v59, %v2661_v10 }
 0x20a   : > { %v2655_v16 = vadd.f32 %v2654_v23, %v2653_v25  ;;  %v2664_v32 = vrot.slane %v2663_v30, 2 }
 0x20c   : > { %v2656_v55 = vrot.slane %v2655_v16, 1  ;;  %v2665_v24 = vadd.f32 %v2664_v32, %v2663_v30 }
 0x20e   : > { %v2657_v41 = vadd.f32 %v2656_v55, %v2655_v16  ;;  %v2666_v61 = vrot.slane %v2665_v24, 1 }
 0x210   : > { %2658 = vst [vmem:[%s262_s10] sm:$0x1] %v2657_v41  ;;  %v2667_v54 = vadd.f32 %v2666_v61, %v2665_v24 }
 0x212   : > { %2668 = vst [vmem:[%s262_s10 + $0x1] sm:$0x1] %v2667_v54 }
 0x213 PF: > { %s17_s21 = sadd.s32 1, %s3839_s21  }
 0x214   : > { %p14_p4 = scmp.ge.s32.totalorder %s17_s21, 4  }
 0x216   :  { %16 = sbr.rel (!%p14_p4) target bundleno = 1 (0x1), region = 97 }

// kernel: _lambda_.4
= control target key start
LH: loop header
LB: loop body
LE: loop exit
PB: predicated region body
PF: predicated region fallthrough
CT: control target
= control target key end

     0   :  { %s6581_s9 = smov 0   ;;  %s8092_s0 = inlined_call_operand.vmem [shape: bf16[2,32,16,16], index: 0, kind: input, shape index: {}]   ;;  %s8093_s1 = inlined_call_operand.vmem [shape: bf16[4,4,8,128], index: 1, kind: input, shape index: {}]   ;;  %s8094_s2 = inlined_call_operand.vmem [shape: bf16[2,256,128], index: 2, kind: output, shape index: {}]  }
   0x1 LB: > { %s4701_s10 = sadd.s32 4294967295, %s6562_s9   ;;  %p4705_p0 = scmp.ge.s32.totalorder %s6562_s9, 1  ;;  %s6562_s9 = sphi %s6581_s9, %s12_s9  }
   0x2   : > { %p112_p1 = scmp.lt.s32.totalorder %s6562_s9, 3 }
   0x4   : > { %p113_p2 = pnand %p4705_p0, %p112_p1 }
   0x6   : > { %116 = sbr.rel (%p113_p2) target bundleno = 872 (0x368), region = 28 }
   0xd   : > { %p134_p3 = scmp.lt.s32.totalorder %s4701_s10, 1  ;;  %v4742_v0 = vld [vmem:[%s8093_s1 + $0x10] sm:$0xf]  ;;  %vm907_vm0 = vcmask 1043456   ;;  %v4875_v1 = vld [vmem:[%s8093_s1 + $0x8] sm:$0xf] }
   0xe   : > { %6467 = vmatprep.subr.msk.bf16.mxu1 %vm907_vm0, %v4742_v0  ;;  %v909_v2 = vsel %vm907_vm0, %v4742_v0, 0  ;;  %6475 = vmatprep.subr.msk.bf16.mxu0 %vm907_vm0, %v4875_v1  ;;  %v2623_v3 = vsel %vm907_vm0, %v4875_v1, 0  ;;  %v8155_v4 = vmov 0   ;;  %v6611_v5 = vld [vmem:[%s8093_s1] sm:$0xf]  ;;  %s6565_s23 = smov 120  }
   0xf   : > { %s8357_s10 = smov (!%p134_p3, %s4701_s10), 1  ;;  %5444 = vmatpush3.bf16.msra.mxu1 %v909_v2  ;;  %5716 = vmatpush3.bf16.msra.mxu0 %v2623_v3  ;;  %v6616_v6 = vld [vmem:[%s8093_s1 + $0x18] sm:$0xf]  ;;  %vm689_vm1 = vcmask 1040384   ;;  %vm690_vm2 = vsmask.f32 256 }
  0x10   : > { %5717 = vmatprep.mubr.bf16.mxu0 %v8155_v4  ;;  %s5042_s15 = sshll.u32 %s8357_s10, 8  ;;  %6468 = vmatprep.subr.msk.bf16.mxu1 %vm907_vm0, %v6611_v5  ;;  %vm858_vm3 = vcmask 64512   ;;  %vm7003_vm4 = vmand %vm689_vm1, %vm690_vm2  ;;  %vm820_vm5 = vcmask 1047552   ;;  %vm821_vm6 = vsmask.f32 7424 }
  0x11   : > { %s6606_s18 = scalar_lea.vmem %s8092_s0, %s5042_s15  ;;  %6476 = vmatprep.subr.msk.bf16.mxu0 %vm907_vm0, %v6616_v6  ;;  %vm7478_vm7 = vmand %vm820_vm5, %vm821_vm6 }
  0x12   : > { %v6619_v7 = vld [vmem:[%s6606_s18] sm:$0xff]   ;;  %v6626_v8 = vld [vmem:[%s6606_s18 + $0x8] sm:$0xff]   ;;  %v6633_v11 = vld [vmem:[%s6606_s18 + $0x10] sm:$0xff]  }
  0x13   : > { %8220 = vst [vmem:[#allocation2_spill] sm:$0xff] %v6619_v7  ;;  %v8123_v9 = vshrl.u32 %v6619_v7, 16  ;;  %v8124_v10 = vshll.u32 %v6619_v7, 16  ;;  %2545 = vrot.lane.b32.xlu1 %v6626_v8, %s6565_s23  ;;  %v6638_v13 = vld [vmem:[%s6606_s18 + $0x20] sm:$0xff]   ;;  %v6641_v14 = vld [vmem:[%s6606_s18 + $0x30] sm:$0xff]   ;;  %v384_v15 = vshrl.u32 %v6633_v11, 16 }
  0x14   : > { %8221 = vst [vmem:[#allocation3_spill] sm:$0xff] %v6638_v13  ;;  %8222 = vst [vmem:[#allocation4_spill] sm:$0xff] %v6641_v14  ;;  %v387_v16 = vshll.u32 %v6633_v11, 16  ;;  %v8121_v18 = vshrl.u32 %v6638_v13, 16  ;;  %v8122_v19 = vshll.u32 %v6638_v13, 16  ;;  %v8118_v20 = vshrl.u32 %v6641_v14, 16 }
  0x15   : > { %v372_v12 = vrot.slane %v8123_v9, 7  ;;  %v386_v21 = vrot.slane %v384_v15, 7  ;;  %v8120_v23 = vshll.u32 %v6641_v14, 16  ;;  %v6659_v28 = vld [vmem:[%s6606_s18 + $0x40] sm:$0xff]   ;;  %v6664_v30 = vld [vmem:[%s6606_s18 + $0x50] sm:$0xff]   ;;  %v6667_v31 = vld [vmem:[%s6606_s18 + $0x18] sm:$0xff]  }
  0x16   : > { %v728_v22 = vrot.slane %v387_v16, 1  ;;  %v400_v24 = vrot.slane %v8121_v18, 7  ;;  %v414_v25 = vrot.slane %v8118_v20, 7  ;;  %8224 = vst [vmem:[#allocation6_spill] sm:$0xff] %v6659_v28  ;;  %8225 = vst [vmem:[#allocation7_spill] sm:$0xff] %v6664_v30  ;;  %v8117_v32 = vshrl.u32 %v6659_v28, 16 }
  0x17   : > { %v375_v17 = vor.u32 %v8124_v10, %v372_v12  ;;  %v389_v26 = vor.u32 %v387_v16, %v386_v21  ;;  %8226 = vst [vmem:[#allocation8_spill] sm:$0xff] %v6667_v31  ;;  %v8119_v34 = vshll.u32 %v6659_v28, 16  ;;  %v8114_v35 = vshrl.u32 %v6664_v30, 16  ;;  %v6679_v37 = vld [vmem:[%s6606_s18 + $0x60] sm:$0xff]   ;;  %v6684_v40 = vld [vmem:[%s6606_s18 + $0x28] sm:$0xff]   ;;  %v6696_v45 = vld [vmem:[%s6606_s18 + $0x70] sm:$0xff]  }
  0x18   : > { %v6656_v27 = vor.u32 %v728_v22, %v384_v15  ;;  %v403_v29 = vor.u32 %v8122_v19, %v400_v24  ;;  %v417_v33 = vor.u32 %v8120_v23, %v414_v25  ;;  %v428_v36 = vrot.slane %v8117_v32, 7  ;;  %8227 = vst [vmem:[#allocation9_spill] sm:$0xff] %v6679_v37  ;;  %8228 = vst [vmem:[#allocation10_spill] sm:$0xff] %v6684_v40  ;;  %v6705_v48 = vld [vmem:[%s6606_s18 + $0x38] sm:$0xff]   ;;  %v6717_v53 = vld [vmem:[%s6606_s18 + $0x80] sm:$0xff]  }
  0x19   : > { %593 = vrot.lane.b32.xlu0 %v375_v17, %s6565_s23  ;;  %v377_v38 = vshrl.u32 %v6626_v8, 16  ;;  %v380_v39 = vshll.u32 %v6626_v8, 16  ;;  %v8116_v41 = vshll.u32 %v6664_v30, 16  ;;  %v442_v43 = vrot.slane %v8114_v35, 7  ;;  %8229 = vst [vmem:[#allocation11_spill] sm:$0xff] %v6696_v45  ;;  %8231 = vst [vmem:[#allocation13_spill] sm:$0xff] %v6705_v48 }
  0x1a   : > { %8223 = vst [vmem:[#allocation5_spill] sm:$0xff] %v6656_v27  ;;  %601 = vrot.lane.b32.xlu1 %v403_v29, %s6565_s23  ;;  %v431_v42 = vor.u32 %v8119_v34, %v428_v36  ;;  %v8113_v44 = vshrl.u32 %v6679_v37, 16  ;;  %v8115_v51 = vshll.u32 %v6679_v37, 16  ;;  %v8110_v52 = vshrl.u32 %v6696_v45, 16  ;;  %8232 = vst [vmem:[#allocation14_spill] sm:$0xff] %v6717_v53  ;;  %v6720_v54 = vld [vmem:[%s6606_s18 + $0x48] sm:$0xff]  }
  0x1b   : > { %v726_v46 = vrot.slane %v380_v39, 1  ;;  %v445_v49 = vor.u32 %v8116_v41, %v442_v43  ;;  %8233 = vst [vmem:[#allocation15_spill] sm:$0xff] %v6720_v54  ;;  %v8112_v57 = vshll.u32 %v6696_v45, 16  ;;  %v8109_v58 = vshrl.u32 %v6717_v53, 16  ;;  %v6732_v59 = vld [vmem:[%s6606_s18 + $0x90] sm:$0xff]   ;;  %v6735_v60 = vld [vmem:[%s6606_s18 + $0x58] sm:$0xff]  }
  0x1c   : > { %v456_v50 = vrot.slane %v8113_v44, 7  ;;  %v470_v56 = vrot.slane %v8110_v52, 7  ;;  %8234 = vst [vmem:[#allocation16_spill] sm:$0xff] %v6732_v59  ;;  %8235 = vst [vmem:[#allocation17_spill] sm:$0xff] %v6735_v60  ;;  %v8111_v61 = vshll.u32 %v6717_v53, 16  ;;  %v6739_v62 = vld [vmem:[%s6606_s18 + $0xa0] sm:$0xff]  }
  0x1d   : > { %597 = vrot.lane.b32.xlu0 %v389_v26, %s6565_s23  ;;  %v6702_v47 = vor.u32 %v726_v46, %v377_v38  ;;  %8236 = vst [vmem:[#allocation18_spill] sm:$0xff] %v6739_v62  ;;  %v484_v0 = vrot.slane %v8109_v58, 7  ;;  %v8106_v1 = vshrl.u32 %v6732_v59, 16  ;;  %v6750_v2 = vld [vmem:[%s6606_s18 + $0x68] sm:$0xff]   ;;  %v8108_v15 = vshll.u32 %v6732_v59, 16  ;;  %v6762_v17 = vld [vmem:[%s6606_s18 + $0xb0] sm:$0xff]  }
  0x1e   : > { %2547 = vrot.lane.b32.xlu1 %v6667_v31, %s6565_s23  ;;  %v459_v55 = vor.u32 %v8115_v51, %v456_v50  ;;  %v473_v63 = vor.u32 %v8112_v57, %v470_v56  ;;  %8237 = vst [vmem:[#allocation19_spill] sm:$0xff] %v6750_v2  ;;  %v8102_v16 = vshrl.u32 %v6739_v62, 16  ;;  %8238 = vst [vmem:[#allocation20_spill] sm:$0xff] %v6762_v17  ;;  %v6765_v21 = vld [vmem:[%s6606_s18 + $0x78] sm:$0xff]   ;;  %v8107_v25 = vshll.u32 %v6739_v62, 16  ;;  %v6777_v29 = vld [vmem:[%s6606_s18 + $0xc0] sm:$0xff]  }
  0x1f   : > { %8230 = vst [vmem:[#allocation12_spill] sm:$0xff] %v6702_v47  ;;  %v487_v3 = vor.u32 %v8111_v61, %v484_v0  ;;  %v498_v12 = vrot.slane %v8106_v1, 7  ;;  %8239 = vst [vmem:[#allocation21_spill] sm:$0xff] %v6765_v21  ;;  %v8096_v26 = vshrl.u32 %v6762_v17, 16  ;;  %v8099_v43 = vshll.u32 %v6762_v17, 16 }
  0x20   : > { %v512_v24 = vrot.slane %v8102_v16, 7  ;;  %8240 = vst [vmem:[#allocation22_spill] sm:$0xff] %v6777_v29  ;;  %v8095_v46 = vshrl.u32 %v6777_v29, 16  ;;  %v379_v16 = vrot.slane %v377_v38, 7  ;;  %v8152_v8 = vshll.u32 %v6684_v40, 16 }
  0x21   : > { %605 = vrot.lane.b32.xlu0 %v417_v33, %s6565_s23  ;;  %v501_v22 = vor.u32 %v8108_v15, %v498_v12  ;;  %v6783_v33 = vld [vmem:[%s6606_s18 + $0x88] sm:$0xff]   ;;  %v8142_v15 = vshrl.u32 %v6750_v2, 16  ;;  %v8147_v52 = vshll.u32 %v6735_v60, 16  ;;  %v8143_v35 = vshll.u32 %v6765_v21, 16 }
  0x22   : > { %609 = vrot.lane.b32.xlu1 %v431_v42, %s6565_s23  ;;  %8241 = vst [vmem:[#allocation23_spill] sm:$0xff] %v6783_v33  ;;  %v515_v36 = vor.u32 %v8107_v25, %v512_v24  ;;  %v526_v42 = vrot.slane %v8096_v26, 7  ;;  %v540_v56 = vrot.slane %v8095_v46, 7  ;;  %v6813_v12 = vld [vmem:[%s6606_s18 + $0xa8] sm:$0xff]   ;;  %v6822_v46 = vld [vmem:[%s6606_s18 + $0xf0] sm:$0xff]   ;;  %v6830_v26 = vld [vmem:[%s6606_s18 + $0xb8] sm:$0xff]  }
  0x23   : > { %8245 = vst [vmem:[#allocation27_spill] sm:$0xff] %v6813_v12  ;;  %8246 = vst [vmem:[#allocation28_spill] sm:$0xff] %v6822_v46  ;;  %v8151_v25 = vshll.u32 %v6705_v48, 16  ;;  %v463_v61 = vrot.slane %v8142_v15, 7  ;;  %v8136_v57 = vshrl.u32 %v6783_v33, 16  ;;  %v8127_v41 = vshrl.u32 %v6813_v12, 16 }
  0x24   : > { %v529_v50 = vor.u32 %v8099_v43, %v526_v42  ;;  %8247 = vst [vmem:[#allocation29_spill] sm:$0xff] %v6830_v26  ;;  %v6840_v43 = vld [vmem:[%s6606_s18 + $0xc8] sm:$0xff]   ;;  %v8131_v19 = vshll.u32 %v6830_v26, 16 }
  0x25   : > { %2549 = vrot.lane.b32.xlu0 %v6684_v40, %s6565_s23  ;;  %8248 = vst [vmem:[#allocation30_spill] sm:$0xff] %v6840_v43  ;;  %v491_v51 = vrot.slane %v8136_v57, 7  ;;  %v519_v34 = vrot.slane %v8127_v41, 7  ;;  %v8125_v23 = vshrl.u32 %v6840_v43, 16  ;;  %v8130_v9 = vshll.u32 %v6840_v43, 16  ;;  %v6984_v41 = vld [vmem:[%s6606_s18 + $0xf8] sm:$0xff]  }
  0x26   : > { %2551 = vrot.lane.b32.xlu1 %v6705_v48, %s6565_s23  ;;  %8251 = vst [vmem:[#allocation33_spill] sm:$0xff] %v6984_v41 }
  0x29   : > { %613 = vrot.lane.b32.xlu0 %v445_v49, %s6565_s23  ;;  %v6792_v49 = vld [vmem:[%s6606_s18 + $0xd0] sm:$0xff]  }
  0x2a   : > { %617 = vrot.lane.b32.xlu1 %v459_v55, %s6565_s23  ;;  %8242 = vst [vmem:[#allocation24_spill] sm:$0xff] %v6792_v49  ;;  %v6800_v55 = vld [vmem:[%s6606_s18 + $0x98] sm:$0xff]   ;;  %v8097_v0 = vshrl.u32 %v6792_v49, 16 }
  0x2b   : > { %8243 = vst [vmem:[#allocation25_spill] sm:$0xff] %v6800_v55  ;;  %v8139_v20 = vshll.u32 %v6800_v55, 16 }
  0x2c   : > { %v554_v24 = vrot.slane %v8097_v0, 7 }
  0x2d   : > { %2553 = vrot.lane.b32.xlu0 %v6720_v54, %s6565_s23 }
  0x2e   : > { %2555 = vrot.lane.b32.xlu1 %v6735_v60, %s6565_s23 }
  0x31   : > { %621 = vrot.lane.b32.xlu0 %v473_v63, %s6565_s23  ;;  %v8098_v63 = vshll.u32 %v6777_v29, 16 }
  0x32   : > { %625 = vrot.lane.b32.xlu1 %v487_v3, %s6565_s23  ;;  %v6807_v3 = vld [vmem:[%s6606_s18 + $0xe0] sm:$0xff]  }
  0x33   : > { %8244 = vst [vmem:[#allocation26_spill] sm:$0xff] %v6807_v3  ;;  %v8100_v42 = vshrl.u32 %v6807_v3, 16  ;;  %v8104_v0 = vshll.u32 %v6807_v3, 16 }
  0x35   : > { %2557 = vrot.lane.b32.xlu0 %v6750_v2, %s6565_s23 }
  0x36   : > { %2559 = vrot.lane.b32.xlu1 %v6765_v21, %s6565_s23 }
  0x39   : > { %629 = vrot.lane.b32.xlu0 %v501_v22, %s6565_s23  ;;  %v543_v22 = vor.u32 %v8098_v63, %v540_v56  ;;  %v568_v56 = vrot.slane %v8100_v42, 7  ;;  %v8103_v63 = vshrl.u32 %v6822_v46, 16  ;;  %v8105_v42 = vshll.u32 %v6822_v46, 16 }
  0x3a   : > { %633 = vrot.lane.b32.xlu1 %v515_v36, %s6565_s23  ;;  %v8101_v36 = vshll.u32 %v6792_v49, 16 }
  0x3d   : > { %2561 = vrot.lane.b32.xlu0 %v6783_v33, %s6565_s23 }
  0x3e   : > { %2563 = vrot.lane.b32.xlu1 %v6800_v55, %s6565_s23 }
  0x41   : > { %637 = vrot.lane.b32.xlu0 %v529_v50, %s6565_s23  ;;  %v557_v50 = vor.u32 %v8101_v36, %v554_v24  ;;  %v582_v24 = vrot.slane %v8103_v63, 7  ;;  %v6853_v36 = vld [vmem:[%s6606_s18 + $0xd8] sm:$0xff]   ;;  %v382_v63 = vor.u32 %v380_v39, %v379_v16 }
  0x42   : > { %641 = vrot.lane.b32.xlu1 %v543_v22, %s6565_s23  ;;  %v571_v22 = vor.u32 %v8104_v0, %v568_v56  ;;  %8249 = vst [vmem:[#allocation31_spill] sm:$0xff] %v6853_v36  ;;  %v6861_v56 = vld [vmem:[%s6606_s18 + $0xe8] sm:$0xff]   ;;  %v8150_v0 = vshrl.u32 %v6684_v40, 16 }
  0x43   : > { %8250 = vst [vmem:[#allocation32_spill] sm:$0xff] %v6861_v56  ;;  %v8129_v10 = vshrl.u32 %v6861_v56, 16 }
  0x45   : > { %2565 = vrot.lane.b32.xlu0 %v6813_v12, %s6565_s23 }
  0x46   : > { %2567 = vrot.lane.b32.xlu1 %v6830_v26, %s6565_s23 }
  0x49   : > { %645 = vrot.lane.b32.xlu0 %v557_v50, %s6565_s23  ;;  %v585_v50 = vor.u32 %v8105_v42, %v582_v24  ;;  %v8154_v24 = vshll.u32 %v6667_v31, 16  ;;  %v8146_v42 = vshrl.u32 %v6720_v54, 16 }
  0x4a   : > { %649 = vrot.lane.b32.xlu1 %v571_v22, %s6565_s23  ;;  %v8153_v22 = vshrl.u32 %v6667_v31, 16 }
  0x4c   : > { %v393_v38 = vrot.slane %v8153_v22, 7 }
  0x4d   : > { %2569 = vrot.lane.b32.xlu0 %v6840_v43, %s6565_s23 }
  0x4e   : > { %2571 = vrot.lane.b32.xlu1 %v6853_v36, %s6565_s23  ;;  %v396_v39 = vor.u32 %v8154_v24, %v393_v38  ;;  %v8148_v38 = vshll.u32 %v6720_v54, 16 }
  0x51   : > { %653 = vrot.lane.b32.xlu0 %v585_v50, %s6565_s23  ;;  %v407_v50 = vrot.slane %v8150_v0, 7 }
  0x52   : > { %595 = vrot.lane.b32.xlu1 %v382_v63, %s6565_s23  ;;  %v8149_v63 = vshrl.u32 %v6705_v48, 16 }
  0x53   : > { %v410_v16 = vor.u32 %v8152_v8, %v407_v50 }
  0x54   : > { %v421_v1 = vrot.slane %v8149_v63, 7 }
  0x55   : > { %2573 = vrot.lane.b32.xlu0 %v6861_v56, %s6565_s23 }
  0x56   : > { %2822 = vrot.lane.b32.xlu1 %v6633_v11, %s6565_s23  ;;  %v435_v11 = vrot.slane %v8146_v42, 7  ;;  %v424_v50 = vor.u32 %v8151_v25, %v421_v1  ;;  %v8144_v1 = vshll.u32 %v6750_v2, 16 }
  0x59   : > { %2820 = vrot.lane.b32.xlu0 %v6619_v7, %s6565_s23 }
  0x5a   : > { %603 = vrot.lane.b32.xlu1 %v410_v16, %s6565_s23  ;;  %v8145_v16 = vshrl.u32 %v6735_v60, 16 }
  0x5c   : > { %v449_v58 = vrot.slane %v8145_v16, 7 }
  0x5d   : > { %599 = vrot.lane.b32.xlu0 %v396_v39, %s6565_s23  ;;  %v438_v39 = vor.u32 %v8148_v38, %v435_v11 }
  0x5e   : > { %2826 = vrot.lane.b32.xlu1 %v6641_v14, %s6565_s23  ;;  %v452_v11 = vor.u32 %v8147_v52, %v449_v58  ;;  %v8140_v58 = vshll.u32 %v6783_v33, 16 }
  0x61   : > { %2824 = vrot.lane.b32.xlu0 %v6638_v13, %s6565_s23 }
  0x62   : > { %611 = vrot.lane.b32.xlu1 %v438_v39, %s6565_s23  ;;  %v8141_v39 = vshrl.u32 %v6765_v21, 16 }
  0x64   : > { %v477_v44 = vrot.slane %v8141_v39, 7 }
  0x65   : > { %607 = vrot.lane.b32.xlu0 %v424_v50, %s6565_s23  ;;  %v466_v50 = vor.u32 %v8144_v1, %v463_v61 }
  0x66   : > { %2830 = vrot.lane.b32.xlu1 %v6664_v30, %s6565_s23  ;;  %v480_v61 = vor.u32 %v8143_v35, %v477_v44  ;;  %v8132_v44 = vshll.u32 %v6813_v12, 16 }
  0x69   : > { %2828 = vrot.lane.b32.xlu0 %v6659_v28, %s6565_s23 }
  0x6a   : > { %619 = vrot.lane.b32.xlu1 %v466_v50, %s6565_s23  ;;  %v8133_v50 = vshrl.u32 %v6800_v55, 16 }
  0x6c   : > { %v505_v32 = vrot.slane %v8133_v50, 7 }
  0x6d   : > { %615 = vrot.lane.b32.xlu0 %v452_v11, %s6565_s23  ;;  %v494_v11 = vor.u32 %v8140_v58, %v491_v51 }
  0x6e   : > { %2834 = vrot.lane.b32.xlu1 %v6696_v45, %s6565_s23  ;;  %v508_v51 = vor.u32 %v8139_v20, %v505_v32  ;;  %v547_v32 = vrot.slane %v8125_v23, 7 }
  0x71   : > { %2832 = vrot.lane.b32.xlu0 %v6679_v37, %s6565_s23 }
  0x72   : > { %627 = vrot.lane.b32.xlu1 %v494_v11, %s6565_s23  ;;  %v8126_v11 = vshrl.u32 %v6830_v26, 16 }
  0x74   : > { %v533_v18 = vrot.slane %v8126_v11, 7  ;;  %v8134_v11 = vshll.u32 %v6853_v36, 16 }
  0x75   : > { %623 = vrot.lane.b32.xlu0 %v480_v61, %s6565_s23  ;;  %v522_v61 = vor.u32 %v8132_v44, %v519_v34 }
  0x76   : > { %2838 = vrot.lane.b32.xlu1 %v6732_v59, %s6565_s23  ;;  %v536_v34 = vor.u32 %v8131_v19, %v533_v18  ;;  %v2901_v18 = vsel %vm907_vm0, %v6616_v6, 0 }
  0x79   : > { %2836 = vrot.lane.b32.xlu0 %v6717_v53, %s6565_s23 }
  0x7a   : > { %635 = vrot.lane.b32.xlu1 %v522_v61, %s6565_s23  ;;  %v8128_v61 = vshrl.u32 %v6853_v36, 16 }
  0x7c   : > { %v561_v23 = vrot.slane %v8128_v61, 7  ;;  %v6996_v61 = vld [vmem:[%s8093_s1 + $0x28] sm:$0xf] }
  0x7d   : > { %631 = vrot.lane.b32.xlu0 %v508_v51, %s6565_s23  ;;  %v550_v51 = vor.u32 %v8130_v9, %v547_v32  ;;  %v8137_v9 = vshrl.u32 %v6984_v41, 16 }
  0x7e   : > { %2842 = vrot.lane.b32.xlu1 %v6762_v17, %s6565_s23 }
  0x7f   : > { %v589_v50 = vrot.slane %v8137_v9, 7 }
  0x81   : > { %2840 = vrot.lane.b32.xlu0 %v6739_v62, %s6565_s23  ;;  %v3104_v62 = vsel %vm907_vm0, %v6996_v61, 0 }
  0x82   : > { %643 = vrot.lane.b32.xlu1 %v550_v51, %s6565_s23  ;;  %v8135_v51 = vshll.u32 %v6861_v56, 16 }
  0x85   : > { %639 = vrot.lane.b32.xlu0 %v536_v34, %s6565_s23  ;;  %v6986_v32 = vpop.permute.xlu1 %2545  ;;  %v575_v34 = vrot.slane %v8129_v10, 7  ;;  %v564_v10 = vor.u32 %v8134_v11, %v561_v23  ;;  %v8138_v23 = vshll.u32 %v6984_v41, 16 }
  0x86   : > { %5718 = vmatmul.mubr.msk.bf16.vlgmr.msra.gmra.mrb[0].mxu0 %vm858_vm3, %v6986_v32  ;;  %2846 = vrot.lane.b32.xlu1 %v6792_v49, %s6565_s23 }
  0x87   : > { %5750 = vmatpush3.bf16.msra.mxu0 %v2901_v18  ;;  %v578_v19 = vor.u32 %v8135_v51, %v575_v34  ;;  %v1121_v34 = vsel %vm907_vm0, %v6611_v5, 0  ;;  %v592_v5 = vor.u32 %v8138_v23, %v589_v50  ;;  %v7056_v50 = vcombine.low %v8155_v4, %v8155_v4 }
  0x88   : > { %6477 = vmatprep.subr.msk.bf16.mxu0 %vm907_vm0, %v6996_v61  ;;  %v7218_v61 = vld [vmem:[%s8093_s1 + $0x38] sm:$0xf] }
  0x89   : > { %2844 = vrot.lane.b32.xlu0 %v6777_v29, %s6565_s23  ;;  %8254 = vst [vmem:[#allocation34_spill] sm:$0xff] %v7056_v50 }
  0x8a   : > { %651 = vrot.lane.b32.xlu1 %v578_v19, %s6565_s23 }
  0x8b   : > { %v594_v18 = vpop.permute.xlu0 %593 }
  0x8c   : > { %v692_v44 = vsel %vm7003_vm4, 0, %v594_v18  ;;  %v602_v51 = vpop.permute.xlu1 %601 }
  0x8d   : > { %5445 = vmatprep.mubr.msk.bf16.mxu1 %vm858_vm3, %v692_v44  ;;  %647 = vrot.lane.b32.xlu0 %v564_v10, %s6565_s23  ;;  %v7030_v44 = vsel %vm7003_vm4, 0, %v602_v51  ;;  %v7035_v10 = vld [vmem:[%s8093_s1 + $0x20] sm:$0xf] }
  0x8e   : > { %2850 = vrot.lane.b32.xlu1 %v6822_v46, %s6565_s23 }
  0x8f   : > { %v598_v11 = vpop.permute.xlu0 %597 }
  0x90   : > { %v7026_v57 = vsel %vm7003_vm4, 0, %v598_v11  ;;  %v7047_v11 = vpop.permute.xlu1 %2547 }
  0x91   : > { %5446 = vmatmul.mubr.msk.bf16.vlgmr.msra.gmra.mrb[0].mxu1 %vm858_vm3, %v7026_v57  ;;  %2848 = vrot.lane.b32.xlu0 %v6807_v3, %s6565_s23 }
  0x92   : > { %5478 = vmatpush3.bf16.msra.mxu1 %v1121_v34  ;;  %5449 = vmatprep.mubr.msk.bf16.mxu1 %vm858_vm3, %v7030_v44 }
  0x93   : > { %v606_v19 = vpop.permute.xlu0 %605  ;;  %6469 = vmatprep.subr.msk.bf16.mxu1 %vm907_vm0, %v7035_v10  ;;  %5721 = vmatprep.mubr.msk.bf16.mxu0 %vm858_vm3, %v7047_v11 }
  0x94   : > { %3098 = vrot.lane.b32.xlu1 %v6984_v41, %s6565_s23  ;;  %v610_v18 = vpop.permute.xlu1 %609  ;;  %v7064_v34 = vsel %vm7003_vm4, 0, %v606_v19 }
  0x95   : > { %655 = vrot.lane.b32.xlu0 %v592_v5, %s6565_s23  ;;  %v7070_v5 = vsel %vm7003_vm4, 0, %v610_v18 }
  0x97   : > { %v7060_v51 = vpop.permute.xlu0 %2549 }
  0x98   : > { %5722 = vmatmul.mubr.msk.bf16.gmra.mrb[4].mxu0 %vm858_vm3, %v7060_v51  ;;  %v7078_v23 = vpop.permute.xlu1 %2551 }
  0x99   : > { %5450 = vmatmul.mubr.msk.bf16.gmra.mrb[4].mxu1 %vm858_vm3, %v7064_v34  ;;  %3301 = vrot.lane.b32.xlu0 %v7056_v50, %s6565_s23 }
  0x9a   : > { %5453 = vmatprep.mubr.msk.bf16.mxu1 %vm858_vm3, %v7070_v5  ;;  %5725 = vmatprep.mubr.msk.bf16.mxu0 %vm858_vm3, %v7078_v23 }
  0x9b   : > { %v614_v9 = vpop.permute.xlu0 %613 }
  0x9c   : > { %v618_v20 = vpop.permute.xlu1 %617  ;;  %v7086_v18 = vsel %vm7003_vm4, 0, %v614_v9 }
  0x9d   : > { %v7092_v58 = vsel %vm7003_vm4, 0, %v618_v20 }
  0x9f   : > { %v7082_v19 = vpop.permute.xlu0 %2553 }
  0xa0   : > { %5726 = vmatmul.mubr.msk.bf16.gmra.mrb[8].mxu0 %vm858_vm3, %v7082_v19  ;;  %v7098_v15 = vpop.permute.xlu1 %2555 }
  0xa1   : > { %5454 = vmatmul.mubr.msk.bf16.gmra.mrb[8].mxu1 %vm858_vm3, %v7086_v18  ;;  %5729 = vmatprep.mubr.msk.bf16.mxu0 %vm858_vm3, %v7098_v15 }
  0xa2   : > { %5457 = vmatprep.mubr.msk.bf16.mxu1 %vm858_vm3, %v7092_v58 }
  0xa3   : > { %v622_v39 = vpop.permute.xlu0 %621 }
  0xa4   : > { %v626_v35 = vpop.permute.xlu1 %625  ;;  %v7106_v1 = vsel %vm7003_vm4, 0, %v622_v39 }
  0xa5   : > { %v7112_v20 = vsel %vm7003_vm4, 0, %v626_v35 }
  0xa7   : > { %v7102_v9 = vpop.permute.xlu0 %2557 }
  0xa8   : > { %5730 = vmatmul.mubr.msk.bf16.gmra.mrb[12].mxu0 %vm858_vm3, %v7102_v9  ;;  %v7118_v42 = vpop.permute.xlu1 %2559 }
  0xa9   : > { %5458 = vmatmul.mubr.msk.bf16.gmra.mrb[12].mxu1 %vm858_vm3, %v7106_v1  ;;  %5733 = vmatprep.mubr.msk.bf16.mxu0 %vm858_vm3, %v7118_v42 }
  0xaa   : > { %5461 = vmatprep.mubr.msk.bf16.mxu1 %vm858_vm3, %v7112_v20 }
  0xab   : > { %v630_v16 = vpop.permute.xlu0 %629 }
  0xac   : > { %v634_v52 = vpop.permute.xlu1 %633  ;;  %v7126_v38 = vsel %vm7003_vm4, 0, %v630_v16 }
  0xad   : > { %v7132_v35 = vsel %vm7003_vm4, 0, %v634_v52 }
  0xaf   : > { %v7122_v39 = vpop.permute.xlu0 %2561 }
  0xb0   : > { %5734 = vmatmul.mubr.msk.bf16.gmra.mrb[16].mxu0 %vm858_vm3, %v7122_v39  ;;  %v7138_v0 = vpop.permute.xlu1 %2563 }
  0xb1   : > { %5462 = vmatmul.mubr.msk.bf16.gmra.mrb[16].mxu1 %vm858_vm3, %v7126_v38  ;;  %5737 = vmatprep.mubr.msk.bf16.mxu0 %vm858_vm3, %v7138_v0 }
  0xb2   : > { %5465 = vmatprep.mubr.msk.bf16.mxu1 %vm858_vm3, %v7132_v35 }
  0xb3   : > { %v638_v63 = vpop.permute.xlu0 %637 }
  0xb4   : > { %v642_v25 = vpop.permute.xlu1 %641  ;;  %v7146_v8 = vsel %vm7003_vm4, 0, %v638_v63 }
  0xb5   : > { %v7152_v52 = vsel %vm7003_vm4, 0, %v642_v25 }
  0xb7   : > { %v7142_v16 = vpop.permute.xlu0 %2565 }
  0xb8   : > { %5738 = vmatmul.mubr.msk.bf16.gmra.mrb[20].mxu0 %vm858_vm3, %v7142_v16  ;;  %v7158_v24 = vpop.permute.xlu1 %2567 }
  0xb9   : > { %5466 = vmatmul.mubr.msk.bf16.gmra.mrb[20].mxu1 %vm858_vm3, %v7146_v8  ;;  %5741 = vmatprep.mubr.msk.bf16.mxu0 %vm858_vm3, %v7158_v24 }
  0xba   : > { %5469 = vmatprep.mubr.msk.bf16.mxu1 %vm858_vm3, %v7152_v52 }
  0xbb   : > { %v646_v22 = vpop.permute.xlu0 %645 }
  0xbc   : > { %v650_v4 = vpop.permute.xlu1 %649  ;;  %v7166_v50 = vsel %vm7003_vm4, 0, %v646_v22 }
  0xbd   : > { %v7172_v25 = vsel %vm7003_vm4, 0, %v650_v4  ;;  %v8257_v4 = vmov 0  }
  0xbe   : > { %8255 = vst [vmem:[#allocation35_spill] sm:$0xff] %v7172_v25 }
  0xbf   : > { %v7162_v63 = vpop.permute.xlu0 %2569 }
  0xc0   : > { %5742 = vmatmul.mubr.msk.bf16.gmra.mrb[24].mxu0 %vm858_vm3, %v7162_v63  ;;  %v7178_v46 = vpop.permute.xlu1 %2571 }
  0xc1   : > { %5470 = vmatmul.mubr.msk.bf16.gmra.mrb[24].mxu1 %vm858_vm3, %v7166_v50  ;;  %5745 = vmatprep.mubr.msk.bf16.mxu0 %vm858_vm3, %v7178_v46 }
  0xc2   : > { %5473 = vmatprep.mubr.msk.bf16.mxu1 %vm858_vm3, %v7172_v25  ;;  %v3307_v25 = vsel %vm907_vm0, %v7218_v61, 0 }
  0xc3   : > { %v654_v41 = vpop.permute.xlu0 %653 }
  0xc4   : > { %v596_v3 = vpop.permute.xlu1 %595  ;;  %v7186_v49 = vsel %vm7003_vm4, 0, %v654_v41  ;;  %v1290_v41 = vsel %vm907_vm0, %v7035_v10, 0 }
  0xc5   : > { %8256 = vst [vmem:[#allocation36_spill] sm:$0xff] %v7186_v49  ;;  %v7202_v45 = vsel %vm7003_vm4, 0, %v596_v3 }
  0xc7   : > { %v7182_v22 = vpop.permute.xlu0 %2573 }
  0xc8   : > { %5746 = vmatmul.mubr.msk.bf16.gmra.mrb[28].mxu0 %vm858_vm3, %v7182_v22  ;;  %v7193_v17 = vpop.permute.xlu1 %2822 }
  0xc9   : > { %5474 = vmatmul.mubr.msk.bf16.gmra.mrb[28].mxu1 %vm858_vm3, %v7186_v49 }
  0xca   : > { %5479 = vmatprep.mubr.bf16.mxu1 %v8257_v4 }
  0xcb   : > { %v2821_v29 = vpop.permute.xlu0 %2820 }
  0xcc   : > { %5751 = vmatprep.mubr.msk.bf16.mxu0 %vm858_vm3, %v2821_v29  ;;  %v604_v53 = vpop.permute.xlu1 %603  ;;  %v7213_v29 = vld [vmem:[%s8093_s1 + $0x30] sm:$0xf] }
  0xcf   : > { %v600_v59 = vpop.permute.xlu0 %599 }
  0xd0   : > { %5752 = vmatmul.mubr.msk.bf16.vlgmr.msra.gmra.mrb[0].mxu0 %vm858_vm3, %v7193_v17  ;;  %v7208_v37 = vsel %vm7003_vm4, 0, %v600_v59  ;;  %v7226_v3 = vpop.permute.xlu1 %2826 }
  0xd1   : > { %5480 = vmatmul.mubr.msk.bf16.vlgmr.msra.gmra.mrb[0].mxu1 %vm858_vm3, %v7202_v45  ;;  %5784 = vmatpush3.bf16.msra.mxu0 %v3104_v62  ;;  %v7236_v62 = vsel %vm7003_vm4, 0, %v604_v53 }
  0xd2   : > { %5512 = vmatpush3.bf16.msra.mxu1 %v1290_v41  ;;  %5483 = vmatprep.mubr.msk.bf16.mxu1 %vm858_vm3, %v7208_v37 }
  0xd3   : > { %v7224_v59 = vpop.permute.xlu0 %2824  ;;  %6470 = vmatprep.subr.msk.bf16.mxu1 %vm907_vm0, %v7213_v29  ;;  %6478 = vmatprep.subr.msk.bf16.mxu0 %vm907_vm0, %v7218_v61 }
  0xd4   : > { %5755 = vmatprep.mubr.msk.bf16.mxu0 %vm858_vm3, %v7224_v59  ;;  %v612_v30 = vpop.permute.xlu1 %611 }
  0xd5   : > { %v7256_v13 = vsel %vm7003_vm4, 0, %v612_v30 }
  0xd7   : > { %v608_v10 = vpop.permute.xlu0 %607 }
  0xd8   : > { %5756 = vmatmul.mubr.msk.bf16.gmra.mrb[4].mxu0 %vm858_vm3, %v7226_v3  ;;  %v7242_v41 = vsel %vm7003_vm4, 0, %v608_v10  ;;  %v7250_v14 = vpop.permute.xlu1 %2830 }
  0xd9   : > { %5484 = vmatmul.mubr.msk.bf16.gmra.mrb[4].mxu1 %vm858_vm3, %v7236_v62 }
  0xda   : > { %5487 = vmatprep.mubr.msk.bf16.mxu1 %vm858_vm3, %v7242_v41 }
  0xdb   : > { %v7248_v28 = vpop.permute.xlu0 %2828 }
  0xdc   : > { %5759 = vmatprep.mubr.msk.bf16.mxu0 %vm858_vm3, %v7248_v28  ;;  %v620_v27 = vpop.permute.xlu1 %619 }
  0xdd   : > { %v705_v43 = vsel %vm7003_vm4, 0, %v620_v27 }
  0xdf   : > { %v616_v53 = vpop.permute.xlu0 %615 }
  0xe0   : > { %5760 = vmatmul.mubr.msk.bf16.gmra.mrb[8].mxu0 %vm858_vm3, %v7250_v14  ;;  %v7262_v10 = vsel %vm7003_vm4, 0, %v616_v53  ;;  %v7270_v56 = vpop.permute.xlu1 %2834 }
  0xe1   : > { %5488 = vmatmul.mubr.msk.bf16.gmra.mrb[8].mxu1 %vm858_vm3, %v7256_v13 }
  0xe2   : > { %5491 = vmatprep.mubr.msk.bf16.mxu1 %vm858_vm3, %v7262_v10 }
  0xe3   : > { %v7268_v7 = vpop.permute.xlu0 %2832 }
  0xe4   : > { %5763 = vmatprep.mubr.msk.bf16.mxu0 %vm858_vm3, %v7268_v7  ;;  %v628_v36 = vpop.permute.xlu1 %627 }
  0xe5   : > { %v709_v27 = vsel %vm7003_vm4, 0, %v628_v36 }
  0xe7   : > { %v624_v30 = vpop.permute.xlu0 %623 }
  0xe8   : > { %5764 = vmatmul.mubr.msk.bf16.gmra.mrb[12].mxu0 %vm858_vm3, %v7270_v56  ;;  %v707_v53 = vsel %vm7003_vm4, 0, %v624_v30  ;;  %v7284_v12 = vpop.permute.xlu1 %2838 }
  0xe9   : > { %5492 = vmatmul.mubr.msk.bf16.gmra.mrb[12].mxu1 %vm858_vm3, %v705_v43 }
  0xea   : > { %5495 = vmatprep.mubr.msk.bf16.mxu1 %vm858_vm3, %v707_v53 }
  0xeb   : > { %v7282_v26 = vpop.permute.xlu0 %2836 }
  0xec   : > { %5767 = vmatprep.mubr.msk.bf16.mxu0 %vm858_vm3, %v7282_v26  ;;  %v636_v33 = vpop.permute.xlu1 %635 }
  0xed   : > { %v713_v36 = vsel %vm7003_vm4, 0, %v636_v33 }
  0xef   : > { %v632_v55 = vpop.permute.xlu0 %631 }
  0xf0   : > { %5768 = vmatmul.mubr.msk.bf16.gmra.mrb[16].mxu0 %vm858_vm3, %v7284_v12  ;;  %v711_v30 = vsel %vm7003_vm4, 0, %v632_v55  ;;  %v7298_v2 = vpop.permute.xlu1 %2842 }
  0xf1   : > { %5496 = vmatmul.mubr.msk.bf16.gmra.mrb[16].mxu1 %vm858_vm3, %v709_v27 }
  0xf2   : > { %5499 = vmatprep.mubr.msk.bf16.mxu1 %vm858_vm3, %v711_v30 }
  0xf3   : > { %v7296_v21 = vpop.permute.xlu0 %2840 }
  0xf4   : > { %5771 = vmatprep.mubr.msk.bf16.mxu0 %vm858_vm3, %v7296_v21  ;;  %v644_v54 = vpop.permute.xlu1 %643 }
  0xf5   : > { %v717_v33 = vsel %vm7003_vm4, 0, %v644_v54 }
  0xf7   : > { %v640_v60 = vpop.permute.xlu0 %639 }
  0xf8   : > { %5772 = vmatmul.mubr.msk.bf16.gmra.mrb[20].mxu0 %vm858_vm3, %v7298_v2  ;;  %v715_v55 = vsel %vm7003_vm4, 0, %v640_v60  ;;  %v7312_v40 = vpop.permute.xlu1 %2846 }
  0xf9   : > { %5500 = vmatmul.mubr.msk.bf16.gmra.mrb[20].mxu1 %vm858_vm3, %v713_v36 }
  0xfa   : > { %5503 = vmatprep.mubr.msk.bf16.mxu1 %vm858_vm3, %v715_v55 }
  0xfb   : > { %v7310_v48 = vpop.permute.xlu0 %2844 }
  0xfc   : > { %5775 = vmatprep.mubr.msk.bf16.mxu0 %vm858_vm3, %v7310_v48  ;;  %v652_v4 = vpop.permute.xlu1 %651 }
  0xfd   : > { %v721_v54 = vsel %vm7003_vm4, 0, %v652_v4  ;;  %v4807_v4 = vld [vmem:[%s8093_s1 + $0x4] sm:$0xf] }
  0xff   : > { %v648_v47 = vpop.permute.xlu0 %647 }
 0x100   : > { %5776 = vmatmul.mubr.msk.bf16.gmra.mrb[24].mxu0 %vm858_vm3, %v7312_v40  ;;  %v719_v60 = vsel %vm7003_vm4, 0, %v648_v47  ;;  %v7328_v49 = vpop.permute.xlu1 %2850  ;;  %v1488_v47 = vsel %vm907_vm0, %v7213_v29, 0 }
 0x101   : > { %5504 = vmatmul.mubr.msk.bf16.gmra.mrb[24].mxu1 %vm858_vm3, %v717_v33 }
 0x102   : > { %5507 = vmatprep.mubr.msk.bf16.mxu1 %vm858_vm3, %v719_v60 }
 0x103   : > { %v7324_v31 = vpop.permute.xlu0 %2848 }
 0x104   : > { %5779 = vmatprep.mubr.msk.bf16.mxu0 %vm858_vm3, %v7324_v31 }
 0x108   : > { %5780 = vmatmul.mubr.msk.bf16.gmra.mrb[28].mxu0 %vm858_vm3, %v7328_v49 }
 0x109   : > { %5508 = vmatmul.mubr.msk.bf16.gmra.mrb[28].mxu1 %vm858_vm3, %v721_v54  ;;  %5785 = vmatprep.mubr.msk.bf16.mxu0 %vm858_vm3, %v6986_v32 }
 0x10a   : > { %5513 = vmatprep.mubr.msk.bf16.mxu1 %vm858_vm3, %v7202_v45  ;;  %v4942_v45 = vld [vmem:[%s8093_s1 + $0xc] sm:$0xf] }
 0x110   : > { %5786 = vmatmul.mubr.msk.bf16.vlgmr.msra.gmra.mrb[0].mxu0 %vm858_vm3, %v7047_v11 }
 0x111   : > { %5514 = vmatmul.mubr.msk.bf16.vlgmr.msra.gmra.mrb[0].mxu1 %vm858_vm3, %v7208_v37  ;;  %5789 = vmatprep.mubr.msk.bf16.mxu0 %vm858_vm3, %v7060_v51  ;;  %v3099_v37 = vpop.permute.xlu1 %3098  ;;  %v7516_v51 = vld [vmem:[%s8093_s1 + $0x2c] sm:$0xf] }
 0x112   : > { %5546 = vmatpush3.bf16.msra.mxu1 %v1488_v47  ;;  %5818 = vmatpush3.bf16.msra.mxu0 %v3307_v25  ;;  %v7546_v25 = vld [vmem:[%s6606_s18 + $0x28] sm:$0xff]  }
 0x113   : > { %5517 = vmatprep.mubr.msk.bf16.mxu1 %vm858_vm3, %v7236_v62  ;;  %6471 = vmatprep.subr.msk.bf16.mxu1 %vm907_vm0, %v4807_v4  ;;  %v8279_v62 = vld [vmem:[#allocation19_spill] sm:$0xff] }
 0x114   : > { %6479 = vmatprep.subr.msk.bf16.mxu0 %vm907_vm0, %v4942_v45 }
 0x118   : > { %5790 = vmatmul.mubr.msk.bf16.gmra.mrb[4].mxu0 %vm858_vm3, %v7078_v23  ;;  %v7504_v23 = vld [vmem:[%s8093_s1 + $0x24] sm:$0xf] }
 0x119   : > { %5518 = vmatmul.mubr.msk.bf16.gmra.mrb[4].mxu1 %vm858_vm3, %v7242_v41  ;;  %5793 = vmatprep.mubr.msk.bf16.mxu0 %vm858_vm3, %v7082_v19  ;;  %v7523_v19 = vld [vmem:[%s6606_s18 + $0x18] sm:$0xff]   ;;  %v8280_v41 = vshll.u32 %v8279_v62, 16 }
 0x11a   : > { %5521 = vmatprep.mubr.msk.bf16.mxu1 %vm858_vm3, %v7256_v13  ;;  %v656_v13 = vpop.permute.xlu0 %655 }
 0x120   : > { %5794 = vmatmul.mubr.msk.bf16.gmra.mrb[8].mxu0 %vm858_vm3, %v7098_v15  ;;  %v723_v15 = vsel %vm7003_vm4, 0, %v656_v13 }
 0x121   : > { %5522 = vmatmul.mubr.msk.bf16.gmra.mrb[8].mxu1 %vm858_vm3, %v7262_v10  ;;  %5797 = vmatprep.mubr.msk.bf16.mxu0 %vm858_vm3, %v7102_v9  ;;  %v8273_v9 = vld [vmem:[#allocation15_spill] sm:$0xff]  ;;  %v750_v10 = vrot.slane %v8280_v41, 1 }
 0x122   : > { %5525 = vmatprep.mubr.msk.bf16.mxu1 %vm858_vm3, %v705_v43  ;;  %v1716_v43 = vsel %vm907_vm0, %v4807_v4, 0  ;;  %v8285_v4 = vld [vmem:[#allocation23_spill] sm:$0xff] }
 0x128   : > { %5798 = vmatmul.mubr.msk.bf16.gmra.mrb[12].mxu0 %vm858_vm3, %v7118_v42  ;;  %v8267_v42 = vld [vmem:[#allocation10_spill] sm:$0xff] }
 0x129   : > { %5526 = vmatmul.mubr.msk.bf16.gmra.mrb[12].mxu1 %vm858_vm3, %v707_v53  ;;  %5801 = vmatprep.mubr.msk.bf16.mxu0 %vm858_vm3, %v7122_v39  ;;  %v8271_v11 = vshrl.u32 %v8267_v42, 16 }
 0x12a   : > { %5529 = vmatprep.mubr.msk.bf16.mxu1 %vm858_vm3, %v709_v27  ;;  %v8281_v27 = vld [vmem:[#allocation21_spill] sm:$0xff] }
 0x130   : > { %5802 = vmatmul.mubr.msk.bf16.gmra.mrb[16].mxu0 %vm858_vm3, %v7138_v0  ;;  %v4823_v0 = vld [vmem:[%s8093_s1 + $0x14] sm:$0xf] }
 0x131   : > { %5530 = vmatmul.mubr.msk.bf16.gmra.mrb[16].mxu1 %vm858_vm3, %v711_v30  ;;  %5805 = vmatprep.mubr.msk.bf16.mxu0 %vm858_vm3, %v7142_v16  ;;  %v1946_v32 = vsel %vm907_vm0, %v4823_v0, 0  ;;  %v8275_v16 = vld [vmem:[#allocation17_spill] sm:$0xff]  ;;  %v8282_v30 = vshll.u32 %v8281_v27, 16 }
 0x132   : > { %5533 = vmatprep.mubr.msk.bf16.mxu1 %vm858_vm3, %v713_v36  ;;  %v8278_v61 = vshrl.u32 %v8275_v16, 16 }
 0x133   : > { %v754_v36 = vrot.slane %v8282_v30, 1 }
 0x138   : > { %5806 = vmatmul.mubr.msk.bf16.gmra.mrb[20].mxu0 %vm858_vm3, %v7158_v24 }
 0x139   : > { %5534 = vmatmul.mubr.msk.bf16.gmra.mrb[20].mxu1 %vm858_vm3, %v715_v55  ;;  %5809 = vmatprep.mubr.msk.bf16.mxu0 %vm858_vm3, %v7162_v63  ;;  %v8283_v55 = vshrl.u32 %v8279_v62, 16 }
 0x13a   : > { %5537 = vmatprep.mubr.msk.bf16.mxu1 %vm858_vm3, %v717_v33 }
 0x13b   : > { %v751_v33 = vor.u32 %v750_v10, %v8283_v55 }
 0x13d   : > { %v7584_v47 = vsel %vm7478_vm7, %v751_v33, 0 }
 0x140   : > { %5810 = vmatmul.mubr.msk.bf16.gmra.mrb[24].mxu0 %vm858_vm3, %v7178_v46  ;;  %v3550_v46 = vsel %vm907_vm0, %v4942_v45, 0  ;;  %v8286_v45 = vshll.u32 %v8285_v4, 16 }
 0x141   : > { %5538 = vmatmul.mubr.msk.bf16.gmra.mrb[24].mxu1 %vm858_vm3, %v719_v60  ;;  %5813 = vmatprep.mubr.msk.bf16.mxu0 %vm858_vm3, %v7182_v22  ;;  %v8277_v22 = vshrl.u32 %v8273_v9, 16  ;;  %v8284_v60 = vshrl.u32 %v8281_v27, 16 }
 0x142   : > { %5541 = vmatprep.mubr.msk.bf16.mxu1 %vm858_vm3, %v721_v54  ;;  %v758_v13 = vrot.slane %v8286_v45, 1 }
 0x143   : > { %v755_v54 = vor.u32 %v754_v36, %v8284_v60 }
 0x148   : > { %5814 = vmatmul.mubr.msk.bf16.gmra.mrb[28].mxu0 %vm858_vm3, %v3099_v37  ;;  %v7590_v37 = vsel %vm7478_vm7, %v755_v54, 0  ;;  %v8309_v54 = vld [vmem:[#allocation3_spill] sm:$0xff] }
 0x149   : > { %5542 = vmatmul.mubr.msk.bf16.gmra.mrb[28].mxu1 %vm858_vm3, %v723_v15  ;;  %5819 = vmatprep.mubr.msk.bf16.mxu0 %vm858_vm3, %v7193_v17  ;;  %v8262_v17 = vmov 0   ;;  %v8287_v15 = vld [vmem:[#allocation25_spill] sm:$0xff] }
 0x14a   : > { %5547 = vmatprep.mubr.msk.bf16.mxu1 %vm858_vm3, %v7026_v57  ;;  %v4958_v57 = vld [vmem:[%s8093_s1 + $0x1c] sm:$0xf] }
 0x150   : > { %5820 = vmatmul.mubr.msk.bf16.vlgmr.msra.gmra.mrb[0].mxu0 %vm858_vm3, %v7224_v59 }
 0x151   : > { %5548 = vmatmul.mubr.msk.bf16.vlgmr.msra.gmra.mrb[0].mxu1 %vm858_vm3, %v7030_v44  ;;  %5823 = vmatprep.mubr.msk.bf16.mxu0 %vm858_vm3, %v7226_v3  ;;  %v7507_v44 = vld [vmem:[%s6606_s18 + $0x8] sm:$0xff]  }
 0x152   : > { %5580 = vmatpush3.bf16.msra.mxu1 %v1716_v43  ;;  %5852 = vmatpush3.bf16.msra.mxu0 %v3550_v46  ;;  %v8288_v43 = vshll.u32 %v8287_v15, 16 }
 0x153   : > { %5551 = vmatprep.mubr.msk.bf16.mxu1 %vm858_vm3, %v7064_v34  ;;  %6472 = vmatprep.subr.msk.bf16.mxu1 %vm907_vm0, %v4823_v0  ;;  %v8289_v0 = vshrl.u32 %v8285_v4, 16 }
 0x154   : > { %6480 = vmatprep.subr.msk.bf16.mxu0 %vm907_vm0, %v4958_v57  ;;  %v762_v46 = vrot.slane %v8288_v43, 1 }
 0x158   : > { %5824 = vmatmul.mubr.msk.bf16.gmra.mrb[4].mxu0 %vm858_vm3, %v7248_v28  ;;  %v3302_v28 = vpop.permute.xlu0 %3301 }
 0x159   : > { %5552 = vmatmul.mubr.msk.bf16.gmra.mrb[4].mxu1 %vm858_vm3, %v7070_v5  ;;  %5827 = vmatprep.mubr.msk.bf16.mxu0 %vm858_vm3, %v7250_v14  ;;  %v8259_v14 = vld [vmem:[#allocation36_spill] sm:$0xff] }
 0x15a   : > { %5555 = vmatprep.mubr.msk.bf16.mxu1 %vm858_vm3, %v7086_v18 }
 0x160   : > { %5828 = vmatmul.mubr.msk.bf16.gmra.mrb[8].mxu0 %vm858_vm3, %v7268_v7  ;;  %v8258_v7 = vld [vmem:[#allocation35_spill] sm:$0xff] }
 0x161   : > { %5556 = vmatmul.mubr.msk.bf16.gmra.mrb[8].mxu1 %vm858_vm3, %v7092_v58  ;;  %5831 = vmatprep.mubr.msk.bf16.mxu0 %vm858_vm3, %v7270_v56  ;;  %v8268_v56 = vshll.u32 %v8267_v42, 16 }
 0x162   : > { %5559 = vmatprep.mubr.msk.bf16.mxu1 %vm858_vm3, %v7106_v1 }
 0x163   : > { %v734_v24 = vrot.slane %v8268_v56, 1 }
 0x168   : > { %5832 = vmatmul.mubr.msk.bf16.gmra.mrb[12].mxu0 %vm858_vm3, %v7282_v26 }
 0x169   : > { %5560 = vmatmul.mubr.msk.bf16.gmra.mrb[12].mxu1 %vm858_vm3, %v7112_v20  ;;  %5835 = vmatprep.mubr.msk.bf16.mxu0 %vm858_vm3, %v7284_v12  ;;  %v8274_v20 = vshll.u32 %v8273_v9, 16 }
 0x16a   : > { %5563 = vmatprep.mubr.msk.bf16.mxu1 %vm858_vm3, %v7126_v38  ;;  %v8269_v38 = vld [vmem:[#allocation13_spill] sm:$0xff] }
 0x16b   : > { %v8270_v1 = vshll.u32 %v8269_v38, 16  ;;  %v8272_v34 = vshrl.u32 %v8269_v38, 16  ;;  %v742_v39 = vrot.slane %v8274_v20, 1 }
 0x16d   : > { %v738_v58 = vrot.slane %v8270_v1, 1  ;;  %v743_v29 = vor.u32 %v742_v39, %v8277_v22  ;;  %v8303_v22 = vld [vmem:[#allocation32_spill] sm:$0xff] }
 0x16f   : > { %v739_v5 = vor.u32 %v738_v58, %v8272_v34  ;;  %v7560_v3 = vsel %vm7478_vm7, %v743_v29, 0  ;;  %v8297_v58 = vld [vmem:[#allocation30_spill] sm:$0xff]  ;;  %v8299_v34 = vld [vmem:[#allocation31_spill] sm:$0xff]  ;;  %v8304_v29 = vshll.u32 %v8303_v22, 16 }
 0x170   : > { %5836 = vmatmul.mubr.msk.bf16.gmra.mrb[16].mxu0 %vm858_vm3, %v7296_v21  ;;  %v8301_v20 = vshrl.u32 %v8297_v58, 16 }
 0x171   : > { %5564 = vmatmul.mubr.msk.bf16.gmra.mrb[16].mxu1 %vm858_vm3, %v7132_v35  ;;  %5839 = vmatprep.mubr.msk.bf16.mxu0 %vm858_vm3, %v7298_v2  ;;  %v7539_v35 = vsel %vm7478_vm7, %v739_v5, 0  ;;  %v8300_v5 = vshll.u32 %v8299_v34, 16 }
 0x172   : > { %5567 = vmatprep.mubr.msk.bf16.mxu1 %vm858_vm3, %v7146_v8  ;;  %v3796_v8 = vsel %vm907_vm0, %v4958_v57, 0  ;;  %v759_v57 = vor.u32 %v758_v13, %v8289_v0  ;;  %v6528_v13 = vld [vmem:[%s6606_s18] sm:$0xff]  }
 0x178   : > { %5840 = vmatmul.mubr.msk.bf16.gmra.mrb[20].mxu0 %vm858_vm3, %v7310_v48  ;;  %v8260_v48 = vld [vmem:[#allocation8_spill] sm:$0xff] }
 0x179   : > { %5568 = vmatmul.mubr.msk.bf16.gmra.mrb[20].mxu1 %vm858_vm3, %v7152_v52  ;;  %5843 = vmatprep.mubr.msk.bf16.mxu0 %vm858_vm3, %v7312_v40  ;;  %v8261_v40 = vshll.u32 %v8260_v48, 16  ;;  %v8265_v21 = vshrl.u32 %v8260_v48, 16  ;;  %v8276_v52 = vshll.u32 %v8275_v16, 16  ;;  %v8291_v48 = vld [vmem:[#allocation27_spill] sm:$0xff] }
 0x17a   : > { %5571 = vmatprep.mubr.msk.bf16.mxu1 %vm858_vm3, %v7166_v50  ;;  %v735_v50 = vor.u32 %v734_v24, %v8271_v11  ;;  %v8295_v56 = vshrl.u32 %v8291_v48, 16 }
 0x17b   : > { %v730_v2 = vrot.slane %v8261_v40, 1  ;;  %v746_v63 = vrot.slane %v8276_v52, 1  ;;  %v8292_v40 = vshll.u32 %v8291_v48, 16 }
 0x17c   : > { %v7533_v18 = vsel %vm7478_vm7, %v735_v50, 0 }
 0x17d   : > { %v731_v26 = vor.u32 %v730_v2, %v8265_v21  ;;  %v747_v59 = vor.u32 %v746_v63, %v8278_v61  ;;  %v766_v2 = vrot.slane %v8292_v40, 1  ;;  %v782_v61 = vrot.slane %v8304_v29, 1  ;;  %v8315_v40 = vld [vmem:[#allocation6_spill] sm:$0xff] }
 0x17f   : > { %v7497_v6 = vsel %vm7478_vm7, %v731_v26, 0  ;;  %v7566_v53 = vsel %vm7478_vm7, %v747_v59, 0  ;;  %v8293_v26 = vld [vmem:[#allocation29_spill] sm:$0xff]  ;;  %v767_v24 = vor.u32 %v766_v2, %v8295_v56  ;;  %v8305_v59 = vld [vmem:[#allocation2_spill] sm:$0xff]  ;;  %v8316_v2 = vshll.u32 %v8315_v40, 16 }
 0x180   : > { %5844 = vmatmul.mubr.msk.bf16.gmra.mrb[24].mxu0 %vm858_vm3, %v7324_v31  ;;  %v8308_v36 = vshrl.u32 %v8305_v59, 16  ;;  %v7717_v56 = vld [vmem:[%s8093_s1 + $0x34] sm:$0xf]  ;;  %v8355_v31 = vld [vmem:[#allocation34_spill] sm:$0xff] }
 0x181   : > { %5572 = vmatmul.mubr.msk.bf16.gmra.mrb[24].mxu1 %vm858_vm3, %v8258_v7  ;;  %5847 = vmatprep.mubr.msk.bf16.mxu0 %vm858_vm3, %v7328_v49  ;;  %v8266_v49 = vld [vmem:[#allocation12_spill] sm:$0xff]  ;;  %v8290_v7 = vshrl.u32 %v8287_v15, 16  ;;  %v7632_v1 = vsel %vm7478_vm7, %v767_v24, 0 }
 0x182   : > { %5575 = vmatprep.mubr.msk.bf16.mxu1 %vm858_vm3, %v8259_v14  ;;  %v7487_v12 = vsel %vm7478_vm7, %v8266_v49, 0  ;;  %v8294_v49 = vshll.u32 %v8293_v26, 16  ;;  %v7720_v24 = vld [vmem:[%s6606_s18 + $0x10] sm:$0xff]  }
 0x183   : > { %v763_v14 = vor.u32 %v762_v46, %v8290_v7  ;;  %v8312_v46 = vld [vmem:[#allocation5_spill] sm:$0xff] }
 0x184   : > { %v770_v42 = vrot.slane %v8294_v49, 1  ;;  %v7698_v0 = vsel %vm7478_vm7, %v8312_v46, 0  ;;  %v2146_v49 = vsel %vm907_vm0, %v7504_v23, 0  ;;  %v7798_v46 = vld [vmem:[%s6606_s18 + $0x60] sm:$0xff]  }
 0x185   : > { %v7614_v21 = vsel %vm7478_vm7, %v763_v14, 0 }
 0x188   : > { %5848 = vmatmul.mubr.msk.bf16.gmra.mrb[28].mxu0 %vm858_vm3, %v3302_v28  ;;  %v7608_v28 = vsel %vm7478_vm7, %v759_v57, 0  ;;  %v8313_v57 = vld [vmem:[#allocation4_spill] sm:$0xff] }
 0x189   : > { %5576 = vmatmul.mubr.bf16.gmra.mrb[28].mxu1 %v8262_v17  ;;  %5853 = vmatprep.mubr.bf16.mxu0 %v8262_v17  ;;  %v8314_v7 = vshll.u32 %v8313_v57, 16 }
 0x18a   : > { %5581 = vmatprep.mubr.bf16.mxu1 %v8262_v17 }
 0x18b   : > { %v736_v14 = vrot.slane %v8314_v7, 1 }
 0x190   : > { %5854 = vmatmul.mubr.msk.bf16.vlgmr.msra.gmra.mrb[0].mxu0 %vm858_vm3, %v7487_v12 }
 0x191   : > { %5582 = vmatmul.mubr.msk.bf16.vlgmr.msra.gmra.mrb[0].mxu1 %vm858_vm3, %v7507_v44  ;;  %5886 = vmatpush3.bf16.msra.mxu0 %v3796_v8  ;;  %v8296_v8 = vshrl.u32 %v8293_v26, 16 }
 0x192   : > { %5614 = vmatpush3.bf16.msra.mxu1 %v1946_v32  ;;  %5857 = vmatprep.mubr.msk.bf16.mxu0 %vm858_vm3, %v7497_v6  ;;  %v8298_v32 = vshll.u32 %v8297_v58, 16 }
 0x193   : > { %5585 = vmatprep.mubr.msk.bf16.mxu1 %vm858_vm3, %v7523_v19  ;;  %6473 = vmatprep.subr.msk.bf16.mxu1 %vm907_vm0, %v7504_v23  ;;  %v8317_v23 = vshrl.u32 %v8313_v57, 16 }
 0x194   : > { %6481 = vmatprep.subr.msk.bf16.mxu0 %vm907_vm0, %v7516_v51  ;;  %v774_v11 = vrot.slane %v8298_v32, 1  ;;  %v7736_v32 = vld [vmem:[%s6606_s18 + $0x20] sm:$0xff]  }
 0x196   : > { %v775_v39 = vor.u32 %v774_v11, %v8301_v20 }
 0x198   : > { %5858 = vmatmul.mubr.msk.bf16.gmra.mrb[4].mxu0 %vm858_vm3, %v7533_v18  ;;  %v7656_v63 = vsel %vm7478_vm7, %v775_v39, 0  ;;  %v8321_v39 = vld [vmem:[#allocation9_spill] sm:$0xff] }
 0x199   : > { %5586 = vmatmul.mubr.msk.bf16.gmra.mrb[4].mxu1 %vm858_vm3, %v7546_v25  ;;  %5861 = vmatprep.mubr.msk.bf16.mxu0 %vm858_vm3, %v7539_v35 }
 0x19a   : > { %5589 = vmatprep.mubr.msk.bf16.mxu1 %vm858_vm3, %v8269_v38  ;;  %v771_v38 = vor.u32 %v770_v42, %v8296_v8  ;;  %v7729_v8 = vld [vmem:[%s8093_s1 + $0x3c] sm:$0xf] }
 0x19c   : > { %v7638_v50 = vsel %vm7478_vm7, %v771_v38, 0  ;;  %v8318_v38 = vshrl.u32 %v8315_v40, 16 }
 0x1a0   : > { %5862 = vmatmul.mubr.msk.bf16.gmra.mrb[8].mxu0 %vm858_vm3, %v7560_v3 }
 0x1a1   : > { %5590 = vmatmul.mubr.msk.bf16.gmra.mrb[8].mxu1 %vm858_vm3, %v8273_v9  ;;  %5865 = vmatprep.mubr.msk.bf16.mxu0 %vm858_vm3, %v7566_v53  ;;  %v778_v9 = vrot.slane %v8300_v5, 1 }
 0x1a2   : > { %5593 = vmatprep.mubr.msk.bf16.mxu1 %vm858_vm3, %v8275_v16  ;;  %v8302_v16 = vshrl.u32 %v8299_v34, 16 }
 0x1a4   : > { %v779_v52 = vor.u32 %v778_v9, %v8302_v16  ;;  %v8322_v16 = vshll.u32 %v8321_v39, 16 }
 0x1a6   : > { %v7664_v10 = vsel %vm7478_vm7, %v779_v52, 0  ;;  %v748_v52 = vrot.slane %v8322_v16, 1 }
 0x1a8   : > { %5866 = vmatmul.mubr.msk.bf16.gmra.mrb[12].mxu0 %vm858_vm3, %v7584_v47 }
 0x1a9   : > { %5594 = vmatmul.mubr.msk.bf16.gmra.mrb[12].mxu1 %vm858_vm3, %v8279_v62  ;;  %5869 = vmatprep.mubr.msk.bf16.mxu0 %vm858_vm3, %v7590_v37  ;;  %v8306_v62 = vshll.u32 %v8305_v59, 16  ;;  %v7768_v59 = vld [vmem:[%s6606_s18 + $0x40] sm:$0xff]  }
 0x1aa   : > { %5597 = vmatprep.mubr.msk.bf16.mxu1 %vm858_vm3, %v8281_v27  ;;  %v8307_v27 = vshrl.u32 %v8303_v22, 16 }
 0x1ab   : > { %v724_v41 = vrot.slane %v8306_v62, 1  ;;  %v8324_v62 = vshrl.u32 %v8321_v39, 16 }
 0x1ac   : > { %v783_v30 = vor.u32 %v782_v61, %v8307_v27 }
 0x1ad   : > { %v725_v55 = vor.u32 %v724_v41, %v8308_v36  ;;  %v749_v41 = vor.u32 %v748_v52, %v8324_v62  ;;  %v8337_v52 = vld [vmem:[#allocation20_spill] sm:$0xff] }
 0x1ae   : > { %v7680_v33 = vsel %vm7478_vm7, %v783_v30, 0  ;;  %v8325_v30 = vld [vmem:[#allocation11_spill] sm:$0xff] }
 0x1af   : > { %v823_v60 = vsel %vm7478_vm7, %v725_v55, 0  ;;  %v8326_v36 = vshll.u32 %v8325_v30, 16 }
 0x1b0   : > { %5870 = vmatmul.mubr.msk.bf16.gmra.mrb[16].mxu0 %vm858_vm3, %v7608_v28 }
 0x1b1   : > { %5598 = vmatmul.mubr.msk.bf16.gmra.mrb[16].mxu1 %vm858_vm3, %v8285_v4  ;;  %5873 = vmatprep.mubr.msk.bf16.mxu0 %vm858_vm3, %v7614_v21  ;;  %v8310_v4 = vshll.u32 %v8309_v54, 16  ;;  %v752_v55 = vrot.slane %v8326_v36, 1 }
 0x1b2   : > { %5601 = vmatprep.mubr.msk.bf16.mxu1 %vm858_vm3, %v8287_v15  ;;  %v8311_v15 = vshrl.u32 %v8309_v54, 16  ;;  %v8327_v54 = vld [vmem:[#allocation14_spill] sm:$0xff] }
 0x1b3   : > { %v732_v45 = vrot.slane %v8310_v4, 1  ;;  %v8328_v4 = vshll.u32 %v8327_v54, 16  ;;  %v8330_v57 = vshrl.u32 %v8327_v54, 16  ;;  %v8341_v54 = vshrl.u32 %v8337_v52, 16 }
 0x1b5   : > { %v733_v43 = vor.u32 %v732_v45, %v8311_v15  ;;  %v756_v45 = vrot.slane %v8328_v4, 1  ;;  %v8329_v15 = vshrl.u32 %v8325_v30, 16 }
 0x1b7   : > { %v7710_v42 = vsel %vm7478_vm7, %v733_v43, 0  ;;  %v753_v43 = vor.u32 %v752_v55, %v8329_v15  ;;  %v757_v7 = vor.u32 %v756_v45, %v8330_v57  ;;  %v7849_v55 = vld [vmem:[%s6606_s18 + $0x90] sm:$0xff]   ;;  %v7858_v45 = vld [vmem:[%s6606_s18 + $0xa0] sm:$0xff]  }
 0x1b8   : > { %5874 = vmatmul.mubr.msk.bf16.gmra.mrb[20].mxu0 %vm858_vm3, %v7632_v1 }
 0x1b9   : > { %5602 = vmatmul.mubr.msk.bf16.gmra.mrb[20].mxu1 %vm858_vm3, %v8291_v48  ;;  %5877 = vmatprep.mubr.msk.bf16.mxu0 %vm858_vm3, %v7638_v50  ;;  %v3997_v48 = vsel %vm907_vm0, %v7516_v51, 0  ;;  %v737_v51 = vor.u32 %v736_v14, %v8317_v23  ;;  %v7806_v14 = vsel %vm7478_vm7, %v753_v43, 0 }
 0x1ba   : > { %5605 = vmatprep.mubr.msk.bf16.mxu1 %vm858_vm3, %v8293_v26  ;;  %v740_v26 = vrot.slane %v8316_v2, 1 }
 0x1bb   : > { %v7746_v11 = vsel %vm7478_vm7, %v737_v51, 0 }
 0x1c0   : > { %5878 = vmatmul.mubr.msk.bf16.gmra.mrb[24].mxu0 %vm858_vm3, %v7656_v63 }
 0x1c1   : > { %5606 = vmatmul.mubr.msk.bf16.gmra.mrb[24].mxu1 %vm858_vm3, %v8297_v58  ;;  %5881 = vmatprep.mubr.msk.bf16.mxu0 %vm858_vm3, %v7664_v10  ;;  %v741_v58 = vor.u32 %v740_v26, %v8318_v38  ;;  %v7812_v26 = vsel %vm7478_vm7, %v757_v7, 0  ;;  %v7819_v38 = vld [vmem:[%s6606_s18 + $0x70] sm:$0xff]  }
 0x1c2   : > { %5609 = vmatprep.mubr.msk.bf16.mxu1 %vm858_vm3, %v8299_v34  ;;  %v8319_v34 = vld [vmem:[#allocation7_spill] sm:$0xff]  ;;  %v8343_v7 = vld [vmem:[#allocation24_spill] sm:$0xff] }
 0x1c3   : > { %v8320_v5 = vshll.u32 %v8319_v34, 16  ;;  %v7752_v20 = vsel %vm7478_vm7, %v741_v58, 0  ;;  %v8323_v29 = vshrl.u32 %v8319_v34, 16 }
 0x1c5   : > { %v744_v9 = vrot.slane %v8320_v5, 1  ;;  %v7828_v5 = vld [vmem:[%s6606_s18 + $0x80] sm:$0xff]  }
 0x1c7   : > { %v745_v61 = vor.u32 %v744_v9, %v8323_v29  ;;  %v8338_v29 = vshll.u32 %v8337_v52, 16 }
 0x1c8   : > { %5882 = vmatmul.mubr.msk.bf16.gmra.mrb[28].mxu0 %vm858_vm3, %v7680_v33 }
 0x1c9   : > { %5610 = vmatmul.mubr.msk.bf16.gmra.mrb[28].mxu1 %vm858_vm3, %v8303_v22  ;;  %5887 = vmatprep.mubr.msk.bf16.mxu0 %vm858_vm3, %v823_v60  ;;  %v7759_v22 = vld [vmem:[%s6606_s18 + $0x30] sm:$0xff]   ;;  %v7776_v27 = vsel %vm7478_vm7, %v745_v61, 0  ;;  %v7782_v60 = vsel %vm7478_vm7, %v749_v41, 0  ;;  %v768_v61 = vrot.slane %v8338_v29, 1  ;;  %v8339_v41 = vld [vmem:[#allocation22_spill] sm:$0xff] }
 0x1ca   : > { %5615 = vmatprep.mubr.msk.bf16.mxu1 %vm858_vm3, %v6528_v13  ;;  %v7789_v13 = vld [vmem:[%s6606_s18 + $0x50] sm:$0xff]   ;;  %v8340_v30 = vshll.u32 %v8339_v41, 16  ;;  %v8342_v15 = vshrl.u32 %v8339_v41, 16 }
 0x1cb   : > { %v769_v4 = vor.u32 %v768_v61, %v8341_v54  ;;  %v8349_v41 = vld [vmem:[#allocation28_spill] sm:$0xff] }
 0x1cc   : > { %v772_v36 = vrot.slane %v8340_v30, 1  ;;  %v8350_v30 = vshll.u32 %v8349_v41, 16 }
 0x1cd   : > { %v7866_v57 = vsel %vm7478_vm7, %v769_v4, 0  ;;  %v7907_v4 = vld [vmem:[%s6606_s18 + $0xd0] sm:$0xff]  }
 0x1ce   : > { %v773_v43 = vor.u32 %v772_v36, %v8342_v15  ;;  %v784_v36 = vrot.slane %v8350_v30, 1  ;;  %v8351_v15 = vshrl.u32 %v8349_v41, 16 }
 0x1d0   : > { %5888 = vmatmul.mubr.msk.bf16.vlgmr.msra.gmra.mrb[0].mxu0 %vm858_vm3, %v7698_v0 }
 0x1d1   : > { %5616 = vmatmul.mubr.msk.bf16.vlgmr.msra.gmra.mrb[0].mxu1 %vm858_vm3, %v7720_v24  ;;  %5920 = vmatpush3.bf16.msra.mxu0 %v3997_v48  ;;  %v8331_v48 = vld [vmem:[#allocation16_spill] sm:$0xff] }
 0x1d2   : > { %5648 = vmatpush3.bf16.msra.mxu1 %v2146_v49  ;;  %5891 = vmatprep.mubr.msk.bf16.mxu0 %vm858_vm3, %v7710_v42  ;;  %v8332_v40 = vshll.u32 %v8331_v48, 16  ;;  %v8333_v49 = vld [vmem:[#allocation18_spill] sm:$0xff]  ;;  %v8335_v58 = vshrl.u32 %v8331_v48, 16  ;;  %v8344_v48 = vshll.u32 %v8343_v7, 16 }
 0x1d3   : > { %5619 = vmatprep.mubr.msk.bf16.mxu1 %vm858_vm3, %v7736_v32  ;;  %6474 = vmatprep.subr.msk.bf16.mxu1 %vm907_vm0, %v7717_v56  ;;  %v8334_v23 = vshll.u32 %v8333_v49, 16  ;;  %v8336_v9 = vshrl.u32 %v8333_v49, 16  ;;  %v8345_v49 = vld [vmem:[#allocation26_spill] sm:$0xff] }
 0x1d4   : > { %6482 = vmatprep.subr.msk.bf16.mxu0 %vm907_vm0, %v7729_v8  ;;  %v760_v2 = vrot.slane %v8332_v40, 1  ;;  %v776_v40 = vrot.slane %v8344_v48, 1  ;;  %v8348_v52 = vshrl.u32 %v8345_v49, 16 }
 0x1d5   : > { %v764_v51 = vrot.slane %v8334_v23, 1  ;;  %v8346_v23 = vshll.u32 %v8345_v49, 16  ;;  %v4195_v49 = vsel %vm907_vm0, %v7729_v8, 0  ;;  %v6555_v8 = vld [vmem:[%s6606_s18 + $0xe8] sm:$0xff]  }
 0x1d6   : > { %v761_v34 = vor.u32 %v760_v2, %v8335_v58  ;;  %v7872_v2 = vsel %vm7478_vm7, %v773_v43, 0  ;;  %v7879_v58 = vld [vmem:[%s6606_s18 + $0xb0] sm:$0xff]   ;;  %v785_v43 = vor.u32 %v784_v36, %v8351_v15 }
 0x1d7   : > { %v765_v39 = vor.u32 %v764_v51, %v8336_v9  ;;  %v780_v51 = vrot.slane %v8346_v23, 1  ;;  %v2350_v23 = vsel %vm907_vm0, %v7717_v56, 0 }
 0x1d8   : > { %5892 = vmatmul.mubr.msk.bf16.gmra.mrb[4].mxu0 %vm858_vm3, %v7746_v11  ;;  %v7836_v16 = vsel %vm7478_vm7, %v761_v34, 0  ;;  %v8347_v34 = vshrl.u32 %v8343_v7, 16  ;;  %v7916_v7 = vld [vmem:[%s6606_s18 + $0xe0] sm:$0xff]   ;;  %v7922_v48 = vsel %vm7478_vm7, %v785_v43, 0 }
 0x1d9   : > { %5620 = vmatmul.mubr.msk.bf16.gmra.mrb[4].mxu1 %vm858_vm3, %v7759_v22  ;;  %5895 = vmatprep.mubr.msk.bf16.mxu0 %vm858_vm3, %v7752_v20  ;;  %v7842_v62 = vsel %vm7478_vm7, %v765_v39, 0  ;;  %v7888_v39 = vld [vmem:[%s6606_s18 + $0xc0] sm:$0xff]   ;;  %v781_v29 = vor.u32 %v780_v51, %v8348_v52 }
 0x1da   : > { %5623 = vmatprep.mubr.msk.bf16.mxu1 %vm858_vm3, %v7768_v59  ;;  %v777_v9 = vor.u32 %v776_v40, %v8347_v34  ;;  %v7927_v40 = vld [vmem:[%s6606_s18 + $0xf0] sm:$0xff]  }
 0x1db   : > { %v7902_v54 = vsel %vm7478_vm7, %v781_v29, 0 }
 0x1dc   : > { %v7896_v61 = vsel %vm7478_vm7, %v777_v9, 0 }
 0x1e0   : > { %5896 = vmatmul.mubr.msk.bf16.gmra.mrb[8].mxu0 %vm858_vm3, %v7776_v27 }
 0x1e1   : > { %5624 = vmatmul.mubr.msk.bf16.gmra.mrb[8].mxu1 %vm858_vm3, %v7789_v13  ;;  %5899 = vmatprep.mubr.msk.bf16.mxu0 %vm858_vm3, %v7782_v60 }
 0x1e2   : > { %5627 = vmatprep.mubr.msk.bf16.mxu1 %vm858_vm3, %v7798_v46 }
 0x1e8   : > { %5900 = vmatmul.mubr.msk.bf16.gmra.mrb[12].mxu0 %vm858_vm3, %v7806_v14 }
 0x1e9   : > { %5628 = vmatmul.mubr.msk.bf16.gmra.mrb[12].mxu1 %vm858_vm3, %v7819_v38  ;;  %5903 = vmatprep.mubr.msk.bf16.mxu0 %vm858_vm3, %v7812_v26 }
 0x1ea   : > { %5631 = vmatprep.mubr.msk.bf16.mxu1 %vm858_vm3, %v7828_v5 }
 0x1f0   : > { %5904 = vmatmul.mubr.msk.bf16.gmra.mrb[16].mxu0 %vm858_vm3, %v7836_v16 }
 0x1f1   : > { %5632 = vmatmul.mubr.msk.bf16.gmra.mrb[16].mxu1 %vm858_vm3, %v7849_v55  ;;  %5907 = vmatprep.mubr.msk.bf16.mxu0 %vm858_vm3, %v7842_v62 }
 0x1f2   : > { %5635 = vmatprep.mubr.msk.bf16.mxu1 %vm858_vm3, %v7858_v45 }
 0x1f8   : > { %5908 = vmatmul.mubr.msk.bf16.gmra.mrb[20].mxu0 %vm858_vm3, %v7866_v57 }
 0x1f9   : > { %5636 = vmatmul.mubr.msk.bf16.gmra.mrb[20].mxu1 %vm858_vm3, %v7879_v58  ;;  %5911 = vmatprep.mubr.msk.bf16.mxu0 %vm858_vm3, %v7872_v2 }
 0x1fa   : > { %5639 = vmatprep.mubr.msk.bf16.mxu1 %vm858_vm3, %v7888_v39 }
 0x200   : > { %5912 = vmatmul.mubr.msk.bf16.gmra.mrb[24].mxu0 %vm858_vm3, %v7896_v61 }
 0x201   : > { %5640 = vmatmul.mubr.msk.bf16.gmra.mrb[24].mxu1 %vm858_vm3, %v7907_v4  ;;  %5915 = vmatprep.mubr.msk.bf16.mxu0 %vm858_vm3, %v7902_v54 }
 0x202   : > { %5643 = vmatprep.mubr.msk.bf16.mxu1 %vm858_vm3, %v7916_v7 }
 0x208   : > { %5916 = vmatmul.mubr.msk.bf16.gmra.mrb[28].mxu0 %vm858_vm3, %v7922_v48 }
 0x209   : > { %5644 = vmatmul.mubr.msk.bf16.gmra.mrb[28].mxu1 %vm858_vm3, %v7927_v40  ;;  %5921 = vmatprep.mubr.msk.bf16.mxu0 %vm858_vm3, %v7487_v12  ;;  %v6544_v12 = vld [vmem:[%s6606_s18 + $0x38] sm:$0xff]  }
 0x20a   : > { %5649 = vmatprep.mubr.msk.bf16.mxu1 %vm858_vm3, %v7507_v44  ;;  %v6546_v44 = vld [vmem:[%s6606_s18 + $0x58] sm:$0xff]  }
 0x210   : > { %5922 = vmatmul.mubr.msk.bf16.vlgmr.msra.gmra.mrb[0].mxu0 %vm858_vm3, %v7497_v6  ;;  %v6545_v6 = vld [vmem:[%s6606_s18 + $0x48] sm:$0xff]  }
 0x211   : > { %5650 = vmatmul.mubr.msk.bf16.vlgmr.msra.gmra.mrb[0].mxu1 %vm858_vm3, %v7523_v19  ;;  %5954 = vmatpush3.bf16.msra.mxu0 %v4195_v49  ;;  %v6547_v19 = vld [vmem:[%s6606_s18 + $0x68] sm:$0xff]  }
 0x212   : > { %5682 = vmatpush3.bf16.msra.mxu1 %v2350_v23  ;;  %5925 = vmatprep.mubr.msk.bf16.mxu0 %vm858_vm3, %v7533_v18  ;;  %v6548_v18 = vld [vmem:[%s6606_s18 + $0x78] sm:$0xff]  }
 0x213   : > { %5653 = vmatprep.mubr.msk.bf16.mxu1 %vm858_vm3, %v7546_v25  ;;  %v6550_v25 = vld [vmem:[%s6606_s18 + $0x98] sm:$0xff]  }
 0x218   : > { %5926 = vmatmul.mubr.msk.bf16.gmra.mrb[4].mxu0 %vm858_vm3, %v7539_v35  ;;  %v6549_v35 = vld [vmem:[%s6606_s18 + $0x88] sm:$0xff]  }
 0x219   : > { %5654 = vmatmul.mubr.msk.bf16.gmra.mrb[4].mxu1 %vm858_vm3, %v6544_v12  ;;  %5929 = vmatprep.mubr.msk.bf16.mxu0 %vm858_vm3, %v7560_v3  ;;  %v6551_v3 = vld [vmem:[%s6606_s18 + $0xa8] sm:$0xff]  }
 0x21a   : > { %5657 = vmatprep.mubr.msk.bf16.mxu1 %vm858_vm3, %v6545_v6 }
 0x220   : > { %5930 = vmatmul.mubr.msk.bf16.gmra.mrb[8].mxu0 %vm858_vm3, %v7566_v53  ;;  %v6552_v53 = vld [vmem:[%s6606_s18 + $0xb8] sm:$0xff]  }
 0x221   : > { %5658 = vmatmul.mubr.msk.bf16.gmra.mrb[8].mxu1 %vm858_vm3, %v6546_v44  ;;  %5933 = vmatprep.mubr.msk.bf16.mxu0 %vm858_vm3, %v7584_v47  ;;  %v6553_v47 = vld [vmem:[%s6606_s18 + $0xc8] sm:$0xff]  }
 0x222   : > { %5661 = vmatprep.mubr.msk.bf16.mxu1 %vm858_vm3, %v6547_v19 }
 0x228   : > { %5934 = vmatmul.mubr.msk.bf16.gmra.mrb[12].mxu0 %vm858_vm3, %v7590_v37  ;;  %v8352_v37 = vld [vmem:[#allocation33_spill] sm:$0xff] }
 0x229   : > { %5662 = vmatmul.mubr.msk.bf16.gmra.mrb[12].mxu1 %vm858_vm3, %v6548_v18  ;;  %5937 = vmatprep.mubr.msk.bf16.mxu0 %vm858_vm3, %v7608_v28  ;;  %v8353_v28 = vshll.u32 %v8352_v37, 16 }
 0x22a   : > { %5665 = vmatprep.mubr.msk.bf16.mxu1 %vm858_vm3, %v6549_v35 }
 0x230   : > { %5938 = vmatmul.mubr.msk.bf16.gmra.mrb[16].mxu0 %vm858_vm3, %v7614_v21  ;;  %v786_v21 = vrot.slane %v8353_v28, 1 }
 0x231   : > { %5666 = vmatmul.mubr.msk.bf16.gmra.mrb[16].mxu1 %vm858_vm3, %v6550_v25  ;;  %5941 = vmatprep.mubr.msk.bf16.mxu0 %vm858_vm3, %v7632_v1  ;;  %v6554_v1 = vld [vmem:[%s6606_s18 + $0xd8] sm:$0xff]   ;;  %s5043_s18 = sshll.u32 %s8357_s10, 7 }
 0x232   : > { %5669 = vmatprep.mubr.msk.bf16.mxu1 %vm858_vm3, %v6551_v3  ;;  %s8071_s25 = scalar_lea.vmem %s8094_s2, %s5043_s18 }
 0x238   : > { %5942 = vmatmul.mubr.msk.bf16.gmra.mrb[20].mxu0 %vm858_vm3, %v7638_v50  ;;  %v8354_v50 = vshrl.u32 %v8352_v37, 16 }
 0x239   : > { %5670 = vmatmul.mubr.msk.bf16.gmra.mrb[20].mxu1 %vm858_vm3, %v6552_v53  ;;  %5945 = vmatprep.mubr.msk.bf16.mxu0 %vm858_vm3, %v7656_v63 }
 0x23a   : > { %5673 = vmatprep.mubr.msk.bf16.mxu1 %vm858_vm3, %v6553_v47  ;;  %v787_v56 = vor.u32 %v786_v21, %v8354_v50 }
 0x23c   : > { %v854_v63 = vsel %vm7478_vm7, %v787_v56, 0 }
 0x240   : > { %5946 = vmatmul.mubr.msk.bf16.gmra.mrb[24].mxu0 %vm858_vm3, %v7664_v10 }
 0x241   : > { %5674 = vmatmul.mubr.msk.bf16.gmra.mrb[24].mxu1 %vm858_vm3, %v6554_v1  ;;  %5949 = vmatprep.mubr.msk.bf16.mxu0 %vm858_vm3, %v7680_v33 }
 0x242   : > { %5677 = vmatprep.mubr.msk.bf16.mxu1 %vm858_vm3, %v6555_v8 }
 0x248   : > { %5950 = vmatmul.mubr.msk.bf16.gmra.mrb[28].mxu0 %vm858_vm3, %v854_v63 }
 0x249   : > { %5678 = vmatmul.mubr.msk.bf16.gmra.mrb[28].mxu1 %vm858_vm3, %v8352_v37  ;;  %5955 = vmatprep.mubr.msk.bf16.mxu0 %vm858_vm3, %v7698_v0 }
 0x24a   : > { %5683 = vmatprep.mubr.msk.bf16.mxu1 %vm858_vm3, %v7720_v24 }
 0x250   : > { %5956 = vmatmul.mubr.msk.bf16.vlgmr.msra.gmra.mrb[0].mxu0 %vm858_vm3, %v7710_v42 }
 0x251   : > { %5684 = vmatmul.mubr.msk.bf16.vlgmr.msra.gmra.mrb[0].mxu1 %vm858_vm3, %v7736_v32  ;;  %5959 = vmatprep.mubr.msk.bf16.mxu0 %vm858_vm3, %v7746_v11 }
 0x252   : > { %5687 = vmatprep.mubr.msk.bf16.mxu1 %vm858_vm3, %v7759_v22 }
 0x258   : > { %5960 = vmatmul.mubr.msk.bf16.gmra.mrb[4].mxu0 %vm858_vm3, %v7752_v20 }
 0x259   : > { %5688 = vmatmul.mubr.msk.bf16.gmra.mrb[4].mxu1 %vm858_vm3, %v7768_v59  ;;  %5963 = vmatprep.mubr.msk.bf16.mxu0 %vm858_vm3, %v7776_v27 }
 0x25a   : > { %5691 = vmatprep.mubr.msk.bf16.mxu1 %vm858_vm3, %v7789_v13 }
 0x260   : > { %5964 = vmatmul.mubr.msk.bf16.gmra.mrb[8].mxu0 %vm858_vm3, %v7782_v60 }
 0x261   : > { %5692 = vmatmul.mubr.msk.bf16.gmra.mrb[8].mxu1 %vm858_vm3, %v7798_v46  ;;  %5967 = vmatprep.mubr.msk.bf16.mxu0 %vm858_vm3, %v7806_v14 }
 0x262   : > { %5695 = vmatprep.mubr.msk.bf16.mxu1 %vm858_vm3, %v7819_v38 }
 0x268   : > { %5968 = vmatmul.mubr.msk.bf16.gmra.mrb[12].mxu0 %vm858_vm3, %v7812_v26 }
 0x269   : > { %5696 = vmatmul.mubr.msk.bf16.gmra.mrb[12].mxu1 %vm858_vm3, %v7828_v5  ;;  %5971 = vmatprep.mubr.msk.bf16.mxu0 %vm858_vm3, %v7836_v16 }
 0x26a   : > { %5699 = vmatprep.mubr.msk.bf16.mxu1 %vm858_vm3, %v7849_v55 }
 0x270   : > { %5972 = vmatmul.mubr.msk.bf16.gmra.mrb[16].mxu0 %vm858_vm3, %v7842_v62 }
 0x271   : > { %5700 = vmatmul.mubr.msk.bf16.gmra.mrb[16].mxu1 %vm858_vm3, %v7858_v45  ;;  %5975 = vmatprep.mubr.msk.bf16.mxu0 %vm858_vm3, %v7866_v57 }
 0x272   : > { %5703 = vmatprep.mubr.msk.bf16.mxu1 %vm858_vm3, %v7879_v58 }
 0x278   : > { %5976 = vmatmul.mubr.msk.bf16.gmra.mrb[20].mxu0 %vm858_vm3, %v7872_v2 }
 0x279   : > { %5704 = vmatmul.mubr.msk.bf16.gmra.mrb[20].mxu1 %vm858_vm3, %v7888_v39  ;;  %5979 = vmatprep.mubr.msk.bf16.mxu0 %vm858_vm3, %v7896_v61 }
 0x27a   : > { %5707 = vmatprep.mubr.msk.bf16.mxu1 %vm858_vm3, %v7907_v4 }
 0x280   : > { %5980 = vmatmul.mubr.msk.bf16.gmra.mrb[24].mxu0 %vm858_vm3, %v7902_v54 }
 0x281   : > { %5708 = vmatmul.mubr.msk.bf16.gmra.mrb[24].mxu1 %vm858_vm3, %v7916_v7  ;;  %5983 = vmatprep.mubr.msk.bf16.mxu0 %vm858_vm3, %v7922_v48 }
 0x282   : > { %5711 = vmatprep.mubr.msk.bf16.mxu1 %vm858_vm3, %v7927_v40 }
 0x288   : > { %5984 = vmatmul.mubr.bf16.gmra.mrb[28].mxu0 %v8262_v17 }
 0x289   : > { %5712 = vmatmul.mubr.msk.bf16.gmra.mrb[28].mxu1 %vm858_vm3, %v8355_v31 }
 0x323   : > { %v5957_v10 = vpop.f32.mrb[0].mxu0 }
 0x324   : > { %v5685_v33 = vpop.f32.mrb[0].mxu1  ;;  %v4231_v0 = vpop.f32.mrb[1].mxu0 }
 0x325   : > { %v5987_v42 = vadd.f32 %v5957_v10, %v5685_v33  ;;  %v2386_v24 = vpop.f32.mrb[1].mxu1  ;;  %v5958_v32 = vpop.f32.mrb[2].mxu0 }
 0x326   : > { %v5988_v11 = vadd.f32 %v4231_v0, %v2386_v24  ;;  %v5686_v20 = vpop.f32.mrb[2].mxu1  ;;  %v4234_v22 = vpop.f32.mrb[3].mxu0 }
 0x327   : > { %v4424_v59 = vmul.f32 0.2, %v5987_v42  ;;  %v5989_v27 = vadd.f32 %v5958_v32, %v5686_v20  ;;  %v2389_v60 = vpop.f32.mrb[3].mxu1  ;;  %vm4392_vm8 = vcmp.gt.f32.partialorder %v5987_v42, 0.0 }
 0x328   : > { %v4422_v13 = vmul.f32 0.2, %v5988_v11  ;;  %v5990_v17 = vadd.f32 %v4234_v22, %v2389_v60  ;;  %vm4390_vm9 = vcmp.gt.f32.partialorder %v5988_v11, 0.0 }
 0x329   : > { %vm4393_vm10 = vcmp.gt.f32.partialorder %v5989_v27, 0.0  ;;  %v4425_v46 = vmul.f32 0.2, %v5989_v27  ;;  %v4456_v26 = vsel %vm4392_vm8, %v5987_v42, %v4424_v59 }
 0x32a   : > { %vm4391_vm11 = vcmp.gt.f32.partialorder %v5990_v17, 0.0  ;;  %v4423_v14 = vmul.f32 0.2, %v5990_v17  ;;  %v4454_v16 = vsel %vm4390_vm9, %v5988_v11, %v4422_v13 }
 0x32b   : > { %v4457_v38 = vsel %vm4393_vm10, %v5989_v27, %v4425_v46  ;;  %v5961_v5 = vpop.f32.mrb[4].mxu0 }
 0x32c   : > { %v5084_v62 = vpack.c.bf16 %v4457_v38, %v4456_v26  ;;  %v4455_v55 = vsel %vm4391_vm11, %v5990_v17, %v4423_v14  ;;  %v5689_v45 = vpop.f32.mrb[4].mxu1  ;;  %v4247_v57 = vpop.f32.mrb[5].mxu0 }
 0x32d   : > { %v5079_v2 = vpack.c.bf16 %v4455_v55, %v4454_v16  ;;  %v5991_v51 = vadd.f32 %v5961_v5, %v5689_v45  ;;  %v2402_v58 = vpop.f32.mrb[5].mxu1  ;;  %v5962_v34 = vpop.f32.mrb[6].mxu0 }
 0x32e   : > { %5156 = vst [vmem:[%s8071_s25 + $0x8] sm:$0xff] %v5084_v62   ;;  %v5992_v9 = vadd.f32 %v4247_v57, %v2402_v58  ;;  %v5690_v39 = vpop.f32.mrb[6].mxu1  ;;  %v4250_v52 = vpop.f32.mrb[7].mxu0 }
 0x32f   : > { %5080 = vst [vmem:[%s8071_s25] sm:$0xff] %v5079_v2   ;;  %v4428_v29 = vmul.f32 0.2, %v5991_v51  ;;  %v5993_v61 = vadd.f32 %v5962_v34, %v5690_v39  ;;  %v2405_v41 = vpop.f32.mrb[7].mxu1  ;;  %vm4396_vm12 = vcmp.gt.f32.partialorder %v5991_v51, 0.0 }
 0x330   : > { %v4426_v30 = vmul.f32 0.2, %v5992_v9  ;;  %v5994_v36 = vadd.f32 %v4250_v52, %v2405_v41  ;;  %vm4394_vm13 = vcmp.gt.f32.partialorder %v5992_v9, 0.0 }
 0x331   : > { %vm4397_vm14 = vcmp.gt.f32.partialorder %v5993_v61, 0.0  ;;  %v4429_v54 = vmul.f32 0.2, %v5993_v61  ;;  %v4460_v15 = vsel %vm4396_vm12, %v5991_v51, %v4428_v29 }
 0x332   : > { %vm4395_vm15 = vcmp.gt.f32.partialorder %v5994_v36, 0.0  ;;  %v4427_v4 = vmul.f32 0.2, %v5994_v36  ;;  %v4458_v48 = vsel %vm4394_vm13, %v5992_v9, %v4426_v30 }
 0x333   : > { %v4461_v43 = vsel %vm4397_vm14, %v5993_v61, %v4429_v54  ;;  %v5965_v7 = vpop.f32.mrb[8].mxu0 }
 0x334   : > { %v5094_v40 = vpack.c.bf16 %v4461_v43, %v4460_v15  ;;  %v4459_v49 = vsel %vm4395_vm15, %v5994_v36, %v4427_v4  ;;  %v5693_v23 = vpop.f32.mrb[8].mxu1  ;;  %v4263_v12 = vpop.f32.mrb[9].mxu0 }
 0x335   : > { %v5089_v6 = vpack.c.bf16 %v4459_v49, %v4458_v48  ;;  %v5995_v44 = vadd.f32 %v5965_v7, %v5693_v23  ;;  %v2418_v19 = vpop.f32.mrb[9].mxu1  ;;  %v5966_v18 = vpop.f32.mrb[10].mxu0 }
 0x336   : > { %5158 = vst [vmem:[%s8071_s25 + $0x18] sm:$0xff] %v5094_v40   ;;  %v5996_v35 = vadd.f32 %v4263_v12, %v2418_v19  ;;  %v5694_v25 = vpop.f32.mrb[10].mxu1  ;;  %v4266_v3 = vpop.f32.mrb[11].mxu0 }
 0x337   : > { %5157 = vst [vmem:[%s8071_s25 + $0x10] sm:$0xff] %v5089_v6   ;;  %v4432_v53 = vmul.f32 0.2, %v5995_v44  ;;  %v5997_v47 = vadd.f32 %v5966_v18, %v5694_v25  ;;  %v2421_v37 = vpop.f32.mrb[11].mxu1  ;;  %vm4400_vm0 = vcmp.gt.f32.partialorder %v5995_v44, 0.0 }
 0x338   : > { %v4430_v28 = vmul.f32 0.2, %v5996_v35  ;;  %v5998_v21 = vadd.f32 %v4266_v3, %v2421_v37  ;;  %vm4398_vm1 = vcmp.gt.f32.partialorder %v5996_v35, 0.0 }
 0x339   : > { %vm4401_vm2 = vcmp.gt.f32.partialorder %v5997_v47, 0.0  ;;  %v4433_v1 = vmul.f32 0.2, %v5997_v47  ;;  %v4464_v56 = vsel %vm4400_vm0, %v5995_v44, %v4432_v53 }
 0x33a   : > { %vm4399_vm3 = vcmp.gt.f32.partialorder %v5998_v21, 0.0  ;;  %v4431_v50 = vmul.f32 0.2, %v5998_v21  ;;  %v4462_v31 = vsel %vm4398_vm1, %v5996_v35, %v4430_v28 }
 0x33b   : > { %v4465_v8 = vsel %vm4401_vm2, %v5997_v47, %v4433_v1  ;;  %v5969_v63 = vpop.f32.mrb[12].mxu0 }
 0x33c   : > { %v5104_v10 = vpack.c.bf16 %v4465_v8, %v4464_v56  ;;  %v4463_v33 = vsel %vm4399_vm3, %v5998_v21, %v4431_v50  ;;  %v5697_v0 = vpop.f32.mrb[12].mxu1  ;;  %v4279_v42 = vpop.f32.mrb[13].mxu0 }
 0x33d   : > { %v5099_v24 = vpack.c.bf16 %v4463_v33, %v4462_v31  ;;  %v5999_v32 = vadd.f32 %v5969_v63, %v5697_v0  ;;  %v2434_v11 = vpop.f32.mrb[13].mxu1  ;;  %v5970_v20 = vpop.f32.mrb[14].mxu0 }
 0x33e   : > { %5160 = vst [vmem:[%s8071_s25 + $0x28] sm:$0xff] %v5104_v10   ;;  %v6000_v22 = vadd.f32 %v4279_v42, %v2434_v11  ;;  %v5698_v59 = vpop.f32.mrb[14].mxu1  ;;  %v4282_v27 = vpop.f32.mrb[15].mxu0 }
 0x33f   : > { %5159 = vst [vmem:[%s8071_s25 + $0x20] sm:$0xff] %v5099_v24   ;;  %v4436_v60 = vmul.f32 0.2, %v5999_v32  ;;  %v6001_v13 = vadd.f32 %v5970_v20, %v5698_v59  ;;  %v2437_v17 = vpop.f32.mrb[15].mxu1  ;;  %vm4404_vm4 = vcmp.gt.f32.partialorder %v5999_v32, 0.0 }
 0x340   : > { %v4434_v46 = vmul.f32 0.2, %v6000_v22  ;;  %v6002_v14 = vadd.f32 %v4282_v27, %v2437_v17  ;;  %vm4402_vm5 = vcmp.gt.f32.partialorder %v6000_v22, 0.0 }
 0x341   : > { %vm4405_vm6 = vcmp.gt.f32.partialorder %v6001_v13, 0.0  ;;  %v4437_v26 = vmul.f32 0.2, %v6001_v13  ;;  %v4468_v5 = vsel %vm4404_vm4, %v5999_v32, %v4436_v60 }
 0x342   : > { %vm4403_vm7 = vcmp.gt.f32.partialorder %v6002_v14, 0.0  ;;  %v4435_v38 = vmul.f32 0.2, %v6002_v14  ;;  %v4466_v55 = vsel %vm4402_vm5, %v6000_v22, %v4434_v46 }
 0x343   : > { %v4469_v16 = vsel %vm4405_vm6, %v6001_v13, %v4437_v26  ;;  %v5973_v62 = vpop.f32.mrb[16].mxu0 }
 0x344   : > { %v5114_v45 = vpack.c.bf16 %v4469_v16, %v4468_v5  ;;  %v4467_v57 = vsel %vm4403_vm7, %v6002_v14, %v4435_v38  ;;  %v5701_v2 = vpop.f32.mrb[16].mxu1  ;;  %v4295_v51 = vpop.f32.mrb[17].mxu0 }
 0x345   : > { %v5109_v58 = vpack.c.bf16 %v4467_v57, %v4466_v55  ;;  %v6003_v34 = vadd.f32 %v5973_v62, %v5701_v2  ;;  %v2450_v9 = vpop.f32.mrb[17].mxu1  ;;  %v5974_v39 = vpop.f32.mrb[18].mxu0 }
 0x346   : > { %5162 = vst [vmem:[%s8071_s25 + $0x38] sm:$0xff] %v5114_v45   ;;  %v6004_v52 = vadd.f32 %v4295_v51, %v2450_v9  ;;  %v5702_v29 = vpop.f32.mrb[18].mxu1  ;;  %v4298_v61 = vpop.f32.mrb[19].mxu0 }
 0x347   : > { %5161 = vst [vmem:[%s8071_s25 + $0x30] sm:$0xff] %v5109_v58   ;;  %v4440_v41 = vmul.f32 0.2, %v6003_v34  ;;  %v6005_v30 = vadd.f32 %v5974_v39, %v5702_v29  ;;  %v2453_v36 = vpop.f32.mrb[19].mxu1  ;;  %vm4408_vm8 = vcmp.gt.f32.partialorder %v6003_v34, 0.0 }
 0x348   : > { %v4438_v54 = vmul.f32 0.2, %v6004_v52  ;;  %v6006_v4 = vadd.f32 %v4298_v61, %v2453_v36  ;;  %vm4406_vm9 = vcmp.gt.f32.partialorder %v6004_v52, 0.0 }
 0x349   : > { %vm4409_vm10 = vcmp.gt.f32.partialorder %v6005_v30, 0.0  ;;  %v4441_v15 = vmul.f32 0.2, %v6005_v30  ;;  %v4472_v7 = vsel %vm4408_vm8, %v6003_v34, %v4440_v41 }
 0x34a   : > { %vm4407_vm11 = vcmp.gt.f32.partialorder %v6006_v4, 0.0  ;;  %v4439_v43 = vmul.f32 0.2, %v6006_v4  ;;  %v4470_v49 = vsel %vm4406_vm9, %v6004_v52, %v4438_v54 }
 0x34b   : > { %v4473_v48 = vsel %vm4409_vm10, %v6005_v30, %v4441_v15  ;;  %v5977_v40 = vpop.f32.mrb[20].mxu0 }
 0x34c   : > { %v5124_v23 = vpack.c.bf16 %v4473_v48, %v4472_v7  ;;  %v4471_v12 = vsel %vm4407_vm11, %v6006_v4, %v4439_v43  ;;  %v5705_v6 = vpop.f32.mrb[20].mxu1  ;;  %v4311_v44 = vpop.f32.mrb[21].mxu0 }
 0x34d   : > { %v5119_v19 = vpack.c.bf16 %v4471_v12, %v4470_v49  ;;  %v6007_v18 = vadd.f32 %v5977_v40, %v5705_v6  ;;  %v2466_v35 = vpop.f32.mrb[21].mxu1  ;;  %v5978_v25 = vpop.f32.mrb[22].mxu0 }
 0x34e   : > { %5164 = vst [vmem:[%s8071_s25 + $0x48] sm:$0xff] %v5124_v23   ;;  %v6008_v3 = vadd.f32 %v4311_v44, %v2466_v35  ;;  %v5706_v53 = vpop.f32.mrb[22].mxu1  ;;  %v4314_v47 = vpop.f32.mrb[23].mxu0 }
 0x34f   : > { %5163 = vst [vmem:[%s8071_s25 + $0x40] sm:$0xff] %v5119_v19   ;;  %v4444_v37 = vmul.f32 0.2, %v6007_v18  ;;  %v6009_v28 = vadd.f32 %v5978_v25, %v5706_v53  ;;  %v2469_v21 = vpop.f32.mrb[23].mxu1  ;;  %vm4412_vm12 = vcmp.gt.f32.partialorder %v6007_v18, 0.0 }
 0x350   : > { %v4442_v1 = vmul.f32 0.2, %v6008_v3  ;;  %v6010_v50 = vadd.f32 %v4314_v47, %v2469_v21  ;;  %vm4410_vm13 = vcmp.gt.f32.partialorder %v6008_v3, 0.0 }
 0x351   : > { %vm4413_vm14 = vcmp.gt.f32.partialorder %v6009_v28, 0.0  ;;  %v4445_v56 = vmul.f32 0.2, %v6009_v28  ;;  %v4476_v63 = vsel %vm4412_vm12, %v6007_v18, %v4444_v37 }
 0x352   : > { %vm4411_vm15 = vcmp.gt.f32.partialorder %v6010_v50, 0.0  ;;  %v4443_v8 = vmul.f32 0.2, %v6010_v50  ;;  %v4474_v33 = vsel %vm4410_vm13, %v6008_v3, %v4442_v1 }
 0x353   : > { %v4477_v31 = vsel %vm4413_vm14, %v6009_v28, %v4445_v56  ;;  %v5981_v10 = vpop.f32.mrb[24].mxu0 }
 0x354   : > { %v5134_v0 = vpack.c.bf16 %v4477_v31, %v4476_v63  ;;  %v4475_v42 = vsel %vm4411_vm15, %v6010_v50, %v4443_v8  ;;  %v5709_v24 = vpop.f32.mrb[24].mxu1  ;;  %v4327_v32 = vpop.f32.mrb[25].mxu0 }
 0x355   : > { %v5129_v11 = vpack.c.bf16 %v4475_v42, %v4474_v33  ;;  %v6011_v20 = vadd.f32 %v5981_v10, %v5709_v24  ;;  %v2482_v22 = vpop.f32.mrb[25].mxu1  ;;  %v5982_v59 = vpop.f32.mrb[26].mxu0 }
 0x356   : > { %5166 = vst [vmem:[%s8071_s25 + $0x58] sm:$0xff] %v5134_v0   ;;  %v6012_v27 = vadd.f32 %v4327_v32, %v2482_v22  ;;  %v5710_v60 = vpop.f32.mrb[26].mxu1  ;;  %v4330_v13 = vpop.f32.mrb[27].mxu0 }
 0x357   : > { %5165 = vst [vmem:[%s8071_s25 + $0x50] sm:$0xff] %v5129_v11   ;;  %v4448_v17 = vmul.f32 0.2, %v6011_v20  ;;  %v6013_v46 = vadd.f32 %v5982_v59, %v5710_v60  ;;  %v2485_v14 = vpop.f32.mrb[27].mxu1  ;;  %vm4416_vm0 = vcmp.gt.f32.partialorder %v6011_v20, 0.0 }
 0x358   : > { %v4446_v26 = vmul.f32 0.2, %v6012_v27  ;;  %v6014_v38 = vadd.f32 %v4330_v13, %v2485_v14  ;;  %vm4414_vm1 = vcmp.gt.f32.partialorder %v6012_v27, 0.0 }
 0x359   : > { %vm4417_vm2 = vcmp.gt.f32.partialorder %v6013_v46, 0.0  ;;  %v4449_v5 = vmul.f32 0.2, %v6013_v46  ;;  %v4480_v62 = vsel %vm4416_vm0, %v6011_v20, %v4448_v17 }
 0x35a   : > { %vm4415_vm3 = vcmp.gt.f32.partialorder %v6014_v38, 0.0  ;;  %v4447_v16 = vmul.f32 0.2, %v6014_v38  ;;  %v4478_v57 = vsel %vm4414_vm1, %v6012_v27, %v4446_v26 }
 0x35b   : > { %v4481_v55 = vsel %vm4417_vm2, %v6013_v46, %v4449_v5  ;;  %v5985_v45 = vpop.f32.mrb[28].mxu0 }
 0x35c   : > { %v5144_v2 = vpack.c.bf16 %v4481_v55, %v4480_v62  ;;  %v4479_v51 = vsel %vm4415_vm3, %v6014_v38, %v4447_v16  ;;  %v5713_v58 = vpop.f32.mrb[28].mxu1  ;;  %v4343_v34 = vpop.f32.mrb[29].mxu0 }
 0x35d   : > { %v5139_v9 = vpack.c.bf16 %v4479_v51, %v4478_v57  ;;  %v6015_v39 = vadd.f32 %v5985_v45, %v5713_v58  ;;  %v2498_v52 = vpop.f32.mrb[29].mxu1  ;;  %v5986_v29 = vpop.f32.mrb[30].mxu0 }
 0x35e   : > { %5168 = vst [vmem:[%s8071_s25 + $0x68] sm:$0xff] %v5144_v2   ;;  %v6016_v61 = vadd.f32 %v4343_v34, %v2498_v52  ;;  %v5714_v41 = vpop.f32.mrb[30].mxu1  ;;  %v4346_v30 = vpop.f32.mrb[31].mxu0 }
 0x35f   : > { %5167 = vst [vmem:[%s8071_s25 + $0x60] sm:$0xff] %v5139_v9   ;;  %v4452_v36 = vmul.f32 0.2, %v6015_v39  ;;  %v6017_v54 = vadd.f32 %v5986_v29, %v5714_v41  ;;  %v2501_v4 = vpop.f32.mrb[31].mxu1  ;;  %vm4420_vm4 = vcmp.gt.f32.partialorder %v6015_v39, 0.0 }
 0x360   : > { %v4450_v15 = vmul.f32 0.2, %v6016_v61  ;;  %v6018_v43 = vadd.f32 %v4346_v30, %v2501_v4  ;;  %vm4418_vm5 = vcmp.gt.f32.partialorder %v6016_v61, 0.0 }
 0x361   : > { %vm4421_vm6 = vcmp.gt.f32.partialorder %v6017_v54, 0.0  ;;  %v4453_v7 = vmul.f32 0.2, %v6017_v54  ;;  %v4484_v40 = vsel %vm4420_vm4, %v6015_v39, %v4452_v36 }
 0x362   : > { %vm4419_vm7 = vcmp.gt.f32.partialorder %v6018_v43, 0.0  ;;  %v4451_v48 = vmul.f32 0.2, %v6018_v43  ;;  %v4482_v23 = vsel %vm4418_vm5, %v6016_v61, %v4450_v15 }
 0x363   : > { %v4485_v49 = vsel %vm4421_vm6, %v6017_v54, %v4453_v7 }
 0x364   : > { %v5154_v12 = vpack.c.bf16 %v4485_v49, %v4484_v40  ;;  %v4483_v6 = vsel %vm4419_vm7, %v6018_v43, %v4451_v48 }
 0x365   : > { %v5149_v44 = vpack.c.bf16 %v4483_v6, %v4482_v23 }
 0x366   : > { %5170 = vst [vmem:[%s8071_s25 + $0x78] sm:$0xff] %v5154_v12  }
 0x367   : > { %5169 = vst [vmem:[%s8071_s25 + $0x70] sm:$0xff] %v5149_v44  }
 0x368 PF: > { %s12_s9 = sadd.s32 1, %s6562_s9  }
 0x369   : > { %p9_p4 = scmp.ge.s32.totalorder %s12_s9, 4  }
 0x36b   :  { %11 = sbr.rel (!%p9_p4) target bundleno = 1 (0x1), region = 73 }

</bundles_post_ra>
